<compile_context>
chip_gen: v7x
topology: tpu7x:2x2x1
jax: 0.10.0
libtpu: 0.0.40
codegen_flags: <defaults>
</compile_context>

<pallas_src>
import functools

import jax
import jax.numpy as jnp
from jax.experimental import pallas as pl
from jax.experimental.pallas import tpu as pltpu

NEG_SLOPE = 0.01     # nn.LeakyReLU() default
BN_EPS = 1e-5        # nn.BatchNorm2d default


def _leaky(x):
    return jnp.where(x > 0, x, NEG_SLOPE * x)


def _row_col(Lb, Lp, Wp):
    """Per-lane (row, col) within each packed image, each shape (1, Lb)."""
    idx = jax.lax.broadcasted_iota(jnp.int32, (1, Lb), 1)
    if Lp & (Lp - 1) == 0:                               # power of two
        pos = jnp.bitwise_and(idx, Lp - 1)
    else:
        pos = idx % Lp
    if Wp & (Wp - 1) == 0:
        row = jnp.right_shift(pos, Wp.bit_length() - 1)
        col = jnp.bitwise_and(pos, Wp - 1)
    else:
        row = pos // Wp
        col = pos - row * Wp
    return row, col


def _tap_masks(row, col, Hp, Wp, k):
    """Row/col validity masks for a 'same' k x k conv; None means all-true."""
    p = (k - 1) // 2
    rowok = [None if di == p else (row >= p - di) & (row < Hp + p - di)
             for di in range(k)]
    colok = [None if dj == p else (col >= p - dj) & (col < Wp + p - dj)
             for dj in range(k)]
    return p, rowok, colok


def _and_mask(a, b):
    if a is None:
        return b
    if b is None:
        return a
    return a & b


def _mask(mask, x):
    return x if mask is None else jnp.where(mask, x, 0.0)


# ----------------------------- stage 1 kernel -------------------------------

def stage1_kernel(xemb_ref, pool_ref, wup_ref, bup_ref, w1t_ref, w2_ref,
                  xcat_ref, *, Hp, Wp, Hup, Wup, oh, ow, cout, B, margin):
    """Per grid step (B images packed on lanes): ConvTranspose2d(k=2,s=1)
    fused with the F.pad alignment as one K=4*Cin bf16 MXU matmul over four
    lane-shifted taps of the prepadded input, per-image ChannelAttention on
    pool_input, and the channel concat (sublane axis of xcat)."""
    Lp = Hp * Wp
    Lb = B * Lp

    # ---- transposed conv: four lane-shifted taps read straight from the ref
    taps = [xemb_ref[0, :, margin - s: margin - s + Lb]       # (Cin, Lb) bf16
            for s in (0, 1, Wp, Wp + 1)]
    xs = jnp.concatenate(taps, axis=0)                        # (4*Cin, Lb)
    up = jnp.dot(wup_ref[...], xs, preferred_element_type=jnp.float32)

    bias = bup_ref[...]                                       # (Cout, 1) f32
    if oh == 0 and ow == 0 and Hup == Hp and Wup == Wp:
        up = up + bias                                        # full window
    else:  # bias only inside the (F.pad-aligned) ConvTranspose window
        row, col = _row_col(Lb, Lp, Wp)
        win = ((row >= oh) & (row < oh + Hup) &
               (col >= ow) & (col < ow + Wup))
        up = up + jnp.where(win, bias, 0.0)

    # ---- ChannelAttention on pool_input (tiny per-image MLP, off the MXU) --
    pool = pool_ref[0]                                        # (Cout, Lb) f32
    w1t = w1t_ref[...]                                        # (Cout, Cr)
    w2 = w2_ref[...]                                          # (Cout, Cr)

    def mlp(v):                                               # v: (Cout, 1)
        h = _leaky(jnp.sum(w1t * v, axis=0, keepdims=True))   # fc1 + LeakyReLU
        return jnp.sum(w2 * h, axis=1, keepdims=True)         # fc2

    for b in range(B):                                        # static unroll
        seg = pool[:, b * Lp:(b + 1) * Lp]                    # (Cout, Lp)
        avg = jnp.mean(seg, axis=1, keepdims=True)
        mx = jnp.max(seg, axis=1, keepdims=True)
        att = jnp.tanh(mlp(avg) + mlp(mx))                    # (Cout, 1)
        xcat_ref[0, :cout, b * Lp:(b + 1) * Lp] = att * seg   # concat, top half

    xcat_ref[0, cout:, :] = up                                # concat, bottom


# ----------------------------- stage 2 kernel -------------------------------

def stage2_kernel(xcat_ref, weff_ref, beff_ref, dw1w_ref, dw1b_ref, c2w_ref,
                  dw2w_ref, dw2b_ref, sa7w_ref, out_ref, *, Hp, Wp, B, k1, k2):
    """Per grid step: (BN folded into 1x1) + LeakyReLU -> depthwise k1 + Tanh
    -> 1x1 + LeakyReLU -> depthwise k2 + Tanh -> SpatialAttention(7).
    All spatial shifts are pltpu.roll on the flattened lane axis (XLU) with
    hoisted row/col masks covering borders and image-to-image wrap."""
    f32 = jnp.float32
    Lp = Hp * Wp
    Lb = B * Lp
    row, col = _row_col(Lb, Lp, Wp)

    def roll_lane(v, s):                                      # out[p] = v[p + s]
        s = (-s) % Lb
        return v if s == 0 else pltpu.roll(v, s, axis=1)

    # hoisted masks (shared between the two depthwise convs when k1 == k2)
    p1, rowok1, colok1 = _tap_masks(row, col, Hp, Wp, k1)
    comb1 = [_and_mask(rowok1[di], colok1[dj])
             for di in range(k1) for dj in range(k1)]
    if k2 == k1:
        p2, comb2 = p1, comb1
    else:
        p2, rowok2, colok2 = _tap_masks(row, col, Hp, Wp, k2)
        comb2 = [_and_mask(rowok2[di], colok2[dj])
                 for di in range(k2) for dj in range(k2)]

    def dw_conv(src, taps, bias, k, p, comb):
        """Depthwise k x k 'same' conv on the flattened (C, Lb) layout."""
        acc = None
        for di in range(k):
            for dj in range(k):
                s = (di - p) * Wp + (dj - p)
                w = taps[:, di * k + dj:di * k + dj + 1]      # (C, 1)
                term = _mask(comb[di * k + dj], roll_lane(src, s) * w)
                acc = term if acc is None else acc + term
        return acc + bias

    # Conv1: BatchNorm (folded into W_eff/b_eff) + 1x1 (no bias) + LeakyReLU
    xc = xcat_ref[0]                                          # (Cin, Lb) f32
    y = jnp.dot(weff_ref[...], xc.astype(weff_ref.dtype),
                preferred_element_type=f32)
    y = _leaky(y + beff_ref[...])
    # Conv1: depthwise k1 (groups=Cout, bias) + Tanh
    y = jnp.tanh(dw_conv(y, dw1w_ref[...], dw1b_ref[...], k1, p1, comb1))
    # Conv2: 1x1 (no bias) + LeakyReLU
    y = _leaky(jnp.dot(c2w_ref[...], y.astype(c2w_ref.dtype),
                       preferred_element_type=f32))
    # Conv2: depthwise k2 (groups=Cout, bias) + Tanh
    y = jnp.tanh(dw_conv(y, dw2w_ref[...], dw2b_ref[...], k2, p2, comb2))

    # SpatialAttention(7): channel mean/max -> 7x7 conv -> LeakyReLU -> scale.
    # Pack the 7 row-shifted copies of (mean, max) onto sublanes so each of
    # the 7 column taps is a (14, Lb) FMA instead of 49 two-sublane taps.
    mm = jnp.concatenate([jnp.mean(y, axis=0, keepdims=True),
                          jnp.max(y, axis=0, keepdims=True)], axis=0)  # (2, Lb)
    p7, rowok7, colok7 = _tap_masks(row, col, Hp, Wp, 7)
    stack = jnp.concatenate(
        [_mask(rowok7[di], roll_lane(mm, (di - p7) * Wp)) for di in range(7)],
        axis=0)                                               # (14, Lb)
    acc = None
    for dj in range(7):
        term = _mask(colok7[dj],
                     roll_lane(stack, dj - p7) * sa7w_ref[:, dj:dj + 1])
        acc = term if acc is None else acc + term
    att = _leaky(jnp.sum(acc, axis=0, keepdims=True))         # (1, Lb)
    out_ref[0] = att * y


# ------------------------------- wrapper ------------------------------------

def decoder_forward(pool_input, inputs, p, *, k1, k2, images_per_step=1,
                    mxu_dtype=jnp.bfloat16):
    """pool_input: (N, Cout, Hp, Wp), inputs: (N, Cin, Hin, Win), NCHW.
    Returns the NCHW output of Decoder.forward (training-mode BatchNorm)."""
    f32 = jnp.float32
    N, Cin, Hin, Win = inputs.shape
    _, Cout, Hp, Wp = pool_input.shape
    assert Cin == 2 * Cout, "Decoder requires in_channels == 2 * out_channels"
    Cr = Cout // 16
    assert Cr >= 1, "ChannelAttention needs out_channels >= 16"
    Hup, Wup = Hin + 1, Win + 1            # ConvTranspose2d(k=2, s=1) output
    h_diff = Wp - Wup                      # torch quirk: h_diff pads the W axis
    w_diff = Hp - Hup                      # torch quirk: w_diff pads the H axis
    assert h_diff >= 0 and w_diff >= 0, "negative F.pad (crop) is unsupported"
    oh, ow = w_diff // 2, h_diff // 2
    Lp = Hp * Wp

    B = images_per_step
    assert N % B == 0, "batch must be divisible by images_per_step"
    G = N // B                             # grid steps (keep >= 2 on v7x)
    Lb = B * Lp                            # packed lane width per step

    # front zero margin per step's lane slab (>= Wp + 1, lane aligned)
    margin = -(-(Wp + 1) // 128) * 128

    # ---- activation repacking: channel-major, B images packed on lanes -----
    # xemb embeds the up-conv input on the aligned (Hp, Wp) grid: one pad
    # replaces the ConvTranspose zero-extension and the F.pad alignment; its
    # (always >= 1) trailing zero row/col also makes every lane-wrap tap and
    # every image-to-image boundary of the packed layout read zeros.
    x = inputs.astype(mxu_dtype).reshape(G, B, Cin, Hin, Win)
    x = jnp.transpose(x, (0, 2, 1, 3, 4))                      # (G,Cin,B,Hin,Win)
    xemb = jnp.pad(x, ((0, 0), (0, 0), (0, 0),
                       (oh, Hp - Hin - oh), (ow, Wp - Win - ow)))
    xemb = xemb.reshape(G, Cin, Lb)
    xemb = jnp.pad(xemb, ((0, 0), (0, 0), (margin, 0)))        # front zeros

    pool_f = pool_input.astype(f32).reshape(G, B, Cout, Lp)
    pool_f = jnp.transpose(pool_f, (0, 2, 1, 3)).reshape(G, Cout, Lb)

    # ---- weight repacking (tiny, once per call) -----------------------------
    w_up = jnp.transpose(p['up_w'].astype(f32), (2, 3, 0, 1))  # (2,2,Cin,Cout)
    w_up = jnp.transpose(w_up.reshape(4 * Cin, Cout)).astype(mxu_dtype)
    b_up = p['up_b'].astype(f32).reshape(Cout, 1)
    ca_w1t = jnp.transpose(p['ca_fc1_w'][:, :, 0, 0].astype(f32))  # (Cout, Cr)
    ca_w2 = p['ca_fc2_w'][:, :, 0, 0].astype(f32)                  # (Cout, Cr)

    cp = pltpu.CompilerParams(dimension_semantics=("parallel",))

    # ---- stage 1: up-conv + align, channel attention, concat ----------------
    xcat = pl.pallas_call(
        functools.partial(stage1_kernel, Hp=Hp, Wp=Wp, Hup=Hup, Wup=Wup,
                          oh=oh, ow=ow, cout=Cout, B=B, margin=margin),
        grid=(G,),
        in_specs=[
            pl.BlockSpec((1, Cin, margin + Lb), lambda g: (g, 0, 0)),
            pl.BlockSpec((1, Cout, Lb), lambda g: (g, 0, 0)),
            pl.BlockSpec((Cout, 4 * Cin), lambda g: (0, 0)),
            pl.BlockSpec((Cout, 1), lambda g: (0, 0)),
            pl.BlockSpec((Cout, Cr), lambda g: (0, 0)),
            pl.BlockSpec((Cout, Cr), lambda g: (0, 0)),
        ],
        out_specs=pl.BlockSpec((1, Cin, Lb), lambda g: (g, 0, 0)),
        out_shape=jax.ShapeDtypeStruct((G, Cin, Lb), f32),
        compiler_params=cp,
    )(xemb, pool_f, w_up, b_up, ca_w1t, ca_w2)

    # ---- BatchNorm2d(Cin) batch statistics, folded into the 1x1 conv --------
    # PyTorch training-mode semantics (batch mean, biased variance), reduced
    # here in f32 XLA glue from xcat instead of in-kernel lane-sparse stores.
    count = N * Lp
    mean = jnp.sum(xcat, axis=(0, 2)) / count                  # (Cin,)
    var = jnp.maximum(jnp.sum(xcat * xcat, axis=(0, 2)) / count - mean * mean,
                      0.0)
    a = p['bn_gamma'].astype(f32) * jax.lax.rsqrt(var + BN_EPS)
    bsh = p['bn_beta'].astype(f32) - mean * a
    w_pw = p['c1_pw_w'][:, :, 0, 0].astype(f32)                # (Cout, Cin)
    w_eff = (w_pw * a[None, :]).astype(mxu_dtype)
    b_eff = (w_pw @ bsh).reshape(Cout, 1)                      # f32

    dw1_w = p['c1_dw_w'].astype(f32).reshape(Cout, k1 * k1)
    dw1_b = p['c1_dw_b'].astype(f32).reshape(Cout, 1)
    c2_w = p['c2_pw_w'][:, :, 0, 0].astype(mxu_dtype)          # (Cout, Cout)
    dw2_w = p['c2_dw_w'].astype(f32).reshape(Cout, k2 * k2)
    dw2_b = p['c2_dw_b'].astype(f32).reshape(Cout, 1)
    # SpatialAttention weight (1, 2, 7, 7) -> rows (di*2 + channel), cols dj
    sa7_w = jnp.transpose(p['sa_w'][0].astype(f32), (1, 0, 2)).reshape(14, 7)

    # ---- stage 2: Conv1 / Conv2 / SpatialAttention, VMEM-resident ----------
    # TODO(synk): for much larger Hp*Wp (v7x: 64 MiB VMEM), tile the lane axis
    # with a (k-1)//2-row halo and set vmem_limit_bytes explicitly.
    out_cm = pl.pallas_call(
        functools.partial(stage2_kernel, Hp=Hp, Wp=Wp, B=B, k1=k1, k2=k2),
        grid=(G,),
        in_specs=[
            pl.BlockSpec((1, Cin, Lb), lambda g: (g, 0, 0)),
            pl.BlockSpec((Cout, Cin), lambda g: (0, 0)),
            pl.BlockSpec((Cout, 1), lambda g: (0, 0)),
            pl.BlockSpec((Cout, k1 * k1), lambda g: (0, 0)),
            pl.BlockSpec((Cout, 1), lambda g: (0, 0)),
            pl.BlockSpec((Cout, Cout), lambda g: (0, 0)),
            pl.BlockSpec((Cout, k2 * k2), lambda g: (0, 0)),
            pl.BlockSpec((Cout, 1), lambda g: (0, 0)),
            pl.BlockSpec((14, 7), lambda g: (0, 0)),
        ],
        out_specs=pl.BlockSpec((1, Cout, Lb), lambda g: (g, 0, 0)),
        out_shape=jax.ShapeDtypeStruct((G, Cout, Lb), f32),
        compiler_params=cp,
    )(xcat, w_eff, b_eff, dw1_w, dw1_b, c2_w, dw2_w, dw2_b, sa7_w)

    # back to NCHW (small XLA transpose)
    out = out_cm.reshape(G, Cout, B, Hp, Wp)
    return jnp.transpose(out, (0, 2, 1, 3, 4)).reshape(N, Cout, Hp, Wp)


# --------------------------------- main --------------------------------------

if __name__ == "__main__":
    N = 4
    Cout = 32                  # out_channels (needs Cout // 16 >= 1)
    Cin = 2 * Cout             # in_channels (concat of pool_att + upsampled)
    k1 = k2 = 3
    Hin = Win = 14             # ConvTranspose(k=2,s=1) -> 15x15, F.pad -> 16x16
    Hp = Wp = 16

    key = jax.random.PRNGKey(0)
    keys = jax.random.split(key, 16)

    def rnd(k, shape, scale=0.1):
        return scale * jax.random.normal(k, shape, dtype=jnp.float32)

    params = {
        # ConvTranspose2d(Cin, Cout, 2, stride=1): weight (Cin, Cout, 2, 2)
        'up_w': rnd(keys[0], (Cin, Cout, 2, 2)),
        'up_b': rnd(keys[1], (Cout,)),
        # BatchNorm2d(Cin): PyTorch default init
        'bn_gamma': jnp.ones((Cin,), jnp.float32),
        'bn_beta': jnp.zeros((Cin,), jnp.float32),
        # Conv1: 1x1 (no bias) + depthwise k1 (bias)
        'c1_pw_w': rnd(keys[2], (Cout, Cin, 1, 1)),
        'c1_dw_w': rnd(keys[3], (Cout, 1, k1, k1)),
        'c1_dw_b': rnd(keys[4], (Cout,)),
        # Conv2: 1x1 (no bias) + depthwise k2 (bias)
        'c2_pw_w': rnd(keys[5], (Cout, Cout, 1, 1)),
        'c2_dw_w': rnd(keys[6], (Cout, 1, k2, k2)),
        'c2_dw_b': rnd(keys[7], (Cout,)),
        # ChannelAttention(Cout)
        'ca_fc1_w': rnd(keys[8], (Cout // 16, Cout, 1, 1)),
        'ca_fc2_w': rnd(keys[9], (Cout, Cout // 16, 1, 1)),
        # SpatialAttention(7)
        'sa_w': rnd(keys[10], (1, 2, 7, 7)),
    }

    pool_input = jax.random.normal(keys[11], (N, Cout, Hp, Wp), dtype=jnp.float32)
    inputs = jax.random.normal(keys[12], (N, Cin, Hin, Win), dtype=jnp.float32)

    fwd = jax.jit(functools.partial(decoder_forward, k1=k1, k2=k2,
                                    images_per_step=2))
    out = fwd(pool_input, inputs, params)
    out = jax.block_until_ready(out)

    assert out.shape == (N, Cout, Hp, Wp), out.shape
    assert bool(jnp.all(jnp.isfinite(out)))
    print("KERNEL_OK")
</pallas_src>

<mosaic_0001>
module attributes {stable_mosaic.version = 11 : i64} {
  func.func @stage1_kernel(%arg0: i32, %arg1: memref<1x64x640xbf16, #tpu.memory_space<vmem>>, %arg2: memref<1x32x512xf32, #tpu.memory_space<vmem>>, %arg3: memref<32x256xbf16, #tpu.memory_space<vmem>>, %arg4: memref<32x1xf32, #tpu.memory_space<vmem>>, %arg5: memref<32x2xf32, #tpu.memory_space<vmem>>, %arg6: memref<32x2xf32, #tpu.memory_space<vmem>>, %arg7: memref<1x64x512xf32, #tpu.memory_space<vmem>>) attributes {dimension_semantics = [#tpu.dimension_semantics<parallel>], iteration_bounds = array<i64: 2>, scalar_prefetch = 0 : i64, scratch_operands = 0 : i64, tpu.core_type = #tpu.core_type<tc>, window_params = [{transform_indices = @transform_0, window_bounds = array<i64: 1, 64, 640>}, {transform_indices = @transform_1, window_bounds = array<i64: 1, 32, 512>}, {pipeline_mode = #tpu.pipeline_mode<synchronous>, transform_indices = @transform_2, window_bounds = array<i64: 32, 256>}, {pipeline_mode = #tpu.pipeline_mode<synchronous>, transform_indices = @transform_3, window_bounds = array<i64: 32, 1>}, {pipeline_mode = #tpu.pipeline_mode<synchronous>, transform_indices = @transform_4, window_bounds = array<i64: 32, 2>}, {pipeline_mode = #tpu.pipeline_mode<synchronous>, transform_indices = @transform_5, window_bounds = array<i64: 32, 2>}, {transform_indices = @transform_6, window_bounds = array<i64: 1, 64, 512>}]} {
    %c0 = arith.constant 0 : index
    %c0_0 = arith.constant 0 : index
    %c128 = arith.constant 128 : index
    %0 = vector.load %arg1[%c0, %c0_0, %c128] : memref<1x64x640xbf16, #tpu.memory_space<vmem>>, vector<1x64x512xbf16>
    %1 = vector.shape_cast %0 : vector<1x64x512xbf16> to vector<64x512xbf16>
    %c0_1 = arith.constant 0 : index
    %c0_2 = arith.constant 0 : index
    %c127 = arith.constant 127 : index
    %2 = vector.load %arg1[%c0_1, %c0_2, %c127] : memref<1x64x640xbf16, #tpu.memory_space<vmem>>, vector<1x64x512xbf16>
    %3 = vector.shape_cast %2 : vector<1x64x512xbf16> to vector<64x512xbf16>
    %c0_3 = arith.constant 0 : index
    %c0_4 = arith.constant 0 : index
    %c112 = arith.constant 112 : index
    %4 = vector.load %arg1[%c0_3, %c0_4, %c112] : memref<1x64x640xbf16, #tpu.memory_space<vmem>>, vector<1x64x512xbf16>
    %5 = vector.shape_cast %4 : vector<1x64x512xbf16> to vector<64x512xbf16>
    %c0_5 = arith.constant 0 : index
    %c0_6 = arith.constant 0 : index
    %c111 = arith.constant 111 : index
    %6 = vector.load %arg1[%c0_5, %c0_6, %c111] : memref<1x64x640xbf16, #tpu.memory_space<vmem>>, vector<1x64x512xbf16>
    %7 = vector.shape_cast %6 : vector<1x64x512xbf16> to vector<64x512xbf16>
    %8 = tpu.concatenate %1, %3, %5, %7 in 0 : vector<64x512xbf16>, vector<64x512xbf16>, vector<64x512xbf16>, vector<64x512xbf16> -> vector<256x512xbf16>
    %c0_7 = arith.constant 0 : index
    %c0_8 = arith.constant 0 : index
    %9 = vector.load %arg3[%c0_7, %c0_8] : memref<32x256xbf16, #tpu.memory_space<vmem>>, vector<32x256xbf16>
    %cst = arith.constant dense<0.000000e+00> : vector<32x512xf32>
    %10 = tpu.matmul %9, %8, %cst {dimension_numbers = #tpu.dot_dimension_numbers<[1], [0], [0], [1], [0, 0, 1, 1], [], []>} : vector<32x256xbf16>, vector<256x512xbf16>, vector<32x512xf32> -> vector<32x512xf32>
    %c0_9 = arith.constant 0 : index
    %c0_10 = arith.constant 0 : index
    %11 = vector.load %arg4[%c0_9, %c0_10] : memref<32x1xf32, #tpu.memory_space<vmem>>, vector<32x1xf32>
    %12 = tpu.iota {dimensions = array<i32: 1>} : vector<1x512xi32>
    %c255_i32 = arith.constant 255 : i32
    %13 = vector.broadcast %c255_i32 : i32 to vector<1x512xi32>
    %14 = arith.andi %12, %13 : vector<1x512xi32>
    %c4_i32 = arith.constant 4 : i32
    %15 = vector.broadcast %c4_i32 : i32 to vector<1x512xi32>
    %16 = arith.shrsi %14, %15 : vector<1x512xi32>
    %c15_i32 = arith.constant 15 : i32
    %17 = vector.broadcast %c15_i32 : i32 to vector<1x512xi32>
    %18 = arith.andi %14, %17 : vector<1x512xi32>
    %c0_i32 = arith.constant 0 : i32
    %19 = vector.broadcast %c0_i32 : i32 to vector<1x512xi32>
    %20 = arith.cmpi sge, %16, %19 : vector<1x512xi32>
    %c15_i32_11 = arith.constant 15 : i32
    %21 = vector.broadcast %c15_i32_11 : i32 to vector<1x512xi32>
    %22 = arith.cmpi slt, %16, %21 : vector<1x512xi32>
    %23 = arith.andi %20, %22 : vector<1x512xi1>
    %c0_i32_12 = arith.constant 0 : i32
    %24 = vector.broadcast %c0_i32_12 : i32 to vector<1x512xi32>
    %25 = arith.cmpi sge, %18, %24 : vector<1x512xi32>
    %26 = arith.andi %23, %25 : vector<1x512xi1>
    %c15_i32_13 = arith.constant 15 : i32
    %27 = vector.broadcast %c15_i32_13 : i32 to vector<1x512xi32>
    %28 = arith.cmpi slt, %18, %27 : vector<1x512xi32>
    %29 = arith.andi %26, %28 : vector<1x512xi1>
    %cst_14 = arith.constant 0.000000e+00 : f32
    %30 = vector.shape_cast %29 : vector<1x512xi1> to vector<1x512xi1>
    %31 = vector.broadcast %30 : vector<1x512xi1> to vector<32x512xi1>
    %32 = vector.shape_cast %11 : vector<32x1xf32> to vector<32x1xf32>
    %33 = vector.broadcast %32 : vector<32x1xf32> to vector<32x512xf32>
    %34 = vector.broadcast %cst_14 : f32 to vector<32x512xf32>
    %35 = arith.select %31, %33, %34 : vector<32x512xi1>, vector<32x512xf32>
    %36 = arith.addf %10, %35 : vector<32x512xf32>
    %c0_15 = arith.constant 0 : index
    %c0_16 = arith.constant 0 : index
    %c0_17 = arith.constant 0 : index
    %37 = vector.load %arg2[%c0_15, %c0_16, %c0_17] : memref<1x32x512xf32, #tpu.memory_space<vmem>>, vector<1x32x512xf32>
    %38 = vector.shape_cast %37 : vector<1x32x512xf32> to vector<32x512xf32>
    %c0_18 = arith.constant 0 : index
    %c0_19 = arith.constant 0 : index
    %39 = vector.load %arg5[%c0_18, %c0_19] : memref<32x2xf32, #tpu.memory_space<vmem>>, vector<32x2xf32>
    %c0_20 = arith.constant 0 : index
    %c0_21 = arith.constant 0 : index
    %40 = vector.load %arg6[%c0_20, %c0_21] : memref<32x2xf32, #tpu.memory_space<vmem>>, vector<32x2xf32>
    %41 = vector.extract_strided_slice %38 {offsets = [0, 0], sizes = [32, 256], strides = [1, 1]} : vector<32x512xf32> to vector<32x256xf32>
    %cst_22 = arith.constant dense<0.000000e+00> : vector<32xf32>
    %42 = vector.multi_reduction <add>, %41, %cst_22 [1] : vector<32x256xf32> to vector<32xf32>
    %43 = vector.shape_cast %42 : vector<32xf32> to vector<32x1xf32>
    %cst_23 = arith.constant 2.560000e+02 : f32
    %44 = vector.broadcast %cst_23 : f32 to vector<32x1xf32>
    %45 = arith.divf %43, %44 : vector<32x1xf32>
    %cst_24 = arith.constant dense<0xFF800000> : vector<32xf32>
    %46 = vector.multi_reduction <maximumf>, %41, %cst_24 [1] : vector<32x256xf32> to vector<32xf32>
    %47 = vector.shape_cast %46 : vector<32xf32> to vector<32x1xf32>
    %48 = vector.broadcast %45 : vector<32x1xf32> to vector<32x2xf32>
    %49 = arith.mulf %39, %48 : vector<32x2xf32>
    %cst_25 = arith.constant dense<0.000000e+00> : vector<2xf32>
    %50 = vector.multi_reduction <add>, %49, %cst_25 [0] : vector<32x2xf32> to vector<2xf32>
    %51 = vector.shape_cast %50 : vector<2xf32> to vector<1x2xf32>
    %cst_26 = arith.constant 0.000000e+00 : f32
    %52 = vector.broadcast %cst_26 : f32 to vector<1x2xf32>
    %53 = arith.cmpf ogt, %51, %52 : vector<1x2xf32>
    %cst_27 = arith.constant 0.00999999977 : f32
    %54 = vector.broadcast %cst_27 : f32 to vector<1x2xf32>
    %55 = arith.mulf %54, %51 : vector<1x2xf32>
    %56 = arith.select %53, %51, %55 : vector<1x2xi1>, vector<1x2xf32>
    %57 = vector.broadcast %56 : vector<1x2xf32> to vector<32x2xf32>
    %58 = arith.mulf %40, %57 : vector<32x2xf32>
    %cst_28 = arith.constant dense<0.000000e+00> : vector<32xf32>
    %59 = vector.multi_reduction <add>, %58, %cst_28 [1] : vector<32x2xf32> to vector<32xf32>
    %60 = vector.shape_cast %59 : vector<32xf32> to vector<32x1xf32>
    %61 = vector.broadcast %47 : vector<32x1xf32> to vector<32x2xf32>
    %62 = arith.mulf %39, %61 : vector<32x2xf32>
    %cst_29 = arith.constant dense<0.000000e+00> : vector<2xf32>
    %63 = vector.multi_reduction <add>, %62, %cst_29 [0] : vector<32x2xf32> to vector<2xf32>
    %64 = vector.shape_cast %63 : vector<2xf32> to vector<1x2xf32>
    %cst_30 = arith.constant 0.000000e+00 : f32
    %65 = vector.broadcast %cst_30 : f32 to vector<1x2xf32>
    %66 = arith.cmpf ogt, %64, %65 : vector<1x2xf32>
    %cst_31 = arith.constant 0.00999999977 : f32
    %67 = vector.broadcast %cst_31 : f32 to vector<1x2xf32>
    %68 = arith.mulf %67, %64 : vector<1x2xf32>
    %69 = arith.select %66, %64, %68 : vector<1x2xi1>, vector<1x2xf32>
    %70 = vector.broadcast %69 : vector<1x2xf32> to vector<32x2xf32>
    %71 = arith.mulf %40, %70 : vector<32x2xf32>
    %cst_32 = arith.constant dense<0.000000e+00> : vector<32xf32>
    %72 = vector.multi_reduction <add>, %71, %cst_32 [1] : vector<32x2xf32> to vector<32xf32>
    %73 = vector.shape_cast %72 : vector<32xf32> to vector<32x1xf32>
    %74 = arith.addf %60, %73 : vector<32x1xf32>
    %75 = math.tanh %74 : vector<32x1xf32>
    %76 = vector.broadcast %75 : vector<32x1xf32> to vector<32x256xf32>
    %77 = arith.mulf %76, %41 : vector<32x256xf32>
    %c0_33 = arith.constant 0 : index
    %c0_34 = arith.constant 0 : index
    %c0_35 = arith.constant 0 : index
    %78 = vector.load %arg7[%c0_33, %c0_34, %c0_35] : memref<1x64x512xf32, #tpu.memory_space<vmem>>, vector<1x32x256xf32>
    %79 = vector.shape_cast %78 : vector<1x32x256xf32> to vector<32x256xf32>
    %80 = vector.shape_cast %77 : vector<32x256xf32> to vector<1x32x256xf32>
    tpu.vector_store %arg7[%c0_33, %c0_34, %c0_35], %80 {strides = array<i32>} : memref<1x64x512xf32, #tpu.memory_space<vmem>>, vector<1x32x256xf32>,
    %81 = vector.extract_strided_slice %38 {offsets = [0, 256], sizes = [32, 256], strides = [1, 1]} : vector<32x512xf32> to vector<32x256xf32>
    %cst_36 = arith.constant dense<0.000000e+00> : vector<32xf32>
    %82 = vector.multi_reduction <add>, %81, %cst_36 [1] : vector<32x256xf32> to vector<32xf32>
    %83 = vector.shape_cast %82 : vector<32xf32> to vector<32x1xf32>
    %cst_37 = arith.constant 2.560000e+02 : f32
    %84 = vector.broadcast %cst_37 : f32 to vector<32x1xf32>
    %85 = arith.divf %83, %84 : vector<32x1xf32>
    %cst_38 = arith.constant dense<0xFF800000> : vector<32xf32>
    %86 = vector.multi_reduction <maximumf>, %81, %cst_38 [1] : vector<32x256xf32> to vector<32xf32>
    %87 = vector.shape_cast %86 : vector<32xf32> to vector<32x1xf32>
    %88 = vector.broadcast %85 : vector<32x1xf32> to vector<32x2xf32>
    %89 = arith.mulf %39, %88 : vector<32x2xf32>
    %cst_39 = arith.constant dense<0.000000e+00> : vector<2xf32>
    %90 = vector.multi_reduction <add>, %89, %cst_39 [0] : vector<32x2xf32> to vector<2xf32>
    %91 = vector.shape_cast %90 : vector<2xf32> to vector<1x2xf32>
    %cst_40 = arith.constant 0.000000e+00 : f32
    %92 = vector.broadcast %cst_40 : f32 to vector<1x2xf32>
    %93 = arith.cmpf ogt, %91, %92 : vector<1x2xf32>
    %cst_41 = arith.constant 0.00999999977 : f32
    %94 = vector.broadcast %cst_41 : f32 to vector<1x2xf32>
    %95 = arith.mulf %94, %91 : vector<1x2xf32>
    %96 = arith.select %93, %91, %95 : vector<1x2xi1>, vector<1x2xf32>
    %97 = vector.broadcast %96 : vector<1x2xf32> to vector<32x2xf32>
    %98 = arith.mulf %40, %97 : vector<32x2xf32>
    %cst_42 = arith.constant dense<0.000000e+00> : vector<32xf32>
    %99 = vector.multi_reduction <add>, %98, %cst_42 [1] : vector<32x2xf32> to vector<32xf32>
    %100 = vector.shape_cast %99 : vector<32xf32> to vector<32x1xf32>
    %101 = vector.broadcast %87 : vector<32x1xf32> to vector<32x2xf32>
    %102 = arith.mulf %39, %101 : vector<32x2xf32>
    %cst_43 = arith.constant dense<0.000000e+00> : vector<2xf32>
    %103 = vector.multi_reduction <add>, %102, %cst_43 [0] : vector<32x2xf32> to vector<2xf32>
    %104 = vector.shape_cast %103 : vector<2xf32> to vector<1x2xf32>
    %cst_44 = arith.constant 0.000000e+00 : f32
    %105 = vector.broadcast %cst_44 : f32 to vector<1x2xf32>
    %106 = arith.cmpf ogt, %104, %105 : vector<1x2xf32>
    %cst_45 = arith.constant 0.00999999977 : f32
    %107 = vector.broadcast %cst_45 : f32 to vector<1x2xf32>
    %108 = arith.mulf %107, %104 : vector<1x2xf32>
    %109 = arith.select %106, %104, %108 : vector<1x2xi1>, vector<1x2xf32>
    %110 = vector.broadcast %109 : vector<1x2xf32> to vector<32x2xf32>
    %111 = arith.mulf %40, %110 : vector<32x2xf32>
    %cst_46 = arith.constant dense<0.000000e+00> : vector<32xf32>
    %112 = vector.multi_reduction <add>, %111, %cst_46 [1] : vector<32x2xf32> to vector<32xf32>
    %113 = vector.shape_cast %112 : vector<32xf32> to vector<32x1xf32>
    %114 = arith.addf %100, %113 : vector<32x1xf32>
    %115 = math.tanh %114 : vector<32x1xf32>
    %116 = vector.broadcast %115 : vector<32x1xf32> to vector<32x256xf32>
    %117 = arith.mulf %116, %81 : vector<32x256xf32>
    %c0_47 = arith.constant 0 : index
    %c0_48 = arith.constant 0 : index
    %c256 = arith.constant 256 : index
    %118 = vector.load %arg7[%c0_47, %c0_48, %c256] : memref<1x64x512xf32, #tpu.memory_space<vmem>>, vector<1x32x256xf32>
    %119 = vector.shape_cast %118 : vector<1x32x256xf32> to vector<32x256xf32>
    %120 = vector.shape_cast %117 : vector<32x256xf32> to vector<1x32x256xf32>
    tpu.vector_store %arg7[%c0_47, %c0_48, %c256], %120 {strides = array<i32>} : memref<1x64x512xf32, #tpu.memory_space<vmem>>, vector<1x32x256xf32>,
    %c0_49 = arith.constant 0 : index
    %c32 = arith.constant 32 : index
    %c0_50 = arith.constant 0 : index
    %121 = vector.load %arg7[%c0_49, %c32, %c0_50] : memref<1x64x512xf32, #tpu.memory_space<vmem>>, vector<1x32x512xf32>
    %122 = vector.shape_cast %121 : vector<1x32x512xf32> to vector<32x512xf32>
    %123 = vector.shape_cast %36 : vector<32x512xf32> to vector<1x32x512xf32>
    tpu.vector_store %arg7[%c0_49, %c32, %c0_50], %123 {strides = array<i32>} : memref<1x64x512xf32, #tpu.memory_space<vmem>>, vector<1x32x512xf32>,
    return
  }
  func.func @transform_0(%arg0: i32) -> (i32, i32, i32) {
    %c0_i32 = arith.constant 0 : i32
    %c0_i32_0 = arith.constant 0 : i32
    %c0_i32_1 = arith.constant 0 : i32
    return %arg0, %c0_i32, %c0_i32_0 : i32, i32, i32
  }
  func.func @transform_1(%arg0: i32) -> (i32, i32, i32) {
    %c0_i32 = arith.constant 0 : i32
    %c0_i32_0 = arith.constant 0 : i32
    %c0_i32_1 = arith.constant 0 : i32
    return %arg0, %c0_i32, %c0_i32_0 : i32, i32, i32
  }
  func.func @transform_2(%arg0: i32) -> (i32, i32) {
    %c0_i32 = arith.constant 0 : i32
    %c0_i32_0 = arith.constant 0 : i32
    %c0_i32_1 = arith.constant 0 : i32
    return %c0_i32, %c0_i32_0 : i32, i32
  }
  func.func @transform_3(%arg0: i32) -> (i32, i32) {
    %c0_i32 = arith.constant 0 : i32
    %c0_i32_0 = arith.constant 0 : i32
    %c0_i32_1 = arith.constant 0 : i32
    return %c0_i32, %c0_i32_0 : i32, i32
  }
  func.func @transform_4(%arg0: i32) -> (i32, i32) {
    %c0_i32 = arith.constant 0 : i32
    %c0_i32_0 = arith.constant 0 : i32
    %c0_i32_1 = arith.constant 0 : i32
    return %c0_i32, %c0_i32_0 : i32, i32
  }
  func.func @transform_5(%arg0: i32) -> (i32, i32) {
    %c0_i32 = arith.constant 0 : i32
    %c0_i32_0 = arith.constant 0 : i32
    %c0_i32_1 = arith.constant 0 : i32
    return %c0_i32, %c0_i32_0 : i32, i32
  }
  func.func @transform_6(%arg0: i32) -> (i32, i32, i32) {
    %c0_i32 = arith.constant 0 : i32
    %c0_i32_0 = arith.constant 0 : i32
    %c0_i32_1 = arith.constant 0 : i32
    return %arg0, %c0_i32, %c0_i32_0 : i32, i32, i32
  }
}

module attributes {stable_mosaic.version = 11 : i64} {
  func.func @stage2_kernel(%arg0: i32, %arg1: memref<1x64x512xf32, #tpu.memory_space<vmem>>, %arg2: memref<32x64xbf16, #tpu.memory_space<vmem>>, %arg3: memref<32x1xf32, #tpu.memory_space<vmem>>, %arg4: memref<32x9xf32, #tpu.memory_space<vmem>>, %arg5: memref<32x1xf32, #tpu.memory_space<vmem>>, %arg6: memref<32x32xbf16, #tpu.memory_space<vmem>>, %arg7: memref<32x9xf32, #tpu.memory_space<vmem>>, %arg8: memref<32x1xf32, #tpu.memory_space<vmem>>, %arg9: memref<14x7xf32, #tpu.memory_space<vmem>>, %arg10: memref<1x32x512xf32, #tpu.memory_space<vmem>>) attributes {dimension_semantics = [#tpu.dimension_semantics<parallel>], iteration_bounds = array<i64: 2>, scalar_prefetch = 0 : i64, scratch_operands = 0 : i64, tpu.core_type = #tpu.core_type<tc>, window_params = [{transform_indices = @transform_0, window_bounds = array<i64: 1, 64, 512>}, {pipeline_mode = #tpu.pipeline_mode<synchronous>, transform_indices = @transform_1, window_bounds = array<i64: 32, 64>}, {pipeline_mode = #tpu.pipeline_mode<synchronous>, transform_indices = @transform_2, window_bounds = array<i64: 32, 1>}, {pipeline_mode = #tpu.pipeline_mode<synchronous>, transform_indices = @transform_3, window_bounds = array<i64: 32, 9>}, {pipeline_mode = #tpu.pipeline_mode<synchronous>, transform_indices = @transform_4, window_bounds = array<i64: 32, 1>}, {pipeline_mode = #tpu.pipeline_mode<synchronous>, transform_indices = @transform_5, window_bounds = array<i64: 32, 32>}, {pipeline_mode = #tpu.pipeline_mode<synchronous>, transform_indices = @transform_6, window_bounds = array<i64: 32, 9>}, {pipeline_mode = #tpu.pipeline_mode<synchronous>, transform_indices = @transform_7, window_bounds = array<i64: 32, 1>}, {pipeline_mode = #tpu.pipeline_mode<synchronous>, transform_indices = @transform_8, window_bounds = array<i64: 14, 7>}, {transform_indices = @transform_9, window_bounds = array<i64: 1, 32, 512>}]} {
    %0 = tpu.iota {dimensions = array<i32: 1>} : vector<1x512xi32>
    %c255_i32 = arith.constant 255 : i32
    %1 = vector.broadcast %c255_i32 : i32 to vector<1x512xi32>
    %2 = arith.andi %0, %1 : vector<1x512xi32>
    %c4_i32 = arith.constant 4 : i32
    %3 = vector.broadcast %c4_i32 : i32 to vector<1x512xi32>
    %4 = arith.shrsi %2, %3 : vector<1x512xi32>
    %c15_i32 = arith.constant 15 : i32
    %5 = vector.broadcast %c15_i32 : i32 to vector<1x512xi32>
    %6 = arith.andi %2, %5 : vector<1x512xi32>
    %c1_i32 = arith.constant 1 : i32
    %7 = vector.broadcast %c1_i32 : i32 to vector<1x512xi32>
    %8 = arith.cmpi sge, %4, %7 : vector<1x512xi32>
    %c17_i32 = arith.constant 17 : i32
    %9 = vector.broadcast %c17_i32 : i32 to vector<1x512xi32>
    %10 = arith.cmpi slt, %4, %9 : vector<1x512xi32>
    %11 = arith.andi %8, %10 : vector<1x512xi1>
    %c-1_i32 = arith.constant -1 : i32
    %12 = vector.broadcast %c-1_i32 : i32 to vector<1x512xi32>
    %13 = arith.cmpi sge, %4, %12 : vector<1x512xi32>
    %c15_i32_0 = arith.constant 15 : i32
    %14 = vector.broadcast %c15_i32_0 : i32 to vector<1x512xi32>
    %15 = arith.cmpi slt, %4, %14 : vector<1x512xi32>
    %16 = arith.andi %13, %15 : vector<1x512xi1>
    %c1_i32_1 = arith.constant 1 : i32
    %17 = vector.broadcast %c1_i32_1 : i32 to vector<1x512xi32>
    %18 = arith.cmpi sge, %6, %17 : vector<1x512xi32>
    %c17_i32_2 = arith.constant 17 : i32
    %19 = vector.broadcast %c17_i32_2 : i32 to vector<1x512xi32>
    %20 = arith.cmpi slt, %6, %19 : vector<1x512xi32>
    %21 = arith.andi %18, %20 : vector<1x512xi1>
    %c-1_i32_3 = arith.constant -1 : i32
    %22 = vector.broadcast %c-1_i32_3 : i32 to vector<1x512xi32>
    %23 = arith.cmpi sge, %6, %22 : vector<1x512xi32>
    %c15_i32_4 = arith.constant 15 : i32
    %24 = vector.broadcast %c15_i32_4 : i32 to vector<1x512xi32>
    %25 = arith.cmpi slt, %6, %24 : vector<1x512xi32>
    %26 = arith.andi %23, %25 : vector<1x512xi1>
    %27 = arith.andi %11, %21 : vector<1x512xi1>
    %28 = arith.andi %11, %26 : vector<1x512xi1>
    %29 = arith.andi %16, %21 : vector<1x512xi1>
    %30 = arith.andi %16, %26 : vector<1x512xi1>
    %c0 = arith.constant 0 : index
    %c0_5 = arith.constant 0 : index
    %c0_6 = arith.constant 0 : index
    %31 = vector.load %arg1[%c0, %c0_5, %c0_6] : memref<1x64x512xf32, #tpu.memory_space<vmem>>, vector<1x64x512xf32>
    %32 = vector.shape_cast %31 : vector<1x64x512xf32> to vector<64x512xf32>
    %c0_7 = arith.constant 0 : index
    %c0_8 = arith.constant 0 : index
    %33 = vector.load %arg2[%c0_7, %c0_8] : memref<32x64xbf16, #tpu.memory_space<vmem>>, vector<32x64xbf16>
    %34 = arith.truncf %32 : vector<64x512xf32> to vector<64x512xbf16>
    %cst = arith.constant dense<0.000000e+00> : vector<32x512xf32>
    %35 = tpu.matmul %33, %34, %cst {dimension_numbers = #tpu.dot_dimension_numbers<[1], [0], [0], [1], [0, 0, 1, 1], [], []>} : vector<32x64xbf16>, vector<64x512xbf16>, vector<32x512xf32> -> vector<32x512xf32>
    %c0_9 = arith.constant 0 : index
    %c0_10 = arith.constant 0 : index
    %36 = vector.load %arg3[%c0_9, %c0_10] : memref<32x1xf32, #tpu.memory_space<vmem>>, vector<32x1xf32>
    %37 = vector.broadcast %36 : vector<32x1xf32> to vector<32x512xf32>
    %38 = arith.addf %35, %37 : vector<32x512xf32>
    %cst_11 = arith.constant 0.000000e+00 : f32
    %39 = vector.broadcast %cst_11 : f32 to vector<32x512xf32>
    %40 = arith.cmpf ogt, %38, %39 : vector<32x512xf32>
    %cst_12 = arith.constant 0.00999999977 : f32
    %41 = vector.broadcast %cst_12 : f32 to vector<32x512xf32>
    %42 = arith.mulf %41, %38 : vector<32x512xf32>
    %43 = arith.select %40, %38, %42 : vector<32x512xi1>, vector<32x512xf32>
    %c0_13 = arith.constant 0 : index
    %c0_14 = arith.constant 0 : index
    %44 = vector.load %arg4[%c0_13, %c0_14] : memref<32x9xf32, #tpu.memory_space<vmem>>, vector<32x9xf32>
    %c0_15 = arith.constant 0 : index
    %c0_16 = arith.constant 0 : index
    %45 = vector.load %arg5[%c0_15, %c0_16] : memref<32x1xf32, #tpu.memory_space<vmem>>, vector<32x1xf32>
    %46 = vector.extract_strided_slice %44 {offsets = [0, 0], sizes = [32, 1], strides = [1, 1]} : vector<32x9xf32> to vector<32x1xf32>
    %c17_i32_17 = arith.constant 17 : i32
    %47 = tpu.dynamic_rotate %43 by %c17_i32_17 dim 1 : vector<32x512xf32>, i32 -> vector<32x512xf32>
    %48 = vector.broadcast %46 : vector<32x1xf32> to vector<32x512xf32>
    %49 = arith.mulf %47, %48 : vector<32x512xf32>
    %cst_18 = arith.constant 0.000000e+00 : f32
    %50 = vector.shape_cast %27 : vector<1x512xi1> to vector<1x512xi1>
    %51 = vector.broadcast %50 : vector<1x512xi1> to vector<32x512xi1>
    %52 = vector.broadcast %cst_18 : f32 to vector<32x512xf32>
    %53 = arith.select %51, %49, %52 : vector<32x512xi1>, vector<32x512xf32>
    %54 = vector.extract_strided_slice %44 {offsets = [0, 1], sizes = [32, 1], strides = [1, 1]} : vector<32x9xf32> to vector<32x1xf32>
    %c16_i32 = arith.constant 16 : i32
    %55 = tpu.dynamic_rotate %43 by %c16_i32 dim 1 : vector<32x512xf32>, i32 -> vector<32x512xf32>
    %56 = vector.broadcast %54 : vector<32x1xf32> to vector<32x512xf32>
    %57 = arith.mulf %55, %56 : vector<32x512xf32>
    %cst_19 = arith.constant 0.000000e+00 : f32
    %58 = vector.shape_cast %11 : vector<1x512xi1> to vector<1x512xi1>
    %59 = vector.broadcast %58 : vector<1x512xi1> to vector<32x512xi1>
    %60 = vector.broadcast %cst_19 : f32 to vector<32x512xf32>
    %61 = arith.select %59, %57, %60 : vector<32x512xi1>, vector<32x512xf32>
    %62 = arith.addf %53, %61 : vector<32x512xf32>
    %63 = vector.extract_strided_slice %44 {offsets = [0, 2], sizes = [32, 1], strides = [1, 1]} : vector<32x9xf32> to vector<32x1xf32>
    %c15_i32_20 = arith.constant 15 : i32
    %64 = tpu.dynamic_rotate %43 by %c15_i32_20 dim 1 : vector<32x512xf32>, i32 -> vector<32x512xf32>
    %65 = vector.broadcast %63 : vector<32x1xf32> to vector<32x512xf32>
    %66 = arith.mulf %64, %65 : vector<32x512xf32>
    %cst_21 = arith.constant 0.000000e+00 : f32
    %67 = vector.shape_cast %28 : vector<1x512xi1> to vector<1x512xi1>
    %68 = vector.broadcast %67 : vector<1x512xi1> to vector<32x512xi1>
    %69 = vector.broadcast %cst_21 : f32 to vector<32x512xf32>
    %70 = arith.select %68, %66, %69 : vector<32x512xi1>, vector<32x512xf32>
    %71 = arith.addf %62, %70 : vector<32x512xf32>
    %72 = vector.extract_strided_slice %44 {offsets = [0, 3], sizes = [32, 1], strides = [1, 1]} : vector<32x9xf32> to vector<32x1xf32>
    %c1_i32_22 = arith.constant 1 : i32
    %73 = tpu.dynamic_rotate %43 by %c1_i32_22 dim 1 : vector<32x512xf32>, i32 -> vector<32x512xf32>
    %74 = vector.broadcast %72 : vector<32x1xf32> to vector<32x512xf32>
    %75 = arith.mulf %73, %74 : vector<32x512xf32>
    %cst_23 = arith.constant 0.000000e+00 : f32
    %76 = vector.shape_cast %21 : vector<1x512xi1> to vector<1x512xi1>
    %77 = vector.broadcast %76 : vector<1x512xi1> to vector<32x512xi1>
    %78 = vector.broadcast %cst_23 : f32 to vector<32x512xf32>
    %79 = arith.select %77, %75, %78 : vector<32x512xi1>, vector<32x512xf32>
    %80 = arith.addf %71, %79 : vector<32x512xf32>
    %81 = vector.extract_strided_slice %44 {offsets = [0, 4], sizes = [32, 1], strides = [1, 1]} : vector<32x9xf32> to vector<32x1xf32>
    %82 = vector.broadcast %81 : vector<32x1xf32> to vector<32x512xf32>
    %83 = arith.mulf %43, %82 : vector<32x512xf32>
    %84 = arith.addf %80, %83 : vector<32x512xf32>
    %85 = vector.extract_strided_slice %44 {offsets = [0, 5], sizes = [32, 1], strides = [1, 1]} : vector<32x9xf32> to vector<32x1xf32>
    %c511_i32 = arith.constant 511 : i32
    %86 = tpu.dynamic_rotate %43 by %c511_i32 dim 1 : vector<32x512xf32>, i32 -> vector<32x512xf32>
    %87 = vector.broadcast %85 : vector<32x1xf32> to vector<32x512xf32>
    %88 = arith.mulf %86, %87 : vector<32x512xf32>
    %cst_24 = arith.constant 0.000000e+00 : f32
    %89 = vector.shape_cast %26 : vector<1x512xi1> to vector<1x512xi1>
    %90 = vector.broadcast %89 : vector<1x512xi1> to vector<32x512xi1>
    %91 = vector.broadcast %cst_24 : f32 to vector<32x512xf32>
    %92 = arith.select %90, %88, %91 : vector<32x512xi1>, vector<32x512xf32>
    %93 = arith.addf %84, %92 : vector<32x512xf32>
    %94 = vector.extract_strided_slice %44 {offsets = [0, 6], sizes = [32, 1], strides = [1, 1]} : vector<32x9xf32> to vector<32x1xf32>
    %c497_i32 = arith.constant 497 : i32
    %95 = tpu.dynamic_rotate %43 by %c497_i32 dim 1 : vector<32x512xf32>, i32 -> vector<32x512xf32>
    %96 = vector.broadcast %94 : vector<32x1xf32> to vector<32x512xf32>
    %97 = arith.mulf %95, %96 : vector<32x512xf32>
    %cst_25 = arith.constant 0.000000e+00 : f32
    %98 = vector.shape_cast %29 : vector<1x512xi1> to vector<1x512xi1>
    %99 = vector.broadcast %98 : vector<1x512xi1> to vector<32x512xi1>
    %100 = vector.broadcast %cst_25 : f32 to vector<32x512xf32>
    %101 = arith.select %99, %97, %100 : vector<32x512xi1>, vector<32x512xf32>
    %102 = arith.addf %93, %101 : vector<32x512xf32>
    %103 = vector.extract_strided_slice %44 {offsets = [0, 7], sizes = [32, 1], strides = [1, 1]} : vector<32x9xf32> to vector<32x1xf32>
    %c496_i32 = arith.constant 496 : i32
    %104 = tpu.dynamic_rotate %43 by %c496_i32 dim 1 : vector<32x512xf32>, i32 -> vector<32x512xf32>
    %105 = vector.broadcast %103 : vector<32x1xf32> to vector<32x512xf32>
    %106 = arith.mulf %104, %105 : vector<32x512xf32>
    %cst_26 = arith.constant 0.000000e+00 : f32
    %107 = vector.shape_cast %16 : vector<1x512xi1> to vector<1x512xi1>
    %108 = vector.broadcast %107 : vector<1x512xi1> to vector<32x512xi1>
    %109 = vector.broadcast %cst_26 : f32 to vector<32x512xf32>
    %110 = arith.select %108, %106, %109 : vector<32x512xi1>, vector<32x512xf32>
    %111 = arith.addf %102, %110 : vector<32x512xf32>
    %112 = vector.extract_strided_slice %44 {offsets = [0, 8], sizes = [32, 1], strides = [1, 1]} : vector<32x9xf32> to vector<32x1xf32>
    %c495_i32 = arith.constant 495 : i32
    %113 = tpu.dynamic_rotate %43 by %c495_i32 dim 1 : vector<32x512xf32>, i32 -> vector<32x512xf32>
    %114 = vector.broadcast %112 : vector<32x1xf32> to vector<32x512xf32>
    %115 = arith.mulf %113, %114 : vector<32x512xf32>
    %cst_27 = arith.constant 0.000000e+00 : f32
    %116 = vector.shape_cast %30 : vector<1x512xi1> to vector<1x512xi1>
    %117 = vector.broadcast %116 : vector<1x512xi1> to vector<32x512xi1>
    %118 = vector.broadcast %cst_27 : f32 to vector<32x512xf32>
    %119 = arith.select %117, %115, %118 : vector<32x512xi1>, vector<32x512xf32>
    %120 = arith.addf %111, %119 : vector<32x512xf32>
    %121 = vector.broadcast %45 : vector<32x1xf32> to vector<32x512xf32>
    %122 = arith.addf %120, %121 : vector<32x512xf32>
    %123 = math.tanh %122 : vector<32x512xf32>
    %c0_28 = arith.constant 0 : index
    %c0_29 = arith.constant 0 : index
    %124 = vector.load %arg6[%c0_28, %c0_29] : memref<32x32xbf16, #tpu.memory_space<vmem>>, vector<32x32xbf16>
    %125 = arith.truncf %123 : vector<32x512xf32> to vector<32x512xbf16>
    %cst_30 = arith.constant dense<0.000000e+00> : vector<32x512xf32>
    %126 = tpu.matmul %124, %125, %cst_30 {dimension_numbers = #tpu.dot_dimension_numbers<[1], [0], [0], [1], [0, 0, 1, 1], [], []>} : vector<32x32xbf16>, vector<32x512xbf16>, vector<32x512xf32> -> vector<32x512xf32>
    %cst_31 = arith.constant 0.000000e+00 : f32
    %127 = vector.broadcast %cst_31 : f32 to vector<32x512xf32>
    %128 = arith.cmpf ogt, %126, %127 : vector<32x512xf32>
    %cst_32 = arith.constant 0.00999999977 : f32
    %129 = vector.broadcast %cst_32 : f32 to vector<32x512xf32>
    %130 = arith.mulf %129, %126 : vector<32x512xf32>
    %131 = arith.select %128, %126, %130 : vector<32x512xi1>, vector<32x512xf32>
    %c0_33 = arith.constant 0 : index
    %c0_34 = arith.constant 0 : index
    %132 = vector.load %arg7[%c0_33, %c0_34] : memref<32x9xf32, #tpu.memory_space<vmem>>, vector<32x9xf32>
    %c0_35 = arith.constant 0 : index
    %c0_36 = arith.constant 0 : index
    %133 = vector.load %arg8[%c0_35, %c0_36] : memref<32x1xf32, #tpu.memory_space<vmem>>, vector<32x1xf32>
    %134 = vector.extract_strided_slice %132 {offsets = [0, 0], sizes = [32, 1], strides = [1, 1]} : vector<32x9xf32> to vector<32x1xf32>
    %c17_i32_37 = arith.constant 17 : i32
    %135 = tpu.dynamic_rotate %131 by %c17_i32_37 dim 1 : vector<32x512xf32>, i32 -> vector<32x512xf32>
    %136 = vector.broadcast %134 : vector<32x1xf32> to vector<32x512xf32>
    %137 = arith.mulf %135, %136 : vector<32x512xf32>
    %cst_38 = arith.constant 0.000000e+00 : f32
    %138 = vector.shape_cast %27 : vector<1x512xi1> to vector<1x512xi1>
    %139 = vector.broadcast %138 : vector<1x512xi1> to vector<32x512xi1>
    %140 = vector.broadcast %cst_38 : f32 to vector<32x512xf32>
    %141 = arith.select %139, %137, %140 : vector<32x512xi1>, vector<32x512xf32>
    %142 = vector.extract_strided_slice %132 {offsets = [0, 1], sizes = [32, 1], strides = [1, 1]} : vector<32x9xf32> to vector<32x1xf32>
    %c16_i32_39 = arith.constant 16 : i32
    %143 = tpu.dynamic_rotate %131 by %c16_i32_39 dim 1 : vector<32x512xf32>, i32 -> vector<32x512xf32>
    %144 = vector.broadcast %142 : vector<32x1xf32> to vector<32x512xf32>
    %145 = arith.mulf %143, %144 : vector<32x512xf32>
    %cst_40 = arith.constant 0.000000e+00 : f32
    %146 = vector.shape_cast %11 : vector<1x512xi1> to vector<1x512xi1>
    %147 = vector.broadcast %146 : vector<1x512xi1> to vector<32x512xi1>
    %148 = vector.broadcast %cst_40 : f32 to vector<32x512xf32>
    %149 = arith.select %147, %145, %148 : vector<32x512xi1>, vector<32x512xf32>
    %150 = arith.addf %141, %149 : vector<32x512xf32>
    %151 = vector.extract_strided_slice %132 {offsets = [0, 2], sizes = [32, 1], strides = [1, 1]} : vector<32x9xf32> to vector<32x1xf32>
    %c15_i32_41 = arith.constant 15 : i32
    %152 = tpu.dynamic_rotate %131 by %c15_i32_41 dim 1 : vector<32x512xf32>, i32 -> vector<32x512xf32>
    %153 = vector.broadcast %151 : vector<32x1xf32> to vector<32x512xf32>
    %154 = arith.mulf %152, %153 : vector<32x512xf32>
    %cst_42 = arith.constant 0.000000e+00 : f32
    %155 = vector.shape_cast %28 : vector<1x512xi1> to vector<1x512xi1>
    %156 = vector.broadcast %155 : vector<1x512xi1> to vector<32x512xi1>
    %157 = vector.broadcast %cst_42 : f32 to vector<32x512xf32>
    %158 = arith.select %156, %154, %157 : vector<32x512xi1>, vector<32x512xf32>
    %159 = arith.addf %150, %158 : vector<32x512xf32>
    %160 = vector.extract_strided_slice %132 {offsets = [0, 3], sizes = [32, 1], strides = [1, 1]} : vector<32x9xf32> to vector<32x1xf32>
    %c1_i32_43 = arith.constant 1 : i32
    %161 = tpu.dynamic_rotate %131 by %c1_i32_43 dim 1 : vector<32x512xf32>, i32 -> vector<32x512xf32>
    %162 = vector.broadcast %160 : vector<32x1xf32> to vector<32x512xf32>
    %163 = arith.mulf %161, %162 : vector<32x512xf32>
    %cst_44 = arith.constant 0.000000e+00 : f32
    %164 = vector.shape_cast %21 : vector<1x512xi1> to vector<1x512xi1>
    %165 = vector.broadcast %164 : vector<1x512xi1> to vector<32x512xi1>
    %166 = vector.broadcast %cst_44 : f32 to vector<32x512xf32>
    %167 = arith.select %165, %163, %166 : vector<32x512xi1>, vector<32x512xf32>
    %168 = arith.addf %159, %167 : vector<32x512xf32>
    %169 = vector.extract_strided_slice %132 {offsets = [0, 4], sizes = [32, 1], strides = [1, 1]} : vector<32x9xf32> to vector<32x1xf32>
    %170 = vector.broadcast %169 : vector<32x1xf32> to vector<32x512xf32>
    %171 = arith.mulf %131, %170 : vector<32x512xf32>
    %172 = arith.addf %168, %171 : vector<32x512xf32>
    %173 = vector.extract_strided_slice %132 {offsets = [0, 5], sizes = [32, 1], strides = [1, 1]} : vector<32x9xf32> to vector<32x1xf32>
    %c511_i32_45 = arith.constant 511 : i32
    %174 = tpu.dynamic_rotate %131 by %c511_i32_45 dim 1 : vector<32x512xf32>, i32 -> vector<32x512xf32>
    %175 = vector.broadcast %173 : vector<32x1xf32> to vector<32x512xf32>
    %176 = arith.mulf %174, %175 : vector<32x512xf32>
    %cst_46 = arith.constant 0.000000e+00 : f32
    %177 = vector.shape_cast %26 : vector<1x512xi1> to vector<1x512xi1>
    %178 = vector.broadcast %177 : vector<1x512xi1> to vector<32x512xi1>
    %179 = vector.broadcast %cst_46 : f32 to vector<32x512xf32>
    %180 = arith.select %178, %176, %179 : vector<32x512xi1>, vector<32x512xf32>
    %181 = arith.addf %172, %180 : vector<32x512xf32>
    %182 = vector.extract_strided_slice %132 {offsets = [0, 6], sizes = [32, 1], strides = [1, 1]} : vector<32x9xf32> to vector<32x1xf32>
    %c497_i32_47 = arith.constant 497 : i32
    %183 = tpu.dynamic_rotate %131 by %c497_i32_47 dim 1 : vector<32x512xf32>, i32 -> vector<32x512xf32>
    %184 = vector.broadcast %182 : vector<32x1xf32> to vector<32x512xf32>
    %185 = arith.mulf %183, %184 : vector<32x512xf32>
    %cst_48 = arith.constant 0.000000e+00 : f32
    %186 = vector.shape_cast %29 : vector<1x512xi1> to vector<1x512xi1>
    %187 = vector.broadcast %186 : vector<1x512xi1> to vector<32x512xi1>
    %188 = vector.broadcast %cst_48 : f32 to vector<32x512xf32>
    %189 = arith.select %187, %185, %188 : vector<32x512xi1>, vector<32x512xf32>
    %190 = arith.addf %181, %189 : vector<32x512xf32>
    %191 = vector.extract_strided_slice %132 {offsets = [0, 7], sizes = [32, 1], strides = [1, 1]} : vector<32x9xf32> to vector<32x1xf32>
    %c496_i32_49 = arith.constant 496 : i32
    %192 = tpu.dynamic_rotate %131 by %c496_i32_49 dim 1 : vector<32x512xf32>, i32 -> vector<32x512xf32>
    %193 = vector.broadcast %191 : vector<32x1xf32> to vector<32x512xf32>
    %194 = arith.mulf %192, %193 : vector<32x512xf32>
    %cst_50 = arith.constant 0.000000e+00 : f32
    %195 = vector.shape_cast %16 : vector<1x512xi1> to vector<1x512xi1>
    %196 = vector.broadcast %195 : vector<1x512xi1> to vector<32x512xi1>
    %197 = vector.broadcast %cst_50 : f32 to vector<32x512xf32>
    %198 = arith.select %196, %194, %197 : vector<32x512xi1>, vector<32x512xf32>
    %199 = arith.addf %190, %198 : vector<32x512xf32>
    %200 = vector.extract_strided_slice %132 {offsets = [0, 8], sizes = [32, 1], strides = [1, 1]} : vector<32x9xf32> to vector<32x1xf32>
    %c495_i32_51 = arith.constant 495 : i32
    %201 = tpu.dynamic_rotate %131 by %c495_i32_51 dim 1 : vector<32x512xf32>, i32 -> vector<32x512xf32>
    %202 = vector.broadcast %200 : vector<32x1xf32> to vector<32x512xf32>
    %203 = arith.mulf %201, %202 : vector<32x512xf32>
    %cst_52 = arith.constant 0.000000e+00 : f32
    %204 = vector.shape_cast %30 : vector<1x512xi1> to vector<1x512xi1>
    %205 = vector.broadcast %204 : vector<1x512xi1> to vector<32x512xi1>
    %206 = vector.broadcast %cst_52 : f32 to vector<32x512xf32>
    %207 = arith.select %205, %203, %206 : vector<32x512xi1>, vector<32x512xf32>
    %208 = arith.addf %199, %207 : vector<32x512xf32>
    %209 = vector.broadcast %133 : vector<32x1xf32> to vector<32x512xf32>
    %210 = arith.addf %208, %209 : vector<32x512xf32>
    %211 = math.tanh %210 : vector<32x512xf32>
    %cst_53 = arith.constant dense<0.000000e+00> : vector<512xf32>
    %212 = vector.multi_reduction <add>, %211, %cst_53 [0] : vector<32x512xf32> to vector<512xf32>
    %213 = vector.shape_cast %212 : vector<512xf32> to vector<1x512xf32>
    %cst_54 = arith.constant 3.200000e+01 : f32
    %214 = vector.broadcast %cst_54 : f32 to vector<1x512xf32>
    %215 = arith.divf %213, %214 : vector<1x512xf32>
    %cst_55 = arith.constant dense<0xFF800000> : vector<512xf32>
    %216 = vector.multi_reduction <maximumf>, %211, %cst_55 [0] : vector<32x512xf32> to vector<512xf32>
    %217 = vector.shape_cast %216 : vector<512xf32> to vector<1x512xf32>
    %218 = tpu.concatenate %215, %217 in 0 : vector<1x512xf32>, vector<1x512xf32> -> vector<2x512xf32>
    %c3_i32 = arith.constant 3 : i32
    %219 = vector.broadcast %c3_i32 : i32 to vector<1x512xi32>
    %220 = arith.cmpi sge, %4, %219 : vector<1x512xi32>
    %c19_i32 = arith.constant 19 : i32
    %221 = vector.broadcast %c19_i32 : i32 to vector<1x512xi32>
    %222 = arith.cmpi slt, %4, %221 : vector<1x512xi32>
    %223 = arith.andi %220, %222 : vector<1x512xi1>
    %c2_i32 = arith.constant 2 : i32
    %224 = vector.broadcast %c2_i32 : i32 to vector<1x512xi32>
    %225 = arith.cmpi sge, %4, %224 : vector<1x512xi32>
    %c18_i32 = arith.constant 18 : i32
    %226 = vector.broadcast %c18_i32 : i32 to vector<1x512xi32>
    %227 = arith.cmpi slt, %4, %226 : vector<1x512xi32>
    %228 = arith.andi %225, %227 : vector<1x512xi1>
    %c1_i32_56 = arith.constant 1 : i32
    %229 = vector.broadcast %c1_i32_56 : i32 to vector<1x512xi32>
    %230 = arith.cmpi sge, %4, %229 : vector<1x512xi32>
    %c17_i32_57 = arith.constant 17 : i32
    %231 = vector.broadcast %c17_i32_57 : i32 to vector<1x512xi32>
    %232 = arith.cmpi slt, %4, %231 : vector<1x512xi32>
    %233 = arith.andi %230, %232 : vector<1x512xi1>
    %c-1_i32_58 = arith.constant -1 : i32
    %234 = vector.broadcast %c-1_i32_58 : i32 to vector<1x512xi32>
    %235 = arith.cmpi sge, %4, %234 : vector<1x512xi32>
    %c15_i32_59 = arith.constant 15 : i32
    %236 = vector.broadcast %c15_i32_59 : i32 to vector<1x512xi32>
    %237 = arith.cmpi slt, %4, %236 : vector<1x512xi32>
    %238 = arith.andi %235, %237 : vector<1x512xi1>
    %c-2_i32 = arith.constant -2 : i32
    %239 = vector.broadcast %c-2_i32 : i32 to vector<1x512xi32>
    %240 = arith.cmpi sge, %4, %239 : vector<1x512xi32>
    %c14_i32 = arith.constant 14 : i32
    %241 = vector.broadcast %c14_i32 : i32 to vector<1x512xi32>
    %242 = arith.cmpi slt, %4, %241 : vector<1x512xi32>
    %243 = arith.andi %240, %242 : vector<1x512xi1>
    %c-3_i32 = arith.constant -3 : i32
    %244 = vector.broadcast %c-3_i32 : i32 to vector<1x512xi32>
    %245 = arith.cmpi sge, %4, %244 : vector<1x512xi32>
    %c13_i32 = arith.constant 13 : i32
    %246 = vector.broadcast %c13_i32 : i32 to vector<1x512xi32>
    %247 = arith.cmpi slt, %4, %246 : vector<1x512xi32>
    %248 = arith.andi %245, %247 : vector<1x512xi1>
    %c3_i32_60 = arith.constant 3 : i32
    %249 = vector.broadcast %c3_i32_60 : i32 to vector<1x512xi32>
    %250 = arith.cmpi sge, %6, %249 : vector<1x512xi32>
    %c19_i32_61 = arith.constant 19 : i32
    %251 = vector.broadcast %c19_i32_61 : i32 to vector<1x512xi32>
    %252 = arith.cmpi slt, %6, %251 : vector<1x512xi32>
    %253 = arith.andi %250, %252 : vector<1x512xi1>
    %c2_i32_62 = arith.constant 2 : i32
    %254 = vector.broadcast %c2_i32_62 : i32 to vector<1x512xi32>
    %255 = arith.cmpi sge, %6, %254 : vector<1x512xi32>
    %c18_i32_63 = arith.constant 18 : i32
    %256 = vector.broadcast %c18_i32_63 : i32 to vector<1x512xi32>
    %257 = arith.cmpi slt, %6, %256 : vector<1x512xi32>
    %258 = arith.andi %255, %257 : vector<1x512xi1>
    %c1_i32_64 = arith.constant 1 : i32
    %259 = vector.broadcast %c1_i32_64 : i32 to vector<1x512xi32>
    %260 = arith.cmpi sge, %6, %259 : vector<1x512xi32>
    %c17_i32_65 = arith.constant 17 : i32
    %261 = vector.broadcast %c17_i32_65 : i32 to vector<1x512xi32>
    %262 = arith.cmpi slt, %6, %261 : vector<1x512xi32>
    %263 = arith.andi %260, %262 : vector<1x512xi1>
    %c-1_i32_66 = arith.constant -1 : i32
    %264 = vector.broadcast %c-1_i32_66 : i32 to vector<1x512xi32>
    %265 = arith.cmpi sge, %6, %264 : vector<1x512xi32>
    %c15_i32_67 = arith.constant 15 : i32
    %266 = vector.broadcast %c15_i32_67 : i32 to vector<1x512xi32>
    %267 = arith.cmpi slt, %6, %266 : vector<1x512xi32>
    %268 = arith.andi %265, %267 : vector<1x512xi1>
    %c-2_i32_68 = arith.constant -2 : i32
    %269 = vector.broadcast %c-2_i32_68 : i32 to vector<1x512xi32>
    %270 = arith.cmpi sge, %6, %269 : vector<1x512xi32>
    %c14_i32_69 = arith.constant 14 : i32
    %271 = vector.broadcast %c14_i32_69 : i32 to vector<1x512xi32>
    %272 = arith.cmpi slt, %6, %271 : vector<1x512xi32>
    %273 = arith.andi %270, %272 : vector<1x512xi1>
    %c-3_i32_70 = arith.constant -3 : i32
    %274 = vector.broadcast %c-3_i32_70 : i32 to vector<1x512xi32>
    %275 = arith.cmpi sge, %6, %274 : vector<1x512xi32>
    %c13_i32_71 = arith.constant 13 : i32
    %276 = vector.broadcast %c13_i32_71 : i32 to vector<1x512xi32>
    %277 = arith.cmpi slt, %6, %276 : vector<1x512xi32>
    %278 = arith.andi %275, %277 : vector<1x512xi1>
    %c48_i32 = arith.constant 48 : i32
    %279 = tpu.dynamic_rotate %218 by %c48_i32 dim 1 : vector<2x512xf32>, i32 -> vector<2x512xf32>
    %cst_72 = arith.constant 0.000000e+00 : f32
    %280 = vector.shape_cast %223 : vector<1x512xi1> to vector<1x512xi1>
    %281 = vector.broadcast %280 : vector<1x512xi1> to vector<2x512xi1>
    %282 = vector.broadcast %cst_72 : f32 to vector<2x512xf32>
    %283 = arith.select %281, %279, %282 : vector<2x512xi1>, vector<2x512xf32>
    %c32_i32 = arith.constant 32 : i32
    %284 = tpu.dynamic_rotate %218 by %c32_i32 dim 1 : vector<2x512xf32>, i32 -> vector<2x512xf32>
    %cst_73 = arith.constant 0.000000e+00 : f32
    %285 = vector.shape_cast %228 : vector<1x512xi1> to vector<1x512xi1>
    %286 = vector.broadcast %285 : vector<1x512xi1> to vector<2x512xi1>
    %287 = vector.broadcast %cst_73 : f32 to vector<2x512xf32>
    %288 = arith.select %286, %284, %287 : vector<2x512xi1>, vector<2x512xf32>
    %c16_i32_74 = arith.constant 16 : i32
    %289 = tpu.dynamic_rotate %218 by %c16_i32_74 dim 1 : vector<2x512xf32>, i32 -> vector<2x512xf32>
    %cst_75 = arith.constant 0.000000e+00 : f32
    %290 = vector.shape_cast %233 : vector<1x512xi1> to vector<1x512xi1>
    %291 = vector.broadcast %290 : vector<1x512xi1> to vector<2x512xi1>
    %292 = vector.broadcast %cst_75 : f32 to vector<2x512xf32>
    %293 = arith.select %291, %289, %292 : vector<2x512xi1>, vector<2x512xf32>
    %c496_i32_76 = arith.constant 496 : i32
    %294 = tpu.dynamic_rotate %218 by %c496_i32_76 dim 1 : vector<2x512xf32>, i32 -> vector<2x512xf32>
    %cst_77 = arith.constant 0.000000e+00 : f32
    %295 = vector.shape_cast %238 : vector<1x512xi1> to vector<1x512xi1>
    %296 = vector.broadcast %295 : vector<1x512xi1> to vector<2x512xi1>
    %297 = vector.broadcast %cst_77 : f32 to vector<2x512xf32>
    %298 = arith.select %296, %294, %297 : vector<2x512xi1>, vector<2x512xf32>
    %c480_i32 = arith.constant 480 : i32
    %299 = tpu.dynamic_rotate %218 by %c480_i32 dim 1 : vector<2x512xf32>, i32 -> vector<2x512xf32>
    %cst_78 = arith.constant 0.000000e+00 : f32
    %300 = vector.shape_cast %243 : vector<1x512xi1> to vector<1x512xi1>
    %301 = vector.broadcast %300 : vector<1x512xi1> to vector<2x512xi1>
    %302 = vector.broadcast %cst_78 : f32 to vector<2x512xf32>
    %303 = arith.select %301, %299, %302 : vector<2x512xi1>, vector<2x512xf32>
    %c464_i32 = arith.constant 464 : i32
    %304 = tpu.dynamic_rotate %218 by %c464_i32 dim 1 : vector<2x512xf32>, i32 -> vector<2x512xf32>
    %cst_79 = arith.constant 0.000000e+00 : f32
    %305 = vector.shape_cast %248 : vector<1x512xi1> to vector<1x512xi1>
    %306 = vector.broadcast %305 : vector<1x512xi1> to vector<2x512xi1>
    %307 = vector.broadcast %cst_79 : f32 to vector<2x512xf32>
    %308 = arith.select %306, %304, %307 : vector<2x512xi1>, vector<2x512xf32>
    %309 = tpu.concatenate %283, %288, %293, %218, %298, %303, %308 in 0 : vector<2x512xf32>, vector<2x512xf32>, vector<2x512xf32>, vector<2x512xf32>, vector<2x512xf32>, vector<2x512xf32>, vector<2x512xf32> -> vector<14x512xf32>
    %c3_i32_80 = arith.constant 3 : i32
    %310 = tpu.dynamic_rotate %309 by %c3_i32_80 dim 1 : vector<14x512xf32>, i32 -> vector<14x512xf32>
    %c0_81 = arith.constant 0 : index
    %c0_82 = arith.constant 0 : index
    %311 = vector.load %arg9[%c0_81, %c0_82] : memref<14x7xf32, #tpu.memory_space<vmem>>, vector<14x1xf32>
    %312 = vector.broadcast %311 : vector<14x1xf32> to vector<14x512xf32>
    %313 = arith.mulf %310, %312 : vector<14x512xf32>
    %cst_83 = arith.constant 0.000000e+00 : f32
    %314 = vector.shape_cast %253 : vector<1x512xi1> to vector<1x512xi1>
    %315 = vector.broadcast %314 : vector<1x512xi1> to vector<14x512xi1>
    %316 = vector.broadcast %cst_83 : f32 to vector<14x512xf32>
    %317 = arith.select %315, %313, %316 : vector<14x512xi1>, vector<14x512xf32>
    %c2_i32_84 = arith.constant 2 : i32
    %318 = tpu.dynamic_rotate %309 by %c2_i32_84 dim 1 : vector<14x512xf32>, i32 -> vector<14x512xf32>
    %c0_85 = arith.constant 0 : index
    %c1 = arith.constant 1 : index
    %319 = vector.load %arg9[%c0_85, %c1] : memref<14x7xf32, #tpu.memory_space<vmem>>, vector<14x1xf32>
    %320 = vector.broadcast %319 : vector<14x1xf32> to vector<14x512xf32>
    %321 = arith.mulf %318, %320 : vector<14x512xf32>
    %cst_86 = arith.constant 0.000000e+00 : f32
    %322 = vector.shape_cast %258 : vector<1x512xi1> to vector<1x512xi1>
    %323 = vector.broadcast %322 : vector<1x512xi1> to vector<14x512xi1>
    %324 = vector.broadcast %cst_86 : f32 to vector<14x512xf32>
    %325 = arith.select %323, %321, %324 : vector<14x512xi1>, vector<14x512xf32>
    %326 = arith.addf %317, %325 : vector<14x512xf32>
    %c1_i32_87 = arith.constant 1 : i32
    %327 = tpu.dynamic_rotate %309 by %c1_i32_87 dim 1 : vector<14x512xf32>, i32 -> vector<14x512xf32>
    %c0_88 = arith.constant 0 : index
    %c2 = arith.constant 2 : index
    %328 = vector.load %arg9[%c0_88, %c2] : memref<14x7xf32, #tpu.memory_space<vmem>>, vector<14x1xf32>
    %329 = vector.broadcast %328 : vector<14x1xf32> to vector<14x512xf32>
    %330 = arith.mulf %327, %329 : vector<14x512xf32>
    %cst_89 = arith.constant 0.000000e+00 : f32
    %331 = vector.shape_cast %263 : vector<1x512xi1> to vector<1x512xi1>
    %332 = vector.broadcast %331 : vector<1x512xi1> to vector<14x512xi1>
    %333 = vector.broadcast %cst_89 : f32 to vector<14x512xf32>
    %334 = arith.select %332, %330, %333 : vector<14x512xi1>, vector<14x512xf32>
    %335 = arith.addf %326, %334 : vector<14x512xf32>
    %c0_90 = arith.constant 0 : index
    %c3 = arith.constant 3 : index
    %336 = vector.load %arg9[%c0_90, %c3] : memref<14x7xf32, #tpu.memory_space<vmem>>, vector<14x1xf32>
    %337 = vector.broadcast %336 : vector<14x1xf32> to vector<14x512xf32>
    %338 = arith.mulf %309, %337 : vector<14x512xf32>
    %339 = arith.addf %335, %338 : vector<14x512xf32>
    %c511_i32_91 = arith.constant 511 : i32
    %340 = tpu.dynamic_rotate %309 by %c511_i32_91 dim 1 : vector<14x512xf32>, i32 -> vector<14x512xf32>
    %c0_92 = arith.constant 0 : index
    %c4 = arith.constant 4 : index
    %341 = vector.load %arg9[%c0_92, %c4] : memref<14x7xf32, #tpu.memory_space<vmem>>, vector<14x1xf32>
    %342 = vector.broadcast %341 : vector<14x1xf32> to vector<14x512xf32>
    %343 = arith.mulf %340, %342 : vector<14x512xf32>
    %cst_93 = arith.constant 0.000000e+00 : f32
    %344 = vector.shape_cast %268 : vector<1x512xi1> to vector<1x512xi1>
    %345 = vector.broadcast %344 : vector<1x512xi1> to vector<14x512xi1>
    %346 = vector.broadcast %cst_93 : f32 to vector<14x512xf32>
    %347 = arith.select %345, %343, %346 : vector<14x512xi1>, vector<14x512xf32>
    %348 = arith.addf %339, %347 : vector<14x512xf32>
    %c510_i32 = arith.constant 510 : i32
    %349 = tpu.dynamic_rotate %309 by %c510_i32 dim 1 : vector<14x512xf32>, i32 -> vector<14x512xf32>
    %c0_94 = arith.constant 0 : index
    %c5 = arith.constant 5 : index
    %350 = vector.load %arg9[%c0_94, %c5] : memref<14x7xf32, #tpu.memory_space<vmem>>, vector<14x1xf32>
    %351 = vector.broadcast %350 : vector<14x1xf32> to vector<14x512xf32>
    %352 = arith.mulf %349, %351 : vector<14x512xf32>
    %cst_95 = arith.constant 0.000000e+00 : f32
    %353 = vector.shape_cast %273 : vector<1x512xi1> to vector<1x512xi1>
    %354 = vector.broadcast %353 : vector<1x512xi1> to vector<14x512xi1>
    %355 = vector.broadcast %cst_95 : f32 to vector<14x512xf32>
    %356 = arith.select %354, %352, %355 : vector<14x512xi1>, vector<14x512xf32>
    %357 = arith.addf %348, %356 : vector<14x512xf32>
    %c509_i32 = arith.constant 509 : i32
    %358 = tpu.dynamic_rotate %309 by %c509_i32 dim 1 : vector<14x512xf32>, i32 -> vector<14x512xf32>
    %c0_96 = arith.constant 0 : index
    %c6 = arith.constant 6 : index
    %359 = vector.load %arg9[%c0_96, %c6] : memref<14x7xf32, #tpu.memory_space<vmem>>, vector<14x1xf32>
    %360 = vector.broadcast %359 : vector<14x1xf32> to vector<14x512xf32>
    %361 = arith.mulf %358, %360 : vector<14x512xf32>
    %cst_97 = arith.constant 0.000000e+00 : f32
    %362 = vector.shape_cast %278 : vector<1x512xi1> to vector<1x512xi1>
    %363 = vector.broadcast %362 : vector<1x512xi1> to vector<14x512xi1>
    %364 = vector.broadcast %cst_97 : f32 to vector<14x512xf32>
    %365 = arith.select %363, %361, %364 : vector<14x512xi1>, vector<14x512xf32>
    %366 = arith.addf %357, %365 : vector<14x512xf32>
    %cst_98 = arith.constant dense<0.000000e+00> : vector<512xf32>
    %367 = vector.multi_reduction <add>, %366, %cst_98 [0] : vector<14x512xf32> to vector<512xf32>
    %368 = vector.shape_cast %367 : vector<512xf32> to vector<1x512xf32>
    %cst_99 = arith.constant 0.000000e+00 : f32
    %369 = vector.broadcast %cst_99 : f32 to vector<1x512xf32>
    %370 = arith.cmpf ogt, %368, %369 : vector<1x512xf32>
    %cst_100 = arith.constant 0.00999999977 : f32
    %371 = vector.broadcast %cst_100 : f32 to vector<1x512xf32>
    %372 = arith.mulf %371, %368 : vector<1x512xf32>
    %373 = arith.select %370, %368, %372 : vector<1x512xi1>, vector<1x512xf32>
    %374 = vector.broadcast %373 : vector<1x512xf32> to vector<32x512xf32>
    %375 = arith.mulf %374, %211 : vector<32x512xf32>
    %c0_101 = arith.constant 0 : index
    %c0_102 = arith.constant 0 : index
    %c0_103 = arith.constant 0 : index
    %376 = vector.load %arg10[%c0_101, %c0_102, %c0_103] : memref<1x32x512xf32, #tpu.memory_space<vmem>>, vector<1x32x512xf32>
    %377 = vector.shape_cast %376 : vector<1x32x512xf32> to vector<32x512xf32>
    %378 = vector.shape_cast %375 : vector<32x512xf32> to vector<1x32x512xf32>
    tpu.vector_store %arg10[%c0_101, %c0_102, %c0_103], %378 {strides = array<i32>} : memref<1x32x512xf32, #tpu.memory_space<vmem>>, vector<1x32x512xf32>,
    return
  }
  func.func @transform_0(%arg0: i32) -> (i32, i32, i32) {
    %c0_i32 = arith.constant 0 : i32
    %c0_i32_0 = arith.constant 0 : i32
    %c0_i32_1 = arith.constant 0 : i32
    return %arg0, %c0_i32, %c0_i32_0 : i32, i32, i32
  }
  func.func @transform_1(%arg0: i32) -> (i32, i32) {
    %c0_i32 = arith.constant 0 : i32
    %c0_i32_0 = arith.constant 0 : i32
    %c0_i32_1 = arith.constant 0 : i32
    return %c0_i32, %c0_i32_0 : i32, i32
  }
  func.func @transform_2(%arg0: i32) -> (i32, i32) {
    %c0_i32 = arith.constant 0 : i32
    %c0_i32_0 = arith.constant 0 : i32
    %c0_i32_1 = arith.constant 0 : i32
    return %c0_i32, %c0_i32_0 : i32, i32
  }
  func.func @transform_3(%arg0: i32) -> (i32, i32) {
    %c0_i32 = arith.constant 0 : i32
    %c0_i32_0 = arith.constant 0 : i32
    %c0_i32_1 = arith.constant 0 : i32
    return %c0_i32, %c0_i32_0 : i32, i32
  }
  func.func @transform_4(%arg0: i32) -> (i32, i32) {
    %c0_i32 = arith.constant 0 : i32
    %c0_i32_0 = arith.constant 0 : i32
    %c0_i32_1 = arith.constant 0 : i32
    return %c0_i32, %c0_i32_0 : i32, i32
  }
  func.func @transform_5(%arg0: i32) -> (i32, i32) {
    %c0_i32 = arith.constant 0 : i32
    %c0_i32_0 = arith.constant 0 : i32
    %c0_i32_1 = arith.constant 0 : i32
    return %c0_i32, %c0_i32_0 : i32, i32
  }
  func.func @transform_6(%arg0: i32) -> (i32, i32) {
    %c0_i32 = arith.constant 0 : i32
    %c0_i32_0 = arith.constant 0 : i32
    %c0_i32_1 = arith.constant 0 : i32
    return %c0_i32, %c0_i32_0 : i32, i32
  }
  func.func @transform_7(%arg0: i32) -> (i32, i32) {
    %c0_i32 = arith.constant 0 : i32
    %c0_i32_0 = arith.constant 0 : i32
    %c0_i32_1 = arith.constant 0 : i32
    return %c0_i32, %c0_i32_0 : i32, i32
  }
  func.func @transform_8(%arg0: i32) -> (i32, i32) {
    %c0_i32 = arith.constant 0 : i32
    %c0_i32_0 = arith.constant 0 : i32
    %c0_i32_1 = arith.constant 0 : i32
    return %c0_i32, %c0_i32_0 : i32, i32
  }
  func.func @transform_9(%arg0: i32) -> (i32, i32, i32) {
    %c0_i32 = arith.constant 0 : i32
    %c0_i32_0 = arith.constant 0 : i32
    %c0_i32_1 = arith.constant 0 : i32
    return %arg0, %c0_i32, %c0_i32_0 : i32, i32, i32
  }
}

</mosaic_0001>

<bundles_post_ra>
// kernel: decoder_forward.2
= control target key start
LH: loop header
LB: loop body
LE: loop exit
PB: predicated region body
PF: predicated region fallthrough
CT: control target
= control target key end

     0   :  { %s1465_s21 = smov 0   ;;  %s2002_s0 = inlined_call_operand.vmem [shape: bf16[2,64,640], index: 0, kind: input, shape index: {}]   ;;  %s2003_s1 = inlined_call_operand.vmem [shape: f32[2,32,512], index: 1, kind: input, shape index: {}]   ;;  %s2004_s2 = inlined_call_operand.vmem [shape: bf16[32,256], index: 2, kind: input, shape index: {}]   ;;  %s2005_s3 = inlined_call_operand.vmem [shape: f32[32,1], index: 3, kind: input, shape index: {}]   ;;  %s2006_s4 = inlined_call_operand.vmem [shape: f32[32,2], index: 4, kind: input, shape index: {}]   ;;  %s2007_s5 = inlined_call_operand.vmem [shape: f32[32,2], index: 5, kind: input, shape index: {}]   ;;  %s2008_s6 = inlined_call_operand.vmem [shape: f32[2,64,512], index: 6, kind: output, shape index: {}]  }
   0x1 LB: > { %s1275_s22 = sadd.s32 4294967295, %s1424_s21   ;;  %p1279_p0 = scmp.ge.s32.totalorder %s1424_s21, 1  ;;  %s1424_s21 = sphi %s1465_s21, %s16_s21  }
   0x2   : > { %p222_p1 = scmp.lt.s32.totalorder %s1424_s21, 3 }
   0x4   : > { %p223_p2 = pnand %p1279_p0, %p222_p1 }
   0x5   : > { %p257_p3 = scmp.lt.s32.totalorder (!%p223_p2), %s1275_s22, 1  ;;  %s1426_s27 = smov (!%p223_p2), 1   ;;  %vm516_vm0 = vcmask (!%p223_p2), 7168   ;;  %vm589_vm1 = vcmask (!%p223_p2), 130048   ;;  %vm662_vm2 = vcmask (!%p223_p2), 138240   ;;  %vm975_vm3 = vcmask (!%p223_p2), 15360  }
   0x6   : > { %226 = sbr.rel (%p223_p2) target bundleno = 544 (0x220), region = 44  ;;  %s1427_s28 = smov (!%p223_p2), 16  }
   0x7   : > { %s1428_s29 = smov (!%p223_p2), 17  }
   0xd   : > { %s2024_s22 = smov (!%p257_p3, %s1275_s22), 1 }
   0xe   : > { %s1329_s23 = smul.u32 160, %s2024_s22  ;;  %s1327_s30 = sshll.u32 %s2024_s22, 7 }
   0xf   : > { %s1620_s9 = scalar_lea.vmem %s2003_s1, %s1327_s30  ;;  %s1328_s20 = sshll.u32 %s2024_s22, 8 }
  0x10   : > { %s1479_s26 = scalar_lea.vmem %s2002_s0, %s1329_s23  ;;  %v1625_v61 = vld [vmem:[%s1620_s9] sm:$0xff]  ;;  %v1628_v62 = vld [vmem:[%s1620_s9 + $0x8] sm:$0xff]  ;;  %s1857_s25 = scalar_lea.vmem %s2008_s6, %s1328_s20 }
  0x11   : > { %v1482_v0 = vld [vmem:[%s1479_s26 + $0xc] ss:$20 sps:$4 sm:$0xff]   ;;  %v1485_v1 = vld [vmem:[%s1479_s26 + $0x4] ss:$20 sps:$4 sm:$0xff]   ;;  %v1495_v3 = vld [vmem:[%s1479_s26 + $0x8] ss:$20 sps:$4 sm:$0xff]  }
  0x12   : > { %482 = vrot.lane.b32.xlu1 %v1482_v0, %s1426_s27  ;;  %v1490_v2 = vld [vmem:[%s1479_s26 + $0x10] ss:$20 sps:$4 sm:$0xff]   ;;  %478 = vrot.lane.b32.xlu0 %v1485_v1, %s1426_s27  ;;  %v1500_v4 = vld [vmem:[%s1479_s26 + $0x2c] ss:$20 sps:$4 sm:$0xff]  }
  0x13   : > { %v1505_v5 = vld [vmem:[%s1479_s26] ss:$20 sps:$4 sm:$0xff]   ;;  %v1515_v7 = vld [vmem:[%s1479_s26 + $0x30] ss:$20 sps:$4 sm:$0xff]   ;;  %v1518_v8 = vld [vmem:[%s1479_s26 + $0x28] ss:$20 sps:$4 sm:$0xff]  }
  0x14   : > { %v1510_v6 = vld [vmem:[%s1479_s26 + $0x34] ss:$20 sps:$4 sm:$0xff]   ;;  %v1523_v9 = vld [vmem:[%s1479_s26 + $0x38] ss:$20 sps:$4 sm:$0xff]   ;;  %v1372_v10 = vld [vmem:[%s1479_s26 + $0x10] ss:$20 sps:$4 sm:$0xff]  }
  0x15   : > { %v1374_v11 = vld [vmem:[%s1479_s26 + $0xc] ss:$20 sps:$4 sm:$0xff]   ;;  %v1375_v13 = vld [vmem:[%s1479_s26 + $0x8] ss:$20 sps:$4 sm:$0xff]   ;;  %865 = vmatprep.subr.bf16.mxu1 %v1372_v10  ;;  %v1377_v15 = vld [vmem:[%s1479_s26 + $0x4] ss:$20 sps:$4 sm:$0xff]  }
  0x16   : > { %484 = vrot.lane.b32.xlu1 %v1490_v2, %s1426_s27  ;;  %480 = vrot.lane.b32.xlu0 %v1495_v3, %s1426_s27  ;;  %v1530_v12 = vld [vmem:[%s1479_s26 + $0x58] ss:$20 sps:$4 sm:$0xff]   ;;  %v1534_v14 = vld [vmem:[%s1479_s26 + $0x54] ss:$20 sps:$4 sm:$0xff]  }
  0x17   : > { %866 = vmatpush1.bf16.msra.mxu1 %v1374_v11  ;;  %v1378_v16 = vld [vmem:[%s1479_s26 + $0x38] ss:$20 sps:$4 sm:$0xff]   ;;  %v1380_v17 = vld [vmem:[%s1479_s26 + $0x34] ss:$20 sps:$4 sm:$0xff]   ;;  %812 = vmatprep.subr.bf16.mxu0 %v1375_v13  ;;  %v1381_v18 = vld [vmem:[%s1479_s26 + $0x30] ss:$20 sps:$4 sm:$0xff]  }
  0x18   : > { %v1383_v19 = vld [vmem:[%s1479_s26 + $0x2c] ss:$20 sps:$4 sm:$0xff]   ;;  %813 = vmatpush1.bf16.msra.mxu0 %v1377_v15  ;;  %867 = vmatprep.subr.bf16.mxu1 %v1378_v16  ;;  %v1386_v22 = vld [vmem:[%s1479_s26 + $0x5c] ss:$20 sps:$4 sm:$0xff]   ;;  %v1389_v26 = vld [vmem:[%s1479_s26 + $0x54] ss:$20 sps:$4 sm:$0xff]  }
  0x19   : > { %v1384_v20 = vld [vmem:[%s1479_s26 + $0x60] ss:$20 sps:$4 sm:$0xff]   ;;  %814 = vmatprep.subr.bf16.mxu0 %v1381_v18  ;;  %v1387_v23 = vld [vmem:[%s1479_s26 + $0x58] ss:$20 sps:$4 sm:$0xff]   ;;  %v1556_v24 = vld [vmem:[%s1479_s26 + $0x5c] ss:$20 sps:$4 sm:$0xff]  }
  0x1a   : > { %488 = vrot.lane.b32.xlu1 %v1500_v4, %s1426_s27  ;;  %476 = vrot.lane.b32.xlu0 %v1505_v5, %s1426_s27  ;;  %v1547_v21 = vld [vmem:[%s1479_s26 + $0x60] ss:$20 sps:$4 sm:$0xff]   ;;  %v1390_v25 = vld [vmem:[%s1479_s26 + $0x88] ss:$20 sps:$4 sm:$0xff]  }
  0x1b   : > { %868 = vmatpush1.bf16.msra.mxu1 %v1380_v17  ;;  %v1393_v27 = vld [vmem:[%s1479_s26 + $0x80] ss:$20 sps:$4 sm:$0xff]   ;;  %v1364_v28 = vld [vmem:[%s1479_s26 + $0x7c] ss:$20 sps:$4 sm:$0xff]   ;;  %v1392_v29 = vld [vmem:[%s1479_s26 + $0x84] ss:$20 sps:$4 sm:$0xff]  }
  0x1c   : > { %869 = vmatprep.subr.bf16.mxu1 %v1384_v20  ;;  %815 = vmatpush1.bf16.msra.mxu0 %v1383_v19  ;;  %v1366_v30 = vld [vmem:[%s1479_s26 + $0x50] ss:$20 sps:$4 sm:$0xff]   ;;  %v1369_v33 = vld [vmem:[%s1479_s26 + $0x80] ss:$20 sps:$4 sm:$0xff]   ;;  %v1370_v34 = vld [vmem:[%s1479_s26 + $0x78] ss:$20 sps:$4 sm:$0xff]  }
  0x1d   : > { %816 = vmatprep.subr.bf16.mxu0 %v1387_v23  ;;  %v1395_v31 = vld [vmem:[%s1479_s26 + $0x7c] ss:$20 sps:$4 sm:$0xff]   ;;  %v1367_v32 = vld [vmem:[%s1479_s26 + $0x84] ss:$20 sps:$4 sm:$0xff]   ;;  %v1660_v15 = vld [vmem:[%s1620_s9 + $0x48] sm:$0xff] }
  0x1e   : > { %492 = vrot.lane.b32.xlu1 %v1510_v6, %s1426_s27  ;;  %490 = vrot.lane.b32.xlu0 %v1515_v7, %s1426_s27  ;;  %v1371_v35 = vld [vmem:[%s1479_s26 + $0x88] ss:$20 sps:$4 sm:$0xff]  }
  0x1f   : > { %870 = vmatpush1.bf16.msra.mxu1 %v1386_v22  ;;  %v1654_v13 = vld [vmem:[%s1620_s9 + $0x38] sm:$0xff] }
  0x20   : > { %871 = vmatprep.subr.bf16.mxu1 %v1390_v25  ;;  %817 = vmatpush1.bf16.msra.mxu0 %v1389_v26  ;;  %v959_v26 = vmax.f32 %v1625_v61, %v1628_v62 }
  0x21   : > { %818 = vmatprep.subr.bf16.mxu0 %v1393_v27 }
  0x22   : > { %486 = vrot.lane.b32.xlu1 %v1518_v8, %s1426_s27  ;;  %494 = vrot.lane.b32.xlu0 %v1523_v9, %s1426_s27 }
  0x23   : > { %872 = vmatpush1.bf16.msra.mxu1 %v1392_v29  ;;  %v1678_v29 = vld [vmem:[%s1620_s9 + $0x58] sm:$0xff] }
  0x24   : > { %819 = vmatpush1.bf16.msra.mxu0 %v1395_v31 }
  0x26   : > { %500 = vrot.lane.b32.xlu1 %v1530_v12, %s1426_s27  ;;  %498 = vrot.lane.b32.xlu0 %v1534_v14, %s1426_s27 }
  0x2a   : > { %504 = vrot.lane.b32.xlu1 %v1547_v21, %s1426_s27  ;;  %502 = vrot.lane.b32.xlu0 %v1556_v24, %s1426_s27 }
  0x2e   : > { %508 = vrot.lane.b32.xlu1 %v1364_v28, %s1426_s27  ;;  %496 = vrot.lane.b32.xlu0 %v1366_v30, %s1426_s27 }
  0x32   : > { %512 = vrot.lane.b32.xlu1 %v1367_v32, %s1426_s27  ;;  %510 = vrot.lane.b32.xlu0 %v1369_v33, %s1426_s27 }
  0x36   : > { %506 = vrot.lane.b32.xlu1 %v1370_v34, %s1426_s27  ;;  %514 = vrot.lane.b32.xlu0 %v1371_v35, %s1426_s27 }
  0x3a   : > { %553 = vrot.lane.b32.xlu1 %v1495_v3, %s1427_s28  ;;  %551 = vrot.lane.b32.xlu0 %v1485_v1, %s1427_s28 }
  0x3e   : > { %557 = vrot.lane.b32.xlu1 %v1490_v2, %s1427_s28  ;;  %555 = vrot.lane.b32.xlu0 %v1482_v0, %s1427_s28 }
  0x42   : > { %561 = vrot.lane.b32.xlu1 %v1500_v4, %s1427_s28  ;;  %549 = vrot.lane.b32.xlu0 %v1505_v5, %s1427_s28 }
  0x46   : > { %565 = vrot.lane.b32.xlu1 %v1510_v6, %s1427_s28  ;;  %563 = vrot.lane.b32.xlu0 %v1515_v7, %s1427_s28 }
  0x4a   : > { %559 = vrot.lane.b32.xlu1 %v1518_v8, %s1427_s28  ;;  %567 = vrot.lane.b32.xlu0 %v1523_v9, %s1427_s28 }
  0x4e   : > { %573 = vrot.lane.b32.xlu1 %v1530_v12, %s1427_s28  ;;  %571 = vrot.lane.b32.xlu0 %v1534_v14, %s1427_s28 }
  0x52   : > { %577 = vrot.lane.b32.xlu1 %v1547_v21, %s1427_s28  ;;  %575 = vrot.lane.b32.xlu0 %v1556_v24, %s1427_s28 }
  0x56   : > { %581 = vrot.lane.b32.xlu1 %v1364_v28, %s1427_s28  ;;  %569 = vrot.lane.b32.xlu0 %v1366_v30, %s1427_s28 }
  0x5a   : > { %585 = vrot.lane.b32.xlu1 %v1367_v32, %s1427_s28  ;;  %583 = vrot.lane.b32.xlu0 %v1369_v33, %s1427_s28 }
  0x5e   : > { %579 = vrot.lane.b32.xlu1 %v1370_v34, %s1427_s28  ;;  %587 = vrot.lane.b32.xlu0 %v1371_v35, %s1427_s28 }
  0x62   : > { %626 = vrot.lane.b32.xlu1 %v1495_v3, %s1428_s29  ;;  %624 = vrot.lane.b32.xlu0 %v1485_v1, %s1428_s29  ;;  %v1634_v3 = vld [vmem:[%s1620_s9 + $0x10] sm:$0xff] }
  0x66   : > { %630 = vrot.lane.b32.xlu1 %v1490_v2, %s1428_s29  ;;  %628 = vrot.lane.b32.xlu0 %v1482_v0, %s1428_s29  ;;  %v942_v2 = vadd.f32 %v1628_v62, %v1625_v61 }
  0x6a   : > { %634 = vrot.lane.b32.xlu1 %v1500_v4, %s1428_s29  ;;  %622 = vrot.lane.b32.xlu0 %v1505_v5, %s1428_s29  ;;  %v1637_v4 = vld [vmem:[%s1620_s9 + $0x18] sm:$0xff]  ;;  %v1640_v5 = vld [vmem:[%s1620_s9 + $0x20] sm:$0xff] }
  0x6b   : > { %v1068_v10 = vadd.f32 %v1637_v4, %v1634_v3 }
  0x6e   : > { %638 = vrot.lane.b32.xlu1 %v1510_v6, %s1428_s29  ;;  %636 = vrot.lane.b32.xlu0 %v1515_v7, %s1428_s29  ;;  %v1643_v6 = vld [vmem:[%s1620_s9 + $0x28] sm:$0xff] }
  0x6f   : > { %v945_v11 = vadd.f32 %v1643_v6, %v1640_v5  ;;  %v962_v27 = vmax.f32 %v1640_v5, %v1643_v6 }
  0x72   : > { %632 = vrot.lane.b32.xlu1 %v1518_v8, %s1428_s29  ;;  %640 = vrot.lane.b32.xlu0 %v1523_v9, %s1428_s29 }
  0x76   : > { %646 = vrot.lane.b32.xlu1 %v1530_v12, %s1428_s29  ;;  %644 = vrot.lane.b32.xlu0 %v1534_v14, %s1428_s29  ;;  %v1651_v12 = vld [vmem:[%s1620_s9 + $0x30] sm:$0xff]  ;;  %v1657_v14 = vld [vmem:[%s1620_s9 + $0x40] sm:$0xff] }
  0x77   : > { %v1071_v20 = vadd.f32 %v1654_v13, %v1651_v12 }
  0x7a   : > { %650 = vrot.lane.b32.xlu1 %v1547_v21, %s1428_s29  ;;  %648 = vrot.lane.b32.xlu0 %v1556_v24, %s1428_s29  ;;  %v948_v21 = vadd.f32 %v1660_v15, %v1657_v14 }
  0x7e   : > { %654 = vrot.lane.b32.xlu1 %v1364_v28, %s1428_s29  ;;  %642 = vrot.lane.b32.xlu0 %v1366_v30, %s1428_s29  ;;  %v1675_v28 = vld [vmem:[%s1620_s9 + $0x50] sm:$0xff] }
  0x82   : > { %658 = vrot.lane.b32.xlu1 %v1367_v32, %s1428_s29  ;;  %656 = vrot.lane.b32.xlu0 %v1369_v33, %s1428_s29  ;;  %v1074_v32 = vadd.f32 %v1678_v29, %v1675_v28 }
  0x84   : > { %v483_v36 = vpop.permute.xlu1 %482  ;;  %v479_v37 = vpop.permute.xlu0 %478 }
  0x86   : > { %652 = vrot.lane.b32.xlu1 %v1370_v34, %s1428_s29  ;;  %660 = vrot.lane.b32.xlu0 %v1371_v35, %s1428_s29  ;;  %v1084_v35 = vmax.f32 %v1634_v3, %v1637_v4 }
  0x88   : > { %v485_v38 = vpop.permute.xlu1 %484  ;;  %v481_v39 = vpop.permute.xlu0 %480 }
  0x89   : > { %v520_v40 = vsel %vm516_vm0, %v483_v36, %v485_v38  ;;  %v518_v41 = vsel %vm516_vm0, %v479_v37, %v481_v39  ;;  %v519_v42 = vsel %vm516_vm0, %v481_v39, %v483_v36  ;;  %v1687_v36 = vld [vmem:[%s1620_s9 + $0x60] sm:$0xff] }
  0x8a   : > { %873 = vmatprep.subr.bf16.mxu1 %v520_v40  ;;  %820 = vmatprep.subr.bf16.mxu0 %v518_v41  ;;  %v1398_v39 = vld [vmem:[%s2004_s2 + $0x4] ss:$8 sps:$4 sm:$0xff]  }
  0x8b   : > { %874 = vmatpush1.bf16.msra.mxu1 %v519_v42  ;;  %v1087_v42 = vmax.f32 %v1651_v12, %v1654_v13  ;;  %844 = vmatprep.mubr.bf16.mxu0 %v1398_v39 }
  0x8c   : > { %v489_v43 = vpop.permute.xlu1 %488  ;;  %v477_v44 = vpop.permute.xlu0 %476  ;;  %897 = vmatprep.mubr.bf16.mxu1 %v1398_v39 }
  0x8d   : > { %v517_v45 = vsel %vm516_vm0, %v477_v44, %v479_v37  ;;  %v1690_v37 = vld [vmem:[%s1620_s9 + $0x68] sm:$0xff]  ;;  %v1701_v44 = vld [vmem:[%s1620_s9 + $0x70] sm:$0xff] }
  0x8e   : > { %821 = vmatpush1.bf16.msra.mxu0 %v517_v45  ;;  %v1704_v45 = vld [vmem:[%s1620_s9 + $0x78] sm:$0xff] }
  0x90   : > { %v493_v46 = vpop.permute.xlu1 %492  ;;  %v491_v47 = vpop.permute.xlu0 %490 }
  0x91   : > { %v522_v48 = vsel %vm516_vm0, %v489_v43, %v491_v47  ;;  %v523_v53 = vsel %vm516_vm0, %v491_v47, %v493_v46 }
  0x92   : > { %822 = vmatprep.subr.bf16.mxu0 %v522_v48 }
  0x94   : > { %v487_v49 = vpop.permute.xlu1 %486  ;;  %v495_v50 = vpop.permute.xlu0 %494 }
  0x95   : > { %v521_v51 = vsel %vm516_vm0, %v487_v49, %v489_v43  ;;  %v524_v52 = vsel %vm516_vm0, %v493_v46, %v495_v50  ;;  %v951_v43 = vadd.f32 %v1690_v37, %v1687_v36  ;;  %v965_v49 = vmax.f32 %v1657_v14, %v1660_v15 }
  0x96   : > { %823 = vmatpush1.bf16.msra.mxu0 %v521_v51  ;;  %875 = vmatprep.subr.bf16.mxu1 %v524_v52  ;;  %v1077_v50 = vadd.f32 %v1704_v45, %v1701_v44 }
  0x97   : > { %876 = vmatpush1.bf16.msra.mxu1 %v523_v53 }
  0x98   : > { %v501_v54 = vpop.permute.xlu1 %500  ;;  %v499_v55 = vpop.permute.xlu0 %498 }
  0x99   : > { %v526_v56 = vsel %vm516_vm0, %v499_v55, %v501_v54 }
  0x9a   : > { %824 = vmatprep.subr.bf16.mxu0 %v526_v56  ;;  %v968_v56 = vmax.f32 %v1687_v36, %v1690_v37 }
  0x9c   : > { %v505_v57 = vpop.permute.xlu1 %504  ;;  %v503_v58 = vpop.permute.xlu0 %502 }
  0x9d   : > { %v528_v59 = vsel %vm516_vm0, %v503_v58, %v505_v57  ;;  %v527_v60 = vsel %vm516_vm0, %v501_v54, %v503_v58 }
  0x9e   : > { %877 = vmatprep.subr.bf16.mxu1 %v528_v59 }
  0x9f   : > { %878 = vmatpush1.bf16.msra.mxu1 %v527_v60 }
  0xa0   : > { %v509_v63 = vpop.permute.xlu1 %508  ;;  %v497_v0 = vpop.permute.xlu0 %496 }
  0xa1   : > { %v525_v1 = vsel %vm516_vm0, %v497_v0, %v499_v55  ;;  %v1090_v55 = vmax.f32 %v1675_v28, %v1678_v29 }
  0xa2   : > { %825 = vmatpush1.bf16.msra.mxu0 %v525_v1 }
  0xa4   : > { %v513_v7 = vpop.permute.xlu1 %512  ;;  %v511_v8 = vpop.permute.xlu0 %510 }
  0xa5   : > { %943 = vadd.xlane.f32.xlu0 %v942_v2  ;;  %v530_v9 = vsel %vm516_vm0, %v509_v63, %v511_v8  ;;  %v531_v22 = vsel %vm516_vm0, %v511_v8, %v513_v7 }
  0xa6   : > { %826 = vmatprep.subr.bf16.mxu0 %v530_v9 }
  0xa8   : > { %v507_v16 = vpop.permute.xlu1 %506  ;;  %v515_v17 = vpop.permute.xlu0 %514 }
  0xa9   : > { %v529_v18 = vsel %vm516_vm0, %v507_v16, %v509_v63  ;;  %1069 = vadd.xlane.f32.xlu0 %v1068_v10  ;;  %v532_v19 = vsel %vm516_vm0, %v513_v7, %v515_v17  ;;  %v1093_v63 = vmax.f32 %v1701_v44, %v1704_v45 }
  0xaa   : > { %946 = vadd.xlane.f32.xlu1 %v945_v11  ;;  %827 = vmatpush1.bf16.msra.mxu0 %v529_v18 }
  0xab   : > { %879 = vmatprep.subr.bf16.mxu1 %v532_v19 }
  0xac   : > { %880 = vmatpush1.bf16.msra.mxu1 %v531_v22  ;;  %v554_v23 = vpop.permute.xlu1 %553  ;;  %v552_v24 = vpop.permute.xlu0 %551 }
  0xad   : > { %1072 = vadd.xlane.f32.xlu0 %v1071_v20  ;;  %v591_v25 = vsel %vm589_vm1, %v552_v24, %v554_v23 }
  0xae   : > { %949 = vadd.xlane.f32.xlu1 %v948_v21  ;;  %828 = vmatprep.subr.bf16.mxu0 %v591_v25 }
  0xb0   : > { %v558_v30 = vpop.permute.xlu1 %557  ;;  %v556_v31 = vpop.permute.xlu0 %555 }
  0xb1   : > { %960 = vmax.xlane.f32.xlu0 %v959_v26  ;;  %v593_v33 = vsel %vm589_vm1, %v556_v31, %v558_v30  ;;  %v592_v34 = vsel %vm589_vm1, %v554_v23, %v556_v31 }
  0xb2   : > { %963 = vmax.xlane.f32.xlu1 %v962_v27  ;;  %881 = vmatprep.subr.bf16.mxu1 %v593_v33 }
  0xb3   : > { %882 = vmatpush1.bf16.msra.mxu1 %v592_v34 }
  0xb4   : > { %v562_v38 = vpop.permute.xlu1 %561  ;;  %v550_v40 = vpop.permute.xlu0 %549 }
  0xb5   : > { %1075 = vadd.xlane.f32.xlu0 %v1074_v32  ;;  %v590_v41 = vsel %vm589_vm1, %v550_v40, %v552_v24 }
  0xb6   : > { %1085 = vmax.xlane.f32.xlu1 %v1084_v35  ;;  %829 = vmatpush1.bf16.msra.mxu0 %v590_v41 }
  0xb8   : > { %v566_v46 = vpop.permute.xlu1 %565  ;;  %v564_v47 = vpop.permute.xlu0 %563 }
  0xb9   : > { %1088 = vmax.xlane.f32.xlu0 %v1087_v42  ;;  %v595_v48 = vsel %vm589_vm1, %v562_v38, %v564_v47  ;;  %v596_v57 = vsel %vm589_vm1, %v564_v47, %v566_v46 }
  0xba   : > { %952 = vadd.xlane.f32.xlu1 %v951_v43  ;;  %830 = vmatprep.subr.bf16.mxu0 %v595_v48 }
  0xbc   : > { %v560_v51 = vpop.permute.xlu1 %559  ;;  %v568_v52 = vpop.permute.xlu0 %567 }
  0xbd   : > { %v594_v53 = vsel %vm589_vm1, %v560_v51, %v562_v38  ;;  %966 = vmax.xlane.f32.xlu0 %v965_v49  ;;  %v597_v54 = vsel %vm589_vm1, %v566_v46, %v568_v52 }
  0xbe   : > { %1078 = vadd.xlane.f32.xlu1 %v1077_v50  ;;  %831 = vmatpush1.bf16.msra.mxu0 %v594_v53 }
  0xbf   : > { %883 = vmatprep.subr.bf16.mxu1 %v597_v54 }
  0xc0   : > { %884 = vmatpush1.bf16.msra.mxu1 %v596_v57  ;;  %v574_v58 = vpop.permute.xlu1 %573  ;;  %v572_v59 = vpop.permute.xlu0 %571 }
  0xc1   : > { %1091 = vmax.xlane.f32.xlu0 %v1090_v55  ;;  %v599_v60 = vsel %vm589_vm1, %v572_v59, %v574_v58 }
  0xc2   : > { %969 = vmax.xlane.f32.xlu1 %v968_v56  ;;  %832 = vmatprep.subr.bf16.mxu0 %v599_v60 }
  0xc4   : > { %v578_v0 = vpop.permute.xlu1 %577  ;;  %v576_v1 = vpop.permute.xlu0 %575 }
  0xc5   : > { %1094 = vmax.xlane.f32.xlu0 %v1093_v63  ;;  %v601_v2 = vsel %vm589_vm1, %v576_v1, %v578_v0  ;;  %v600_v7 = vsel %vm589_vm1, %v574_v58, %v576_v1  ;;  %v1396_v1 = vld [vmem:[%s2004_s2] ss:$8 sps:$4 sm:$0xff]  }
  0xc6   : > { %885 = vmatprep.subr.bf16.mxu1 %v601_v2 }
  0xc7   : > { %886 = vmatpush1.bf16.msra.mxu1 %v600_v7  ;;  %v1399_v7 = vld [vmem:[%s2004_s2 + $0x14] ss:$8 sps:$4 sm:$0xff]  }
  0xc8   : > { %v582_v8 = vpop.permute.xlu1 %581  ;;  %v570_v9 = vpop.permute.xlu0 %569 }
  0xc9   : > { %v598_v10 = vsel %vm589_vm1, %v570_v9, %v572_v59  ;;  %v1429_v9 = vmov 0  }
  0xca   : > { %833 = vmatpush1.bf16.msra.mxu0 %v598_v10  ;;  %1342 = vset.pattern.permute.xlu1 %v1429_v9  ;;  %v1401_v10 = vld [vmem:[%s2004_s2 + $0x10] ss:$8 sps:$4 sm:$0xff]  }
  0xcb   : > { %1343 = vset.pattern.permute.xlu0 %v1429_v9 }
  0xcc   : > { %v586_v11 = vpop.permute.xlu1 %585  ;;  %v584_v16 = vpop.permute.xlu0 %583 }
  0xcd   : > { %v603_v17 = vsel %vm589_vm1, %v582_v8, %v584_v16  ;;  %v604_v22 = vsel %vm589_vm1, %v584_v16, %v586_v11 }
  0xce   : > { %834 = vmatprep.subr.bf16.mxu0 %v603_v17 }
  0xd0   : > { %v580_v18 = vpop.permute.xlu1 %579  ;;  %v588_v19 = vpop.permute.xlu0 %587 }
  0xd1   : > { %v602_v20 = vsel %vm589_vm1, %v580_v18, %v582_v8  ;;  %v605_v21 = vsel %vm589_vm1, %v586_v11, %v588_v19 }
  0xd2   : > { %835 = vmatpush1.bf16.msra.mxu0 %v602_v20  ;;  %887 = vmatprep.subr.bf16.mxu1 %v605_v21 }
  0xd3   : > { %888 = vmatpush1.bf16.msra.mxu1 %v604_v22  ;;  %v934_v22 = vld [vmem:[%s2006_s4] sm:$0xff] }
  0xd4   : > { %v627_v23 = vpop.permute.xlu1 %626  ;;  %v625_v24 = vpop.permute.xlu0 %624 }
  0xd5   : > { %v664_v25 = vsel %vm662_vm2, %v625_v24, %v627_v23 }
  0xd6   : > { %836 = vmatprep.subr.bf16.mxu0 %v664_v25 }
  0xd8   : > { %v631_v26 = vpop.permute.xlu1 %630  ;;  %v629_v27 = vpop.permute.xlu0 %628 }
  0xd9   : > { %v666_v30 = vsel %vm662_vm2, %v629_v27, %v631_v26  ;;  %v665_v31 = vsel %vm662_vm2, %v627_v23, %v629_v27  ;;  %v935_v23 = vld [vmem:[%s2006_s4 + $0x8] sm:$0xff]  ;;  %v936_v27 = vld [vmem:[%s2006_s4 + $0x10] sm:$0xff] }
  0xda   : > { %889 = vmatprep.subr.bf16.mxu1 %v666_v30 }
  0xdb   : > { %890 = vmatpush1.bf16.msra.mxu1 %v665_v31 }
  0xdc   : > { %v635_v32 = vpop.permute.xlu1 %634  ;;  %v623_v33 = vpop.permute.xlu0 %622 }
  0xdd   : > { %v663_v34 = vsel %vm662_vm2, %v623_v33, %v625_v24 }
  0xde   : > { %837 = vmatpush1.bf16.msra.mxu0 %v663_v34 }
  0xe0   : > { %v639_v35 = vpop.permute.xlu1 %638  ;;  %v637_v38 = vpop.permute.xlu0 %636 }
  0xe1   : > { %v668_v39 = vsel %vm662_vm2, %v635_v32, %v637_v38  ;;  %v669_v46 = vsel %vm662_vm2, %v637_v38, %v639_v35 }
  0xe2   : > { %838 = vmatprep.subr.bf16.mxu0 %v668_v39 }
  0xe4   : > { %v633_v40 = vpop.permute.xlu1 %632  ;;  %v641_v41 = vpop.permute.xlu0 %640 }
  0xe5   : > { %v667_v42 = vsel %vm662_vm2, %v633_v40, %v635_v32  ;;  %v670_v43 = vsel %vm662_vm2, %v639_v35, %v641_v41 }
  0xe6   : > { %839 = vmatpush1.bf16.msra.mxu0 %v667_v42  ;;  %891 = vmatprep.subr.bf16.mxu1 %v670_v43 }
  0xe7   : > { %892 = vmatpush1.bf16.msra.mxu1 %v669_v46 }
  0xe8   : > { %v647_v47 = vpop.permute.xlu1 %646  ;;  %v645_v48 = vpop.permute.xlu0 %644 }
  0xe9   : > { %v672_v49 = vsel %vm662_vm2, %v645_v48, %v647_v47 }
  0xea   : > { %840 = vmatprep.subr.bf16.mxu0 %v672_v49 }
  0xec   : > { %v651_v50 = vpop.permute.xlu1 %650  ;;  %v649_v51 = vpop.permute.xlu0 %648 }
  0xed   : > { %v674_v52 = vsel %vm662_vm2, %v649_v51, %v651_v50  ;;  %v673_v53 = vsel %vm662_vm2, %v647_v47, %v649_v51  ;;  %v937_v50 = vld [vmem:[%s2006_s4 + $0x18] sm:$0xff] }
  0xee   : > { %893 = vmatprep.subr.bf16.mxu1 %v674_v52 }
  0xef   : > { %894 = vmatpush1.bf16.msra.mxu1 %v673_v53 }
  0xf0   : > { %v655_v54 = vpop.permute.xlu1 %654  ;;  %v643_v55 = vpop.permute.xlu0 %642 }
  0xf1   : > { %v671_v56 = vsel %vm662_vm2, %v643_v55, %v645_v48 }
  0xf2   : > { %841 = vmatpush1.bf16.msra.mxu0 %v671_v56 }
  0xf4   : > { %v659_v57 = vpop.permute.xlu1 %658  ;;  %v657_v58 = vpop.permute.xlu0 %656 }
  0xf5   : > { %v676_v59 = vsel %vm662_vm2, %v655_v54, %v657_v58  ;;  %v677_v8 = vsel %vm662_vm2, %v657_v58, %v659_v57 }
  0xf6   : > { %842 = vmatprep.subr.bf16.mxu0 %v676_v59 }
  0xf8   : > { %v653_v60 = vpop.permute.xlu1 %652  ;;  %v661_v63 = vpop.permute.xlu0 %660 }
  0xf9   : > { %v675_v0 = vsel %vm662_vm2, %v653_v60, %v655_v54  ;;  %v678_v2 = vsel %vm662_vm2, %v659_v57, %v661_v63 }
  0xfa   : > { %843 = vmatpush1.bf16.msra.mxu0 %v675_v0  ;;  %895 = vmatprep.subr.bf16.mxu1 %v678_v2 }
  0xfb   : > { %896 = vmatpush1.bf16.msra.mxu1 %v677_v8 }
  0xfd   : > { %845 = vmatmul.mubr.bf16.vlgmr.msra.gmra.mrb[0].mxu0 %v1396_v1 }
  0xfe   : > { %854 = vmatprep.mubr.bf16.mxu0 %v1399_v7  ;;  %898 = vmatmul.mubr.bf16.vlgmr.msra.gmra.mrb[0].mxu1 %v1396_v1 }
  0xff   : > { %907 = vmatprep.mubr.bf16.mxu1 %v1399_v7 }
 0x105   : > { %855 = vmatmul.mubr.bf16.gmra.mrb[4].mxu0 %v1401_v10 }
 0x106   : > { %908 = vmatmul.mubr.bf16.gmra.mrb[4].mxu1 %v1401_v10 }
 0x132   : > { %v944_v11 = vpop.xlane.xlu0 %943 }
 0x133   : > { %v955_v20 = vmul.f32 0.00390625, %v944_v11 }
 0x135   : > { %v971_v30 = vmul.f32 %v955_v20, %v934_v22 }
 0x136   : > { %v1070_v16 = vpop.xlane.xlu0 %1069 }
 0x137   : > { %v947_v17 = vpop.xlane.xlu1 %946  ;;  %v1080_v31 = vmul.f32 0.00390625, %v1070_v16  ;;  %v976_v40 = vsel %vm975_vm3, %v971_v30, 0.0 }
 0x138   : > { %v956_v21 = vmul.f32 0.00390625, %v947_v17 }
 0x139   : > { %v1096_v41 = vmul.f32 %v1080_v31, %v934_v22 }
 0x13a   : > { %v1073_v18 = vpop.xlane.xlu0 %1072  ;;  %v972_v32 = vmul.f32 %v956_v21, %v935_v23 }
 0x13b   : > { %v950_v19 = vpop.xlane.xlu1 %949  ;;  %v1081_v33 = vmul.f32 0.00390625, %v1073_v18  ;;  %v1100_v55 = vsel %vm975_vm3, %v1096_v41, 0.0 }
 0x13c   : > { %v957_v26 = vmul.f32 0.00390625, %v950_v19  ;;  %v977_v42 = vsel %vm975_vm3, %v972_v32, 0.0 }
 0x13d   : > { %v1097_v43 = vmul.f32 %v1081_v33, %v935_v23  ;;  %v978_v54 = vadd.f32 %v977_v42, %v976_v40 }
 0x13e   : > { %v961_v24 = vpop.xlane.xlu0 %960  ;;  %v973_v38 = vmul.f32 %v957_v26, %v936_v27 }
 0x13f   : > { %v964_v25 = vpop.xlane.xlu1 %963  ;;  %v1008_v46 = vmul.f32 %v961_v24, %v934_v22  ;;  %v1101_v56 = vsel %vm975_vm3, %v1097_v43, 0.0 }
 0x140   : > { %v1009_v47 = vmul.f32 %v964_v25, %v935_v23  ;;  %v979_v52 = vsel %vm975_vm3, %v973_v38, 0.0  ;;  %v1102_v10 = vadd.f32 %v1101_v56, %v1100_v55 }
 0x141   : > { %v980_v58 = vadd.f32 %v979_v52, %v978_v54  ;;  %v1012_v59 = vsel %vm975_vm3, %v1008_v46, 0.0 }
 0x142   : > { %v1076_v34 = vpop.xlane.xlu0 %1075  ;;  %v1013_v60 = vsel %vm975_vm3, %v1009_v47, 0.0 }
 0x143   : > { %v1086_v35 = vpop.xlane.xlu1 %1085  ;;  %v1082_v39 = vmul.f32 0.00390625, %v1076_v34  ;;  %v1014_v19 = vadd.f32 %v1013_v60, %v1012_v59 }
 0x144   : > { %v1132_v16 = vmul.f32 %v1086_v35, %v934_v22 }
 0x145   : > { %v1098_v48 = vmul.f32 %v1082_v39, %v936_v27 }
 0x146   : > { %v1089_v49 = vpop.xlane.xlu0 %1088  ;;  %v1136_v38 = vsel %vm975_vm3, %v1132_v16, 0.0 }
 0x147   : > { %v953_v51 = vpop.xlane.xlu1 %952  ;;  %v1103_v63 = vsel %vm975_vm3, %v1098_v48, 0.0  ;;  %v1133_v2 = vmul.f32 %v1089_v49, %v935_v23 }
 0x148   : > { %v958_v53 = vmul.f32 0.00390625, %v953_v51  ;;  %v1104_v20 = vadd.f32 %v1103_v63, %v1102_v10 }
 0x149   : > { %v1137_v26 = vsel %vm975_vm3, %v1133_v2, 0.0 }
 0x14a   : > { %v974_v57 = vmul.f32 %v958_v53, %v937_v50  ;;  %v967_v0 = vpop.xlane.xlu0 %966  ;;  %v1138_v39 = vadd.f32 %v1137_v26, %v1136_v38 }
 0x14b   : > { %v1079_v1 = vpop.xlane.xlu1 %1078  ;;  %v1010_v8 = vmul.f32 %v967_v0, %v936_v27 }
 0x14c   : > { %v981_v7 = vsel %vm975_vm3, %v974_v57, 0.0  ;;  %v1083_v9 = vmul.f32 0.00390625, %v1079_v1  ;;  %v938_v1 = vld [vmem:[%s2007_s5] sm:$0xff] }
 0x14d   : > { %v982_v11 = vadd.f32 %v981_v7, %v980_v58  ;;  %v1015_v17 = vsel %vm975_vm3, %v1010_v8, 0.0  ;;  %v941_v7 = vld [vmem:[%s2007_s5 + $0x18] sm:$0xff] }
 0x14e   : > { %v1099_v18 = vmul.f32 %v1083_v9, %v937_v50  ;;  %v1092_v24 = vpop.xlane.xlu0 %1091  ;;  %v1016_v33 = vadd.f32 %v1015_v17, %v1014_v19 }
 0x14f   : > { %v983_v21 = vrot.slane %v982_v11, 4  ;;  %v970_v25 = vpop.xlane.xlu1 %969  ;;  %v1134_v23 = vmul.f32 %v1092_v24, %v936_v27 }
 0x150   : > { %v1105_v30 = vsel %vm975_vm3, %v1099_v18, 0.0  ;;  %v1011_v31 = vmul.f32 %v970_v25, %v937_v50 }
 0x151   : > { %v984_v32 = vadd.f32 %v983_v21, %v982_v11  ;;  %v1106_v34 = vadd.f32 %v1105_v30, %v1104_v20  ;;  %v1139_v22 = vsel %vm975_vm3, %v1134_v23, 0.0  ;;  %v940_v11 = vld [vmem:[%s2007_s5 + $0x10] sm:$0xff] }
 0x152   : > { %v1017_v35 = vsel %vm975_vm3, %v1011_v31, 0.0  ;;  %v1095_v43 = vpop.xlane.xlu0 %1094  ;;  %v1140_v49 = vadd.f32 %v1139_v22, %v1138_v39 }
 0x153   : > { %v985_v40 = vrot.slane %v984_v32, 2  ;;  %v1107_v41 = vrot.slane %v1106_v34, 4  ;;  %v1018_v42 = vadd.f32 %v1017_v35, %v1016_v33  ;;  %v1135_v46 = vmul.f32 %v1095_v43, %v937_v50  ;;  %v939_v50 = vld [vmem:[%s2007_s5 + $0x8] sm:$0xff] }
 0x155   : > { %v986_v47 = vadd.f32 %v985_v40, %v984_v32  ;;  %v1108_v48 = vadd.f32 %v1107_v41, %v1106_v34  ;;  %v1019_v27 = vrot.slane %v1018_v42, 4  ;;  %v1141_v51 = vsel %vm975_vm3, %v1135_v46, 0.0 }
 0x156   : > { %v1142_v55 = vadd.f32 %v1141_v51, %v1140_v49 }
 0x157   : > { %v987_v52 = vrot.slane %v986_v47, 1  ;;  %v1109_v53 = vrot.slane %v1108_v48, 2  ;;  %v1020_v54 = vadd.f32 %v1019_v27, %v1018_v42 }
 0x158   : > { %v1143_v57 = vrot.slane %v1142_v55, 4 }
 0x159   : > { %v1021_v56 = vrot.slane %v1020_v54, 2  ;;  %v988_v58 = vadd.f32 %v987_v52, %v986_v47  ;;  %v1110_v59 = vadd.f32 %v1109_v53, %v1108_v48 }
 0x15a   : > { %v1144_v63 = vadd.f32 %v1143_v57, %v1142_v55 }
 0x15b   : > { %v1022_v60 = vadd.f32 %v1021_v56, %v1020_v54  ;;  %vm989_vm4 = vcmp.gt.f32.partialorder %v988_v58, 0.0  ;;  %v990_v0 = vmul.f32 0.01, %v988_v58  ;;  %v1111_v8 = vrot.slane %v1110_v59, 1 }
 0x15c   : > { %v1145_v9 = vrot.slane %v1144_v63, 2 }
 0x15d   : > { %v1023_v2 = vrot.slane %v1022_v60, 1  ;;  %v991_v10 = vsel %vm989_vm4, %v988_v58, %v990_v0  ;;  %v1112_v30 = vadd.f32 %v1111_v8, %v1110_v59 }
 0x15e   : > { %v993_v17 = vmul.f32 %v991_v10, %v939_v50  ;;  %v992_v18 = vmul.f32 %v991_v10, %v938_v1  ;;  %v995_v19 = vmul.f32 %v991_v10, %v941_v7  ;;  %v994_v24 = vmul.f32 %v991_v10, %v940_v11  ;;  %v702_v10 = vld [vmem:[%s2005_s3 + $0x18] sm:$0xff] }
 0x15f   : > { %v1024_v16 = vadd.f32 %v1023_v2, %v1022_v60  ;;  %v1146_v25 = vadd.f32 %v1145_v9, %v1144_v63  ;;  %v1114_v22 = vmul.f32 0.01, %v1112_v30  ;;  %vm1113_vm6 = vcmp.gt.f32.partialorder %v1112_v30, 0.0 }
 0x160   : > { %v999_v20 = vsel %vm975_vm3, %v993_v17, 0.0  ;;  %v996_v21 = vsel %vm975_vm3, %v992_v18, 0.0  ;;  %v1005_v31 = vsel %vm975_vm3, %v995_v19, 0.0  ;;  %v1002_v32 = vsel %vm975_vm3, %v994_v24, 0.0 }
 0x161   : > { %vm1025_vm5 = vcmp.gt.f32.partialorder %v1024_v16, 0.0  ;;  %1000 = vadd.xlane.f32.xlu0 %v999_v20  ;;  %997 = vadd.xlane.f32.xlu1 %v996_v21  ;;  %v1026_v26 = vmul.f32 0.01, %v1024_v16  ;;  %v1147_v38 = vrot.slane %v1146_v25, 1  ;;  %v1115_v43 = vsel %vm1113_vm6, %v1112_v30, %v1114_v22 }
 0x162   : > { %v1117_v48 = vmul.f32 %v1115_v43, %v939_v50  ;;  %v1116_v49 = vmul.f32 %v1115_v43, %v938_v1  ;;  %v1119_v53 = vmul.f32 %v1115_v43, %v941_v7  ;;  %v1118_v54 = vmul.f32 %v1115_v43, %v940_v11 }
 0x163   : > { %v1027_v23 = vsel %vm1025_vm5, %v1024_v16, %v1026_v26  ;;  %v1148_v42 = vadd.f32 %v1147_v38, %v1146_v25 }
 0x164   : > { %v1029_v33 = vmul.f32 %v1027_v23, %v939_v50  ;;  %v1028_v34 = vmul.f32 %v1027_v23, %v938_v1  ;;  %v1031_v40 = vmul.f32 %v1027_v23, %v941_v7  ;;  %v1030_v41 = vmul.f32 %v1027_v23, %v940_v11 }
 0x165   : > { %1006 = vadd.xlane.f32.xlu0 %v1005_v31  ;;  %1003 = vadd.xlane.f32.xlu1 %v1002_v32  ;;  %v1150_v27 = vmul.f32 0.01, %v1148_v42  ;;  %vm1149_vm7 = vcmp.gt.f32.partialorder %v1148_v42, 0.0  ;;  %v1123_v51 = vsel %vm975_vm3, %v1117_v48, 0.0  ;;  %v1120_v52 = vsel %vm975_vm3, %v1116_v49, 0.0 }
 0x166   : > { %v1035_v35 = vsel %vm975_vm3, %v1029_v33, 0.0  ;;  %v1032_v39 = vsel %vm975_vm3, %v1028_v34, 0.0  ;;  %v1041_v46 = vsel %vm975_vm3, %v1031_v40, 0.0  ;;  %v1038_v47 = vsel %vm975_vm3, %v1030_v41, 0.0 }
 0x167   : > { %v1151_v55 = vsel %vm1149_vm7, %v1148_v42, %v1150_v27  ;;  %v1129_v56 = vsel %vm975_vm3, %v1119_v53, 0.0  ;;  %v1126_v57 = vsel %vm975_vm3, %v1118_v54, 0.0 }
 0x168   : > { %v1153_v58 = vmul.f32 %v1151_v55, %v939_v50  ;;  %v1152_v59 = vmul.f32 %v1151_v55, %v938_v1  ;;  %v1155_v0 = vmul.f32 %v1151_v55, %v941_v7  ;;  %v1154_v2 = vmul.f32 %v1151_v55, %v940_v11  ;;  %v699_v50 = vld [vmem:[%s2005_s3] sm:$0xff]  ;;  %v701_v1 = vld [vmem:[%s2005_s3 + $0x10] sm:$0xff]  ;;  %v700_v7 = vld [vmem:[%s2005_s3 + $0x8] sm:$0xff] }
 0x169   : > { %1036 = vadd.xlane.f32.xlu0 %v1035_v35  ;;  %1033 = vadd.xlane.f32.xlu1 %v1032_v39  ;;  %v703_v35 = vlaneseq }
 0x16a   : > { %v1159_v60 = vsel %vm975_vm3, %v1153_v58, 0.0  ;;  %v1156_v63 = vsel %vm975_vm3, %v1152_v59, 0.0  ;;  %v1165_v8 = vsel %vm975_vm3, %v1155_v0, 0.0  ;;  %v1162_v9 = vsel %vm975_vm3, %v1154_v2, 0.0 }
 0x16b   : > { %v704_v41 = vand.u32 127, %v703_v35 }
 0x16d   : > { %1042 = vadd.xlane.f32.xlu0 %v1041_v46  ;;  %1039 = vadd.xlane.f32.xlu1 %v1038_v47  ;;  %v706_v48 = vadd.s32 256, %v704_v41  ;;  %v708_v49 = vand.u32 255, %v704_v41  ;;  %v705_v27 = vadd.s32 128, %v704_v41  ;;  %v707_v53 = vadd.s32 384, %v704_v41 }
 0x16f   : > { %v709_v58 = vand.u32 255, %v705_v27  ;;  %v716_v2 = vand.u32 15, %v708_v49 }
 0x171   : > { %1124 = vadd.xlane.f32.xlu0 %v1123_v51  ;;  %1121 = vadd.xlane.f32.xlu1 %v1120_v52  ;;  %vm740_vm13 = vcmp.lt.s32.totalorder %v716_v2, 15 }
 0x175   : > { %1130 = vadd.xlane.f32.xlu0 %v1129_v56  ;;  %1127 = vadd.xlane.f32.xlu1 %v1126_v57  ;;  %v710_v56 = vand.u32 255, %v706_v48  ;;  %v712_v57 = vshra.s32 %v708_v49, 4 }
 0x177   : > { %v714_v0 = vshra.s32 %v710_v56, 4  ;;  %vm720_vm8 = vcmp.ge.s32.totalorder %v712_v57, 0  ;;  %vm724_vm9 = vcmp.lt.s32.totalorder %v712_v57, 15 }
 0x178   : > { %vm1862_vm12 = vmand %vm720_vm8, %vm724_vm9 }
 0x179   : > { %1160 = vadd.xlane.f32.xlu0 %v1159_v60  ;;  %1157 = vadd.xlane.f32.xlu1 %v1156_v63  ;;  %v711_v63 = vand.u32 255, %v707_v53  ;;  %vm722_vm10 = vcmp.ge.s32.totalorder %v714_v0, 0  ;;  %vm726_vm11 = vcmp.lt.s32.totalorder %v714_v0, 15  ;;  %vm1881_vm4 = vmand %vm1862_vm12, %vm740_vm13 }
 0x17a   : > { %vm1872_vm0 = vmand %vm722_vm10, %vm726_vm11 }
 0x17b   : > { %v719_v41 = vand.u32 15, %v711_v63 }
 0x17d   : > { %1166 = vadd.xlane.f32.xlu0 %v1165_v8  ;;  %1163 = vadd.xlane.f32.xlu1 %v1162_v9  ;;  %v713_v8 = vshra.s32 %v709_v58, 4  ;;  %vm743_vm8 = vcmp.lt.s32.totalorder %v719_v41, 15 }
 0x17f   : > { %vm721_vm14 = vcmp.ge.s32.totalorder %v713_v8, 0  ;;  %vm725_vm15 = vcmp.lt.s32.totalorder %v713_v8, 15 }
 0x180   : > { %vm1889_vm5 = vmand %vm721_vm14, %vm725_vm15 }
 0x18e   : > { %758 = vperm.xlu1 %1342, %v699_v50  }
 0x192   : > { %768 = vperm.xlu1 %1342, %v701_v1   ;;  %v715_v1 = vshra.s32 %v711_v63, 4 }
 0x193   : > { %763 = vperm.xlu0 %1343, %v700_v7  }
 0x194   : > { %vm723_vm1 = vcmp.ge.s32.totalorder %v715_v1, 0  ;;  %vm727_vm2 = vcmp.lt.s32.totalorder %v715_v1, 15 }
 0x195   : > { %vm731_vm7 = vmand %vm723_vm1, %vm727_vm2 }
 0x196   : > { %773 = vperm.xlu1 %1342, %v702_v10   ;;  %v718_v10 = vand.u32 15, %v710_v56  ;;  %vm1915_vm11 = vmand %vm731_vm7, %vm743_vm8 }
 0x198   : > { %vm742_vm3 = vcmp.lt.s32.totalorder %v718_v10, 15 }
 0x199   : > { %vm1902_vm9 = vmand %vm1872_vm0, %vm742_vm3 }
 0x1d0   : > { %v1821_v11 = vpop.f32.mrb[0].mxu0 }
 0x1d1   : > { %v1823_v16 = vpop.f32.mrb[1].mxu0  ;;  %v1825_v17 = vpop.f32.mrb[0].mxu1 }
 0x1d2   : > { %v1827_v18 = vpop.f32.mrb[2].mxu0  ;;  %v1829_v19 = vpop.f32.mrb[1].mxu1 }
 0x1d3   : > { %v1831_v20 = vpop.f32.mrb[3].mxu0  ;;  %v1833_v21 = vpop.f32.mrb[2].mxu1 }
 0x1d4   : > { %v1835_v24 = vpop.f32.mrb[3].mxu1 }
 0x1d8   : > { %v1837_v25 = vpop.f32.mrb[4].mxu0 }
 0x1d9   : > { %v1839_v26 = vpop.f32.mrb[5].mxu0  ;;  %v1841_v30 = vpop.f32.mrb[4].mxu1 }
 0x1da   : > { %v1843_v23 = vpop.f32.mrb[6].mxu0  ;;  %v1845_v31 = vpop.f32.mrb[5].mxu1 }
 0x1db   : > { %v1847_v32 = vpop.f32.mrb[7].mxu0  ;;  %v1849_v33 = vpop.f32.mrb[6].mxu1 }
 0x1dc   : > { %v1851_v34 = vpop.f32.mrb[7].mxu1 }
 0x1ee   : > { %v998_v38 = vpop.xlane.xlu1 %997  ;;  %v1001_v22 = vpop.xlane.xlu0 %1000 }
 0x1f2   : > { %v1004_v39 = vpop.xlane.xlu1 %1003  ;;  %v1007_v40 = vpop.xlane.xlu0 %1006 }
 0x1f6   : > { %v1034_v42 = vpop.xlane.xlu1 %1033  ;;  %v1037_v43 = vpop.xlane.xlu0 %1036 }
 0x1f7   : > { %v1044_v46 = vadd.f32 %v1034_v42, %v998_v38  ;;  %v1045_v47 = vadd.f32 %v1037_v43, %v1001_v22  ;;  %v717_v38 = vand.u32 15, %v709_v58 }
 0x1f9   : > { %1402 = vtanh.f32 %v1044_v46  ;;  %vm741_vm6 = vcmp.lt.s32.totalorder %v717_v38, 15 }
 0x1fa   : > { %1404 = vtanh.f32 %v1045_v47  ;;  %v1040_v51 = vpop.xlane.xlu1 %1039  ;;  %v1043_v52 = vpop.xlane.xlu0 %1042  ;;  %vm1911_vm10 = vmand %vm1889_vm5, %vm741_vm6 }
 0x1fb   : > { %v1046_v54 = vadd.f32 %v1040_v51, %v1004_v39  ;;  %v1047_v55 = vadd.f32 %v1043_v52, %v1007_v40 }
 0x1fd   : > { %1406 = vtanh.f32 %v1046_v54 }
 0x1fe   : > { %1408 = vtanh.f32 %v1047_v55  ;;  %v1122_v59 = vpop.xlane.xlu1 %1121  ;;  %v1125_v60 = vpop.xlane.xlu0 %1124 }
 0x202   : > { %v1128_v9 = vpop.xlane.xlu1 %1127  ;;  %v1131_v50 = vpop.xlane.xlu0 %1130 }
 0x203   : > { %v1403_v7 = vpop.eup %1402 }
 0x204   : > { %v1405_v22 = vpop.eup %1404  ;;  %v1052_v35 = vmul.f32 %v1403_v7, %v1625_v61  ;;  %v1053_v39 = vmul.f32 %v1403_v7, %v1628_v62 }
 0x205   : > { %v1054_v42 = vmul.f32 %v1405_v22, %v1640_v5  ;;  %v1055_v43 = vmul.f32 %v1405_v22, %v1643_v6 }
 0x206   : > { %1060 = vst [vmem:[%s1857_s25] sm:$0xff] %v1052_v35  ;;  %1061 = vst [vmem:[%s1857_s25 + $0x8] sm:$0xff] %v1053_v39  ;;  %v1158_v61 = vpop.xlane.xlu1 %1157  ;;  %v1161_v46 = vpop.xlane.xlu0 %1160 }
 0x207   : > { %v1407_v47 = vpop.eup %1406  ;;  %1062 = vst [vmem:[%s1857_s25 + $0x20] sm:$0xff] %v1054_v42  ;;  %1063 = vst [vmem:[%s1857_s25 + $0x28] sm:$0xff] %v1055_v43  ;;  %v1168_v5 = vadd.f32 %v1158_v61, %v1122_v59  ;;  %v1169_v6 = vadd.f32 %v1161_v46, %v1125_v60 }
 0x208   : > { %v1409_v49 = vpop.eup %1408  ;;  %v1056_v27 = vmul.f32 %v1407_v47, %v1657_v14  ;;  %v1057_v51 = vmul.f32 %v1407_v47, %v1660_v15 }
 0x209   : > { %v1058_v53 = vmul.f32 %v1409_v49, %v1687_v36  ;;  %v1059_v54 = vmul.f32 %v1409_v49, %v1690_v37  ;;  %1410 = vtanh.f32 %v1168_v5 }
 0x20a   : > { %1064 = vst [vmem:[%s1857_s25 + $0x40] sm:$0xff] %v1056_v27  ;;  %1065 = vst [vmem:[%s1857_s25 + $0x48] sm:$0xff] %v1057_v51  ;;  %1412 = vtanh.f32 %v1169_v6  ;;  %v1164_v14 = vpop.xlane.xlu1 %1163  ;;  %v1167_v15 = vpop.xlane.xlu0 %1166 }
 0x20b   : > { %1066 = vst [vmem:[%s1857_s25 + $0x60] sm:$0xff] %v1058_v53  ;;  %1067 = vst [vmem:[%s1857_s25 + $0x68] sm:$0xff] %v1059_v54  ;;  %v1170_v36 = vadd.f32 %v1164_v14, %v1128_v9  ;;  %v1171_v37 = vadd.f32 %v1167_v15, %v1131_v50 }
 0x20d   : > { %1414 = vtanh.f32 %v1170_v36 }
 0x20e   : > { %1416 = vtanh.f32 %v1171_v37  ;;  %v759_v58 = vpop.permute.xlu1 %758 }
 0x20f   : > { %v776_v59 = vsel %vm1881_vm4, %v759_v58, 0.0  ;;  %v778_v60 = vsel %vm1902_vm9, %v759_v58, 0.0  ;;  %v777_v63 = vsel %vm1911_vm10, %v759_v58, 0.0  ;;  %v779_v0 = vsel %vm1915_vm11, %v759_v58, 0.0 }
 0x210   : > { %v847_v2 = vadd.f32 %v1821_v11, %v776_v59  ;;  %v900_v8 = vadd.f32 %v1825_v17, %v778_v60  ;;  %v849_v9 = vadd.f32 %v1823_v16, %v777_v63  ;;  %v902_v50 = vadd.f32 %v1829_v19, %v779_v0 }
 0x212   : > { %1192 = vst [vmem:[%s1857_s25 + $0x80] sm:$0xff] %v847_v2  ;;  %1194 = vst [vmem:[%s1857_s25 + $0x90] sm:$0xff] %v900_v8  ;;  %v769_v1 = vpop.permute.xlu1 %768  ;;  %v764_v7 = vpop.permute.xlu0 %763 }
 0x213   : > { %1193 = vst [vmem:[%s1857_s25 + $0x88] sm:$0xff] %v849_v9  ;;  %1195 = vst [vmem:[%s1857_s25 + $0x98] sm:$0xff] %v902_v50  ;;  %v1411_v10 = vpop.eup %1410  ;;  %v784_v38 = vsel %vm1881_vm4, %v769_v1, 0.0  ;;  %v786_v11 = vsel %vm1902_vm9, %v769_v1, 0.0  ;;  %v780_v16 = vsel %vm1881_vm4, %v764_v7, 0.0  ;;  %v781_v17 = vsel %vm1911_vm10, %v764_v7, 0.0 }
 0x214   : > { %v1413_v19 = vpop.eup %1412  ;;  %v1176_v22 = vmul.f32 %v1411_v10, %v1634_v3  ;;  %v1177_v35 = vmul.f32 %v1411_v10, %v1637_v4  ;;  %v857_v39 = vadd.f32 %v1837_v25, %v784_v38  ;;  %v910_v40 = vadd.f32 %v1841_v30, %v786_v11 }
 0x215   : > { %v1178_v41 = vmul.f32 %v1413_v19, %v1651_v12  ;;  %v1179_v42 = vmul.f32 %v1413_v19, %v1654_v13  ;;  %v782_v43 = vsel %vm1902_vm9, %v764_v7, 0.0  ;;  %v783_v61 = vsel %vm1915_vm11, %v764_v7, 0.0 }
 0x216   : > { %1184 = vst [vmem:[%s1857_s25 + $0x10] sm:$0xff] %v1176_v22  ;;  %1185 = vst [vmem:[%s1857_s25 + $0x18] sm:$0xff] %v1177_v35  ;;  %v851_v3 = vadd.f32 %v1827_v18, %v780_v16  ;;  %v853_v4 = vadd.f32 %v1831_v20, %v781_v17  ;;  %v904_v12 = vadd.f32 %v1833_v21, %v782_v43  ;;  %v774_v25 = vpop.permute.xlu1 %773  ;;  %v785_v46 = vsel %vm1911_vm10, %v769_v1, 0.0 }
 0x217   : > { %1200 = vst [vmem:[%s1857_s25 + $0xc0] sm:$0xff] %v857_v39  ;;  %1202 = vst [vmem:[%s1857_s25 + $0xd0] sm:$0xff] %v910_v40  ;;  %v906_v13 = vadd.f32 %v1835_v24, %v783_v61  ;;  %v1415_v30 = vpop.eup %1414  ;;  %v787_v62 = vsel %vm1915_vm11, %v769_v1, 0.0  ;;  %v788_v18 = vsel %vm1881_vm4, %v774_v25, 0.0  ;;  %v789_v20 = vsel %vm1911_vm10, %v774_v25, 0.0 }
 0x218   : > { %1186 = vst [vmem:[%s1857_s25 + $0x30] sm:$0xff] %v1178_v41  ;;  %1187 = vst [vmem:[%s1857_s25 + $0x38] sm:$0xff] %v1179_v42  ;;  %v1417_v21 = vpop.eup %1416  ;;  %v1180_v24 = vmul.f32 %v1415_v30, %v1675_v28  ;;  %v1181_v47 = vmul.f32 %v1415_v30, %v1678_v29  ;;  %v859_v5 = vadd.f32 %v1839_v26, %v785_v46  ;;  %v790_v28 = vsel %vm1902_vm9, %v774_v25, 0.0 }
 0x219   : > { %1196 = vst [vmem:[%s1857_s25 + $0xa0] sm:$0xff] %v851_v3  ;;  %1197 = vst [vmem:[%s1857_s25 + $0xa8] sm:$0xff] %v853_v4  ;;  %v912_v6 = vadd.f32 %v1845_v31, %v787_v62  ;;  %v1182_v48 = vmul.f32 %v1417_v21, %v1701_v44  ;;  %v1183_v49 = vmul.f32 %v1417_v21, %v1704_v45  ;;  %v791_v29 = vsel %vm1915_vm11, %v774_v25, 0.0 }
 0x21a   : > { %1198 = vst [vmem:[%s1857_s25 + $0xb0] sm:$0xff] %v904_v12  ;;  %1199 = vst [vmem:[%s1857_s25 + $0xb8] sm:$0xff] %v906_v13  ;;  %v861_v26 = vadd.f32 %v1843_v23, %v788_v18  ;;  %v863_v31 = vadd.f32 %v1847_v32, %v789_v20  ;;  %v914_v44 = vadd.f32 %v1849_v33, %v790_v28 }
 0x21b   : > { %1188 = vst [vmem:[%s1857_s25 + $0x50] sm:$0xff] %v1180_v24  ;;  %1189 = vst [vmem:[%s1857_s25 + $0x58] sm:$0xff] %v1181_v47  ;;  %v916_v27 = vadd.f32 %v1851_v34, %v791_v29 }
 0x21c   : > { %1201 = vst [vmem:[%s1857_s25 + $0xc8] sm:$0xff] %v859_v5  ;;  %1203 = vst [vmem:[%s1857_s25 + $0xd8] sm:$0xff] %v912_v6 }
 0x21d   : > { %1190 = vst [vmem:[%s1857_s25 + $0x70] sm:$0xff] %v1182_v48  ;;  %1191 = vst [vmem:[%s1857_s25 + $0x78] sm:$0xff] %v1183_v49 }
 0x21e   : > { %1204 = vst [vmem:[%s1857_s25 + $0xe0] sm:$0xff] %v861_v26  ;;  %1205 = vst [vmem:[%s1857_s25 + $0xe8] sm:$0xff] %v863_v31 }
 0x21f   : > { %1206 = vst [vmem:[%s1857_s25 + $0xf0] sm:$0xff] %v914_v44  ;;  %1207 = vst [vmem:[%s1857_s25 + $0xf8] sm:$0xff] %v916_v27 }
 0x220 PF: > { %s16_s21 = sadd.s32 1, %s1424_s21  }
 0x221   : > { %p13_p4 = scmp.ge.s32.totalorder %s16_s21, 4  }
 0x223   :  { %15 = sbr.rel (!%p13_p4) target bundleno = 1 (0x1), region = 77 }

// kernel: decoder_forward.3
= control target key start
LH: loop header
LB: loop body
LE: loop exit
PB: predicated region body
PF: predicated region fallthrough
CT: control target
= control target key end

     0   :  { %s4076_s30 = smov 0   ;;  %s9700_s0 = inlined_call_operand.vmem [shape: f32[2,64,512], index: 0, kind: input, shape index: {}]   ;;  %s9701_s1 = inlined_call_operand.vmem [shape: bf16[32,64], index: 1, kind: input, shape index: {}]   ;;  %s9702_s2 = inlined_call_operand.vmem [shape: f32[32,1], index: 2, kind: input, shape index: {}]   ;;  %s9703_s3 = inlined_call_operand.vmem [shape: f32[32,9], index: 3, kind: input, shape index: {}]   ;;  %s9704_s4 = inlined_call_operand.vmem [shape: f32[32,1], index: 4, kind: input, shape index: {}]   ;;  %s9705_s5 = inlined_call_operand.vmem [shape: bf16[32,32], index: 5, kind: input, shape index: {}]   ;;  %s9706_s6 = inlined_call_operand.vmem [shape: f32[32,9], index: 6, kind: input, shape index: {}]   ;;  %s9707_s7 = inlined_call_operand.vmem [shape: f32[32,1], index: 7, kind: input, shape index: {}]   ;;  %s9708_s8 = inlined_call_operand.vmem [shape: f32[14,7], index: 8, kind: input, shape index: {}]   ;;  %s9709_s9 = inlined_call_operand.vmem [shape: f32[2,32,512], index: 9, kind: output, shape index: {}]  }
   0x1 LB: > { %s3817_s10 = sadd.s32 4294967295, %s3999_s30   ;;  %p3821_p0 = scmp.ge.s32.totalorder %s3999_s30, 1  ;;  %s3999_s30 = sphi %s4076_s30, %s19_s30  }
   0x2   : > { %p287_p1 = scmp.lt.s32.totalorder %s3999_s30, 3 }
   0x4   : > { %p288_p2 = pnand %p3821_p0, %p287_p1 }
   0x6   : > { %291 = sbr.rel (%p288_p2) target bundleno = 1901 (0x76d), region = 56 }
   0xd   : > { %p323_p3 = scmp.lt.s32.totalorder %s3817_s10, 1  ;;  %v9722_v0 = vmov 0   ;;  %v469_v1 = vld [vmem:[%s9702_s2 + $0x10] sm:$0xff]  ;;  %v470_v2 = vld [vmem:[%s9702_s2 + $0x18] sm:$0xff]  ;;  %v467_v3 = vld [vmem:[%s9702_s2] sm:$0xff]  ;;  %v9714_v41 = vmov 4  }
   0xe   : > { %540 = vmatprep.mubr.bf16.mxu0 %v9722_v0  ;;  %593 = vmatprep.mubr.bf16.mxu1 %v9722_v0  ;;  %v468_v4 = vld [vmem:[%s9702_s2 + $0x8] sm:$0xff]  ;;  %v4135_v31 = vld [vmem:[%s9703_s3 + $0x18] sm:$0xff]  ;;  %v9720_v56 = vmov 1   ;;  %v3921_v57 = vld [vmem:[%s9701_s1] sm:$0xff]   ;;  %vm501_vm0 = vcmask 523264   ;;  %v9712_v60 = vmov 5  }
   0xf   : > { %s11646_s10 = smov (!%p323_p3, %s3817_s10), 1  ;;  %3876 = vset.pattern.permute.xlu1 %v9722_v0  ;;  %3875 = vset.pattern.permute.xlu0 %v9722_v0  ;;  %v4114_v8 = vld [vmem:[%s9703_s3 + $0x8] sm:$0xff]  ;;  %v4162_v58 = vld [vmem:[%s9703_s3 + $0x10] sm:$0xff]  ;;  %v4171_v59 = vld [vmem:[%s9703_s3] sm:$0xff]  ;;  %v9718_v61 = vmov 2   ;;  %v9716_v63 = vmov 3  }
  0x10   : > { %483 = vperm.xlu1 %3876, %v469_v1   ;;  %s3840_s17 = sshll.u32 %s11646_s10, 8  ;;  %473 = vperm.xlu0 %3875, %v467_v3   ;;  %v3922_v62 = vld [vmem:[%s9701_s1 + $0x8] sm:$0xff]   ;;  %s4007_s16 = smov 15  }
  0x11   : > { %s4106_s22 = scalar_lea.vmem %s9700_s0, %s3840_s17  ;;  %s4008_s17 = smov 17  }
  0x12   : > { %v416_v5 = vld [vmem:[%s4106_s22 + $0x8] sm:$0xff]  ;;  %v418_v7 = vld [vmem:[%s4106_s22 + $0x18] sm:$0xff]  ;;  %v415_v11 = vld [vmem:[%s4106_s22] sm:$0xff]  ;;  %s4009_s18 = smov 113   ;;  %s4010_s19 = smov 16  }
  0x13   : > { %v420_v6 = vld [vmem:[%s4106_s22 + $0x28] sm:$0xff]  ;;  %v422_v10 = vld [vmem:[%s4106_s22 + $0x38] sm:$0xff]  ;;  %v419_v12 = vld [vmem:[%s4106_s22 + $0x20] sm:$0xff]  ;;  %s4011_s20 = smov 1   ;;  %s4012_s21 = smov 127  }
  0x14   : > { %v452_v9 = vpack.c.bf16 %v420_v6, %v416_v5  ;;  %488 = vperm.xlu1 %3876, %v470_v2   ;;  %v454_v13 = vpack.c.bf16 %v422_v10, %v418_v7  ;;  %v451_v14 = vpack.c.bf16 %v419_v12, %v415_v11  ;;  %v417_v15 = vld [vmem:[%s4106_s22 + $0x10] sm:$0xff]  ;;  %v424_v17 = vld [vmem:[%s4106_s22 + $0x48] sm:$0xff]  ;;  %478 = vperm.xlu0 %3875, %v468_v4   ;;  %v426_v20 = vld [vmem:[%s4106_s22 + $0x58] sm:$0xff]  ;;  %s4016_s23 = smov 111   ;;  %s4019_s25 = smov 32  }
  0x15   : > { %v421_v16 = vld [vmem:[%s4106_s22 + $0x30] sm:$0xff]  ;;  %v428_v19 = vld [vmem:[%s4106_s22 + $0x68] sm:$0xff]  ;;  %v430_v21 = vld [vmem:[%s4106_s22 + $0x78] sm:$0xff]  ;;  %s4020_s26 = smov 96   ;;  %s4023_s27 = smov 2  }
  0x16   : > { %508 = vmatprep.subr.bf16.mxu0 %v452_v9  ;;  %v453_v18 = vpack.c.bf16 %v421_v16, %v417_v15  ;;  %561 = vmatprep.subr.bf16.mxu1 %v454_v13  ;;  %v456_v22 = vpack.c.bf16 %v428_v19, %v424_v17  ;;  %v458_v23 = vpack.c.bf16 %v430_v21, %v426_v20  ;;  %v423_v24 = vld [vmem:[%s4106_s22 + $0x40] sm:$0xff]  ;;  %v425_v26 = vld [vmem:[%s4106_s22 + $0x50] sm:$0xff]  ;;  %v432_v29 = vld [vmem:[%s4106_s22 + $0x88] sm:$0xff]  ;;  %s4024_s28 = smov 126   ;;  %s4025_s29 = smov 125  }
  0x17   : > { %509 = vmatpush1.bf16.msra.mxu0 %v451_v14  ;;  %v427_v25 = vld [vmem:[%s4106_s22 + $0x60] sm:$0xff]  ;;  %v429_v28 = vld [vmem:[%s4106_s22 + $0x70] sm:$0xff]  ;;  %v436_v30 = vld [vmem:[%s4106_s22 + $0xa8] sm:$0xff] }
  0x18   : > { %562 = vmatpush1.bf16.msra.mxu1 %v453_v18  ;;  %v455_v27 = vpack.c.bf16 %v427_v25, %v423_v24  ;;  %726 = vperm.xlu1 %3876, %v4114_v8   ;;  %v457_v32 = vpack.c.bf16 %v429_v28, %v425_v26  ;;  %v460_v33 = vpack.c.bf16 %v436_v30, %v432_v29  ;;  %v434_v34 = vld [vmem:[%s4106_s22 + $0x98] sm:$0xff]  ;;  %v431_v36 = vld [vmem:[%s4106_s22 + $0x80] sm:$0xff]  ;;  %v433_v39 = vld [vmem:[%s4106_s22 + $0x90] sm:$0xff] }
  0x19   : > { %510 = vmatprep.subr.bf16.mxu0 %v456_v22  ;;  %563 = vmatprep.subr.bf16.mxu1 %v458_v23  ;;  %v438_v35 = vld [vmem:[%s4106_s22 + $0xb8] sm:$0xff]  ;;  %v435_v38 = vld [vmem:[%s4106_s22 + $0xa0] sm:$0xff]  ;;  %v437_v40 = vld [vmem:[%s4106_s22 + $0xb0] sm:$0xff] }
  0x1a   : > { %v462_v37 = vpack.c.bf16 %v438_v35, %v434_v34  ;;  %3881 = vset.pattern.permute.xlu0 %v9714_v41  ;;  %v459_v42 = vpack.c.bf16 %v435_v38, %v431_v36  ;;  %v440_v43 = vld [vmem:[%s4106_s22 + $0xc8] sm:$0xff]  ;;  %v442_v45 = vld [vmem:[%s4106_s22 + $0xd8] sm:$0xff]  ;;  %v461_v46 = vpack.c.bf16 %v437_v40, %v433_v39  ;;  %v439_v49 = vld [vmem:[%s4106_s22 + $0xc0] sm:$0xff] }
  0x1b   : > { %511 = vmatpush1.bf16.msra.mxu0 %v455_v27  ;;  %v444_v44 = vld [vmem:[%s4106_s22 + $0xe8] sm:$0xff]  ;;  %1147 = vperm.xlu0 %3881, %v4114_v8   ;;  %v446_v48 = vld [vmem:[%s4106_s22 + $0xf8] sm:$0xff]  ;;  %v443_v50 = vld [vmem:[%s4106_s22 + $0xe0] sm:$0xff] }
  0x1c   : > { %564 = vmatpush1.bf16.msra.mxu1 %v457_v32  ;;  %512 = vmatprep.subr.bf16.mxu0 %v460_v33  ;;  %v464_v47 = vpack.c.bf16 %v444_v44, %v440_v43  ;;  %v466_v51 = vpack.c.bf16 %v446_v48, %v442_v45  ;;  %v441_v52 = vld [vmem:[%s4106_s22 + $0xd0] sm:$0xff]  ;;  %v463_v54 = vpack.c.bf16 %v443_v50, %v439_v49  ;;  %v9710_v50 = vmov 6  }
  0x1d   : > { %565 = vmatprep.subr.bf16.mxu1 %v462_v37  ;;  %v445_v53 = vld [vmem:[%s4106_s22 + $0xf0] sm:$0xff]  ;;  %736 = vperm.xlu1 %3876, %v4135_v31   ;;  %s4014_s22 = smov 112  }
  0x1e   : > { %v465_v55 = vpack.c.bf16 %v445_v53, %v441_v52 }
  0x1f   : > { %513 = vmatpush1.bf16.msra.mxu0 %v459_v42  ;;  %3882 = vset.pattern.permute.xlu0 %v9712_v60 }
  0x20   : > { %566 = vmatpush1.bf16.msra.mxu1 %v461_v46  ;;  %514 = vmatprep.subr.bf16.mxu0 %v464_v47 }
  0x21   : > { %567 = vmatprep.subr.bf16.mxu1 %v466_v51  ;;  %3877 = vset.pattern.permute.xlu1 %v9720_v56 }
  0x22   : > { %833 = vperm.xlu1 %3877, %v4114_v8   ;;  %1240 = vperm.xlu0 %3882, %v4171_v59  }
  0x23   : > { %515 = vmatpush1.bf16.msra.mxu0 %v463_v54 }
  0x24   : > { %568 = vmatpush1.bf16.msra.mxu1 %v465_v55 }
  0x26   : > { %3828 = vmatmul.mubr.msk.bf16.vlgmr.msra.gmra.mrb[0].mxu0 %vm501_vm0, %v3921_v57  ;;  %837 = vperm.xlu1 %3877, %v4162_v58  }
  0x27   : > { %3830 = vmatmul.mubr.msk.bf16.vlgmr.msra.gmra.mrb[0].mxu1 %vm501_vm0, %v3921_v57  ;;  %550 = vmatprep.mubr.bf16.mxu0 %v9722_v0 }
  0x28   : > { %603 = vmatprep.mubr.bf16.mxu1 %v9722_v0  ;;  %1252 = vperm.xlu0 %3882, %v4135_v31  }
  0x2a   : > { %3878 = vset.pattern.permute.xlu1 %v9718_v61 }
  0x2b   : > { %950 = vperm.xlu1 %3878, %v4171_v59  }
  0x2c   : > { %3885 = vset.pattern.permute.xlu0 %v9710_v50 }
  0x2e   : > { %3829 = vmatmul.mubr.msk.bf16.gmra.mrb[4].mxu0 %vm501_vm0, %v3922_v62 }
  0x2f   : > { %958 = vperm.xlu1 %3878, %v4162_v58   ;;  %3831 = vmatmul.mubr.msk.bf16.gmra.mrb[4].mxu1 %vm501_vm0, %v3922_v62 }
  0x30   : > { %1787 = vmatprep.mubr.bf16.mxu0 %v9722_v0  ;;  %1840 = vmatprep.mubr.bf16.mxu1 %v9722_v0 }
  0x33   : > { %962 = vperm.xlu1 %3878, %v4135_v31  }
  0x37   : > { %3879 = vset.pattern.permute.xlu1 %v9716_v63 }
  0x38   : > { %1075 = vperm.xlu1 %3879, %v4114_v8  }
  0x3c   : > { %1079 = vperm.xlu1 %3879, %v4162_v58  }
  0x40   : > { %3880 = vset.pattern.permute.xlu1 %v9714_v41 }
  0x41   : > { %1143 = vperm.xlu1 %3880, %v4171_v59  }
  0x45   : > { %1151 = vperm.xlu1 %3880, %v4162_v58  }
  0x49   : > { %1155 = vperm.xlu1 %3880, %v4135_v31  }
  0x4d   : > { %3883 = vset.pattern.permute.xlu1 %v9712_v60 }
  0x4e   : > { %1244 = vperm.xlu1 %3883, %v4114_v8  }
  0x52   : > { %1248 = vperm.xlu1 %3883, %v4162_v58  }
  0x56   : > { %3884 = vset.pattern.permute.xlu1 %v9710_v50 }
  0x8f   : > { %v474_v1 = vpop.permute.xlu0 %473  ;;  %v4250_v32 = vpop.permute.xlu1 %483 }
  0x93   : > { %v479_v33 = vpop.permute.xlu0 %478  ;;  %v4256_v37 = vpop.permute.xlu1 %488 }
  0x97   : > { %v4268_v40 = vpop.permute.xlu1 %726 }
  0x98   : > { %10185 = vst [vmem:[#allocation2_spill] sm:$0xff] %v4268_v40 }
  0x9c   : > { %v4276_v43 = vpop.permute.xlu1 %736 }
  0x9d   : > { %10186 = vst [vmem:[#allocation3_spill] sm:$0xff] %v4276_v43 }
  0xa1   : > { %v4286_v44 = vpop.permute.xlu1 %833 }
  0xa2   : > { %10187 = vst [vmem:[#allocation4_spill] sm:$0xff] %v4286_v44 }
  0xa5   : > { %v4292_v45 = vpop.permute.xlu1 %837 }
  0xa6   : > { %10188 = vst [vmem:[#allocation5_spill] sm:$0xff] %v4292_v45 }
  0xaa   : > { %v4303_v47 = vpop.permute.xlu1 %950 }
  0xae   : > { %v4314_v53 = vpop.permute.xlu1 %958 }
  0xaf   : > { %10189 = vst [vmem:[#allocation6_spill] sm:$0xff] %v4314_v53 }
  0xb2   : > { %v4326_v55 = vpop.permute.xlu1 %962 }
  0xb3   : > { %10190 = vst [vmem:[#allocation7_spill] sm:$0xff] %v4326_v55 }
  0xb7   : > { %v4332_v57 = vpop.permute.xlu1 %1075 }
  0xb8   : > { %10191 = vst [vmem:[#allocation8_spill] sm:$0xff] %v4332_v57 }
  0xbb   : > { %v4342_v62 = vpop.permute.xlu1 %1079 }
  0xbc   : > { %10192 = vst [vmem:[#allocation9_spill] sm:$0xff] %v4342_v62 }
  0xf9   : > { %v542_v2 = vpop.f32.mrb[0].mxu0 }
  0xfa   : > { %v543_v3 = vadd.f32 %v542_v2, %v474_v1  ;;  %v595_v4 = vpop.f32.mrb[0].mxu1  ;;  %v544_v5 = vpop.f32.mrb[1].mxu0 }
  0xfb   : > { %v596_v6 = vadd.f32 %v595_v4, %v474_v1  ;;  %v597_v7 = vpop.f32.mrb[1].mxu1  ;;  %v546_v9 = vpop.f32.mrb[2].mxu0  ;;  %v545_v24 = vadd.f32 %v544_v5, %v474_v1 }
  0xfc   : > { %vm614_vm1 = vcmp.gt.f32.partialorder %v543_v3, 0.0  ;;  %v630_v10 = vmul.f32 0.01, %v543_v3  ;;  %v599_v11 = vpop.f32.mrb[2].mxu1  ;;  %v4198_v12 = vpop.f32.mrb[3].mxu0  ;;  %v598_v27 = vadd.f32 %v597_v7, %v474_v1  ;;  %v547_v34 = vadd.f32 %v546_v9, %v479_v33 }
  0xfd   : > { %v632_v14 = vmul.f32 0.01, %v596_v6  ;;  %v4202_v15 = vpop.f32.mrb[3].mxu1  ;;  %vm616_vm2 = vcmp.gt.f32.partialorder %v596_v6, 0.0  ;;  %v631_v26 = vmul.f32 0.01, %v545_v24  ;;  %v600_v36 = vadd.f32 %v599_v11, %v479_v33  ;;  %v4350_v2 = vpop.permute.xlu1 %1143 }
  0xfe   : > { %v4200_v13 = vsel %vm614_vm1, %v543_v3, %v630_v10  ;;  %vm615_vm3 = vcmp.gt.f32.partialorder %v545_v24, 0.0  ;;  %v633_v29 = vmul.f32 0.01, %v598_v27  ;;  %vm617_vm4 = vcmp.gt.f32.partialorder %v598_v27, 0.0  ;;  %v4370_v9 = vpop.permute.xlu0 %1147 }
  0xff   : > { %900 = vrot.lane.b32.xlu1 %v4200_v13, %s4007_s16  ;;  %670 = vrot.lane.b32.xlu0 %v4200_v13, %s4008_s17  ;;  %v4210_v17 = vsel %vm616_vm2, %v596_v6, %v632_v14  ;;  %v4238_v28 = vsel %vm615_vm3, %v545_v24, %v631_v26  ;;  %v634_v35 = vmul.f32 0.01, %v547_v34  ;;  %vm618_vm5 = vcmp.gt.f32.partialorder %v547_v34, 0.0 }
 0x100   : > { %v4244_v30 = vsel %vm617_vm4, %v598_v27, %v633_v29  ;;  %v636_v39 = vmul.f32 0.01, %v600_v36  ;;  %vm620_vm6 = vcmp.gt.f32.partialorder %v600_v36, 0.0  ;;  %v549_v46 = vadd.f32 %v4198_v12, %v479_v33 }
 0x101   : > { %v4208_v16 = vpop.f32.mrb[4].mxu0  ;;  %v4262_v38 = vsel %vm618_vm5, %v547_v34, %v634_v35  ;;  %v602_v49 = vadd.f32 %v4202_v15, %v479_v33  ;;  %v4358_v5 = vpop.permute.xlu1 %1151 }
 0x102   : > { %v4214_v18 = vpop.f32.mrb[4].mxu1  ;;  %v4216_v19 = vpop.f32.mrb[5].mxu0  ;;  %v4270_v42 = vsel %vm620_vm6, %v600_v36, %v636_v39  ;;  %v635_v48 = vmul.f32 0.01, %v549_v46  ;;  %vm619_vm7 = vcmp.gt.f32.partialorder %v549_v46, 0.0  ;;  %v553_v1 = vadd.f32 %v4208_v16, %v4250_v32 }
 0x103   : > { %916 = vrot.lane.b32.xlu1 %v4210_v17, %s4007_s16  ;;  %686 = vrot.lane.b32.xlu0 %v4210_v17, %s4008_s17  ;;  %v4220_v20 = vpop.f32.mrb[5].mxu1  ;;  %v4222_v21 = vpop.f32.mrb[6].mxu0  ;;  %v637_v52 = vmul.f32 0.01, %v602_v49  ;;  %vm621_vm8 = vcmp.gt.f32.partialorder %v602_v49, 0.0  ;;  %v606_v4 = vadd.f32 %v4214_v18, %v4250_v32  ;;  %v555_v15 = vadd.f32 %v4216_v19, %v4250_v32 }
 0x104   : > { %v4224_v22 = vpop.f32.mrb[6].mxu1  ;;  %v4226_v23 = vpop.f32.mrb[7].mxu0  ;;  %v4312_v51 = vsel %vm619_vm7, %v549_v46, %v635_v48  ;;  %v638_v3 = vmul.f32 0.01, %v553_v1  ;;  %vm622_vm9 = vcmp.gt.f32.partialorder %v553_v1, 0.0  ;;  %v608_v18 = vadd.f32 %v4220_v20, %v4250_v32 }
 0x105   : > { %v4228_v25 = vpop.f32.mrb[7].mxu1  ;;  %v4320_v54 = vsel %vm621_vm8, %v602_v49, %v637_v52  ;;  %v640_v7 = vmul.f32 0.01, %v606_v4  ;;  %vm624_vm10 = vcmp.gt.f32.partialorder %v606_v4, 0.0  ;;  %v4372_v10 = vpop.permute.xlu1 %1155  ;;  %v639_v16 = vmul.f32 0.01, %v555_v15 }
 0x106   : > { %v4364_v6 = vsel %vm622_vm9, %v553_v1, %v638_v3  ;;  %v4382_v14 = vpop.permute.xlu0 %1240  ;;  %vm623_vm11 = vcmp.gt.f32.partialorder %v555_v15, 0.0  ;;  %v641_v27 = vmul.f32 0.01, %v608_v18  ;;  %vm625_vm12 = vcmp.gt.f32.partialorder %v608_v18, 0.0 }
 0x107   : > { %1311 = vrot.lane.b32.xlu1 %v4200_v13, %s4009_s18  ;;  %779 = vrot.lane.b32.xlu0 %v4200_v13, %s4010_s19  ;;  %v4374_v11 = vsel %vm624_vm10, %v606_v4, %v640_v7  ;;  %10194 = vst [vmem:[#allocation11_spill] sm:$0xff] %v4382_v14  ;;  %v4400_v19 = vsel %vm623_vm11, %v555_v15, %v639_v16 }
 0x108   : > { %v4410_v32 = vsel %vm625_vm12, %v608_v18, %v641_v27  ;;  %v557_v34 = vadd.f32 %v4222_v21, %v4256_v37  ;;  %v610_v46 = vadd.f32 %v4224_v22, %v4256_v37  ;;  %v559_v50 = vadd.f32 %v4226_v23, %v4256_v37 }
 0x109   : > { %v4380_v12 = vpop.permute.xlu1 %1244  ;;  %v612_v61 = vadd.f32 %v4228_v25, %v4256_v37 }
 0x10a   : > { %10193 = vst [vmem:[#allocation10_spill] sm:$0xff] %v4380_v12  ;;  %v4396_v26 = vpop.permute.xlu0 %1252  ;;  %v642_v39 = vmul.f32 0.01, %v557_v34  ;;  %vm626_vm13 = vcmp.gt.f32.partialorder %v557_v34, 0.0  ;;  %v644_v52 = vmul.f32 0.01, %v610_v46 }
 0x10b   : > { %1327 = vrot.lane.b32.xlu1 %v4210_v17, %s4009_s18  ;;  %795 = vrot.lane.b32.xlu0 %v4210_v17, %s4010_s19  ;;  %10196 = vst [vmem:[#allocation13_spill] sm:$0xff] %v4396_v26  ;;  %vm628_vm14 = vcmp.gt.f32.partialorder %v610_v46, 0.0  ;;  %v643_v63 = vmul.f32 0.01, %v559_v50  ;;  %vm627_vm15 = vcmp.gt.f32.partialorder %v559_v50, 0.0  ;;  %vm629_vm0 = vcmp.gt.f32.partialorder %v612_v61, 0.0 }
 0x10c   : > { %v4438_v49 = vsel %vm626_vm13, %v557_v34, %v642_v39  ;;  %v4448_v3 = vsel %vm628_vm14, %v610_v46, %v644_v52  ;;  %v645_v26 = vmul.f32 0.01, %v612_v61 }
 0x10d   : > { %v4394_v24 = vpop.permute.xlu1 %1248  ;;  %v4510_v0 = vsel %vm627_vm15, %v559_v50, %v643_v63 }
 0x10e   : > { %10195 = vst [vmem:[#allocation12_spill] sm:$0xff] %v4394_v24  ;;  %v4520_v37 = vsel %vm629_vm0, %v612_v61, %v645_v26 }
 0x10f   : > { %908 = vrot.lane.b32.xlu1 %v4238_v28, %s4007_s16  ;;  %1021 = vrot.lane.b32.xlu0 %v4200_v13, %s4011_s20 }
 0x113   : > { %924 = vrot.lane.b32.xlu1 %v4244_v30, %s4007_s16  ;;  %1037 = vrot.lane.b32.xlu0 %v4210_v17, %s4011_s20 }
 0x117   : > { %1319 = vrot.lane.b32.xlu1 %v4238_v28, %s4009_s18  ;;  %1190 = vrot.lane.b32.xlu0 %v4200_v13, %s4012_s21 }
 0x11b   : > { %1335 = vrot.lane.b32.xlu1 %v4244_v30, %s4009_s18  ;;  %1206 = vrot.lane.b32.xlu0 %v4210_v17, %s4012_s21 }
 0x11f   : > { %672 = vrot.lane.b32.xlu1 %v4262_v38, %s4008_s17  ;;  %678 = vrot.lane.b32.xlu0 %v4238_v28, %s4008_s17 }
 0x123   : > { %688 = vrot.lane.b32.xlu1 %v4270_v42, %s4008_s17  ;;  %694 = vrot.lane.b32.xlu0 %v4244_v30, %s4008_s17 }
 0x127   : > { %781 = vrot.lane.b32.xlu1 %v4262_v38, %s4010_s19  ;;  %787 = vrot.lane.b32.xlu0 %v4238_v28, %s4010_s19 }
 0x12b   : > { %797 = vrot.lane.b32.xlu1 %v4270_v42, %s4010_s19  ;;  %803 = vrot.lane.b32.xlu0 %v4244_v30, %s4010_s19 }
 0x12f   : > { %1023 = vrot.lane.b32.xlu1 %v4262_v38, %s4011_s20  ;;  %1029 = vrot.lane.b32.xlu0 %v4238_v28, %s4011_s20 }
 0x133   : > { %1039 = vrot.lane.b32.xlu1 %v4270_v42, %s4011_s20  ;;  %1045 = vrot.lane.b32.xlu0 %v4244_v30, %s4011_s20 }
 0x137   : > { %1192 = vrot.lane.b32.xlu1 %v4262_v38, %s4012_s21  ;;  %1198 = vrot.lane.b32.xlu0 %v4238_v28, %s4012_s21 }
 0x13b   : > { %1208 = vrot.lane.b32.xlu1 %v4270_v42, %s4012_s21  ;;  %1214 = vrot.lane.b32.xlu0 %v4244_v30, %s4012_s21 }
 0x13f   : > { %680 = vrot.lane.b32.xlu1 %v4312_v51, %s4008_s17  ;;  %902 = vrot.lane.b32.xlu0 %v4262_v38, %s4007_s16 }
 0x143   : > { %696 = vrot.lane.b32.xlu1 %v4320_v54, %s4008_s17  ;;  %918 = vrot.lane.b32.xlu0 %v4270_v42, %s4007_s16 }
 0x147   : > { %789 = vrot.lane.b32.xlu1 %v4312_v51, %s4010_s19  ;;  %1313 = vrot.lane.b32.xlu0 %v4262_v38, %s4009_s18 }
 0x14b   : > { %805 = vrot.lane.b32.xlu1 %v4320_v54, %s4010_s19  ;;  %1329 = vrot.lane.b32.xlu0 %v4270_v42, %s4009_s18 }
 0x14f   : > { %1031 = vrot.lane.b32.xlu1 %v4312_v51, %s4011_s20  ;;  %910 = vrot.lane.b32.xlu0 %v4312_v51, %s4007_s16 }
 0x153   : > { %1047 = vrot.lane.b32.xlu1 %v4320_v54, %s4011_s20  ;;  %926 = vrot.lane.b32.xlu0 %v4320_v54, %s4007_s16 }
 0x157   : > { %1200 = vrot.lane.b32.xlu1 %v4312_v51, %s4012_s21  ;;  %1321 = vrot.lane.b32.xlu0 %v4312_v51, %s4009_s18 }
 0x15b   : > { %1216 = vrot.lane.b32.xlu1 %v4320_v54, %s4012_s21  ;;  %1337 = vrot.lane.b32.xlu0 %v4320_v54, %s4009_s18 }
 0x15f   : > { %904 = vrot.lane.b32.xlu1 %v4364_v6, %s4007_s16  ;;  %674 = vrot.lane.b32.xlu0 %v4364_v6, %s4008_s17 }
 0x163   : > { %920 = vrot.lane.b32.xlu1 %v4374_v11, %s4007_s16  ;;  %690 = vrot.lane.b32.xlu0 %v4374_v11, %s4008_s17 }
 0x167   : > { %1315 = vrot.lane.b32.xlu1 %v4364_v6, %s4009_s18  ;;  %783 = vrot.lane.b32.xlu0 %v4364_v6, %s4010_s19 }
 0x16b   : > { %1331 = vrot.lane.b32.xlu1 %v4374_v11, %s4009_s18  ;;  %799 = vrot.lane.b32.xlu0 %v4374_v11, %s4010_s19 }
 0x16f   : > { %912 = vrot.lane.b32.xlu1 %v4400_v19, %s4007_s16  ;;  %1025 = vrot.lane.b32.xlu0 %v4364_v6, %s4011_s20 }
 0x171   : > { %v4406_v20 = vpop.permute.xlu1 %900  ;;  %v4408_v29 = vpop.permute.xlu0 %670 }
 0x173   : > { %928 = vrot.lane.b32.xlu1 %v4410_v32, %s4007_s16  ;;  %1041 = vrot.lane.b32.xlu0 %v4374_v11, %s4011_s20 }
 0x175   : > { %v4416_v33 = vpop.permute.xlu1 %916  ;;  %v4420_v35 = vpop.permute.xlu0 %686 }
 0x177   : > { %1323 = vrot.lane.b32.xlu1 %v4400_v19, %s4009_s18  ;;  %1194 = vrot.lane.b32.xlu0 %v4364_v6, %s4012_s21 }
 0x179   : > { %v4426_v36 = vpop.permute.xlu1 %1311  ;;  %v4430_v48 = vpop.permute.xlu0 %779 }
 0x17b   : > { %1339 = vrot.lane.b32.xlu1 %v4410_v32, %s4009_s18  ;;  %1210 = vrot.lane.b32.xlu0 %v4374_v11, %s4012_s21 }
 0x17d   : > { %v4436_v21 = vpop.permute.xlu1 %1327  ;;  %v4440_v1 = vpop.permute.xlu0 %795 }
 0x17f   : > { %676 = vrot.lane.b32.xlu1 %v4438_v49, %s4008_s17  ;;  %682 = vrot.lane.b32.xlu0 %v4400_v19, %s4008_s17 }
 0x181   : > { %v4446_v22 = vpop.permute.xlu1 %908  ;;  %v4450_v4 = vpop.permute.xlu0 %1021 }
 0x182   : > { %10197 = vst [vmem:[#allocation14_spill] sm:$0xff] %v4450_v4 }
 0x183   : > { %692 = vrot.lane.b32.xlu1 %v4448_v3, %s4008_s17  ;;  %698 = vrot.lane.b32.xlu0 %v4410_v32, %s4008_s17 }
 0x185   : > { %v4456_v7 = vpop.permute.xlu1 %924  ;;  %v4458_v15 = vpop.permute.xlu0 %1037 }
 0x186   : > { %10198 = vst [vmem:[#allocation15_spill] sm:$0xff] %v4458_v15 }
 0x187   : > { %785 = vrot.lane.b32.xlu1 %v4438_v49, %s4010_s19  ;;  %791 = vrot.lane.b32.xlu0 %v4400_v19, %s4010_s19 }
 0x189   : > { %v4464_v16 = vpop.permute.xlu1 %1319  ;;  %v4466_v18 = vpop.permute.xlu0 %1190 }
 0x18b   : > { %801 = vrot.lane.b32.xlu1 %v4448_v3, %s4010_s19  ;;  %807 = vrot.lane.b32.xlu0 %v4410_v32, %s4010_s19 }
 0x18d   : > { %v4472_v27 = vpop.permute.xlu1 %1335  ;;  %v4474_v34 = vpop.permute.xlu0 %1206 }
 0x18f   : > { %1027 = vrot.lane.b32.xlu1 %v4438_v49, %s4011_s20  ;;  %1033 = vrot.lane.b32.xlu0 %v4400_v19, %s4011_s20 }
 0x191   : > { %v4480_v39 = vpop.permute.xlu1 %672  ;;  %v4482_v46 = vpop.permute.xlu0 %678 }
 0x192   : > { %10199 = vst [vmem:[#allocation16_spill] sm:$0xff] %v4480_v39 }
 0x193   : > { %1043 = vrot.lane.b32.xlu1 %v4448_v3, %s4011_s20  ;;  %1049 = vrot.lane.b32.xlu0 %v4410_v32, %s4011_s20 }
 0x195   : > { %v4488_v52 = vpop.permute.xlu1 %688  ;;  %v4492_v60 = vpop.permute.xlu0 %694 }
 0x196   : > { %10200 = vst [vmem:[#allocation17_spill] sm:$0xff] %v4488_v52  ;;  %v10275_v52 = vmov 3  }
 0x197   : > { %1196 = vrot.lane.b32.xlu1 %v4438_v49, %s4012_s21  ;;  %1202 = vrot.lane.b32.xlu0 %v4400_v19, %s4012_s21 }
 0x199   : > { %v4498_v41 = vpop.permute.xlu1 %781  ;;  %v4502_v56 = vpop.permute.xlu0 %787 }
 0x19a   : > { %10201 = vst [vmem:[#allocation18_spill] sm:$0xff] %v4498_v41 }
 0x19b   : > { %1212 = vrot.lane.b32.xlu1 %v4448_v3, %s4012_s21  ;;  %1218 = vrot.lane.b32.xlu0 %v4410_v32, %s4012_s21 }
 0x19d   : > { %v4508_v23 = vpop.permute.xlu1 %797  ;;  %v4512_v55 = vpop.permute.xlu0 %803 }
 0x19f   : > { %684 = vrot.lane.b32.xlu1 %v4510_v0, %s4008_s17  ;;  %906 = vrot.lane.b32.xlu0 %v4438_v49, %s4007_s16 }
 0x1a1   : > { %v4518_v25 = vpop.permute.xlu1 %1023  ;;  %v4522_v43 = vpop.permute.xlu0 %1029 }
 0x1a2   : > { %10202 = vst [vmem:[#allocation19_spill] sm:$0xff] %v4518_v25  ;;  %10203 = vst [vmem:[#allocation20_spill] sm:$0xff] %v4522_v43  ;;  %v9742_v25 = vmov 7   ;;  %v10269_v43 = vmov 2  }
 0x1a3   : > { %700 = vrot.lane.b32.xlu1 %v4520_v37, %s4008_s17  ;;  %922 = vrot.lane.b32.xlu0 %v4448_v3, %s4007_s16 }
 0x1a5   : > { %v4528_v63 = vpop.permute.xlu1 %1039  ;;  %v4530_v50 = vpop.permute.xlu0 %1045 }
 0x1a6   : > { %10204 = vst [vmem:[#allocation21_spill] sm:$0xff] %v4528_v63  ;;  %10205 = vst [vmem:[#allocation22_spill] sm:$0xff] %v4530_v50 }
 0x1a7   : > { %793 = vrot.lane.b32.xlu1 %v4510_v0, %s4010_s19  ;;  %1317 = vrot.lane.b32.xlu0 %v4438_v49, %s4009_s18 }
 0x1a9   : > { %v4536_v61 = vpop.permute.xlu1 %1192  ;;  %v4538_v26 = vpop.permute.xlu0 %1198 }
 0x1aa   : > { %10206 = vst [vmem:[#allocation23_spill] sm:$0xff] %v4536_v61 }
 0x1ab   : > { %809 = vrot.lane.b32.xlu1 %v4520_v37, %s4010_s19  ;;  %1333 = vrot.lane.b32.xlu0 %v4448_v3, %s4009_s18 }
 0x1ad   : > { %v4544_v24 = vpop.permute.xlu1 %1208  ;;  %v4546_v62 = vpop.permute.xlu0 %1214 }
 0x1ae   : > { %10207 = vst [vmem:[#allocation24_spill] sm:$0xff] %v4544_v24 }
 0x1af   : > { %1035 = vrot.lane.b32.xlu1 %v4510_v0, %s4011_s20  ;;  %914 = vrot.lane.b32.xlu0 %v4510_v0, %s4007_s16 }
 0x1b1   : > { %v4552_v45 = vpop.permute.xlu1 %680  ;;  %v4554_v53 = vpop.permute.xlu0 %902 }
 0x1b2   : > { %10208 = vst [vmem:[#allocation25_spill] sm:$0xff] %v4552_v45  ;;  %10209 = vst [vmem:[#allocation26_spill] sm:$0xff] %v4554_v53 }
 0x1b3   : > { %1051 = vrot.lane.b32.xlu1 %v4520_v37, %s4011_s20  ;;  %930 = vrot.lane.b32.xlu0 %v4520_v37, %s4007_s16 }
 0x1b5   : > { %v4560_v12 = vpop.permute.xlu1 %696  ;;  %v4562_v24 = vpop.permute.xlu0 %918 }
 0x1b6   : > { %10210 = vst [vmem:[#allocation27_spill] sm:$0xff] %v4560_v12  ;;  %10211 = vst [vmem:[#allocation28_spill] sm:$0xff] %v4562_v24 }
 0x1b7   : > { %1204 = vrot.lane.b32.xlu1 %v4510_v0, %s4012_s21  ;;  %1365 = vperm.xlu0 %3885, %v4114_v8  }
 0x1b9   : > { %v4567_v61 = vpop.permute.xlu1 %789  ;;  %v4569_v57 = vpop.permute.xlu0 %1313 }
 0x1ba   : > { %10212 = vst [vmem:[#allocation29_spill] sm:$0xff] %v4569_v57 }
 0x1bb   : > { %1220 = vrot.lane.b32.xlu1 %v4520_v37, %s4012_s21  ;;  %1432 = vrot.lane.b32.xlu0 %v4200_v13, %s4014_s22 }
 0x1bc   : > { %3886 = vset.pattern.permute.xlu0 %v9742_v25 }
 0x1bd   : > { %v4575_v53 = vpop.permute.xlu1 %805  ;;  %v4578_v24 = vpop.permute.xlu0 %1329 }
 0x1be   : > { %10213 = vst [vmem:[#allocation30_spill] sm:$0xff] %v4575_v53  ;;  %10214 = vst [vmem:[#allocation31_spill] sm:$0xff] %v4578_v24 }
 0x1bf   : > { %1361 = vperm.xlu1 %3884, %v4171_v59   ;;  %1436 = vrot.lane.b32.xlu0 %v4364_v6, %s4014_s22 }
 0x1c1   : > { %v4583_v57 = vpop.permute.xlu1 %1031  ;;  %v4585_v63 = vpop.permute.xlu0 %910 }
 0x1c2   : > { %10215 = vst [vmem:[#allocation32_spill] sm:$0xff] %v4583_v57  ;;  %10216 = vst [vmem:[#allocation33_spill] sm:$0xff] %v4585_v63  ;;  %v10221_v63 = vmov 7  }
 0x1c3   : > { %1369 = vperm.xlu1 %3884, %v4162_v58   ;;  %1440 = vrot.lane.b32.xlu0 %v4238_v28, %s4014_s22 }
 0x1c5   : > { %v4590_v50 = vpop.permute.xlu1 %1047  ;;  %v4592_v40 = vpop.permute.xlu0 %926 }
 0x1c6   : > { %10217 = vst [vmem:[#allocation34_spill] sm:$0xff] %v4590_v50  ;;  %10218 = vst [vmem:[#allocation35_spill] sm:$0xff] %v4592_v40 }
 0x1c7   : > { %1373 = vperm.xlu1 %3884, %v4135_v31   ;;  %1444 = vrot.lane.b32.xlu0 %v4400_v19, %s4014_s22 }
 0x1c9   : > { %v4597_v25 = vpop.permute.xlu1 %1200  ;;  %v4599_v24 = vpop.permute.xlu0 %1321 }
 0x1ca   : > { %10219 = vst [vmem:[#allocation36_spill] sm:$0xff] %v4597_v25  ;;  %10220 = vst [vmem:[#allocation37_spill] sm:$0xff] %v4599_v24 }
 0x1cb   : > { %1434 = vrot.lane.b32.xlu1 %v4262_v38, %s4014_s22  ;;  %1325 = vrot.lane.b32.xlu0 %v4510_v0, %s4009_s18 }
 0x1cc   : > { %3887 = vset.pattern.permute.xlu1 %v10221_v63 }
 0x1cd   : > { %v4606_v50 = vpop.permute.xlu1 %1216  ;;  %v4608_v40 = vpop.permute.xlu0 %1337 }
 0x1ce   : > { %10222 = vst [vmem:[#allocation38_spill] sm:$0xff] %v4606_v50  ;;  %10223 = vst [vmem:[#allocation39_spill] sm:$0xff] %v4608_v40 }
 0x1cf   : > { %1438 = vrot.lane.b32.xlu1 %v4438_v49, %s4014_s22  ;;  %1341 = vrot.lane.b32.xlu0 %v4520_v37, %s4009_s18 }
 0x1d1   : > { %v4614_v25 = vpop.permute.xlu1 %904  ;;  %v4616_v24 = vpop.permute.xlu0 %674 }
 0x1d2   : > { %10224 = vst [vmem:[#allocation40_spill] sm:$0xff] %v4614_v25  ;;  %10225 = vst [vmem:[#allocation41_spill] sm:$0xff] %v4616_v24 }
 0x1d3   : > { %1442 = vrot.lane.b32.xlu1 %v4312_v51, %s4014_s22  ;;  %1448 = vrot.lane.b32.xlu0 %v4210_v17, %s4014_s22 }
 0x1d5   : > { %v4622_v63 = vpop.permute.xlu1 %920  ;;  %v4624_v50 = vpop.permute.xlu0 %690 }
 0x1d6   : > { %10226 = vst [vmem:[#allocation42_spill] sm:$0xff] %v4622_v63  ;;  %10227 = vst [vmem:[#allocation43_spill] sm:$0xff] %v4624_v50 }
 0x1d7   : > { %1446 = vrot.lane.b32.xlu1 %v4510_v0, %s4014_s22  ;;  %1452 = vrot.lane.b32.xlu0 %v4374_v11, %s4014_s22 }
 0x1d9   : > { %v4630_v40 = vpop.permute.xlu1 %1315  ;;  %v4632_v25 = vpop.permute.xlu0 %783 }
 0x1da   : > { %10228 = vst [vmem:[#allocation44_spill] sm:$0xff] %v4630_v40  ;;  %10229 = vst [vmem:[#allocation45_spill] sm:$0xff] %v4632_v25 }
 0x1db   : > { %1450 = vrot.lane.b32.xlu1 %v4270_v42, %s4014_s22  ;;  %1456 = vrot.lane.b32.xlu0 %v4244_v30, %s4014_s22 }
 0x1dd   : > { %v4638_v24 = vpop.permute.xlu1 %1331  ;;  %v4640_v63 = vpop.permute.xlu0 %799 }
 0x1de   : > { %10230 = vst [vmem:[#allocation46_spill] sm:$0xff] %v4638_v24  ;;  %10231 = vst [vmem:[#allocation47_spill] sm:$0xff] %v4640_v63 }
 0x1df   : > { %1454 = vrot.lane.b32.xlu1 %v4448_v3, %s4014_s22  ;;  %1460 = vrot.lane.b32.xlu0 %v4410_v32, %s4014_s22 }
 0x1e1   : > { %v4646_v50 = vpop.permute.xlu1 %912  ;;  %v4648_v40 = vpop.permute.xlu0 %1025 }
 0x1e2   : > { %10232 = vst [vmem:[#allocation48_spill] sm:$0xff] %v4646_v50  ;;  %10233 = vst [vmem:[#allocation49_spill] sm:$0xff] %v4648_v40 }
 0x1e3   : > { %1458 = vrot.lane.b32.xlu1 %v4320_v54, %s4014_s22  ;;  %1482 = vperm.xlu0 %3886, %v4171_v59  }
 0x1e5   : > { %v4653_v25 = vpop.permute.xlu1 %928  ;;  %v4655_v24 = vpop.permute.xlu0 %1041 }
 0x1e6   : > { %10234 = vst [vmem:[#allocation50_spill] sm:$0xff] %v4653_v25  ;;  %10235 = vst [vmem:[#allocation51_spill] sm:$0xff] %v4655_v24  ;;  %v9770_v25 = vmov 8  }
 0x1e7   : > { %1462 = vrot.lane.b32.xlu1 %v4520_v37, %s4014_s22  ;;  %1494 = vperm.xlu0 %3886, %v4135_v31  }
 0x1e9   : > { %v4660_v63 = vpop.permute.xlu1 %1323  ;;  %v4662_v57 = vpop.permute.xlu0 %1194 }
 0x1ea   : > { %10236 = vst [vmem:[#allocation52_spill] sm:$0xff] %v4660_v63  ;;  %10237 = vst [vmem:[#allocation53_spill] sm:$0xff] %v4662_v57 }
 0x1eb   : > { %1486 = vperm.xlu1 %3887, %v4114_v8   ;;  %1555 = vrot.lane.b32.xlu0 %v4262_v38, %s4016_s23 }
 0x1ec   : > { %3889 = vset.pattern.permute.xlu0 %v9770_v25 }
 0x1ed   : > { %v4667_v40 = vpop.permute.xlu1 %1339  ;;  %v4670_v24 = vpop.permute.xlu0 %1210 }
 0x1ee   : > { %10238 = vst [vmem:[#allocation54_spill] sm:$0xff] %v4667_v40  ;;  %10239 = vst [vmem:[#allocation55_spill] sm:$0xff] %v4670_v24 }
 0x1ef   : > { %1490 = vperm.xlu1 %3887, %v4162_v58   ;;  %1559 = vrot.lane.b32.xlu0 %v4438_v49, %s4016_s23 }
 0x1f1   : > { %v4675_v63 = vpop.permute.xlu1 %676  ;;  %v4677_v57 = vpop.permute.xlu0 %682 }
 0x1f2   : > { %10240 = vst [vmem:[#allocation56_spill] sm:$0xff] %v4675_v63  ;;  %10241 = vst [vmem:[#allocation57_spill] sm:$0xff] %v4677_v57 }
 0x1f3   : > { %1553 = vrot.lane.b32.xlu1 %v4200_v13, %s4016_s23  ;;  %1563 = vrot.lane.b32.xlu0 %v4312_v51, %s4016_s23 }
 0x1f4   : > { %3888 = vset.pattern.permute.xlu1 %v9770_v25 }
 0x1f5   : > { %v4684_v40 = vpop.permute.xlu1 %692  ;;  %v4686_v24 = vpop.permute.xlu0 %698 }
 0x1f6   : > { %10242 = vst [vmem:[#allocation58_spill] sm:$0xff] %v4684_v40  ;;  %10243 = vst [vmem:[#allocation59_spill] sm:$0xff] %v4686_v24 }
 0x1f7   : > { %1557 = vrot.lane.b32.xlu1 %v4364_v6, %s4016_s23  ;;  %1567 = vrot.lane.b32.xlu0 %v4510_v0, %s4016_s23 }
 0x1f9   : > { %v4692_v63 = vpop.permute.xlu1 %785  ;;  %v4694_v57 = vpop.permute.xlu0 %791 }
 0x1fa   : > { %10244 = vst [vmem:[#allocation60_spill] sm:$0xff] %v4692_v63  ;;  %10245 = vst [vmem:[#allocation61_spill] sm:$0xff] %v4694_v57 }
 0x1fb   : > { %1561 = vrot.lane.b32.xlu1 %v4238_v28, %s4016_s23  ;;  %1571 = vrot.lane.b32.xlu0 %v4270_v42, %s4016_s23 }
 0x1fd   : > { %v4700_v25 = vpop.permute.xlu1 %801  ;;  %v4702_v40 = vpop.permute.xlu0 %807 }
 0x1fe   : > { %10246 = vst [vmem:[#allocation62_spill] sm:$0xff] %v4700_v25  ;;  %10247 = vst [vmem:[#allocation63_spill] sm:$0xff] %v4702_v40 }
 0x1ff   : > { %1565 = vrot.lane.b32.xlu1 %v4400_v19, %s4016_s23  ;;  %1575 = vrot.lane.b32.xlu0 %v4448_v3, %s4016_s23 }
 0x201   : > { %v4708_v24 = vpop.permute.xlu1 %1027  ;;  %v4710_v63 = vpop.permute.xlu0 %1033 }
 0x202   : > { %10248 = vst [vmem:[#allocation64_spill] sm:$0xff] %v4708_v24  ;;  %10249 = vst [vmem:[#allocation65_spill] sm:$0xff] %v4710_v63 }
 0x203   : > { %1569 = vrot.lane.b32.xlu1 %v4210_v17, %s4016_s23  ;;  %1579 = vrot.lane.b32.xlu0 %v4320_v54, %s4016_s23 }
 0x205   : > { %v4716_v57 = vpop.permute.xlu1 %1043  ;;  %v4718_v25 = vpop.permute.xlu0 %1049 }
 0x206   : > { %10250 = vst [vmem:[#allocation66_spill] sm:$0xff] %v4716_v57  ;;  %10251 = vst [vmem:[#allocation67_spill] sm:$0xff] %v4718_v25  ;;  %v10256_v25 = vmov 0  }
 0x207   : > { %1573 = vrot.lane.b32.xlu1 %v4374_v11, %s4016_s23  ;;  %1583 = vrot.lane.b32.xlu0 %v4520_v37, %s4016_s23 }
 0x209   : > { %v4724_v40 = vpop.permute.xlu1 %1196  ;;  %v4726_v24 = vpop.permute.xlu0 %1202 }
 0x20a   : > { %10252 = vst [vmem:[#allocation68_spill] sm:$0xff] %v4724_v40  ;;  %10253 = vst [vmem:[#allocation69_spill] sm:$0xff] %v4726_v24 }
 0x20b   : > { %1577 = vrot.lane.b32.xlu1 %v4244_v30, %s4016_s23  ;;  %1607 = vperm.xlu0 %3889, %v4114_v8  }
 0x20d   : > { %v4731_v63 = vpop.permute.xlu1 %1212  ;;  %v4733_v57 = vpop.permute.xlu0 %1218 }
 0x20e   : > { %10254 = vst [vmem:[#allocation70_spill] sm:$0xff] %v4731_v63  ;;  %10255 = vst [vmem:[#allocation71_spill] sm:$0xff] %v4733_v57  ;;  %v666_v63 = vld [vmem:[%s9704_s4] sm:$0xff]  ;;  %v669_v57 = vld [vmem:[%s9704_s4 + $0x18] sm:$0xff] }
 0x20f   : > { %1581 = vrot.lane.b32.xlu1 %v4410_v32, %s4016_s23  ;;  %3890 = vset.pattern.permute.xlu0 %v10256_v25 }
 0x210   : > { %721 = vperm.xlu0 %3890, %v4171_v59  }
 0x211   : > { %v4739_v50 = vpop.permute.xlu1 %684  ;;  %v4742_v40 = vpop.permute.xlu0 %906 }
 0x212   : > { %10257 = vst [vmem:[#allocation72_spill] sm:$0xff] %v4739_v50  ;;  %10258 = vst [vmem:[#allocation73_spill] sm:$0xff] %v4742_v40 }
 0x213   : > { %1603 = vperm.xlu1 %3888, %v4171_v59  }
 0x214   : > { %731 = vperm.xlu0 %3890, %v4162_v58  }
 0x215   : > { %v4745_v24 = vpop.permute.xlu1 %700  ;;  %v4754_v50 = vpop.permute.xlu0 %922 }
 0x216   : > { %10259 = vst [vmem:[#allocation74_spill] sm:$0xff] %v4745_v24  ;;  %10260 = vst [vmem:[#allocation75_spill] sm:$0xff] %v4754_v50  ;;  %v667_v24 = vld [vmem:[%s9704_s4 + $0x8] sm:$0xff]  ;;  %v668_v50 = vld [vmem:[%s9704_s4 + $0x10] sm:$0xff] }
 0x217   : > { %1611 = vperm.xlu1 %3888, %v4162_v58  }
 0x218   : > { %1676 = vperm.xlu0 %3890, %v666_v63   ;;  %v10263_v63 = vmov 1  }
 0x219   : > { %v4757_v40 = vpop.permute.xlu1 %793  ;;  %v4763_v58 = vpop.permute.xlu0 %1317 }
 0x21a   : > { %10261 = vst [vmem:[#allocation76_spill] sm:$0xff] %v4757_v40  ;;  %10262 = vst [vmem:[#allocation77_spill] sm:$0xff] %v4763_v58 }
 0x21b   : > { %1615 = vperm.xlu1 %3888, %v4135_v31  }
 0x21c   : > { %1691 = vperm.xlu0 %3890, %v669_v57  }
 0x21d   : > { %v4769_v4 = vpop.permute.xlu1 %809  ;;  %v4773_v57 = vpop.permute.xlu0 %1333 }
 0x21e   : > { %10264 = vst [vmem:[#allocation78_spill] sm:$0xff] %v4769_v4  ;;  %10265 = vst [vmem:[#allocation79_spill] sm:$0xff] %v4773_v57  ;;  %v334_v4 = vlaneseq }
 0x21f   : > { %3891 = vset.pattern.permute.xlu1 %v10256_v25  ;;  %v4783_v25 = vld [vmem:[%s9706_s6] sm:$0xff] }
 0x220   : > { %1681 = vperm.xlu1 %3891, %v667_v24   ;;  %3892 = vset.pattern.permute.xlu0 %v10263_v63  ;;  %v4778_v24 = vld [vmem:[%s9706_s6 + $0x8] sm:$0xff] }
 0x221   : > { %829 = vperm.xlu0 %3892, %v4171_v59   ;;  %v4785_v58 = vpop.permute.xlu1 %1035  ;;  %v4795_v57 = vpop.permute.xlu0 %914 }
 0x222   : > { %10266 = vst [vmem:[#allocation80_spill] sm:$0xff] %v4785_v58  ;;  %10267 = vst [vmem:[#allocation81_spill] sm:$0xff] %v4795_v57  ;;  %v4803_v58 = vand.u32 127, %v334_v4 }
 0x224   : > { %1686 = vperm.xlu1 %3891, %v668_v50   ;;  %v4791_v50 = vld [vmem:[%s9706_s6 + $0x10] sm:$0xff]  ;;  %10270 = vst [vmem:[#allocation83_spill] sm:$0xff] %v4803_v58  ;;  %v337_v4 = vadd.s32 256, %v4803_v58  ;;  %v339_v12 = vand.u32 255, %v4803_v58  ;;  %vm9818_vm7 = vcmp.lt.s32.totalorder %v4803_v58, 15 }
 0x225   : > { %841 = vperm.xlu0 %3892, %v4135_v31   ;;  %v4797_v40 = vpop.permute.xlu1 %1051  ;;  %v4805_v15 = vpop.permute.xlu0 %930 }
 0x226   : > { %10268 = vst [vmem:[#allocation82_spill] sm:$0xff] %v4797_v40  ;;  %10271 = vst [vmem:[#allocation84_spill] sm:$0xff] %v4805_v15  ;;  %v4813_v40 = vld [vmem:[%s9706_s6 + $0x18] sm:$0xff]  ;;  %v341_v45 = vand.u32 255, %v337_v4 }
 0x228   : > { %1967 = vperm.xlu1 %3891, %v4783_v25   ;;  %v4840_v41 = vshra.s32 %v341_v45, 4 }
 0x229   : > { %2070 = vperm.xlu0 %3892, %v4778_v24   ;;  %v4808_v44 = vpop.permute.xlu1 %1204 }
 0x22a   : > { %10272 = vst [vmem:[#allocation85_spill] sm:$0xff] %v4808_v44  ;;  %v338_v44 = vadd.s32 384, %v4803_v58  ;;  %10280 = vst [vmem:[#allocation92_spill] sm:$0xff] %v4840_v41  ;;  %vm353_vm5 = vcmp.ge.s32.totalorder %v4840_v41, 1  ;;  %vm357_vm6 = vcmp.lt.s32.totalorder %v4840_v41, 17 }
 0x22b   : > { %vm4920_vm13 = vmand %vm353_vm5, %vm357_vm6  ;;  %vm9832_vm6 = vcmp.lt.s32.totalorder %v4803_v58, 113 }
 0x22c   : > { %1977 = vperm.xlu1 %3891, %v4791_v50   ;;  %v342_v14 = vand.u32 255, %v338_v44  ;;  %v4851_v44 = vmul.f32 %v4350_v2, %v4238_v28 }
 0x22d   : > { %3894 = vset.pattern.permute.xlu0 %v10269_v43  ;;  %v4823_v57 = vpop.permute.xlu1 %1220 }
 0x22e   : > { %954 = vperm.xlu0 %3894, %v4114_v8   ;;  %v336_v8 = vadd.s32 128, %v4803_v58  ;;  %10274 = vst [vmem:[#allocation87_spill] sm:$0xff] %v4823_v57  ;;  %10283 = vst [vmem:[#allocation95_spill] sm:$0xff] %v4851_v44 }
 0x230   : > { %3893 = vset.pattern.permute.xlu1 %v10263_v63  ;;  %v340_v15 = vand.u32 255, %v336_v8  ;;  %v4836_v8 = vshra.s32 %v339_v12, 4 }
 0x231   : > { %2066 = vperm.xlu1 %3893, %v4783_v25  }
 0x232   : > { %2178 = vperm.xlu0 %3894, %v4783_v25   ;;  %10278 = vst [vmem:[#allocation90_spill] sm:$0xff] %v4836_v8  ;;  %v4847_v4 = vand.u32 15, %v340_v15  ;;  %vm351_vm3 = vcmp.ge.s32.totalorder %v4836_v8, 1  ;;  %vm355_vm4 = vcmp.lt.s32.totalorder %v4836_v8, 17 }
 0x233   : > { %vm4909_vm12 = vmand %vm351_vm3, %vm355_vm4 }
 0x234   : > { %10282 = vst [vmem:[#allocation94_spill] sm:$0xff] %v4847_v4  ;;  %vm9820_vm9 = vcmp.lt.s32.totalorder %v4847_v4, 15 }
 0x235   : > { %2074 = vperm.xlu1 %3893, %v4791_v50  }
 0x236   : > { %2190 = vperm.xlu0 %3894, %v4813_v40   ;;  %v4818_v63 = vpop.permute.xlu0 %1365 }
 0x237   : > { %10273 = vst [vmem:[#allocation86_spill] sm:$0xff] %v4818_v63  ;;  %v4831_v63 = vshra.s32 %v340_v15, 4  ;;  %v4873_v15 = vand.u32 15, %v339_v12  ;;  %v4893_v12 = vand.u32 15, %v342_v14 }
 0x239   : > { %2078 = vperm.xlu1 %3893, %v4813_v40   ;;  %10277 = vst [vmem:[#allocation89_spill] sm:$0xff] %v4831_v63  ;;  %vm352_vm1 = vcmp.ge.s32.totalorder %v4831_v63, 1  ;;  %vm356_vm2 = vcmp.lt.s32.totalorder %v4831_v63, 17  ;;  %10287 = vst [vmem:[#allocation99_spill] sm:$0xff] %v4873_v15  ;;  %vm9821_vm0 = vcmp.lt.s32.totalorder %v4873_v15, 15 }
 0x23a   : > { %3896 = vset.pattern.permute.xlu0 %v10275_v52  ;;  %v4827_v39 = vpop.permute.xlu0 %1432  ;;  %vm4888_vm8 = vmand %vm352_vm1, %vm356_vm2  ;;  %10293 = vst [vmem:[#allocation103_spill] sm:$0xff] %v4893_v12  ;;  %vm9824_vm2 = vcmp.lt.s32.totalorder %v4893_v12, 15 }
 0x23b   : > { %10276 = vst [vmem:[#allocation88_spill] sm:$0xff] %v4827_v39  ;;  %1071 = vperm.xlu0 %3896, %v4171_v59   ;;  %v4845_v59 = vmul.f32 %v4350_v2, %v4200_v13  ;;  %v4864_v13 = vand.u32 15, %v341_v45  ;;  %v4882_v45 = vmul.f32 %v4370_v9, %v4262_v38  ;;  %v4901_v38 = vmul.f32 %v4370_v9, %v4270_v42  ;;  %vm4952_vm15 = vmand %vm4888_vm8, %vm9820_vm9  ;;  %v10500_v39 = vld [vmem:[#allocation71_spill] sm:$0xff] }
 0x23c   : > { %v10298_v42 = vmov 0  ;;  %vm5023_vm4 = vmand %vm4909_vm12, %vm9821_vm0  ;;  %vm9834_vm9 = vcmp.ge.s32.totalorder %v4847_v4, 1 }
 0x23d   : > { %3895 = vset.pattern.permute.xlu1 %v10269_v43  ;;  %10281 = vst [vmem:[#allocation93_spill] sm:$0xff] %v4845_v59  ;;  %v4855_v43 = vshra.s32 %v342_v14, 4  ;;  %10286 = vst [vmem:[#allocation98_spill] sm:$0xff] %v4864_v13  ;;  %v10299_v42 = vsel %vm4920_vm13, 4294967295, %v10298_v42  ;;  %vm9819_vm14 = vcmp.lt.s32.totalorder %v4864_v13, 15  ;;  %v4942_v59 = vmul.f32 %v4370_v9, %v4320_v54 }
 0x23e   : > { %v4833_v53 = vpop.permute.xlu1 %1361  ;;  %2182 = vperm.xlu1 %3895, %v4778_v24   ;;  %v4838_v57 = vpop.permute.xlu0 %1436  ;;  %10289 = vst [vmem:[#allocation101_spill] sm:$0xff] %v4882_v45  ;;  %10295 = vst [vmem:[#allocation105_spill] sm:$0xff] %v4901_v38  ;;  %v4946_v38 = vmul.f32 %v4358_v5, %v4364_v6  ;;  %v933_v54 = vsel %vm9818_vm7, %v4416_v33, %v4456_v7  ;;  %v4964_v6 = vmul.f32 %v4358_v5, %v4400_v19 }
 0x23f   : > { %10279 = vst [vmem:[#allocation91_spill] sm:$0xff] %v4838_v57  ;;  %1083 = vperm.xlu0 %3896, %v4135_v31   ;;  %10284 = vst [vmem:[#allocation96_spill] sm:$0xff] %v4855_v43  ;;  %v4862_v31 = vmul.f32 %v4350_v2, %v4210_v17  ;;  %v4878_v17 = vmul.f32 %v4350_v2, %v4244_v30  ;;  %v4897_v30 = vmul.f32 %v4370_v9, %v4312_v51  ;;  %v10296_v2 = vmov 0 }
 0x240   : > { %vm354_vm10 = vcmp.ge.s32.totalorder %v4855_v43, 1  ;;  %vm358_vm11 = vcmp.lt.s32.totalorder %v4855_v43, 17  ;;  %v10297_v2 = vsel %vm4909_vm12, 4294967295, %v10296_v2  ;;  %10300 = vst [vmem:[#allocation106_spill] sm:$0xff] %v10299_v42  ;;  %v937_v51 = vsel %vm9818_vm7, %v4446_v22, %v4416_v33  ;;  %10302 = vst [vmem:[#allocation108_spill] sm:$0xff] %v4942_v59 }
 0x241   : > { %10285 = vst [vmem:[#allocation97_spill] sm:$0xff] %v4862_v31  ;;  %10288 = vst [vmem:[#allocation100_spill] sm:$0xff] %v4878_v17  ;;  %v10290_v31 = vmov 0  ;;  %v945_v17 = vsel %vm9818_vm7, %v4456_v7, %v4406_v20  ;;  %v10306_v9 = vmov 4   ;;  %v4972_v59 = vmul.f32 %v4358_v5, %v4410_v32 }
 0x242   : > { %v4857_v57 = vpop.permute.xlu1 %1369  ;;  %2186 = vperm.xlu1 %3895, %v4791_v50   ;;  %v4868_v28 = vpop.permute.xlu0 %1440  ;;  %v10291_v31 = vsel %vm4888_vm8, 4294967295, %v10290_v31  ;;  %10294 = vst [vmem:[#allocation104_spill] sm:$0xff] %v4897_v30  ;;  %10303 = vst [vmem:[#allocation109_spill] sm:$0xff] %v4946_v38  ;;  %v10310_v33 = vmov 0  ;;  %v5000_v32 = vmul.f32 %v4303_v47, %v937_v51  ;;  %v5003_v7 = vmul.f32 %v4303_v47, %v945_v17 }
 0x243   : > { %2294 = vperm.xlu0 %3896, %v4778_v24   ;;  %10292 = vst [vmem:[#allocation102_spill] sm:$0xff] %v10291_v31  ;;  %10307 = vst [vmem:[#allocation110_spill] sm:$0xff] %v4964_v6  ;;  %v10323_v17 = vmov 0  ;;  %v5028_v51 = vmul.f32 %v4303_v47, %v933_v54  ;;  %vm9833_vm0 = vcmp.ge.s32.totalorder %v4864_v13, 1  ;;  %vm9835_vm12 = vcmp.ge.s32.totalorder %v4873_v15, 1 }
 0x244   : > { %10309 = vst [vmem:[#allocation112_spill] sm:$0xff] %v4972_v59  ;;  %vm4978_vm1 = vmand %vm354_vm10, %vm358_vm11  ;;  %v10324_v17 = vsel %vm5023_vm4, 4294967295, %v10323_v17  ;;  %vm9831_vm10 = vcmp.lt.s32.totalorder %v4803_v58, 17  ;;  %vm9830_vm11 = vcmp.lt.s32.totalorder %v4803_v58, 16  ;;  %vm10596_vm4 = vcmp.ge.s32.totalorder %v4855_v43, 4294967295 }
 0x245   : > { %v10311_v33 = vsel %vm4978_vm1, 4294967295, %v10310_v33  ;;  %vm4992_vm3 = vmand %vm4920_vm13, %vm9819_vm14  ;;  %10317 = vst [vmem:[#allocation116_spill] sm:$0xff] %v5000_v32  ;;  %vm9836_vm14 = vcmp.lt.s32.totalorder %v4803_v58, 127  ;;  %v5147_v32 = vsel %vm9830_vm11, %v4512_v55, %v4430_v48 }
 0x246   : > { %v4913_v14 = vpop.permute.xlu1 %1373  ;;  %3897 = vset.pattern.permute.xlu1 %v10275_v52  ;;  %v941_v52 = vsel %vm9818_vm7, %v4406_v20, %v4446_v22  ;;  %v4937_v44 = vpop.permute.xlu0 %1444  ;;  %v10304_v22 = vmov 0  ;;  %v4968_v20 = vmul.f32 %v4358_v5, %v4374_v11  ;;  %10312 = vst [vmem:[#allocation113_spill] sm:$0xff] %v10311_v33  ;;  %v4986_v11 = vmul.f32 %v4372_v10, %v4438_v49  ;;  %10318 = vst [vmem:[#allocation117_spill] sm:$0xff] %v5003_v7  ;;  %v10557_v33 = vld [vmem:[#allocation13_spill] sm:$0xff] }
 0x247   : > { %10301 = vst [vmem:[#allocation107_spill] sm:$0xff] %v4937_v44  ;;  %2290 = vperm.xlu1 %3897, %v4783_v25   ;;  %v10305_v22 = vsel %vm4952_vm15, 4294967295, %v10304_v22  ;;  %3898 = vset.pattern.permute.xlu0 %v10306_v9  ;;  %v10314_v5 = vmov 0  ;;  %v4997_v19 = vmul.f32 %v4303_v47, %v941_v52  ;;  %v5009_v49 = vmul.f32 %v4372_v10, %v4510_v0  ;;  %10325 = vst [vmem:[#allocation122_spill] sm:$0xff] %v5028_v51 }
 0x248   : > { %10308 = vst [vmem:[#allocation111_spill] sm:$0xff] %v4968_v20  ;;  %2354 = vperm.xlu0 %3898, %v4783_v25   ;;  %10313 = vst [vmem:[#allocation114_spill] sm:$0xff] %v4986_v11  ;;  %v10315_v5 = vsel %vm4992_vm3, 4294967295, %v10314_v5  ;;  %v5013_v11 = vmul.f32 %v4372_v10, %v4448_v3  ;;  %v5017_v52 = vmul.f32 %v4372_v10, %v4520_v37  ;;  %v10326_v10 = vmov 0 }
 0x249   : > { %10316 = vst [vmem:[#allocation115_spill] sm:$0xff] %v4997_v19  ;;  %10320 = vst [vmem:[#allocation119_spill] sm:$0xff] %v5009_v49  ;;  %vm9844_vm7 = vcmp.lt.s32.totalorder %v4803_v58, 1  ;;  %v5069_v47 = vsel %vm9832_vm6, %v4464_v16, %v4436_v21  ;;  %v5075_v3 = vsel %vm9832_vm6, %v4426_v36, %v4464_v16  ;;  %v5081_v37 = vsel %vm9832_vm6, %v4436_v21, %v4472_v27 }
 0x24a   : > { %v5005_v30 = vpop.permute.xlu1 %1434  ;;  %10321 = vst [vmem:[#allocation120_spill] sm:$0xff] %v5013_v11  ;;  %10322 = vst [vmem:[#allocation121_spill] sm:$0xff] %v5017_v52  ;;  %v5030_v0 = vpop.permute.xlu0 %1325  ;;  %v5090_v52 = vsel %vm9832_vm6, %v4472_v27, %v4426_v36  ;;  %v5096_v16 = vsel %vm9831_vm10, %v4482_v46, %v4420_v35  ;;  %v5102_v21 = vsel %vm9831_vm10, %v4408_v29, %v4482_v46  ;;  %v10334_v51 = vmov 5  }
 0x24b   : > { %10319 = vst [vmem:[#allocation118_spill] sm:$0xff] %v5005_v30  ;;  %2298 = vperm.xlu1 %3897, %v4791_v50   ;;  %vm5037_vm5 = vmand %vm4978_vm1, %vm9824_vm2  ;;  %vm9848_vm2 = vcmp.ge.s32.totalorder %v4893_v12, 1  ;;  %v5108_v49 = vsel %vm9831_vm10, %v4420_v35, %v4492_v60  ;;  %v5114_v36 = vsel %vm9831_vm10, %v4492_v60, %v4408_v29  ;;  %v5120_v27 = vsel %vm9830_vm11, %v4502_v56, %v4440_v1  ;;  %v10497_v30 = vld [vmem:[#allocation55_spill] sm:$0xff] }
 0x24c   : > { %v10327_v10 = vsel %vm5037_vm5, 4294967295, %v10326_v10  ;;  %2366 = vperm.xlu0 %3898, %v4813_v40   ;;  %10329 = vst [vmem:[#allocation124_spill] sm:$0xff] %v5096_v16  ;;  %10330 = vst [vmem:[#allocation125_spill] sm:$0xff] %v5102_v21  ;;  %v1227_v46 = vsel %vm9836_vm14, %v4538_v26, %v4474_v34  ;;  %v1231_v35 = vsel %vm9836_vm14, %v4466_v18, %v4538_v26  ;;  %v10356_v21 = vld [vmem:[#allocation14_spill] sm:$0xff]  ;;  %vm10365_vm6 = vnez %v10297_v2 }
 0x24d   : > { %10331 = vst [vmem:[#allocation126_spill] sm:$0xff] %v5108_v49  ;;  %10332 = vst [vmem:[#allocation127_spill] sm:$0xff] %v5114_v36  ;;  %v5135_v60 = vsel %vm9830_vm11, %v4430_v48, %v4502_v56  ;;  %v5141_v29 = vsel %vm9830_vm11, %v4440_v1, %v4512_v55  ;;  %v1223_v26 = vsel %vm9836_vm14, %v4474_v34, %v4546_v62  ;;  %v10339_v1 = vld [vmem:[#allocation18_spill] sm:$0xff]  ;;  %v10352_v49 = vmov 6  }
 0x24e   : > { %v5060_v54 = vpop.permute.xlu1 %1438  ;;  %v5083_v11 = vpop.permute.xlu0 %1341  ;;  %10333 = vst [vmem:[#allocation128_spill] sm:$0xff] %v5120_v27  ;;  %10335 = vst [vmem:[#allocation129_spill] sm:$0xff] %v5135_v60  ;;  %v817_v56 = vsel %vm9830_vm11, %v4567_v61, %v4508_v23  ;;  %v821_v55 = vsel %vm9830_vm11, %v10339_v1, %v4567_v61  ;;  %v10340_v48 = vld [vmem:[#allocation30_spill] sm:$0xff]  ;;  %v1235_v61 = vsel %vm9836_vm14, %v4546_v62, %v4466_v18  ;;  %v10347_v18 = vmov 0 }
 0x24f   : > { %10328 = vst [vmem:[#allocation123_spill] sm:$0xff] %v5060_v54  ;;  %2302 = vperm.xlu1 %3897, %v4813_v40   ;;  %10336 = vst [vmem:[#allocation130_spill] sm:$0xff] %v5141_v29  ;;  %v813_v19 = vsel %vm9830_vm11, %v4508_v23, %v10340_v48  ;;  %v825_v34 = vsel %vm9830_vm11, %v10340_v48, %v10339_v1  ;;  %v10342_v29 = vld [vmem:[#allocation11_spill] sm:$0xff]  ;;  %v10344_v23 = vld [vmem:[#allocation16_spill] sm:$0xff]  ;;  %vm10374_vm14 = vcmp.lt.s32.totalorder %v4864_v13, 15  ;;  %vm10595_vm15 = vcmp.lt.s32.totalorder %v4855_v43, 15 }
 0x250   : > { %3901 = vset.pattern.permute.xlu0 %v10334_v51  ;;  %10337 = vst [vmem:[#allocation131_spill] sm:$0xff] %v5147_v32  ;;  %v1255_v27 = vmul.f32 %v10342_v29, %v1231_v35  ;;  %v1256_v60 = vmul.f32 %v10342_v29, %v1227_v46  ;;  %v10343_v32 = vld [vmem:[#allocation25_spill] sm:$0xff]  ;;  %v1257_v1 = vmul.f32 %v10342_v29, %v1223_v26  ;;  %v10346_v46 = vld [vmem:[#allocation27_spill] sm:$0xff]  ;;  %vm5203_vm11 = vmand %vm4888_vm8, %vm9834_vm9  ;;  %vm10370_vm9 = vcmp.lt.s32.totalorder %v4873_v15, 15 }
 0x251   : > { %2454 = vperm.xlu0 %3901, %v4778_v24   ;;  %v712_v59 = vsel %vm9831_vm10, %v10344_v23, %v10343_v32  ;;  %v10345_v48 = vld [vmem:[#allocation17_spill] sm:$0xff]  ;;  %v716_v62 = vsel %vm9831_vm10, %v10346_v46, %v10344_v23  ;;  %v10348_v18 = vsel %vm5203_vm11, 4294967295, %v10347_v18  ;;  %v10350_v26 = vld [vmem:[#allocation4_spill] sm:$0xff]  ;;  %v10353_v23 = vld [vmem:[#allocation15_spill] sm:$0xff] }
 0x252   : > { %v5153_v45 = vpop.permute.xlu1 %1442  ;;  %v5172_v7 = vpop.permute.xlu0 %1448  ;;  %v708_v35 = vsel %vm9831_vm10, %v10343_v32, %v10345_v48  ;;  %10349 = vst [vmem:[#allocation30_spill] sm:$0xff] %v10348_v18  ;;  %v849_v32 = vmul.f32 %v10350_v26, %v821_v55  ;;  %v850_v20 = vmul.f32 %v10350_v26, %v817_v56  ;;  %v848_v6 = vmul.f32 %v10350_v26, %v825_v34  ;;  %v10361_v34 = vld [vmem:[#allocation2_spill] sm:$0xff]  ;;  %vm5279_vm5 = vmand %vm4978_vm1, %vm9848_vm2 }
 0x253   : > { %10338 = vst [vmem:[#allocation132_spill] sm:$0xff] %v5153_v45  ;;  %10341 = vst [vmem:[#allocation18_spill] sm:$0xff] %v5172_v7  ;;  %3899 = vset.pattern.permute.xlu1 %v10306_v9  ;;  %v704_v9 = vsel %vm9831_vm10, %v10345_v48, %v10346_v46  ;;  %v851_v48 = vmul.f32 %v10350_v26, %v813_v19  ;;  %v10354_v46 = vld [vmem:[#allocation20_spill] sm:$0xff]  ;;  %v1258_v56 = vmul.f32 %v10342_v29, %v1235_v61  ;;  %v10358_v19 = vmov 0  ;;  %v10493_v7 = vld [vmem:[#allocation53_spill] sm:$0xff] }
 0x254   : > { %2358 = vperm.xlu1 %3899, %v4778_v24   ;;  %v5218_v16 = vsel %vm9844_vm7, %v10354_v46, %v10353_v23  ;;  %v5224_v55 = vsel %vm9844_vm7, %v10356_v21, %v10354_v46  ;;  %vm5231_vm10 = vmand %vm4920_vm13, %vm9833_vm0  ;;  %v744_v26 = vmul.f32 %v10361_v34, %v712_v59  ;;  %v745_v29 = vmul.f32 %v10361_v34, %v708_v35 }
 0x255   : > { %3902 = vset.pattern.permute.xlu0 %v10352_v49  ;;  %10355 = vst [vmem:[#allocation25_spill] sm:$0xff] %v5218_v16  ;;  %10357 = vst [vmem:[#allocation16_spill] sm:$0xff] %v5224_v55  ;;  %v10359_v19 = vsel %vm5231_vm10, 4294967295, %v10358_v19  ;;  %v10363_v16 = vld [vmem:[#allocation22_spill] sm:$0xff]  ;;  %v10366_v61 = vmov 0  ;;  %v743_v59 = vmul.f32 %v10361_v34, %v716_v62  ;;  %v746_v55 = vmul.f32 %v10361_v34, %v704_v9 }
 0x256   : > { %v5211_v38 = vpop.permute.xlu1 %1446  ;;  %10360 = vst [vmem:[#allocation17_spill] sm:$0xff] %v10359_v19  ;;  %v5236_v36 = vpop.permute.xlu0 %1452  ;;  %2562 = vperm.xlu0 %3902, %v4783_v25   ;;  %v5243_v46 = vsel %vm9844_vm7, %v10353_v23, %v10363_v16  ;;  %vm5250_vm0 = vmand %vm10365_vm6, %vm9835_vm12  ;;  %v5261_v23 = vsel %vm9844_vm7, %v10363_v16, %v10356_v21  ;;  %v5265_v35 = vsel %vm10370_vm9, %v1255_v27, 0.0  ;;  %vm10372_vm12 = vcmp.lt.s32.totalorder %v4847_v4, 15 }
 0x257   : > { %10351 = vst [vmem:[#allocation11_spill] sm:$0xff] %v5211_v38  ;;  %10362 = vst [vmem:[#allocation27_spill] sm:$0xff] %v5236_v36  ;;  %v10367_v61 = vsel %vm5250_vm0, 4294967295, %v10366_v61  ;;  %v5273_v62 = vsel %vm10374_vm14, %v1257_v1, 0.0  ;;  %v10376_v9 = vmov 0  ;;  %v873_v16 = vsel %vm4888_vm8, %v849_v32, 0.0 }
 0x258   : > { %10364 = vst [vmem:[#allocation4_spill] sm:$0xff] %v5243_v46  ;;  %10368 = vst [vmem:[#allocation15_spill] sm:$0xff] %v10367_v61  ;;  %2362 = vperm.xlu1 %3899, %v4791_v50   ;;  %v5269_v46 = vsel %vm10372_vm12, %v1256_v60, 0.0  ;;  %v10377_v9 = vsel %vm5279_vm5, 4294967295, %v10376_v9  ;;  %v874_v21 = vsel %vm4920_vm13, %v850_v20, 0.0  ;;  %v872_v27 = vsel %vm10365_vm6, %v848_v6, 0.0 }
 0x259   : > { %10369 = vst [vmem:[#allocation20_spill] sm:$0xff] %v5261_v23  ;;  %10371 = vst [vmem:[#allocation14_spill] sm:$0xff] %v5265_v35  ;;  %v875_v60 = vsel %vm4978_vm1, %v851_v48, 0.0  ;;  %vm10380_vm9 = vcmp.lt.s32.totalorder %v4893_v12, 15  ;;  %v10383_v32 = vld [vmem:[#allocation32_spill] sm:$0xff]  ;;  %v10384_v35 = vld [vmem:[#allocation19_spill] sm:$0xff] }
 0x25a   : > { %10373 = vst [vmem:[#allocation2_spill] sm:$0xff] %v5269_v46  ;;  %10375 = vst [vmem:[#allocation22_spill] sm:$0xff] %v5273_v62  ;;  %v5291_v1 = vpop.permute.xlu1 %1450  ;;  %v5295_v34 = vsel %vm10380_vm9, %v1258_v56, 0.0  ;;  %v768_v62 = vsel %vm5203_vm11, %v744_v26, 0.0  ;;  %v10382_v46 = vld [vmem:[#allocation21_spill] sm:$0xff]  ;;  %v1063_v6 = vsel %vm9844_vm7, %v10384_v35, %v10383_v32  ;;  %v5307_v48 = vpop.permute.xlu0 %1456  ;;  %2574 = vperm.xlu0 %3902, %v4813_v40   ;;  %v769_v56 = vsel %vm5231_vm10, %v745_v29, 0.0 }
 0x25b   : > { %10378 = vst [vmem:[#allocation133_spill] sm:$0xff] %v10377_v9  ;;  %10379 = vst [vmem:[#allocation134_spill] sm:$0xff] %v5291_v1  ;;  %v1059_v20 = vsel %vm9844_vm7, %v10383_v32, %v10382_v46  ;;  %v767_v26 = vsel %vm5250_vm0, %v743_v59, 0.0  ;;  %v10386_v23 = vld [vmem:[#allocation34_spill] sm:$0xff]  ;;  %v5321_v32 = vadd.f32 %v873_v16, %v768_v62  ;;  %v10391_v59 = vld [vmem:[#allocation8_spill] sm:$0xff]  ;;  %vm10394_vm12 = vcmp.lt.s32.totalorder %v4803_v58, 127 }
 0x25c   : > { %10381 = vst [vmem:[#allocation135_spill] sm:$0xff] %v5295_v34  ;;  %10385 = vst [vmem:[#allocation21_spill] sm:$0xff] %v5307_v48  ;;  %v770_v34 = vsel %vm5279_vm5, %v746_v55, 0.0  ;;  %v1067_v1 = vsel %vm9844_vm7, %v10386_v23, %v10384_v35  ;;  %3900 = vset.pattern.permute.xlu1 %v10334_v51  ;;  %v5323_v48 = vadd.f32 %v874_v21, %v769_v56  ;;  %v10392_v51 = vld [vmem:[#allocation36_spill] sm:$0xff]  ;;  %v10393_v62 = vld [vmem:[#allocation23_spill] sm:$0xff]  ;;  %vm10398_vm14 = vcmp.lt.s32.totalorder %v4803_v58, 15 }
 0x25d   : > { %10387 = vst [vmem:[#allocation32_spill] sm:$0xff] %v5321_v32  ;;  %v5325_v36 = vadd.f32 %v872_v27, %v767_v26  ;;  %v5327_v29 = vadd.f32 %v875_v60, %v770_v34  ;;  %2450 = vperm.xlu1 %3900, %v4783_v25   ;;  %v1091_v54 = vmul.f32 %v10391_v59, %v1063_v6  ;;  %v10396_v27 = vld [vmem:[#allocation28_spill] sm:$0xff]  ;;  %v10397_v60 = vld [vmem:[#allocation33_spill] sm:$0xff]  ;;  %v10400_v34 = vld [vmem:[#allocation26_spill] sm:$0xff]  ;;  %v10405_v26 = vmov 7  }
 0x25e   : > { %10388 = vst [vmem:[#allocation19_spill] sm:$0xff] %v5323_v48  ;;  %v1092_v55 = vmul.f32 %v10391_v59, %v1059_v20  ;;  %v1055_v35 = vsel %vm9844_vm7, %v10382_v46, %v10386_v23  ;;  %v1232_v16 = vsel %vm10394_vm12, %v10393_v62, %v10392_v51  ;;  %v5340_v21 = vpop.permute.xlu1 %1454  ;;  %v5346_v25 = vsel %vm10398_vm14, %v10397_v60, %v10396_v27  ;;  %vm10401_vm9 = vmmov %vm10398_vm14  ;;  %v10403_v23 = vld [vmem:[#allocation24_spill] sm:$0xff]  ;;  %v5359_v56 = vpop.permute.xlu0 %1460 }
 0x25f   : > { %10389 = vst [vmem:[#allocation34_spill] sm:$0xff] %v5325_v36  ;;  %10390 = vst [vmem:[#allocation136_spill] sm:$0xff] %v5327_v29  ;;  %v5352_v20 = vsel %vm10401_vm9, %v10400_v34, %v10397_v60  ;;  %v1090_v46 = vmul.f32 %v10391_v59, %v1067_v1  ;;  %v1228_v6 = vsel %vm10394_vm12, %v10392_v51, %v10403_v23  ;;  %3905 = vset.pattern.permute.xlu0 %v10405_v26  ;;  %v10406_v29 = vld [vmem:[#allocation38_spill] sm:$0xff]  ;;  %v10410_v32 = vld [vmem:[#allocation48_spill] sm:$0xff] }
 0x260   : > { %10395 = vst [vmem:[#allocation8_spill] sm:$0xff] %v5340_v21  ;;  %10399 = vst [vmem:[#allocation36_spill] sm:$0xff] %v5346_v25  ;;  %v10409_v1 = vld [vmem:[#allocation42_spill] sm:$0xff]  ;;  %vm10411_vm7 = vcmp.lt.s32.totalorder %v4803_v58, 15  ;;  %v10412_v51 = vld [vmem:[#allocation40_spill] sm:$0xff]  ;;  %vm10513_vm8 = vcmp.ge.s32.totalorder %v4864_v13, 1 }
 0x261   : > { %10402 = vst [vmem:[#allocation23_spill] sm:$0xff] %v5352_v20  ;;  %10404 = vst [vmem:[#allocation28_spill] sm:$0xff] %v5359_v56  ;;  %v939_v36 = vsel %vm10411_vm7, %v10410_v32, %v10409_v1  ;;  %v1093_v20 = vmul.f32 %v10391_v59, %v1055_v35  ;;  %v10414_v56 = vld [vmem:[#allocation10_spill] sm:$0xff]  ;;  %2458 = vperm.xlu1 %3900, %v4791_v50   ;;  %v10422_v59 = vld [vmem:[#allocation35_spill] sm:$0xff]  ;;  %vm10629_vm1 = vcmp.ge.s32.totalorder %v4893_v12, 1 }
 0x262   : > { %vm10407_vm14 = vmmov %vm10394_vm12  ;;  %v1259_v21 = vmul.f32 %v10414_v56, %v1232_v16  ;;  %v1260_v16 = vmul.f32 %v10414_v56, %v1228_v6 }
 0x263   : > { %v1224_v48 = vsel %vm10407_vm14, %v10403_v23, %v10406_v29  ;;  %vm10408_vm9 = vmmov %vm10394_vm12  ;;  %v10415_v23 = vld [vmem:[#allocation50_spill] sm:$0xff] }
 0x264   : > { %v1236_v60 = vsel %vm10408_vm9, %v10406_v29, %v10393_v62  ;;  %vm10413_vm12 = vmmov %vm10411_vm7 }
 0x265   : > { %v943_v25 = vsel %vm10413_vm12, %v10412_v51, %v10410_v32  ;;  %vm10416_vm14 = vmmov %vm10411_vm7  ;;  %vm10420_vm12 = vcmp.ge.s32.totalorder %v4864_v13, 1  ;;  %2462 = vperm.xlu1 %3900, %v4813_v40  }
 0x266   : > { %v935_v38 = vsel %vm10416_vm14, %v10409_v1, %v10415_v23  ;;  %vm10417_vm9 = vmmov %vm10411_vm7  ;;  %vm10418_vm7 = vcmp.ge.s32.totalorder %v4847_v4, 1  ;;  %v5395_v32 = vsel %vm10420_vm12, %v1092_v55, 0.0  ;;  %v5404_v1 = vpop.permute.xlu1 %1458  ;;  %vm10430_vm14 = vcmp.ge.s32.totalorder %v4873_v15, 1 }
 0x267   : > { %v947_v29 = vsel %vm10417_vm9, %v10415_v23, %v10412_v51  ;;  %v5391_v62 = vsel %vm10418_vm7, %v1091_v54, 0.0  ;;  %10421 = vst [vmem:[#allocation26_spill] sm:$0xff] %v5395_v32  ;;  %vm10423_vm2 = vmmov %vm10417_vm9  ;;  %v1261_v51 = vmul.f32 %v10414_v56, %v1224_v48  ;;  %v1262_v23 = vmul.f32 %v10414_v56, %v1236_v60  ;;  %v10426_v54 = vld [vmem:[#allocation6_spill] sm:$0xff]  ;;  %v5414_v32 = vpop.permute.xlu0 %1482  ;;  %v10439_v56 = vld [vmem:[#allocation31_spill] sm:$0xff] }
 0x268   : > { %10419 = vst [vmem:[#allocation33_spill] sm:$0xff] %v5391_v62  ;;  %v5401_v35 = vsel %vm10423_vm2, %v10396_v27, %v10422_v59  ;;  %10425 = vst [vmem:[#allocation38_spill] sm:$0xff] %v5404_v1  ;;  %v5409_v62 = vmul.f32 %v10426_v54, %v943_v25  ;;  %v5412_v55 = vmul.f32 %v10426_v54, %v939_v36  ;;  %v5418_v27 = vsel %vm10430_vm14, %v1090_v46, 0.0  ;;  %v10440_v60 = vld [vmem:[#allocation37_spill] sm:$0xff] }
 0x269   : > { %10424 = vst [vmem:[#allocation24_spill] sm:$0xff] %v5401_v35  ;;  %10429 = vst [vmem:[#allocation40_spill] sm:$0xff] %v5414_v32  ;;  %v5424_v6 = vsel %vm10423_vm2, %v10422_v59, %v10400_v34  ;;  %v5427_v48 = vmul.f32 %v10426_v54, %v947_v29  ;;  %v5430_v25 = vmul.f32 %v10426_v54, %v935_v38  ;;  %vm10435_vm9 = vcmp.ge.s32.totalorder %v4893_v12, 1  ;;  %v10442_v29 = vld [vmem:[#allocation29_spill] sm:$0xff]  ;;  %v10462_v35 = vld [vmem:[#allocation44_spill] sm:$0xff] }
 0x26a   : > { %10427 = vst [vmem:[#allocation42_spill] sm:$0xff] %v5409_v62  ;;  %10428 = vst [vmem:[#allocation48_spill] sm:$0xff] %v5412_v55  ;;  %v5434_v36 = vsel %vm10435_vm9, %v1093_v20, 0.0  ;;  %vm10437_vm7 = vcmp.lt.s32.totalorder %v4873_v15, 15  ;;  %vm10441_vm12 = vcmp.lt.s32.totalorder %v4803_v58, 113  ;;  %vm10444_vm2 = vcmp.lt.s32.totalorder %v4847_v4, 15  ;;  %3903 = vset.pattern.permute.xlu1 %v10352_v49 }
 0x26b   : > { %10431 = vst [vmem:[#allocation10_spill] sm:$0xff] %v5418_v27  ;;  %10432 = vst [vmem:[#allocation50_spill] sm:$0xff] %v5424_v6  ;;  %v5438_v46 = vsel %vm10437_vm7, %v1259_v21, 0.0  ;;  %v5444_v34 = vsel %vm10441_vm12, %v10440_v60, %v10439_v56  ;;  %v5455_v20 = vsel %vm10444_vm2, %v1260_v16, 0.0  ;;  %v10446_v21 = vld [vmem:[#allocation39_spill] sm:$0xff]  ;;  %vm10455_vm2 = vcmp.lt.s32.totalorder %v4893_v12, 15  ;;  %2566 = vperm.xlu1 %3903, %v4778_v24  }
 0x26c   : > { %10433 = vst [vmem:[#allocation35_spill] sm:$0xff] %v5427_v48  ;;  %10434 = vst [vmem:[#allocation6_spill] sm:$0xff] %v5430_v25  ;;  %v10464_v6 = vld [vmem:[#allocation54_spill] sm:$0xff]  ;;  %v10466_v25 = vld [vmem:[#allocation5_spill] sm:$0xff] }
 0x26d   : > { %10436 = vst [vmem:[#allocation137_spill] sm:$0xff] %v5434_v36  ;;  %10438 = vst [vmem:[#allocation138_spill] sm:$0xff] %v5438_v46  ;;  %v10450_v46 = vld [vmem:[#allocation45_spill] sm:$0xff]  ;;  %v5473_v36 = vpop.permute.xlu1 %1462  ;;  %v10468_v62 = vld [vmem:[#allocation63_spill] sm:$0xff] }
 0x26e   : > { %vm10443_vm14 = vmmov %vm10441_vm12  ;;  %10445 = vst [vmem:[#allocation31_spill] sm:$0xff] %v5455_v20  ;;  %v5489_v20 = vpop.permute.xlu0 %1494  ;;  %v10471_v48 = vld [vmem:[#allocation43_spill] sm:$0xff] }
 0x26f   : > { %v5450_v38 = vsel %vm10443_vm14, %v10442_v29, %v10440_v60  ;;  %vm10447_vm9 = vmmov %vm10441_vm12  ;;  %v10449_v60 = vld [vmem:[#allocation61_spill] sm:$0xff]  ;;  %vm10451_vm12 = vcmp.lt.s32.totalorder %v4803_v58, 16  ;;  %10452 = vst [vmem:[#allocation37_spill] sm:$0xff] %v5473_v36  ;;  %vm10453_vm14 = vcmp.lt.s32.totalorder %v4864_v13, 15  ;;  %2570 = vperm.xlu1 %3903, %v4791_v50   ;;  %v10508_v50 = vld [vmem:[#allocation74_spill] sm:$0xff] }
 0x270   : > { %v5461_v59 = vsel %vm10447_vm9, %v10439_v56, %v10446_v21  ;;  %vm10448_vm7 = vmmov %vm10447_vm9  ;;  %v822_v40 = vsel %vm10451_vm12, %v10450_v46, %v10449_v60  ;;  %v5477_v16 = vsel %vm10453_vm14, %v1261_v51, 0.0  ;;  %v5481_v56 = vsel %vm10455_vm2, %v1262_v23, 0.0  ;;  %10457 = vst [vmem:[#allocation61_spill] sm:$0xff] %v5489_v20  ;;  %v10459_v23 = vld [vmem:[#allocation46_spill] sm:$0xff]  ;;  %v10472_v20 = vld [vmem:[#allocation57_spill] sm:$0xff] }
 0x271   : > { %v5467_v54 = vsel %vm10448_vm7, %v10446_v21, %v10442_v29  ;;  %10454 = vst [vmem:[#allocation29_spill] sm:$0xff] %v5477_v16  ;;  %10456 = vst [vmem:[#allocation39_spill] sm:$0xff] %v5481_v56  ;;  %v10460_v56 = vld [vmem:[#allocation52_spill] sm:$0xff]  ;;  %v10461_v29 = vld [vmem:[#allocation47_spill] sm:$0xff]  ;;  %v5520_v55 = vmul.f32 %v10466_v25, %v822_v40  ;;  %v5549_v49 = vpop.permute.xlu1 %1486 }
 0x272   : > { %v5501_v16 = vsel %vm10448_vm7, %v10460_v56, %v10459_v23  ;;  %v818_v21 = vsel %vm10451_vm12, %v10449_v60, %v10461_v29  ;;  %vm10463_vm14 = vmmov %vm10448_vm7  ;;  %v10475_v40 = vld [vmem:[#allocation41_spill] sm:$0xff]  ;;  %10478 = vst [vmem:[#allocation47_spill] sm:$0xff] %v5549_v49  ;;  %v5569_v24 = vpop.permute.xlu0 %1555 }
 0x273   : > { %v5511_v27 = vsel %vm10463_vm14, %v10462_v35, %v10460_v56  ;;  %vm10465_vm2 = vmmov %vm10448_vm7  ;;  %10467 = vst [vmem:[#allocation45_spill] sm:$0xff] %v5520_v55  ;;  %vm10473_vm14 = vcmp.lt.s32.totalorder %v4803_v58, 17  ;;  %v10492_v36 = vld [vmem:[#allocation69_spill] sm:$0xff]  ;;  %v10505_v55 = vld [vmem:[#allocation56_spill] sm:$0xff]  ;;  %3904 = vset.pattern.permute.xlu1 %v10405_v26 }
 0x274   : > { %v5517_v51 = vsel %vm10465_vm2, %v10459_v23, %v10464_v6  ;;  %vm10469_vm7 = vmmov %vm10451_vm12  ;;  %v5537_v23 = vsel %vm10473_vm14, %v10472_v20, %v10471_v48  ;;  %10488 = vst [vmem:[#allocation5_spill] sm:$0xff] %v5569_v24  ;;  %v10827_v19 = vld [vmem:[#allocation137_spill] sm:$0xff] }
 0x275   : > { %v826_v60 = vsel %vm10469_vm7, %v10468_v62, %v10450_v46  ;;  %vm10470_vm12 = vmmov %vm10465_vm2  ;;  %10474 = vst [vmem:[#allocation46_spill] sm:$0xff] %v5537_v23  ;;  %v814_v46 = vsel %vm10469_vm7, %v10461_v29, %v10468_v62  ;;  %v5559_v23 = vmul.f32 %v10466_v25, %v818_v21  ;;  %v10486_v62 = vld [vmem:[#allocation49_spill] sm:$0xff] }
 0x276   : > { %v5531_v56 = vsel %vm10470_vm12, %v10464_v6, %v10462_v35  ;;  %vm10476_vm2 = vmmov %vm10473_vm14  ;;  %v10479_v35 = vld [vmem:[#allocation59_spill] sm:$0xff]  ;;  %vm10485_vm14 = vcmp.lt.s32.totalorder %v4803_v58, 1  ;;  %v5572_v49 = vmul.f32 %v10466_v25, %v826_v60  ;;  %v5596_v24 = vmul.f32 %v10466_v25, %v814_v46  ;;  %v5612_v46 = vpop.permute.xlu1 %1490 }
 0x277   : > { %v5543_v32 = vsel %vm10476_vm2, %v10475_v40, %v10472_v20  ;;  %vm10480_vm12 = vmmov %vm10476_vm2  ;;  %10482 = vst [vmem:[#allocation54_spill] sm:$0xff] %v5559_v23  ;;  %v10483_v20 = vld [vmem:[#allocation51_spill] sm:$0xff]  ;;  %v10553_v23 = vld [vmem:[#allocation76_spill] sm:$0xff] }
 0x278   : > { %10477 = vst [vmem:[#allocation52_spill] sm:$0xff] %v5543_v32  ;;  %v5556_v6 = vsel %vm10480_vm12, %v10471_v48, %v10479_v35  ;;  %v10484_v32 = vld [vmem:[#allocation65_spill] sm:$0xff]  ;;  %vm10487_vm2 = vmmov %vm10485_vm14  ;;  %v10489_v48 = vld [vmem:[#allocation67_spill] sm:$0xff] }
 0x279   : > { %10481 = vst [vmem:[#allocation44_spill] sm:$0xff] %v5556_v6  ;;  %v1060_v1 = vsel %vm10485_vm14, %v10484_v32, %v10483_v20  ;;  %v1064_v29 = vsel %vm10487_vm2, %v10486_v62, %v10484_v32  ;;  %vm10490_vm7 = vmmov %vm10487_vm2  ;;  %vm10494_vm14 = vcmp.lt.s32.totalorder %v4803_v58, 127 }
 0x27a   : > { %v1056_v21 = vsel %vm10490_vm7, %v10483_v20, %v10489_v48  ;;  %vm10491_vm12 = vmmov %vm10487_vm2  ;;  %v1233_v32 = vsel %vm10494_vm14, %v10493_v7, %v10492_v36  ;;  %vm10495_vm2 = vcmp.lt.s32.totalorder %v4803_v58, 17  ;;  %10496 = vst [vmem:[#allocation63_spill] sm:$0xff] %v5596_v24  ;;  %v10504_v20 = vld [vmem:[#allocation72_spill] sm:$0xff] }
 0x27b   : > { %v1068_v6 = vsel %vm10491_vm12, %v10489_v48, %v10486_v62  ;;  %v5590_v60 = vsel %vm10495_vm2, %v10479_v35, %v10475_v40  ;;  %vm10498_vm7 = vmmov %vm10494_vm14  ;;  %v10499_v48 = vld [vmem:[#allocation9_spill] sm:$0xff] }
 0x27c   : > { %v1229_v62 = vsel %vm10498_vm7, %v10492_v36, %v10497_v30  ;;  %v1095_v45 = vmul.f32 %v10499_v48, %v1064_v29  ;;  %v1096_v44 = vmul.f32 %v10499_v48, %v1060_v1  ;;  %vm10501_vm12 = vmmov %vm10498_vm7  ;;  %v1094_v36 = vmul.f32 %v10499_v48, %v1068_v6  ;;  %v10503_v29 = vld [vmem:[#allocation12_spill] sm:$0xff] }
 0x27d   : > { %v1225_v40 = vsel %vm10501_vm12, %v10497_v30, %v10500_v39  ;;  %vm10502_vm14 = vmmov %vm10498_vm7  ;;  %v1097_v35 = vmul.f32 %v10499_v48, %v1056_v21  ;;  %v1263_v1 = vmul.f32 %v10503_v29, %v1233_v32  ;;  %v714_v30 = vsel %vm10495_vm2, %v10505_v55, %v10504_v20  ;;  %v10506_v21 = vld [vmem:[#allocation58_spill] sm:$0xff] }
 0x27e   : > { %v1237_v25 = vsel %vm10502_vm14, %v10500_v39, %v10493_v7  ;;  %v5624_v39 = vpop.permute.xlu0 %1559  ;;  %v1264_v6 = vmul.f32 %v10503_v29, %v1229_v62  ;;  %vm10507_vm14 = vmmov %vm10495_vm2  ;;  %v1265_v48 = vmul.f32 %v10503_v29, %v1225_v40  ;;  %vm10511_vm7 = vcmp.ge.s32.totalorder %v4847_v4, 1 }
 0x27f   : > { %v710_v32 = vsel %vm10507_vm14, %v10504_v20, %v10506_v21  ;;  %v1266_v42 = vmul.f32 %v10503_v29, %v1237_v25  ;;  %vm10509_vm12 = vmmov %vm10495_vm2  ;;  %v5656_v40 = vsel %vm10511_vm7, %v1095_v45, 0.0  ;;  %v5660_v25 = vsel %vm10513_vm8, %v1096_v44, 0.0  ;;  %v10515_v29 = vld [vmem:[#allocation3_spill] sm:$0xff] }
 0x280   : > { %v706_v7 = vsel %vm10509_vm12, %v10506_v21, %v10508_v50  ;;  %vm10510_vm13 = vmmov %vm10495_vm2  ;;  %10512 = vst [vmem:[#allocation43_spill] sm:$0xff] %v5656_v40  ;;  %v5663_v21 = vmul.f32 %v10515_v29, %v714_v30  ;;  %vm10517_vm14 = vcmp.ge.s32.totalorder %v4873_v15, 1  ;;  %vm10519_vm7 = vcmp.ge.s32.totalorder %v4893_v12, 1 }
 0x281   : > { %v718_v62 = vsel %vm10510_vm13, %v10508_v50, %v10505_v55  ;;  %10514 = vst [vmem:[#allocation57_spill] sm:$0xff] %v5660_v25  ;;  %v5667_v55 = vpop.permute.xlu1 %1553  ;;  %v5672_v50 = vsel %vm10517_vm14, %v1094_v36, 0.0  ;;  %v5676_v45 = vsel %vm10519_vm7, %v1097_v35, 0.0  ;;  %vm10521_vm8 = vcmp.lt.s32.totalorder %v4873_v15, 15  ;;  %v10528_v35 = vld [vmem:[#allocation81_spill] sm:$0xff] }
 0x282   : > { %10516 = vst [vmem:[#allocation41_spill] sm:$0xff] %v5663_v21  ;;  %10518 = vst [vmem:[#allocation59_spill] sm:$0xff] %v5672_v50  ;;  %v5680_v44 = vsel %vm10521_vm8, %v1263_v1, 0.0  ;;  %v5683_v30 = vmul.f32 %v10515_v29, %v710_v32  ;;  %v5685_v20 = vpop.permute.xlu0 %1563  ;;  %vm10524_vm13 = vcmp.lt.s32.totalorder %v4847_v4, 15  ;;  %v5692_v36 = vmul.f32 %v10515_v29, %v718_v62  ;;  %v10545_v21 = vld [vmem:[#allocation7_spill] sm:$0xff] }
 0x283   : > { %10520 = vst [vmem:[#allocation51_spill] sm:$0xff] %v5676_v45  ;;  %10522 = vst [vmem:[#allocation65_spill] sm:$0xff] %v5680_v44  ;;  %v5689_v26 = vsel %vm10524_vm13, %v1264_v6, 0.0  ;;  %v5695_v25 = vmul.f32 %v10515_v29, %v706_v7  ;;  %v10529_v45 = vld [vmem:[#allocation73_spill] sm:$0xff]  ;;  %vm10530_vm14 = vcmp.lt.s32.totalorder %v4803_v58, 15  ;;  %vm10531_vm7 = vcmp.lt.s32.totalorder %v4864_v13, 15 }
 0x284   : > { %10523 = vst [vmem:[#allocation49_spill] sm:$0xff] %v5683_v30  ;;  %10525 = vst [vmem:[#allocation67_spill] sm:$0xff] %v5689_v26  ;;  %v944_v1 = vsel %vm10530_vm14, %v10529_v45, %v10528_v35  ;;  %v5703_v32 = vsel %vm10531_vm7, %v1265_v48, 0.0  ;;  %vm10533_vm8 = vcmp.lt.s32.totalorder %v4893_v12, 15  ;;  %v10535_v6 = vld [vmem:[#allocation75_spill] sm:$0xff]  ;;  %v10537_v7 = vld [vmem:[#allocation84_spill] sm:$0xff] }
 0x285   : > { %10526 = vst [vmem:[#allocation69_spill] sm:$0xff] %v5692_v36  ;;  %10527 = vst [vmem:[#allocation53_spill] sm:$0xff] %v5695_v25  ;;  %v5707_v44 = vsel %vm10533_vm8, %v1266_v42, 0.0  ;;  %v10540_v48 = vld [vmem:[#allocation70_spill] sm:$0xff]  ;;  %vm10542_vm7 = vcmp.lt.s32.totalorder %v4803_v58, 127  ;;  %v5738_v50 = vmul.f32 %v10545_v21, %v944_v1  ;;  %v10558_v1 = vld [vmem:[#allocation60_spill] sm:$0xff] }
 0x286   : > { %10532 = vst [vmem:[#allocation55_spill] sm:$0xff] %v5703_v32  ;;  %10534 = vst [vmem:[#allocation9_spill] sm:$0xff] %v5707_v44  ;;  %v10541_v44 = vld [vmem:[#allocation85_spill] sm:$0xff]  ;;  %v10552_v30 = vld [vmem:[#allocation62_spill] sm:$0xff]  ;;  %vm10572_vm2 = vcmp.lt.s32.totalorder %v4803_v58, 1 }
 0x287   : > { %vm10536_vm13 = vmmov %vm10530_vm14  ;;  %v1230_v32 = vsel %vm10542_vm7, %v10541_v44, %v10540_v48  ;;  %10546 = vst [vmem:[#allocation71_spill] sm:$0xff] %v5738_v50  ;;  %v5982_v50 = vmul.f32 %v4857_v57, %v5517_v51 }
 0x288   : > { %v940_v62 = vsel %vm10536_vm13, %v10528_v35, %v10535_v6  ;;  %vm10538_vm12 = vmmov %vm10536_vm13  ;;  %v10543_v35 = vld [vmem:[#allocation68_spill] sm:$0xff]  ;;  %v1268_v31 = vmul.f32 %v10557_v33, %v1230_v32  ;;  %v10570_v32 = vld [vmem:[#allocation66_spill] sm:$0xff] }
 0x289   : > { %v948_v29 = vsel %vm10538_vm12, %v10537_v7, %v10529_v45  ;;  %vm10539_vm14 = vmmov %vm10538_vm12  ;;  %v5732_v45 = vpop.permute.xlu1 %1557  ;;  %v5757_v26 = vmul.f32 %v10545_v21, %v940_v62  ;;  %10636 = vst [vmem:[#allocation144_spill] sm:$0xff] %v5982_v50  ;;  %v10664_v50 = vld [vmem:[#allocation28_spill] sm:$0xff] }
 0x28a   : > { %v936_v42 = vsel %vm10539_vm14, %v10535_v6, %v10537_v7  ;;  %vm10544_vm8 = vmmov %vm10542_vm7  ;;  %v10547_v6 = vld [vmem:[#allocation87_spill] sm:$0xff]  ;;  %vm10554_vm14 = vcmp.lt.s32.totalorder %v4803_v58, 16 }
 0x28b   : > { %v1234_v40 = vsel %vm10544_vm8, %v10543_v35, %v10541_v44  ;;  %vm10548_vm12 = vmmov %vm10542_vm7  ;;  %v5748_v44 = vpop.permute.xlu0 %1567  ;;  %10550 = vst [vmem:[#allocation12_spill] sm:$0xff] %v5757_v26  ;;  %v5971_v26 = vmul.f32 %v4857_v57, %v5511_v27 }
 0x28c   : > { %v1226_v7 = vsel %vm10548_vm12, %v10540_v48, %v10547_v6  ;;  %vm10549_vm13 = vmmov %vm10542_vm7  ;;  %v5760_v48 = vmul.f32 %v10545_v21, %v948_v29  ;;  %v1267_v36 = vmul.f32 %v10557_v33, %v1234_v40  ;;  %v10561_v29 = vld [vmem:[#allocation78_spill] sm:$0xff]  ;;  %vm10564_vm12 = vcmp.lt.s32.totalorder %v4836_v8, 15 }
 0x28d   : > { %v1238_v24 = vsel %vm10549_vm13, %v10547_v6, %v10543_v35  ;;  %v5766_v35 = vsel %vm10554_vm14, %v10553_v23, %v10552_v30  ;;  %v5769_v6 = vmul.f32 %v10545_v21, %v936_v42  ;;  %vm10559_vm7 = vmmov %vm10554_vm14  ;;  %vm10565_vm13 = vcmp.ge.s32.totalorder %v4836_v8, 4294967295  ;;  %v10574_v42 = vld [vmem:[#allocation64_spill] sm:$0xff]  ;;  %10634 = vst [vmem:[#allocation142_spill] sm:$0xff] %v5971_v26 }
 0x28e   : > { %10551 = vst [vmem:[#allocation72_spill] sm:$0xff] %v5760_v48  ;;  %10555 = vst [vmem:[#allocation56_spill] sm:$0xff] %v5766_v35  ;;  %v5777_v62 = vsel %vm10559_vm7, %v10558_v1, %v10553_v23  ;;  %v1269_v35 = vmul.f32 %v10557_v33, %v1226_v7  ;;  %v1270_v21 = vmul.f32 %v10557_v33, %v1238_v24  ;;  %v10566_v40 = vmov 0  ;;  %v5796_v23 = vpop.permute.xlu1 %1561  ;;  %v10571_v33 = vld [vmem:[#allocation80_spill] sm:$0xff]  ;;  %v10658_v48 = vld [vmem:[#allocation21_spill] sm:$0xff] }
 0x28f   : > { %10556 = vst [vmem:[#allocation58_spill] sm:$0xff] %v5769_v6  ;;  %10560 = vst [vmem:[#allocation74_spill] sm:$0xff] %v5777_v62  ;;  %v5808_v24 = vsel %vm10572_vm2, %v10571_v33, %v10570_v32 }
 0x290   : > { %vm10562_vm8 = vmmov %vm10559_vm7  ;;  %10573 = vst [vmem:[#allocation73_spill] sm:$0xff] %v5808_v24  ;;  %v10588_v24 = vmov 0 }
 0x291   : > { %v5783_v25 = vsel %vm10562_vm8, %v10552_v30, %v10561_v29  ;;  %vm5791_vm14 = vmand %vm10565_vm13, %vm10564_vm12  ;;  %vm10577_vm13 = vcmp.lt.s32.totalorder %v4831_v63, 15 }
 0x292   : > { %10563 = vst [vmem:[#allocation3_spill] sm:$0xff] %v5783_v25  ;;  %v10567_v40 = vsel %vm5791_vm14, 4294967295, %v10566_v40  ;;  %vm10569_vm8 = vmmov %vm10559_vm7  ;;  %v5902_v43 = vpop.permute.xlu1 %1565 }
 0x293   : > { %10568 = vst [vmem:[#allocation81_spill] sm:$0xff] %v10567_v40  ;;  %v5802_v30 = vsel %vm10569_vm8, %v10561_v29, %v10558_v1  ;;  %vm10575_vm12 = vmmov %vm10572_vm2  ;;  %vm10578_vm8 = vcmp.ge.s32.totalorder %v4831_v63, 4294967295  ;;  %v10579_v1 = vmov 0  ;;  %v5827_v29 = vpop.permute.xlu0 %1571  ;;  %v10597_v63 = vmov 0 }
 0x294   : > { %v5814_v7 = vsel %vm10575_vm12, %v10574_v42, %v10571_v33  ;;  %vm5823_vm7 = vmand %vm10578_vm8, %vm10577_vm13  ;;  %v10582_v33 = vld [vmem:[#allocation82_spill] sm:$0xff]  ;;  %vm10586_vm13 = vcmp.lt.s32.totalorder %v4840_v41, 15  ;;  %vm10587_vm8 = vcmp.ge.s32.totalorder %v4840_v41, 4294967295 }
 0x295   : > { %10576 = vst [vmem:[#allocation75_spill] sm:$0xff] %v5814_v7  ;;  %v10580_v1 = vsel %vm5823_vm7, 4294967295, %v10579_v1  ;;  %v5836_v7 = vsel %vm10572_vm2, %v10570_v32, %v10582_v33  ;;  %vm10584_vm12 = vmmov %vm10572_vm2  ;;  %vm10591_vm2 = vcmp.lt.s32.totalorder %v4873_v15, 15  ;;  %v10600_v41 = vld [vmem:[#allocation86_spill] sm:$0xff]  ;;  %v10607_v32 = vmov 0 }
 0x296   : > { %10581 = vst [vmem:[#allocation84_spill] sm:$0xff] %v10580_v1  ;;  %10583 = vst [vmem:[#allocation70_spill] sm:$0xff] %v5836_v7  ;;  %v5842_v8 = vsel %vm10584_vm12, %v10582_v33, %v10574_v42  ;;  %v5860_v42 = vsel %vm10591_vm2, %v1267_v36, 0.0  ;;  %vm10593_vm12 = vcmp.lt.s32.totalorder %v4847_v4, 15  ;;  %v5876_v7 = vmul.f32 %v10600_v41, %v5450_v38  ;;  %v5991_v27 = vpop.permute.xlu1 %1569 }
 0x297   : > { %10585 = vst [vmem:[#allocation85_spill] sm:$0xff] %v5842_v8  ;;  %vm5851_vm3 = vmand %vm10587_vm8, %vm10586_vm13  ;;  %v5864_v33 = vsel %vm10593_vm12, %v1268_v31, 0.0  ;;  %vm10602_vm8 = vcmp.lt.s32.totalorder %v4864_v13, 15  ;;  %vm10604_vm2 = vcmp.lt.s32.totalorder %v4893_v12, 15  ;;  %vm10606_vm12 = vcmp.ge.s32.totalorder %v4873_v15, 1 }
 0x298   : > { %v10589_v24 = vsel %vm5851_vm3, 4294967295, %v10588_v24  ;;  %10592 = vst [vmem:[#allocation7_spill] sm:$0xff] %v5860_v42  ;;  %10594 = vst [vmem:[#allocation87_spill] sm:$0xff] %v5864_v33  ;;  %v5880_v36 = vsel %vm10602_vm8, %v1269_v35, 0.0  ;;  %v5884_v31 = vsel %vm10604_vm2, %v1270_v21, 0.0  ;;  %v5896_v38 = vmul.f32 %v10600_v41, %v5444_v34  ;;  %v5928_v42 = vpop.permute.xlu0 %1575 }
 0x299   : > { %10590 = vst [vmem:[#allocation68_spill] sm:$0xff] %v10589_v24  ;;  %vm5870_vm13 = vmand %vm10596_vm4, %vm10595_vm15  ;;  %v5900_v35 = vmul.f32 %v10600_v41, %v5461_v59  ;;  %vm10612_vm4 = vcmp.ge.s32.totalorder %v4847_v4, 1  ;;  %v10613_v21 = vmov 0  ;;  %v5918_v34 = vmul.f32 %v4833_v53, %v5075_v3 }
 0x29a   : > { %v10598_v63 = vsel %vm5870_vm13, 4294967295, %v10597_v63  ;;  %10601 = vst [vmem:[#allocation76_spill] sm:$0xff] %v5876_v7  ;;  %10603 = vst [vmem:[#allocation13_spill] sm:$0xff] %v5880_v36  ;;  %v5922_v59 = vmul.f32 %v4833_v53, %v5069_v47  ;;  %v10619_v36 = vld [vmem:[#allocation77_spill] sm:$0xff]  ;;  %vm10620_vm2 = vcmp.lt.s32.totalorder %v4803_v58, 113  ;;  %v5940_v3 = vmul.f32 %v4833_v53, %v5081_v37  ;;  %v10626_v47 = vld [vmem:[#allocation79_spill] sm:$0xff] }
 0x29b   : > { %10599 = vst [vmem:[#allocation62_spill] sm:$0xff] %v10598_v63  ;;  %10605 = vst [vmem:[#allocation60_spill] sm:$0xff] %v5884_v31  ;;  %v5914_v31 = vmul.f32 %v10600_v41, %v5467_v54  ;;  %v1355_v33 = vsel %vm10620_vm2, %v10619_v36, %v5030_v0  ;;  %v10622_v41 = vmov 0  ;;  %v1347_v8 = vsel %vm10620_vm2, %v10626_v47, %v5083_v11 }
 0x29c   : > { %vm5890_vm15 = vmand %vm5791_vm14, %vm10606_vm12  ;;  %10610 = vst [vmem:[#allocation66_spill] sm:$0xff] %v5896_v38  ;;  %vm10621_vm12 = vcmp.ge.s32.totalorder %v4864_v13, 1  ;;  %v10630_v37 = vmov 0  ;;  %v10653_v38 = vld [vmem:[#allocation123_spill] sm:$0xff] }
 0x29d   : > { %v10608_v32 = vsel %vm5890_vm15, 4294967295, %v10607_v32  ;;  %10611 = vst [vmem:[#allocation80_spill] sm:$0xff] %v5900_v35  ;;  %vm5908_vm8 = vmand %vm5823_vm7, %vm10612_vm4 }
 0x29e   : > { %10609 = vst [vmem:[#allocation78_spill] sm:$0xff] %v10608_v32  ;;  %v10614_v21 = vsel %vm5908_vm8, 4294967295, %v10613_v21  ;;  %10616 = vst [vmem:[#allocation82_spill] sm:$0xff] %v5914_v31  ;;  %v10648_v31 = vld [vmem:[#allocation118_spill] sm:$0xff] }
 0x29f   : > { %10615 = vst [vmem:[#allocation64_spill] sm:$0xff] %v10614_v21  ;;  %10617 = vst [vmem:[#allocation86_spill] sm:$0xff] %v5918_v34  ;;  %v10647_v34 = vld [vmem:[#allocation132_spill] sm:$0xff] }
 0x2a0   : > { %10618 = vst [vmem:[#allocation139_spill] sm:$0xff] %v5922_v59  ;;  %vm5934_vm4 = vmand %vm5851_vm3, %vm10621_vm12 }
 0x2a1   : > { %v10623_v41 = vsel %vm5934_vm4, 4294967295, %v10622_v41  ;;  %10625 = vst [vmem:[#allocation140_spill] sm:$0xff] %v5940_v3  ;;  %vm10627_vm9 = vmmov %vm10620_vm2  ;;  %v6045_v3 = vpop.permute.xlu1 %1573 }
 0x2a2   : > { %10624 = vst [vmem:[#allocation77_spill] sm:$0xff] %v10623_v41  ;;  %v1351_v54 = vsel %vm10627_vm9, %v5030_v0, %v10626_v47  ;;  %vm10628_vm12 = vmmov %vm10620_vm2  ;;  %v5967_v47 = vmul.f32 %v4833_v53, %v5090_v52  ;;  %v5986_v53 = vmul.f32 %v4857_v57, %v5531_v56  ;;  %v5989_v52 = vmul.f32 %v4913_v14, %v1355_v33  ;;  %v10642_v56 = vld [vmem:[#allocation88_spill] sm:$0xff] }
 0x2a3   : > { %v1359_v6 = vsel %vm10628_vm12, %v5083_v11, %v10619_v36  ;;  %vm5958_vm6 = vmand %vm5870_vm13, %vm10629_vm1  ;;  %v5975_v11 = vmul.f32 %v4857_v57, %v5501_v16  ;;  %v5997_v0 = vmul.f32 %v4913_v14, %v1351_v54  ;;  %v6000_v36 = vmul.f32 %v4913_v14, %v1347_v8  ;;  %v6005_v57 = vpop.permute.xlu0 %1579  ;;  %v10644_v16 = vld [vmem:[#allocation107_spill] sm:$0xff]  ;;  %v10670_v41 = vld [vmem:[#allocation40_spill] sm:$0xff] }
 0x2a4   : > { %v10631_v37 = vsel %vm5958_vm6, 4294967295, %v10630_v37  ;;  %10633 = vst [vmem:[#allocation141_spill] sm:$0xff] %v5967_v47  ;;  %10637 = vst [vmem:[#allocation145_spill] sm:$0xff] %v5986_v53  ;;  %v6003_v51 = vmul.f32 %v4913_v14, %v1359_v6  ;;  %vm10643_vm1 = vcmp.lt.s32.totalorder %v4803_v58, 112  ;;  %v10645_v47 = vld [vmem:[#allocation91_spill] sm:$0xff]  ;;  %v10660_v53 = vld [vmem:[#allocation8_spill] sm:$0xff] }
 0x2a5   : > { %10632 = vst [vmem:[#allocation79_spill] sm:$0xff] %v10631_v37  ;;  %10635 = vst [vmem:[#allocation143_spill] sm:$0xff] %v5975_v11  ;;  %v1473_v54 = vsel %vm10643_vm1, %v10642_v56, %v4868_v28  ;;  %v1477_v25 = vsel %vm10643_vm1, %v10658_v48, %v10642_v56  ;;  %v10662_v37 = vld [vmem:[#allocation37_spill] sm:$0xff]  ;;  %v10667_v56 = vld [vmem:[#allocation38_spill] sm:$0xff] }
 0x2a6   : > { %10638 = vst [vmem:[#allocation146_spill] sm:$0xff] %v5989_v52  ;;  %10639 = vst [vmem:[#allocation147_spill] sm:$0xff] %v5997_v0  ;;  %v10650_v52 = vld [vmem:[#allocation18_spill] sm:$0xff]  ;;  %v10652_v0 = vld [vmem:[#allocation11_spill] sm:$0xff]  ;;  %v6116_v62 = vmul.f32 %v10670_v41, %v1473_v54 }
 0x2a7   : > { %10640 = vst [vmem:[#allocation148_spill] sm:$0xff] %v6000_v36  ;;  %10641 = vst [vmem:[#allocation149_spill] sm:$0xff] %v6003_v51  ;;  %v6060_v33 = vpop.permute.xlu0 %1583  ;;  %v1476_v8 = vsel %vm10643_vm1, %v10653_v38, %v10652_v0  ;;  %v10654_v36 = vld [vmem:[#allocation27_spill] sm:$0xff]  ;;  %v10656_v51 = vld [vmem:[#allocation134_spill] sm:$0xff] }
 0x2a8   : > { %vm10646_vm9 = vmmov %vm10643_vm1  ;;  %10671 = vst [vmem:[#allocation88_spill] sm:$0xff] %v6116_v62 }
 0x2a9   : > { %v1475_v6 = vsel %vm10646_vm9, %v10645_v47, %v10644_v16  ;;  %vm10649_vm2 = vmmov %vm10643_vm1 }
 0x2aa   : > { %v1474_v35 = vsel %vm10649_vm2, %v10648_v31, %v10647_v34  ;;  %vm10651_vm12 = vmmov %vm10643_vm1 }
 0x2ab   : > { %v1469_v59 = vsel %vm10651_vm12, %v4868_v28, %v10650_v52  ;;  %vm10655_vm9 = vmmov %vm10643_vm1  ;;  %v6126_v11 = vpop.permute.xlu0 %1607 }
 0x2ac   : > { %v1471_v14 = vsel %vm10655_vm9, %v10644_v16, %v10654_v36  ;;  %vm10657_vm2 = vmmov %vm10643_vm1 }
 0x2ad   : > { %v1470_v7 = vsel %vm10657_vm2, %v10647_v34, %v10656_v51  ;;  %vm10659_vm12 = vmmov %vm10643_vm1 }
 0x2ae   : > { %v1465_v28 = vsel %vm10659_vm12, %v10650_v52, %v10658_v48  ;;  %vm10661_vm9 = vmmov %vm10643_vm1 }
 0x2af   : > { %v1472_v16 = vsel %vm10661_vm9, %v10652_v0, %v10660_v53  ;;  %vm10663_vm2 = vmmov %vm10643_vm1  ;;  %v1466_v0 = vsel %vm10643_vm1, %v10656_v51, %v10667_v56  ;;  %v6124_v51 = vpop.permute.xlu1 %1577 }
 0x2b0   : > { %v1468_v34 = vsel %vm10663_vm2, %v10660_v53, %v10662_v37  ;;  %vm10665_vm6 = vmmov %vm10643_vm1 }
 0x2b1   : > { %v1467_v52 = vsel %vm10665_vm6, %v10654_v36, %v10664_v50  ;;  %vm10666_vm12 = vmmov %vm10643_vm1  ;;  %vm10688_vm6 = vcmp.lt.s32.totalorder %v4803_v58, 111 }
 0x2b2   : > { %v1479_v48 = vsel %vm10666_vm12, %v10664_v50, %v10645_v47  ;;  %vm10668_vm9 = vmmov %vm10643_vm1  ;;  %v6119_v50 = vmul.f32 %v10670_v41, %v1469_v59  ;;  %v6122_v47 = vmul.f32 %v10670_v41, %v1465_v28  ;;  %v10680_v28 = vld [vmem:[#allocation47_spill] sm:$0xff] }
 0x2b3   : > { %v1480_v53 = vsel %vm10668_vm9, %v10662_v37, %v10653_v38  ;;  %vm10669_vm2 = vmmov %vm10643_vm1  ;;  %v6129_v38 = vmul.f32 %v10670_v41, %v1477_v25  ;;  %v10675_v37 = vld [vmem:[#allocation61_spill] sm:$0xff]  ;;  %v6147_v26 = vmul.f32 %v10680_v28, %v1470_v7  ;;  %v6150_v25 = vmul.f32 %v10680_v28, %v1466_v0 }
 0x2b4   : > { %v1478_v36 = vsel %vm10669_vm2, %v10667_v56, %v10648_v31  ;;  %10672 = vst [vmem:[#allocation107_spill] sm:$0xff] %v6119_v50  ;;  %10673 = vst [vmem:[#allocation91_spill] sm:$0xff] %v6122_v47  ;;  %v6132_v21 = vmul.f32 %v10675_v37, %v1476_v8  ;;  %v6135_v31 = vmul.f32 %v10675_v37, %v1472_v16  ;;  %v10687_v7 = vld [vmem:[#allocation5_spill] sm:$0xff] }
 0x2b5   : > { %10674 = vst [vmem:[#allocation132_spill] sm:$0xff] %v6129_v38  ;;  %v6138_v54 = vmul.f32 %v10675_v37, %v1468_v34  ;;  %v6141_v59 = vmul.f32 %v10675_v37, %v1480_v53  ;;  %v6144_v56 = vmul.f32 %v10680_v28, %v1474_v35  ;;  %10682 = vst [vmem:[#allocation134_spill] sm:$0xff] %v6147_v26  ;;  %v6188_v37 = vpop.permute.xlu0 %721  ;;  %v10697_v38 = vld [vmem:[#allocation44_spill] sm:$0xff]  ;;  %v10717_v26 = vld [vmem:[#allocation113_spill] sm:$0xff] }
 0x2b6   : > { %10676 = vst [vmem:[#allocation118_spill] sm:$0xff] %v6132_v21  ;;  %10677 = vst [vmem:[#allocation18_spill] sm:$0xff] %v6135_v31  ;;  %v6153_v41 = vmul.f32 %v10680_v28, %v1478_v36  ;;  %v6156_v8 = vmul.f32 %v5612_v46, %v1475_v6  ;;  %v6159_v16 = vmul.f32 %v5612_v46, %v1471_v14 }
 0x2b7   : > { %10678 = vst [vmem:[#allocation11_spill] sm:$0xff] %v6138_v54  ;;  %10679 = vst [vmem:[#allocation123_spill] sm:$0xff] %v6141_v59  ;;  %v6162_v34 = vmul.f32 %v5612_v46, %v1467_v52  ;;  %v6174_v6 = vmul.f32 %v5612_v46, %v1479_v48  ;;  %v1582_v52 = vpop.permute.xlu1 %1581  ;;  %v1595_v36 = vsel %vm10688_vm6, %v10687_v7, %v5685_v20  ;;  %v10696_v54 = vld [vmem:[#allocation46_spill] sm:$0xff] }
 0x2b8   : > { %10681 = vst [vmem:[#allocation27_spill] sm:$0xff] %v6144_v56  ;;  %10683 = vst [vmem:[#allocation21_spill] sm:$0xff] %v6150_v25  ;;  %v6258_v50 = vmul.f32 %v6126_v11, %v1595_v36  ;;  %v10704_v36 = vmov 0  ;;  %v10719_v25 = vld [vmem:[#allocation63_spill] sm:$0xff] }
 0x2b9   : > { %10684 = vst [vmem:[#allocation8_spill] sm:$0xff] %v6153_v41  ;;  %10685 = vst [vmem:[#allocation37_spill] sm:$0xff] %v6162_v34  ;;  %v732_v46 = vpop.permute.xlu0 %731 }
 0x2ba   : > { %10686 = vst [vmem:[#allocation28_spill] sm:$0xff] %v6174_v6  ;;  %vm10689_vm12 = vmmov %vm10688_vm6  ;;  %v747_v59 = vmul.f32 %v732_v46, %v5590_v60  ;;  %v749_v21 = vmul.f32 %v732_v46, %v10696_v54  ;;  %v750_v47 = vmul.f32 %v732_v46, %v10697_v38  ;;  %v10700_v60 = vmov 0 }
 0x2bb   : > { %v6225_v28 = vsel %vm10689_vm12, %v5624_v39, %v5748_v44  ;;  %vm10690_vm1 = vmmov %vm10688_vm6  ;;  %v1604_v38 = vpop.permute.xlu1 %1603 }
 0x2bc   : > { %v1594_v53 = vsel %vm10690_vm1, %v5667_v55, %v5796_v23  ;;  %vm10691_vm9 = vmmov %vm10690_vm1 }
 0x2bd   : > { %v1591_v48 = vsel %vm10691_vm9, %v5685_v20, %v5827_v29  ;;  %vm10692_vm2 = vmmov %vm10690_vm1  ;;  %v10695_v20 = vld [vmem:[#allocation52_spill] sm:$0xff]  ;;  %vm10699_vm9 = vcmp.lt.s32.totalorder %v4873_v15, 15  ;;  %v10713_v15 = vld [vmem:[#allocation106_spill] sm:$0xff]  ;;  %v6306_v34 = vpop.permute.xlu0 %1676 }
 0x2be   : > { %v1596_v35 = vsel %vm10692_vm2, %v5732_v45, %v5902_v43  ;;  %vm10693_vm6 = vmmov %vm10690_vm1  ;;  %v748_v31 = vmul.f32 %v732_v46, %v10695_v20  ;;  %v6261_v62 = vmul.f32 %v6126_v11, %v1591_v48  ;;  %v10711_v48 = vld [vmem:[#allocation45_spill] sm:$0xff]  ;;  %10721 = vst [vmem:[#allocation47_spill] sm:$0xff] %v6306_v34 }
 0x2bf   : > { %v6243_v0 = vsel %vm10693_vm6, %v5748_v44, %v5928_v42  ;;  %vm10694_vm12 = vmmov %vm10690_vm1  ;;  %v1599_v44 = vsel %vm10690_vm1, %v6005_v57, %v10687_v7  ;;  %v773_v7 = vsel %vm5231_vm10, %v749_v21, 0.0  ;;  %vm10703_vm6 = vcmp.lt.s32.totalorder %v4847_v4, 15 }
 0x2c0   : > { %v1587_v14 = vsel %vm10694_vm12, %v5827_v29, %v6005_v57  ;;  %10698 = vst [vmem:[#allocation38_spill] sm:$0xff] %v6261_v62  ;;  %vm6270_vm2 = vmand %vm5791_vm14, %vm10699_vm9  ;;  %v771_v57 = vsel %vm5250_vm0, %v747_v59, 0.0  ;;  %v772_v54 = vsel %vm5203_vm11, %v748_v31, 0.0  ;;  %vm10707_vm1 = vnez %v10297_v2  ;;  %v10709_v31 = vld [vmem:[#allocation102_spill] sm:$0xff] }
 0x2c1   : > { %v6264_v29 = vmul.f32 %v6126_v11, %v1587_v14  ;;  %v10701_v60 = vsel %vm6270_vm2, 4294967295, %v10700_v60  ;;  %v774_v14 = vsel %vm5279_vm5, %v750_v47, 0.0  ;;  %vm6286_vm12 = vmand %vm5823_vm7, %vm10703_vm6  ;;  %v10708_v59 = vsel %vm10707_vm1, %v5572_v49, 0.0  ;;  %v10715_v47 = vld [vmem:[#allocation54_spill] sm:$0xff] }
 0x2c2   : > { %10702 = vst [vmem:[#allocation40_spill] sm:$0xff] %v10701_v60  ;;  %v10705_v36 = vsel %vm6286_vm12, 4294967295, %v10704_v36  ;;  %v892_v46 = vadd.f32 %v10708_v59, %v771_v57  ;;  %vm10710_vm9 = vnez %v10709_v31  ;;  %vm10714_vm14 = vnez %v10713_v15 }
 0x2c3   : > { %10706 = vst [vmem:[#allocation61_spill] sm:$0xff] %v10705_v36  ;;  %v10712_v21 = vsel %vm10710_vm9, %v10711_v48, 0.0  ;;  %v10716_v4 = vsel %vm10714_vm14, %v10715_v47, 0.0  ;;  %vm10718_vm6 = vnez %v10717_v26  ;;  %vm10722_vm7 = vcmp.lt.s32.totalorder %v4803_v58, 111 }
 0x2c4   : > { %v893_v20 = vadd.f32 %v10712_v21, %v772_v54  ;;  %v894_v41 = vadd.f32 %v10716_v4, %v773_v7  ;;  %v10720_v56 = vsel %vm10718_vm6, %v10719_v25, 0.0  ;;  %v1590_v49 = vsel %vm10722_vm7, %v5796_v23, %v5991_v27  ;;  %vm10723_vm9 = vmmov %vm10722_vm7  ;;  %v10738_v7 = vld [vmem:[#allocation42_spill] sm:$0xff] }
 0x2c5   : > { %v895_v6 = vadd.f32 %v10720_v56, %v774_v14  ;;  %v1592_v57 = vsel %vm10723_vm9, %v5902_v43, %v6045_v3  ;;  %vm10724_vm14 = vmmov %vm10722_vm7  ;;  %vm10725_vm6 = vcmp.lt.s32.totalorder %v4864_v13, 15  ;;  %v10726_v56 = vmov 0  ;;  %v10744_v21 = vld [vmem:[#allocation6_spill] sm:$0xff] }
 0x2c6   : > { %v6320_v4 = vsel %vm10724_vm14, %v5928_v42, %v6060_v33  ;;  %vm6326_vm4 = vmand %vm5851_vm3, %vm10725_vm6  ;;  %v6331_v23 = vmul.f32 %v6126_v11, %v1599_v44  ;;  %vm10730_vm7 = vcmp.lt.s32.totalorder %v4893_v12, 15  ;;  %v10731_v43 = vmov 0  ;;  %v10735_v42 = vld [vmem:[#allocation35_spill] sm:$0xff]  ;;  %v10741_v11 = vld [vmem:[#allocation48_spill] sm:$0xff] }
 0x2c7   : > { %v10727_v56 = vsel %vm6326_vm4, 4294967295, %v10726_v56  ;;  %vm6337_vm9 = vmand %vm5870_vm13, %vm10730_vm7  ;;  %vm10734_vm14 = vnez %v10324_v17  ;;  %vm10737_vm6 = vnez %v10305_v22  ;;  %vm10740_vm3 = vnez %v10315_v5 }
 0x2c8   : > { %10728 = vst [vmem:[#allocation5_spill] sm:$0xff] %v10727_v56  ;;  %10729 = vst [vmem:[#allocation52_spill] sm:$0xff] %v6331_v23  ;;  %v10732_v43 = vsel %vm6337_vm9, 4294967295, %v10731_v43  ;;  %v10736_v25 = vsel %vm10734_vm14, %v10735_v42, 0.0  ;;  %v10739_v14 = vsel %vm10737_vm6, %v10738_v7, 0.0  ;;  %v10742_v44 = vsel %vm10740_vm3, %v10741_v11, 0.0  ;;  %v1612_v42 = vpop.permute.xlu1 %1611 }
 0x2c9   : > { %10733 = vst [vmem:[#allocation46_spill] sm:$0xff] %v10732_v43  ;;  %v1013_v54 = vadd.f32 %v10736_v25, %v892_v46  ;;  %v1014_v59 = vadd.f32 %v10739_v14, %v893_v20  ;;  %v1015_v48 = vadd.f32 %v10742_v44, %v894_v41  ;;  %vm10743_vm7 = vnez %v10327_v10  ;;  %v6380_v14 = vpop.permute.xlu0 %1691  ;;  %v10753_v44 = vld [vmem:[#allocation57_spill] sm:$0xff]  ;;  %v10781_v43 = vld [vmem:[#allocation74_spill] sm:$0xff] }
 0x2ca   : > { %v10745_v47 = vsel %vm10743_vm7, %v10744_v21, 0.0  ;;  %vm10746_vm14 = vcmp.lt.s32.totalorder %v4803_v58, 111  ;;  %10751 = vst [vmem:[#allocation44_spill] sm:$0xff] %v6380_v14  ;;  %v6419_v14 = vmul.f32 %v1612_v42, %v1596_v35 }
 0x2cb   : > { %v1016_v34 = vadd.f32 %v10745_v47, %v895_v6  ;;  %v1601_v46 = vsel %vm10746_vm14, %v6060_v33, %v5624_v39  ;;  %vm10747_vm6 = vmmov %vm10746_vm14  ;;  %v10749_v33 = vld [vmem:[#allocation59_spill] sm:$0xff]  ;;  %v1136_v21 = vadd.f32 %v10753_v44, %v1015_v48  ;;  %v10758_v48 = vld [vmem:[#allocation126_spill] sm:$0xff]  ;;  %v6409_v44 = vmul.f32 %v1604_v38, %v1594_v53 }
 0x2cc   : > { %v1586_v20 = vsel %vm10747_vm6, %v5991_v27, %v6124_v51  ;;  %vm10748_vm3 = vmmov %vm10747_vm6  ;;  %v1134_v25 = vadd.f32 %v10749_v33, %v1013_v54  ;;  %v10750_v27 = vld [vmem:[#allocation43_spill] sm:$0xff]  ;;  %v10756_v33 = vld [vmem:[#allocation125_spill] sm:$0xff] }
 0x2cd   : > { %v1598_v41 = vsel %vm10748_vm3, %v6124_v51, %v5667_v55  ;;  %v1135_v7 = vadd.f32 %v10750_v27, %v1014_v59  ;;  %v10752_v51 = vld [vmem:[#allocation127_spill] sm:$0xff]  ;;  %v1588_v54 = vsel %vm10748_vm3, %v6045_v3, %v1582_v52  ;;  %vm10755_vm14 = vmmov %vm10748_vm3  ;;  %v6399_v27 = vmul.f32 %v6188_v37, %v10756_v33  ;;  %v10757_v55 = vld [vmem:[#allocation124_spill] sm:$0xff]  ;;  %10759 = vst [vmem:[#allocation45_spill] sm:$0xff] %v6409_v44 }
 0x2ce   : > { %v6387_v11 = vmul.f32 %v6188_v37, %v10752_v51  ;;  %v10754_v47 = vld [vmem:[#allocation51_spill] sm:$0xff]  ;;  %v1600_v59 = vsel %vm10755_vm14, %v1582_v52, %v5732_v45  ;;  %v6403_v51 = vmul.f32 %v6188_v37, %v10757_v55  ;;  %v6413_v3 = vmul.f32 %v1604_v38, %v1586_v20  ;;  %v10763_v45 = vld [vmem:[#allocation109_spill] sm:$0xff]  ;;  %v10764_v33 = vld [vmem:[#allocation110_spill] sm:$0xff]  ;;  %v830_v20 = vpop.permute.xlu0 %829 }
 0x2cf   : > { %v1137_v6 = vadd.f32 %v10754_v47, %v1016_v34  ;;  %v6407_v34 = vmul.f32 %v6188_v37, %v10758_v48  ;;  %v6411_v47 = vmul.f32 %v1604_v38, %v1590_v49  ;;  %v6415_v39 = vmul.f32 %v1604_v38, %v1598_v41  ;;  %v10765_v37 = vld [vmem:[#allocation111_spill] sm:$0xff]  ;;  %v10766_v53 = vld [vmem:[#allocation112_spill] sm:$0xff] }
 0x2d0   : > { %10761 = vst [vmem:[#allocation63_spill] sm:$0xff] %v6413_v3  ;;  %v1182_v52 = vadd.f32 %v10763_v45, %v1134_v25  ;;  %v1183_v58 = vadd.f32 %v10764_v33, %v1135_v7  ;;  %v763_v55 = vsel %vm5250_vm0, %v6387_v11, 0.0  ;;  %v1184_v48 = vadd.f32 %v10765_v37, %v1136_v21  ;;  %v10769_v33 = vld [vmem:[#allocation131_spill] sm:$0xff] }
 0x2d1   : > { %10760 = vst [vmem:[#allocation54_spill] sm:$0xff] %v6411_v47  ;;  %10762 = vst [vmem:[#allocation35_spill] sm:$0xff] %v6415_v39  ;;  %v1185_v23 = vadd.f32 %v10766_v53, %v1137_v6  ;;  %v6426_v49 = vmul.f32 %v1612_v42, %v1592_v57  ;;  %v764_v38 = vsel %vm5203_vm11, %v6399_v27, 0.0  ;;  %v765_v35 = vsel %vm5231_vm10, %v6403_v51, 0.0  ;;  %v10768_v51 = vld [vmem:[#allocation67_spill] sm:$0xff]  ;;  %v10771_v6 = vld [vmem:[#allocation9_spill] sm:$0xff] }
 0x2d2   : > { %v6434_v41 = vmul.f32 %v1612_v42, %v1588_v54  ;;  %v6436_v25 = vmul.f32 %v1612_v42, %v1600_v59  ;;  %v766_v7 = vsel %vm5279_vm5, %v6407_v34, 0.0  ;;  %v1650_v21 = vsel %vm6270_vm2, %v6419_v14, 0.0  ;;  %v1616_v54 = vpop.permute.xlu1 %1615  ;;  %v10767_v59 = vld [vmem:[#allocation65_spill] sm:$0xff]  ;;  %v842_v53 = vpop.permute.xlu0 %841  ;;  %v10770_v11 = vld [vmem:[#allocation55_spill] sm:$0xff] }
 0x2d3   : > { %v1303_v27 = vadd.f32 %v10767_v59, %v1182_v52  ;;  %v1304_v34 = vadd.f32 %v10768_v51, %v1183_v58  ;;  %v1651_v45 = vsel %vm6286_vm12, %v6426_v49, 0.0  ;;  %v844_v37 = vmul.f32 %v830_v20, %v10769_v33  ;;  %v10772_v58 = vld [vmem:[#allocation129_spill] sm:$0xff]  ;;  %v10773_v51 = vld [vmem:[#allocation128_spill] sm:$0xff] }
 0x2d4   : > { %v1305_v57 = vadd.f32 %v10770_v11, %v1184_v48  ;;  %v1306_v42 = vadd.f32 %v10771_v6, %v1185_v23  ;;  %v1652_v14 = vsel %vm6326_vm4, %v6434_v41, 0.0  ;;  %v1653_v52 = vsel %vm6337_vm9, %v6436_v25, 0.0  ;;  %v10774_v48 = vld [vmem:[#allocation130_spill] sm:$0xff] }
 0x2d5   : > { %v845_v59 = vmul.f32 %v830_v20, %v10772_v58  ;;  %v846_v3 = vmul.f32 %v830_v20, %v10773_v51  ;;  %v6473_v49 = vmul.f32 %v1616_v54, %v6225_v28  ;;  %v6476_v33 = vmul.f32 %v1616_v54, %v6243_v0  ;;  %v10776_v25 = vld [vmem:[#allocation142_spill] sm:$0xff]  ;;  %v10779_v28 = vld [vmem:[#allocation143_spill] sm:$0xff] }
 0x2d6   : > { %v6479_v23 = vmul.f32 %v1616_v54, %v6320_v4  ;;  %v847_v6 = vmul.f32 %v830_v20, %v10774_v48  ;;  %v6482_v41 = vmul.f32 %v1616_v54, %v1601_v46  ;;  %v856_v11 = vmul.f32 %v842_v53, %v5802_v30  ;;  %v10782_v20 = vld [vmem:[#allocation77_spill] sm:$0xff]  ;;  %v10784_v46 = vld [vmem:[#allocation144_spill] sm:$0xff]  ;;  %v10786_v48 = vld [vmem:[#allocation79_spill] sm:$0xff] }
 0x2d7   : > { %v10777_v58 = vsel %vm5890_vm15, %v10776_v25, 0.0  ;;  %v10780_v39 = vsel %vm5908_vm8, %v10779_v28, 0.0  ;;  %v868_v4 = vsel %vm10707_vm1, %v844_v37, 0.0  ;;  %v857_v47 = vmul.f32 %v842_v53, %v10781_v43  ;;  %v10793_v37 = vld [vmem:[#allocation56_spill] sm:$0xff]  ;;  %v10794_v28 = vld [vmem:[#allocation3_spill] sm:$0xff] }
 0x2d8   : > { %10775 = vst [vmem:[#allocation42_spill] sm:$0xff] %v6482_v41  ;;  %v1424_v51 = vadd.f32 %v10777_v58, %v1303_v27  ;;  %v1425_v0 = vadd.f32 %v10780_v39, %v1304_v34  ;;  %vm10783_vm6 = vnez %v10782_v20  ;;  %vm10787_vm3 = vnez %v10786_v48  ;;  %v10788_v41 = vld [vmem:[#allocation145_spill] sm:$0xff]  ;;  %v6504_v58 = vpop.permute.xlu0 %2070 }
 0x2d9   : > { %v10785_v54 = vsel %vm10783_vm6, %v10784_v46, 0.0  ;;  %v10789_v25 = vsel %vm10787_vm3, %v10788_v41, 0.0  ;;  %10790 = vst [vmem:[#allocation48_spill] sm:$0xff] %v6504_v58  ;;  %vm10791_vm14 = vnez %v10709_v31  ;;  %vm10792_vm9 = vnez %v10713_v15 }
 0x2da   : > { %v1426_v30 = vadd.f32 %v10785_v54, %v1305_v57  ;;  %v1427_v27 = vadd.f32 %v10789_v25, %v1306_v42  ;;  %v869_v39 = vsel %vm10791_vm14, %v845_v59, 0.0  ;;  %v870_v34 = vsel %vm10792_vm9, %v846_v3, 0.0  ;;  %v6523_v3 = vpop.permute.xlu1 %1681 }
 0x2db   : > { %v858_v43 = vmul.f32 %v842_v53, %v10793_v37  ;;  %v859_v62 = vmul.f32 %v842_v53, %v10794_v28  ;;  %vm10795_vm3 = vnez %v10717_v26  ;;  %v884_v46 = vadd.f32 %v868_v4, %v763_v55  ;;  %v10801_v55 = vld [vmem:[#allocation37_spill] sm:$0xff] }
 0x2dc   : > { %v871_v59 = vsel %vm10795_vm3, %v847_v6, 0.0  ;;  %v880_v53 = vsel %vm10707_vm1, %v856_v11, 0.0  ;;  %vm10796_vm6 = vnez %v10567_v40  ;;  %vm10798_vm12 = vnez %v10580_v1 }
 0x2dd   : > { %v10797_v54 = vsel %vm10796_vm6, %v6156_v8, 0.0  ;;  %v10799_v37 = vsel %vm10798_vm12, %v6159_v16, 0.0  ;;  %v885_v42 = vadd.f32 %v869_v39, %v764_v38  ;;  %v886_v41 = vadd.f32 %v870_v34, %v765_v35  ;;  %v10803_v16 = vld [vmem:[#allocation28_spill] sm:$0xff] }
 0x2de   : > { %v1545_v25 = vadd.f32 %v10797_v54, %v1424_v51  ;;  %v1546_v28 = vadd.f32 %v10799_v37, %v1425_v0  ;;  %v881_v6 = vsel %vm10791_vm14, %v857_v47, 0.0  ;;  %vm10800_vm4 = vnez %v10589_v24  ;;  %v955_v0 = vpop.permute.xlu0 %954  ;;  %v10805_v47 = vld [vmem:[#allocation69_spill] sm:$0xff]  ;;  %v10807_v54 = vld [vmem:[#allocation50_spill] sm:$0xff]  ;;  %v10809_v37 = vld [vmem:[#allocation36_spill] sm:$0xff]  ;;  %v1687_v26 = vpop.permute.xlu1 %1686 }
 0x2df   : > { %v10802_v4 = vsel %vm10800_vm4, %v10801_v55, 0.0  ;;  %v887_v57 = vadd.f32 %v871_v59, %v766_v7  ;;  %v882_v8 = vsel %vm10792_vm9, %v858_v43, 0.0  ;;  %v883_v51 = vsel %vm10795_vm3, %v859_v62, 0.0  ;;  %v10808_v7 = vld [vmem:[#allocation23_spill] sm:$0xff]  ;;  %v10810_v62 = vld [vmem:[#allocation41_spill] sm:$0xff] }
 0x2e0   : > { %v1547_v11 = vadd.f32 %v10802_v4, %v1426_v30  ;;  %v10804_v38 = vsel %vm5870_vm13, %v10803_v16, 0.0  ;;  %v10806_v39 = vsel %vm5250_vm0, %v10805_v47, 0.0  ;;  %v969_v30 = vmul.f32 %v955_v0, %v10807_v54 }
 0x2e1   : > { %v1548_v35 = vadd.f32 %v10804_v38, %v1427_v27  ;;  %v896_v34 = vadd.f32 %v880_v53, %v10806_v39  ;;  %v970_v59 = vmul.f32 %v955_v0, %v10808_v7  ;;  %v971_v43 = vmul.f32 %v955_v0, %v10809_v37  ;;  %v10812_v27 = vld [vmem:[#allocation24_spill] sm:$0xff]  ;;  %v10816_v7 = vld [vmem:[#allocation34_spill] sm:$0xff] }
 0x2e2   : > { %v10811_v55 = vsel %vm5203_vm11, %v10810_v62, 0.0  ;;  %v1666_v58 = vadd.f32 %v1650_v21, %v1545_v25  ;;  %v1667_v16 = vadd.f32 %v1651_v45, %v1546_v28  ;;  %v972_v38 = vmul.f32 %v955_v0, %v10812_v27  ;;  %v10817_v21 = vld [vmem:[#allocation32_spill] sm:$0xff]  ;;  %v10818_v25 = vld [vmem:[#allocation19_spill] sm:$0xff]  ;;  %v6572_v0 = vpop.permute.xlu0 %2178 }
 0x2e3   : > { %v897_v4 = vadd.f32 %v881_v6, %v10811_v55  ;;  %v1668_v15 = vadd.f32 %v1652_v14, %v1547_v11  ;;  %vm10813_vm3 = vnez %v10324_v17  ;;  %vm10814_vm9 = vnez %v10305_v22  ;;  %v10819_v14 = vld [vmem:[#allocation49_spill] sm:$0xff]  ;;  %v10823_v55 = vld [vmem:[#allocation136_spill] sm:$0xff] }
 0x2e4   : > { %v993_v53 = vsel %vm10813_vm3, %v969_v30, 0.0  ;;  %v994_v47 = vsel %vm10814_vm9, %v970_v59, 0.0  ;;  %vm10815_vm14 = vnez %v10315_v5  ;;  %v996_v54 = vsel %vm10743_vm7, %v972_v38, 0.0  ;;  %v10821_v59 = vld [vmem:[#allocation53_spill] sm:$0xff] }
 0x2e5   : > { %v995_v39 = vsel %vm10815_vm14, %v971_v43, 0.0  ;;  %v1009_v6 = vadd.f32 %v993_v53, %v10816_v7  ;;  %v1010_v45 = vadd.f32 %v994_v47, %v10817_v21  ;;  %v10820_v11 = vsel %vm5231_vm10, %v10819_v14, 0.0  ;;  %v10824_v53 = vld [vmem:[#allocation10_spill] sm:$0xff]  ;;  %v10825_v7 = vld [vmem:[#allocation33_spill] sm:$0xff] }
 0x2e6   : > { %v1011_v28 = vadd.f32 %v995_v39, %v10818_v25  ;;  %v898_v30 = vadd.f32 %v882_v8, %v10820_v11  ;;  %v10822_v37 = vsel %vm5279_vm5, %v10821_v59, 0.0  ;;  %v1669_v62 = vadd.f32 %v1653_v52, %v1548_v35  ;;  %v10826_v21 = vld [vmem:[#allocation26_spill] sm:$0xff]  ;;  %v10828_v8 = vld [vmem:[#allocation117_spill] sm:$0xff]  ;;  %v10830_v52 = vld [vmem:[#allocation115_spill] sm:$0xff] }
 0x2e7   : > { %v899_v43 = vadd.f32 %v883_v51, %v10822_v37  ;;  %v1012_v27 = vadd.f32 %v996_v54, %v10823_v55  ;;  %v1702_v38 = vadd.f32 %v1687_v26, %v1666_v58  ;;  %v1130_v47 = vadd.f32 %v10824_v53, %v1009_v6  ;;  %v10832_v54 = vld [vmem:[#allocation101_spill] sm:$0xff]  ;;  %v10833_v59 = vld [vmem:[#allocation104_spill] sm:$0xff] }
 0x2e8   : > { %v1131_v39 = vadd.f32 %v10825_v7, %v1010_v45  ;;  %v1132_v25 = vadd.f32 %v10826_v21, %v1011_v28  ;;  %v1703_v18 = vadd.f32 %v1687_v26, %v1667_v16  ;;  %v10829_v14 = vsel %vm10813_vm3, %v10828_v8, 0.0  ;;  %v10834_v37 = vld [vmem:[#allocation105_spill] sm:$0xff]  ;;  %v6598_v16 = vpop.permute.xlu0 %2190  ;;  %v10836_v55 = vld [vmem:[#allocation108_spill] sm:$0xff]  ;;  %v10842_v8 = vld [vmem:[#allocation31_spill] sm:$0xff] }
 0x2e9   : > { %v1133_v31 = vadd.f32 %v10827_v19, %v1012_v27  ;;  %v1005_v11 = vadd.f32 %v10829_v14, %v884_v46  ;;  %v10831_v51 = vsel %vm10814_vm9, %v10830_v52, 0.0  ;;  %v1704_v58 = vadd.f32 %v1687_v26, %v1668_v15  ;;  %10835 = vst [vmem:[#allocation6_spill] sm:$0xff] %v6598_v16  ;;  %v10837_v46 = vld [vmem:[#allocation116_spill] sm:$0xff]  ;;  %v10843_v14 = vld [vmem:[#allocation29_spill] sm:$0xff] }
 0x2ea   : > { %v1006_v35 = vadd.f32 %v10831_v51, %v885_v42  ;;  %v1178_v6 = vadd.f32 %v10832_v54, %v1130_v47  ;;  %v1179_v45 = vadd.f32 %v10833_v59, %v1131_v39  ;;  %v1180_v28 = vadd.f32 %v10834_v37, %v1132_v25  ;;  %v10839_v42 = vld [vmem:[#allocation122_spill] sm:$0xff]  ;;  %v10847_v54 = vld [vmem:[#allocation71_spill] sm:$0xff] }
 0x2eb   : > { %v1705_v19 = vadd.f32 %v1687_v26, %v1669_v62  ;;  %v1181_v27 = vadd.f32 %v10836_v55, %v1133_v31  ;;  %v10838_v53 = vsel %vm10815_vm14, %v10837_v46, 0.0  ;;  %v10840_v15 = vsel %vm10743_vm7, %v10839_v42, 0.0  ;;  %v10841_v47 = vld [vmem:[#allocation138_spill] sm:$0xff]  ;;  %v10844_v26 = vld [vmem:[#allocation39_spill] sm:$0xff]  ;;  %v10845_v62 = vld [vmem:[#allocation72_spill] sm:$0xff] }
 0x2ec   : > { %v1007_v7 = vadd.f32 %v10838_v53, %v886_v41  ;;  %v1008_v21 = vadd.f32 %v10840_v15, %v887_v57  ;;  %3925 = vtanh.f32 %v1702_v38  ;;  %v1299_v39 = vadd.f32 %v10841_v47, %v1178_v6  ;;  %v10849_v38 = vld [vmem:[#allocation76_spill] sm:$0xff]  ;;  %v1072_v53 = vpop.permute.xlu0 %1071 }
 0x2ed   : > { %v1300_v25 = vadd.f32 %v10842_v8, %v1179_v45  ;;  %v1301_v52 = vadd.f32 %v10843_v14, %v1180_v28  ;;  %3927 = vtanh.f32 %v1703_v18  ;;  %v1302_v31 = vadd.f32 %v10844_v26, %v1181_v27  ;;  %v10851_v18 = vld [vmem:[#allocation66_spill] sm:$0xff]  ;;  %v10854_v55 = vld [vmem:[#allocation80_spill] sm:$0xff]  ;;  %v10863_v14 = vld [vmem:[#allocation27_spill] sm:$0xff] }
 0x2ee   : > { %v10846_v51 = vsel %vm10813_vm3, %v10845_v62, 0.0  ;;  %v10848_v59 = vsel %vm10814_vm9, %v10847_v54, 0.0  ;;  %3929 = vtanh.f32 %v1704_v58  ;;  %v10850_v6 = vsel %vm5890_vm15, %v10849_v38, 0.0  ;;  %v10859_v42 = vld [vmem:[#allocation12_spill] sm:$0xff]  ;;  %v10865_v26 = vld [vmem:[#allocation21_spill] sm:$0xff] }
 0x2ef   : > { %v1017_v41 = vadd.f32 %v10846_v51, %v896_v34  ;;  %v1018_v57 = vadd.f32 %v10848_v59, %v897_v4  ;;  %v1420_v45 = vadd.f32 %v10850_v6, %v1299_v39  ;;  %v10852_v37 = vsel %vm5908_vm8, %v10851_v18, 0.0  ;;  %v10857_v4 = vld [vmem:[#allocation82_spill] sm:$0xff]  ;;  %v10867_v51 = vld [vmem:[#allocation20_spill] sm:$0xff] }
 0x2f0   : > { %v1421_v28 = vadd.f32 %v10852_v37, %v1300_v25  ;;  %vm10853_vm5 = vnez %v10782_v20  ;;  %3931 = vtanh.f32 %v1705_v19  ;;  %vm10856_vm9 = vnez %v10786_v48  ;;  %v10861_v39 = vld [vmem:[#allocation58_spill] sm:$0xff]  ;;  %v10868_v59 = vld [vmem:[#allocation16_spill] sm:$0xff] }
 0x2f1   : > { %v10855_v34 = vsel %vm10853_vm5, %v10854_v55, 0.0  ;;  %v10858_v58 = vsel %vm10856_vm9, %v10857_v4, 0.0  ;;  %v10860_v15 = vsel %vm10815_vm14, %v10859_v42, 0.0  ;;  %v10862_v8 = vsel %vm10743_vm7, %v10861_v39, 0.0  ;;  %v10870_v18 = vld [vmem:[#allocation4_spill] sm:$0xff]  ;;  %v10875_v42 = vld [vmem:[#allocation99_spill] sm:$0xff] }
 0x2f2   : > { %v1422_v27 = vadd.f32 %v10855_v34, %v1301_v52  ;;  %v1423_v46 = vadd.f32 %v10858_v58, %v1302_v31  ;;  %v1019_v47 = vadd.f32 %v10860_v15, %v898_v30  ;;  %v1020_v25 = vadd.f32 %v10862_v8, %v899_v43  ;;  %v10869_v30 = vld [vmem:[#allocation25_spill] sm:$0xff]  ;;  %v10871_v43 = vld [vmem:[#allocation134_spill] sm:$0xff] }
 0x2f3   : > { %v10864_v19 = vsel %vm10796_vm6, %v10863_v14, 0.0  ;;  %v10866_v31 = vsel %vm10800_vm4, %v10865_v26, 0.0  ;;  %v1086_v54 = vmul.f32 %v1072_v53, %v10867_v51  ;;  %v1087_v38 = vmul.f32 %v1072_v53, %v10868_v59  ;;  %v10877_v15 = vld [vmem:[#allocation94_spill] sm:$0xff]  ;;  %v1084_v51 = vpop.permute.xlu0 %1083 }
 0x2f4   : > { %v1541_v52 = vadd.f32 %v10864_v19, %v1420_v45  ;;  %v1543_v62 = vadd.f32 %v10866_v31, %v1422_v27  ;;  %v1088_v6 = vmul.f32 %v1072_v53, %v10869_v30  ;;  %v1089_v37 = vmul.f32 %v1072_v53, %v10870_v18  ;;  %v10873_v45 = vld [vmem:[#allocation8_spill] sm:$0xff]  ;;  %v10886_v18 = vld [vmem:[#allocation93_spill] sm:$0xff] }
 0x2f5   : > { %v10872_v55 = vsel %vm10798_vm12, %v10871_v43, 0.0  ;;  %v10874_v4 = vsel %vm5870_vm13, %v10873_v45, 0.0  ;;  %vm10876_vm7 = vcmp.ge.s32.totalorder %v10875_v42, 1  ;;  %vm10878_vm14 = vcmp.ge.s32.totalorder %v10877_v15, 1 }
 0x2f6   : > { %v1542_v34 = vadd.f32 %v10872_v55, %v1421_v28  ;;  %v1544_v58 = vadd.f32 %v10874_v4, %v1423_v46  ;;  %v1110_v27 = vsel %vm10876_vm7, %v1086_v54, 0.0  ;;  %v1111_v39 = vsel %vm10878_vm14, %v1087_v38, 0.0  ;;  %v10885_v38 = vld [vmem:[#allocation75_spill] sm:$0xff]  ;;  %v10888_v55 = vld [vmem:[#allocation73_spill] sm:$0xff]  ;;  %v10889_v4 = vld [vmem:[#allocation70_spill] sm:$0xff] }
 0x2f7   : > { %v10879_v53 = vsel %vm6270_vm2, %v6258_v50, 0.0  ;;  %vm10880_vm10 = vnez %v10727_v56  ;;  %vm10882_vm11 = vcmp.ge.s32.totalorder %v4864_v13, 1  ;;  %vm10883_vm7 = vcmp.ge.s32.totalorder %v4893_v12, 1  ;;  %v10884_v50 = vld [vmem:[#allocation85_spill] sm:$0xff] }
 0x2f8   : > { %v6673_v8 = vadd.f32 %v10879_v53, %v1541_v52  ;;  %v10881_v28 = vsel %vm10880_vm10, %v6264_v29, 0.0  ;;  %v1112_v46 = vsel %vm10882_vm11, %v1088_v6, 0.0  ;;  %v1113_v19 = vsel %vm10883_vm7, %v1089_v37, 0.0  ;;  %v10887_v29 = vld [vmem:[#allocation95_spill] sm:$0xff]  ;;  %v6691_v53 = vpop.eup %3925  ;;  %v10890_v37 = vld [vmem:[#allocation97_spill] sm:$0xff] }
 0x2f9   : > { %v6679_v14 = vadd.f32 %v10881_v28, %v1543_v62  ;;  %v1126_v26 = vadd.f32 %v1110_v27, %v1005_v11  ;;  %v1127_v31 = vadd.f32 %v1111_v39, %v1006_v35  ;;  %v1128_v54 = vadd.f32 %v1112_v46, %v1007_v7  ;;  %v10891_v35 = vld [vmem:[#allocation100_spill] sm:$0xff]  ;;  %v6699_v39 = vpop.eup %3927  ;;  %v10893_v28 = vld [vmem:[#allocation14_spill] sm:$0xff] }
 0x2fa   : > { %v1129_v59 = vadd.f32 %v1113_v19, %v1008_v21  ;;  %v1098_v52 = vmul.f32 %v1084_v51, %v10884_v50  ;;  %v1099_v30 = vmul.f32 %v1084_v51, %v10885_v38  ;;  %v1100_v45 = vmul.f32 %v1084_v51, %v10888_v55  ;;  %v10894_v19 = vld [vmem:[#allocation2_spill] sm:$0xff] }
 0x2fb   : > { %v1174_v43 = vadd.f32 %v10886_v18, %v1126_v26  ;;  %v1175_v62 = vadd.f32 %v10887_v29, %v1127_v31  ;;  %v1101_v6 = vmul.f32 %v1084_v51, %v10889_v4  ;;  %v1176_v11 = vadd.f32 %v10890_v37, %v1128_v54  ;;  %v6707_v54 = vpop.eup %3929 }
 0x2fc   : > { %v1177_v27 = vadd.f32 %v10891_v35, %v1129_v59  ;;  %vm10892_vm11 = vcmp.ge.s32.totalorder %v10875_v42, 1  ;;  %v1123_v21 = vsel %vm10878_vm14, %v1099_v30, 0.0  ;;  %vm10895_vm7 = vcmp.ge.s32.totalorder %v4864_v13, 1  ;;  %v10897_v59 = vld [vmem:[#allocation22_spill] sm:$0xff]  ;;  %v6711_v29 = vpop.eup %3931 }
 0x2fd   : > { %v1122_v7 = vsel %vm10892_vm11, %v1098_v52, 0.0  ;;  %v1295_v46 = vadd.f32 %v10893_v28, %v1174_v43  ;;  %v1296_v26 = vadd.f32 %v10894_v19, %v1175_v62  ;;  %v1124_v31 = vsel %vm10895_vm7, %v1100_v45, 0.0  ;;  %v10898_v52 = vld [vmem:[#allocation135_spill] sm:$0xff]  ;;  %v10899_v43 = vld [vmem:[#allocation86_spill] sm:$0xff] }
 0x2fe   : > { %vm10896_vm3 = vcmp.ge.s32.totalorder %v4893_v12, 1  ;;  %v1297_v50 = vadd.f32 %v10897_v59, %v1176_v11  ;;  %v1298_v38 = vadd.f32 %v10898_v52, %v1177_v27  ;;  %v1138_v18 = vadd.f32 %v1122_v7, %v1017_v41  ;;  %v10901_v45 = vld [vmem:[#allocation139_spill] sm:$0xff]  ;;  %v10903_v11 = vld [vmem:[#allocation140_spill] sm:$0xff]  ;;  %v10907_v28 = vld [vmem:[#allocation114_spill] sm:$0xff] }
 0x2ff   : > { %v1125_v51 = vsel %vm10896_vm3, %v1101_v6, 0.0  ;;  %v1139_v30 = vadd.f32 %v1123_v21, %v1018_v57  ;;  %v10900_v62 = vsel %vm5890_vm15, %v10899_v43, 0.0  ;;  %v10902_v4 = vsel %vm5908_vm8, %v10901_v45, 0.0  ;;  %v10905_v57 = vld [vmem:[#allocation141_spill] sm:$0xff]  ;;  %v10909_v52 = vld [vmem:[#allocation88_spill] sm:$0xff] }
 0x300   : > { %v1416_v55 = vadd.f32 %v10900_v62, %v1295_v46  ;;  %v1417_v6 = vadd.f32 %v10902_v4, %v1296_v26  ;;  %v1140_v37 = vadd.f32 %v1124_v31, %v1019_v47  ;;  %v1141_v35 = vadd.f32 %v1125_v51, %v1020_v25  ;;  %v10908_v46 = vld [vmem:[#allocation119_spill] sm:$0xff]  ;;  %v10911_v25 = vld [vmem:[#allocation120_spill] sm:$0xff]  ;;  %v10912_v51 = vld [vmem:[#allocation121_spill] sm:$0xff] }
 0x301   : > { %v10904_v27 = vsel %vm10853_vm5, %v10903_v11, 0.0  ;;  %v10906_v7 = vsel %vm10856_vm9, %v10905_v57, 0.0  ;;  %v1186_v19 = vadd.f32 %v10907_v28, %v1138_v18  ;;  %v1187_v59 = vadd.f32 %v10908_v46, %v1139_v30  ;;  %v10917_v30 = vld [vmem:[#allocation7_spill] sm:$0xff]  ;;  %v10923_v46 = vld [vmem:[#allocation60_spill] sm:$0xff] }
 0x302   : > { %v1418_v41 = vadd.f32 %v10904_v27, %v1297_v50  ;;  %v1419_v21 = vadd.f32 %v10906_v7, %v1298_v38  ;;  %v10910_v26 = vsel %vm10796_vm6, %v10909_v52, 0.0  ;;  %v1188_v31 = vadd.f32 %v10911_v25, %v1140_v37  ;;  %v10913_v50 = vld [vmem:[#allocation107_spill] sm:$0xff] }
 0x303   : > { %v1537_v47 = vadd.f32 %v10910_v26, %v1416_v55  ;;  %v1189_v43 = vadd.f32 %v10912_v51, %v1141_v35  ;;  %v10914_v62 = vsel %vm10798_vm12, %v10913_v50, 0.0  ;;  %v10915_v38 = vld [vmem:[#allocation91_spill] sm:$0xff]  ;;  %v1307_v11 = vadd.f32 %v10917_v30, %v1186_v19  ;;  %v10920_v55 = vld [vmem:[#allocation38_spill] sm:$0xff]  ;;  %v10922_v35 = vld [vmem:[#allocation13_spill] sm:$0xff] }
 0x304   : > { %v1538_v45 = vadd.f32 %v10914_v62, %v1417_v6  ;;  %v10916_v18 = vsel %vm10800_vm4, %v10915_v38, 0.0  ;;  %v10918_v27 = vld [vmem:[#allocation87_spill] sm:$0xff]  ;;  %vm10919_vm3 = vnez %v10705_v36  ;;  %v1309_v28 = vadd.f32 %v10922_v35, %v1188_v31  ;;  %v10924_v6 = vld [vmem:[#allocation54_spill] sm:$0xff] }
 0x305   : > { %v1539_v4 = vadd.f32 %v10916_v18, %v1418_v41  ;;  %v1308_v57 = vadd.f32 %v10918_v27, %v1187_v59  ;;  %v10921_v37 = vsel %vm10919_vm3, %v10920_v55, 0.0  ;;  %v1310_v52 = vadd.f32 %v10923_v46, %v1189_v43  ;;  %v10926_v41 = vld [vmem:[#allocation132_spill] sm:$0xff]  ;;  %v10928_v59 = vld [vmem:[#allocation146_spill] sm:$0xff] }
 0x306   : > { %v1663_v7 = vadd.f32 %v10921_v37, %v1542_v34  ;;  %v10925_v26 = vsel %vm10919_vm3, %v10924_v6, 0.0  ;;  %v10927_v19 = vsel %vm5870_vm13, %v10926_v41, 0.0  ;;  %v10929_v50 = vsel %vm5890_vm15, %v10928_v59, 0.0  ;;  %v10930_v34 = vld [vmem:[#allocation147_spill] sm:$0xff]  ;;  %v10932_v18 = vld [vmem:[#allocation46_spill] sm:$0xff] }
 0x307   : > { %v1659_v25 = vadd.f32 %v10925_v26, %v1538_v45  ;;  %v1540_v51 = vadd.f32 %v10927_v19, %v1419_v21  ;;  %v1428_v62 = vadd.f32 %v10929_v50, %v1307_v11  ;;  %v10931_v31 = vsel %vm5908_vm8, %v10930_v34, 0.0  ;;  %v10934_v45 = vld [vmem:[#allocation52_spill] sm:$0xff]  ;;  %v10938_v11 = vld [vmem:[#allocation149_spill] sm:$0xff]  ;;  %v10940_v6 = vld [vmem:[#allocation47_spill] sm:$0xff] }
 0x308   : > { %v1429_v43 = vadd.f32 %v10931_v31, %v1308_v57  ;;  %v1699_v38 = vadd.f32 %v6523_v3, %v1663_v7  ;;  %vm10933_vm11 = vnez %v10932_v18  ;;  %v10936_v21 = vld [vmem:[#allocation148_spill] sm:$0xff]  ;;  %v10939_v35 = vsel %vm10856_vm9, %v10938_v11, 0.0  ;;  %v10941_v57 = vld [vmem:[#allocation35_spill] sm:$0xff]  ;;  %v10945_v50 = vld [vmem:[#allocation45_spill] sm:$0xff] }
 0x309   : > { %v10935_v30 = vsel %vm10933_vm11, %v10934_v45, 0.0  ;;  %v10937_v55 = vsel %vm10853_vm5, %v10936_v21, 0.0  ;;  %v1431_v46 = vadd.f32 %v10939_v35, %v1310_v52  ;;  %v1695_v26 = vadd.f32 %v10940_v6, %v1659_v25  ;;  %v10947_v25 = vld [vmem:[#allocation11_spill] sm:$0xff] }
 0x30a   : > { %v1665_v27 = vadd.f32 %v10935_v30, %v1544_v58  ;;  %v1430_v37 = vadd.f32 %v10937_v55, %v1309_v28  ;;  %v10942_v7 = vsel %vm10933_vm11, %v10941_v57, 0.0  ;;  %v10943_v58 = vld [vmem:[#allocation118_spill] sm:$0xff]  ;;  %3933 = vtanh.f32 %v1699_v38  ;;  %v10949_v38 = vld [vmem:[#allocation63_spill] sm:$0xff] }
 0x30b   : > { %v1661_v41 = vadd.f32 %v10942_v7, %v1540_v51  ;;  %v10944_v19 = vsel %vm10796_vm6, %v10943_v58, 0.0  ;;  %v10946_v34 = vsel %vm6270_vm2, %v10945_v50, 0.0  ;;  %v10948_v31 = vsel %vm10800_vm4, %v10947_v25, 0.0  ;;  %v10951_v55 = vld [vmem:[#allocation18_spill] sm:$0xff] }
 0x30c   : > { %v1549_v59 = vadd.f32 %v10944_v19, %v1428_v62  ;;  %v1701_v28 = vadd.f32 %v6523_v3, %v1665_v27  ;;  %v1658_v52 = vadd.f32 %v10946_v34, %v1537_v47  ;;  %v1551_v45 = vadd.f32 %v10948_v31, %v1430_v37  ;;  %v10959_v19 = vld [vmem:[#allocation44_spill] sm:$0xff] }
 0x30d   : > { %3935 = vtanh.f32 %v1695_v26  ;;  %v1697_v51 = vadd.f32 %v10940_v6, %v1661_v41  ;;  %v1698_v30 = vadd.f32 %v6523_v3, %v6673_v8  ;;  %v10950_v27 = vsel %vm10880_vm10, %v10949_v38, 0.0  ;;  %v10953_v8 = vld [vmem:[#allocation123_spill] sm:$0xff] }
 0x30e   : > { %3937 = vtanh.f32 %v1701_v28  ;;  %v1694_v62 = vadd.f32 %v10940_v6, %v1658_v52  ;;  %v1660_v21 = vadd.f32 %v10950_v27, %v1539_v4  ;;  %v1700_v47 = vadd.f32 %v6523_v3, %v6679_v14  ;;  %v10956_v4 = vld [vmem:[#allocation42_spill] sm:$0xff] }
 0x30f   : > { %3939 = vtanh.f32 %v1697_v51  ;;  %v10952_v37 = vsel %vm10798_vm12, %v10951_v55, 0.0  ;;  %v10954_v35 = vsel %vm5870_vm13, %v10953_v8, 0.0  ;;  %v10955_v57 = vsel %vm6270_vm2, %v6473_v49, 0.0 }
 0x310   : > { %v1550_v11 = vadd.f32 %v10952_v37, %v1429_v43  ;;  %v1552_v26 = vadd.f32 %v10954_v35, %v1431_v46  ;;  %v1670_v7 = vadd.f32 %v10955_v57, %v1549_v59  ;;  %v1657_v3 = vsel %vm10933_vm11, %v10956_v4, 0.0  ;;  %v3923_v57 = vld [vmem:[%s9705_s5] sm:$0xff]  }
 0x311   : > { %3941 = vtanh.f32 %v1694_v62  ;;  %v1696_v14 = vadd.f32 %v10940_v6, %v1660_v21  ;;  %v10957_v43 = vsel %vm10880_vm10, %v6479_v23, 0.0  ;;  %v10958_v46 = vsel %vm10919_vm3, %v6476_v33, 0.0 }
 0x312   : > { %v1672_v41 = vadd.f32 %v10957_v43, %v1551_v45  ;;  %3943 = vtanh.f32 %v1698_v30  ;;  %v1671_v58 = vadd.f32 %v10958_v46, %v1550_v11  ;;  %v1673_v49 = vadd.f32 %v1657_v3, %v1552_v26 }
 0x313   : > { %v1706_v59 = vadd.f32 %v10959_v19, %v1670_v7  ;;  %3945 = vtanh.f32 %v1696_v14  ;;  %vm1748_vm14 = vcmask 261120   ;;  %vm11080_vm4 = vcmp.ge.s32.totalorder %v10875_v42, 1 }
 0x314   : > { %3947 = vtanh.f32 %v1700_v47  ;;  %v1707_v28 = vadd.f32 %v10959_v19, %v1671_v58  ;;  %v1709_v6 = vadd.f32 %v10959_v19, %v1673_v49  ;;  %v1708_v50 = vadd.f32 %v10959_v19, %v1672_v41  ;;  %v3934_v23 = vpop.eup %3933 }
 0x315   : > { %3949 = vtanh.f32 %v1706_v59  ;;  %vm11082_vm6 = vnez %v10305_v22 }
 0x316   : > { %3951 = vtanh.f32 %v1707_v28 }
 0x317   : > { %3953 = vtanh.f32 %v1709_v6  ;;  %v3936_v34 = vpop.eup %3935 }
 0x318   : > { %3955 = vtanh.f32 %v1708_v50  ;;  %v3938_v52 = vpop.eup %3937  ;;  %v1731_v33 = vpack.c.bf16 %v3934_v23, %v3936_v34 }
 0x319   : > { %v3940_v25 = vpop.eup %3939 }
 0x31a   : > { %1755 = vmatprep.subr.bf16.mxu0 %v1731_v33  ;;  %v1733_v45 = vpack.c.bf16 %v3938_v52, %v3940_v25 }
 0x31b   : > { %v3942_v31 = vpop.eup %3941 }
 0x31c   : > { %v3944_v51 = vpop.eup %3943  ;;  %1808 = vmatprep.subr.bf16.mxu1 %v1733_v45 }
 0x31d   : > { %v3946_v30 = vpop.eup %3945  ;;  %v1730_v62 = vpack.c.bf16 %v3944_v51, %v3942_v31  ;;  %v6892_v51 = vpop.permute.xlu1 %1967 }
 0x31e   : > { %v3948_v38 = vpop.eup %3947 }
 0x31f   : > { %v3950_v27 = vpop.eup %3949  ;;  %1756 = vmatpush1.bf16.msra.mxu0 %v1730_v62  ;;  %v1732_v21 = vpack.c.bf16 %v3948_v38, %v3946_v30 }
 0x320   : > { %v3952_v47 = vpop.eup %3951  ;;  %v1734_v55 = vpack.c.bf16 %v3950_v27, %v6691_v53  ;;  %v10960_v53 = vmov 0  }
 0x321   : > { %v3954_v37 = vpop.eup %3953  ;;  %1809 = vmatpush1.bf16.msra.mxu1 %v1732_v21  ;;  %v1735_v11 = vpack.c.bf16 %v3952_v47, %v6699_v39  ;;  %v3924_v39 = vld [vmem:[%s9705_s5 + $0x8] sm:$0xff]   ;;  %v6904_v62 = vpop.permute.xlu1 %1977 }
 0x322   : > { %v3956_v8 = vpop.eup %3955  ;;  %v1737_v35 = vpack.c.bf16 %v3954_v37, %v6711_v29  ;;  %10961 = vst [vmem:[#allocation59_spill] sm:$0xff] %v6904_v62 }
 0x323   : > { %1757 = vmatprep.subr.bf16.mxu0 %v1735_v11  ;;  %v1736_v26 = vpack.c.bf16 %v3956_v8, %v6707_v54 }
 0x324   : > { %1810 = vmatprep.subr.bf16.mxu1 %v1737_v35  ;;  %1758 = vmatpush1.bf16.msra.mxu0 %v1734_v55 }
 0x325   : > { %1811 = vmatpush1.bf16.msra.mxu1 %v1736_v26  ;;  %v6910_v38 = vpop.permute.xlu1 %2066 }
 0x327   : > { %3834 = vmatmul.mubr.msk.bf16.vlgmr.msra.gmra.mrb[8].mxu0 %vm1748_vm14, %v3923_v57 }
 0x328   : > { %3836 = vmatmul.mubr.msk.bf16.vlgmr.msra.gmra.mrb[8].mxu1 %vm1748_vm14, %v3923_v57  ;;  %1797 = vmatprep.mubr.bf16.mxu0 %v10960_v53 }
 0x329   : > { %1850 = vmatprep.mubr.bf16.mxu1 %v10960_v53  ;;  %v6918_v55 = vpop.permute.xlu1 %2074 }
 0x32a   : > { %10962 = vst [vmem:[#allocation43_spill] sm:$0xff] %v6918_v55 }
 0x32d   : > { %v6930_v11 = vpop.permute.xlu1 %2078 }
 0x32e   : > { %10963 = vst [vmem:[#allocation127_spill] sm:$0xff] %v6930_v11 }
 0x32f   : > { %3835 = vmatmul.mubr.msk.bf16.gmra.mrb[12].mxu0 %vm1748_vm14, %v3924_v39 }
 0x330   : > { %3837 = vmatmul.mubr.msk.bf16.gmra.mrb[12].mxu1 %vm1748_vm14, %v3924_v39 }
 0x331   : > { %v6936_v8 = vpop.permute.xlu1 %2182 }
 0x332   : > { %10964 = vst [vmem:[#allocation57_spill] sm:$0xff] %v6936_v8 }
 0x335   : > { %v6946_v35 = vpop.permute.xlu1 %2186 }
 0x336   : > { %10965 = vst [vmem:[#allocation51_spill] sm:$0xff] %v6946_v35 }
 0x339   : > { %v6952_v26 = vpop.permute.xlu1 %2290 }
 0x33d   : > { %v6962_v57 = vpop.permute.xlu1 %2298 }
 0x33e   : > { %10966 = vst [vmem:[#allocation125_spill] sm:$0xff] %v6962_v57 }
 0x3fa   : > { %v1789_v54 = vpop.f32.mrb[8].mxu0 }
 0x3fb   : > { %vm1861_vm7 = vcmp.gt.f32.partialorder %v1789_v54, 0.0  ;;  %v1877_v29 = vmul.f32 0.01, %v1789_v54  ;;  %v1842_v7 = vpop.f32.mrb[8].mxu1  ;;  %v1791_v4 = vpop.f32.mrb[9].mxu0 }
 0x3fc   : > { %v1879_v14 = vmul.f32 0.01, %v1842_v7  ;;  %v1793_v43 = vpop.f32.mrb[10].mxu0  ;;  %v1844_v41 = vpop.f32.mrb[9].mxu1  ;;  %vm1863_vm11 = vcmp.gt.f32.partialorder %v1842_v7, 0.0 }
 0x3fd   : > { %v6850_v3 = vsel %vm1861_vm7, %v1789_v54, %v1877_v29  ;;  %v6856_v46 = vpop.f32.mrb[11].mxu0  ;;  %v1846_v58 = vpop.f32.mrb[10].mxu1  ;;  %v1878_v25 = vmul.f32 0.01, %v1791_v4  ;;  %v1880_v45 = vmul.f32 0.01, %v1844_v41 }
 0x3fe   : > { %2129 = vrot.lane.b32.xlu0 %v6850_v3, %s4007_s16  ;;  %1917 = vrot.lane.b32.xlu1 %v6850_v3, %s4008_s17  ;;  %v6858_v49 = vpop.f32.mrb[11].mxu1  ;;  %v6860_v19 = vsel %vm1863_vm11, %v1842_v7, %v1879_v14  ;;  %vm1862_vm11 = vcmp.gt.f32.partialorder %v1791_v4, 0.0  ;;  %vm1864_vm14 = vcmp.gt.f32.partialorder %v1844_v41, 0.0  ;;  %v1881_v27 = vmul.f32 0.01, %v1793_v43  ;;  %v6974_v7 = vpop.permute.xlu1 %2302 }
 0x3ff   : > { %v6890_v31 = vsel %vm1862_vm11, %v1791_v4, %v1878_v25  ;;  %v6898_v30 = vsel %vm1864_vm14, %v1844_v41, %v1880_v45  ;;  %vm1865_vm7 = vcmp.gt.f32.partialorder %v1793_v43, 0.0  ;;  %v1883_v47 = vmul.f32 0.01, %v1846_v58  ;;  %10967 = vst [vmem:[#allocation124_spill] sm:$0xff] %v6974_v7  ;;  %v7000_v41 = vpop.permute.xlu0 %2294 }
 0x400   : > { %v6916_v21 = vsel %vm1865_vm7, %v1793_v43, %v1881_v27  ;;  %vm1867_vm11 = vcmp.gt.f32.partialorder %v1846_v58, 0.0  ;;  %v1882_v39 = vmul.f32 0.01, %v6856_v46  ;;  %vm1866_vm14 = vcmp.gt.f32.partialorder %v6856_v46, 0.0  ;;  %10968 = vst [vmem:[#allocation126_spill] sm:$0xff] %v7000_v41 }
 0x401   : > { %v6924_v37 = vsel %vm1867_vm11, %v1846_v58, %v1883_v47  ;;  %v1884_v29 = vmul.f32 0.01, %v6858_v49  ;;  %vm1868_vm7 = vcmp.gt.f32.partialorder %v6858_v49, 0.0 }
 0x402   : > { %2145 = vrot.lane.b32.xlu0 %v6860_v19, %s4007_s16  ;;  %1933 = vrot.lane.b32.xlu1 %v6860_v19, %s4008_s17  ;;  %v6866_v59 = vpop.f32.mrb[12].mxu0  ;;  %v6971_v54 = vsel %vm1866_vm14, %v6856_v46, %v1882_v39  ;;  %v6988_v14 = vpop.permute.xlu1 %2358 }
 0x403   : > { %v6868_v28 = vpop.f32.mrb[12].mxu1  ;;  %v6870_v6 = vpop.f32.mrb[13].mxu0  ;;  %v6982_v4 = vsel %vm1868_vm7, %v6858_v49, %v1884_v29  ;;  %v1885_v47 = vmul.f32 0.01, %v6866_v59  ;;  %vm1869_vm11 = vcmp.gt.f32.partialorder %v6866_v59, 0.0 }
 0x404   : > { %v6872_v50 = vpop.f32.mrb[13].mxu1  ;;  %v6874_v23 = vpop.f32.mrb[14].mxu0  ;;  %v1887_v56 = vmul.f32 0.01, %v6868_v28  ;;  %vm1871_vm14 = vcmp.gt.f32.partialorder %v6868_v28, 0.0  ;;  %vm1870_vm7 = vcmp.gt.f32.partialorder %v6870_v6, 0.0 }
 0x405   : > { %v6876_v34 = vpop.f32.mrb[14].mxu1  ;;  %v6882_v52 = vpop.f32.mrb[15].mxu0  ;;  %v7041_v18 = vsel %vm1869_vm11, %v6866_v59, %v1885_v47  ;;  %v1888_v40 = vmul.f32 0.01, %v6872_v50  ;;  %vm1872_vm11 = vcmp.gt.f32.partialorder %v6872_v50, 0.0 }
 0x406   : > { %2513 = vrot.lane.b32.xlu0 %v6850_v3, %s4009_s18  ;;  %2017 = vrot.lane.b32.xlu1 %v6850_v3, %s4010_s19  ;;  %v6884_v33 = vpop.f32.mrb[15].mxu1  ;;  %v6994_v43 = vpop.permute.xlu1 %2362  ;;  %v7050_v36 = vsel %vm1871_vm14, %v6868_v28, %v1887_v56  ;;  %v1886_v28 = vmul.f32 0.01, %v6870_v6  ;;  %vm1873_vm14 = vcmp.gt.f32.partialorder %v6874_v23, 0.0  ;;  %v1891_v57 = vmul.f32 0.01, %v6876_v34 }
 0x407   : > { %v7008_v58 = vpop.permute.xlu0 %2354  ;;  %v7092_v16 = vsel %vm1872_vm11, %v6872_v50, %v1888_v40  ;;  %v1889_v50 = vmul.f32 0.01, %v6874_v23  ;;  %v1890_v32 = vmul.f32 0.01, %v6882_v52  ;;  %vm1874_vm11 = vcmp.gt.f32.partialorder %v6882_v52, 0.0 }
 0x408   : > { %v7079_v1 = vsel %vm1870_vm7, %v6870_v6, %v1886_v28  ;;  %vm1875_vm7 = vcmp.gt.f32.partialorder %v6876_v34, 0.0 }
 0x409   : > { %v7134_v55 = vsel %vm1875_vm7, %v6876_v34, %v1891_v57 }
 0x40a   : > { %2529 = vrot.lane.b32.xlu0 %v6860_v19, %s4009_s18  ;;  %2033 = vrot.lane.b32.xlu1 %v6860_v19, %s4010_s19  ;;  %v7006_v46 = vpop.permute.xlu1 %2450 }
 0x40b   : > { %10969 = vst [vmem:[#allocation109_spill] sm:$0xff] %v7006_v46  ;;  %v7016_v25 = vpop.permute.xlu0 %2366 }
 0x40c   : > { %10971 = vst [vmem:[#allocation111_spill] sm:$0xff] %v7016_v25  ;;  %v1892_v25 = vmul.f32 0.01, %v6884_v33 }
 0x40e   : > { %2241 = vrot.lane.b32.xlu1 %v6850_v3, %s4011_s20  ;;  %2137 = vrot.lane.b32.xlu0 %v6890_v31, %s4007_s16  ;;  %v7014_v49 = vpop.permute.xlu1 %2458 }
 0x40f   : > { %10970 = vst [vmem:[#allocation110_spill] sm:$0xff] %v7014_v49  ;;  %v7028_v27 = vpop.permute.xlu0 %2454  ;;  %v7121_v49 = vsel %vm1873_vm14, %v6874_v23, %v1889_v50  ;;  %vm1876_vm14 = vcmp.gt.f32.partialorder %v6884_v33, 0.0 }
 0x410   : > { %10973 = vst [vmem:[#allocation65_spill] sm:$0xff] %v7028_v27 }
 0x412   : > { %2257 = vrot.lane.b32.xlu1 %v6860_v19, %s4011_s20  ;;  %2153 = vrot.lane.b32.xlu0 %v6898_v30, %s4007_s16  ;;  %v7026_v45 = vpop.permute.xlu1 %2462 }
 0x413   : > { %10972 = vst [vmem:[#allocation112_spill] sm:$0xff] %v7026_v45  ;;  %v7038_v29 = vpop.permute.xlu0 %2562 }
 0x414   : > { %10975 = vst [vmem:[#allocation131_spill] sm:$0xff] %v7038_v29 }
 0x416   : > { %2401 = vrot.lane.b32.xlu1 %v6850_v3, %s4012_s21  ;;  %2521 = vrot.lane.b32.xlu0 %v6890_v31, %s4009_s18  ;;  %v7036_v39 = vpop.permute.xlu1 %2566 }
 0x417   : > { %10974 = vst [vmem:[#allocation67_spill] sm:$0xff] %v7036_v39  ;;  %v7058_v47 = vpop.permute.xlu0 %2574 }
 0x418   : > { %10977 = vst [vmem:[#allocation9_spill] sm:$0xff] %v7058_v47 }
 0x41a   : > { %2417 = vrot.lane.b32.xlu1 %v6860_v19, %s4012_s21  ;;  %2537 = vrot.lane.b32.xlu0 %v6898_v30, %s4009_s18  ;;  %v7056_v59 = vpop.permute.xlu1 %2570 }
 0x41b   : > { %10976 = vst [vmem:[#allocation55_spill] sm:$0xff] %v7056_v59 }
 0x41e   : > { %2625 = vrot.lane.b32.xlu1 %v6850_v3, %s4014_s22  ;;  %1919 = vrot.lane.b32.xlu0 %v6916_v21, %s4008_s17 }
 0x422   : > { %1925 = vrot.lane.b32.xlu1 %v6890_v31, %s4008_s17  ;;  %1935 = vrot.lane.b32.xlu0 %v6924_v37, %s4008_s17 }
 0x426   : > { %1941 = vrot.lane.b32.xlu1 %v6898_v30, %s4008_s17  ;;  %2019 = vrot.lane.b32.xlu0 %v6916_v21, %s4010_s19 }
 0x42a   : > { %2025 = vrot.lane.b32.xlu1 %v6890_v31, %s4010_s19  ;;  %2035 = vrot.lane.b32.xlu0 %v6924_v37, %s4010_s19 }
 0x42e   : > { %2041 = vrot.lane.b32.xlu1 %v6898_v30, %s4010_s19  ;;  %2243 = vrot.lane.b32.xlu0 %v6916_v21, %s4011_s20 }
 0x432   : > { %2249 = vrot.lane.b32.xlu1 %v6890_v31, %s4011_s20  ;;  %2259 = vrot.lane.b32.xlu0 %v6924_v37, %s4011_s20 }
 0x436   : > { %2265 = vrot.lane.b32.xlu1 %v6898_v30, %s4011_s20  ;;  %2403 = vrot.lane.b32.xlu0 %v6916_v21, %s4012_s21 }
 0x43a   : > { %2409 = vrot.lane.b32.xlu1 %v6890_v31, %s4012_s21  ;;  %2419 = vrot.lane.b32.xlu0 %v6924_v37, %s4012_s21 }
 0x43e   : > { %2425 = vrot.lane.b32.xlu1 %v6898_v30, %s4012_s21  ;;  %2627 = vrot.lane.b32.xlu0 %v6916_v21, %s4014_s22 }
 0x442   : > { %2633 = vrot.lane.b32.xlu1 %v6890_v31, %s4014_s22  ;;  %1927 = vrot.lane.b32.xlu0 %v6971_v54, %s4008_s17 }
 0x446   : > { %2131 = vrot.lane.b32.xlu1 %v6916_v21, %s4007_s16  ;;  %1943 = vrot.lane.b32.xlu0 %v6982_v4, %s4008_s17 }
 0x44a   : > { %2147 = vrot.lane.b32.xlu1 %v6924_v37, %s4007_s16  ;;  %2027 = vrot.lane.b32.xlu0 %v6971_v54, %s4010_s19 }
 0x44e   : > { %2515 = vrot.lane.b32.xlu1 %v6916_v21, %s4009_s18  ;;  %2043 = vrot.lane.b32.xlu0 %v6982_v4, %s4010_s19 }
 0x452   : > { %2531 = vrot.lane.b32.xlu1 %v6924_v37, %s4009_s18  ;;  %2251 = vrot.lane.b32.xlu0 %v6971_v54, %s4011_s20 }
 0x456   : > { %2139 = vrot.lane.b32.xlu1 %v6971_v54, %s4007_s16  ;;  %2267 = vrot.lane.b32.xlu0 %v6982_v4, %s4011_s20 }
 0x45a   : > { %2155 = vrot.lane.b32.xlu1 %v6982_v4, %s4007_s16  ;;  %2411 = vrot.lane.b32.xlu0 %v6971_v54, %s4012_s21 }
 0x45e   : > { %2523 = vrot.lane.b32.xlu1 %v6971_v54, %s4009_s18  ;;  %2427 = vrot.lane.b32.xlu0 %v6982_v4, %s4012_s21 }
 0x462   : > { %2539 = vrot.lane.b32.xlu1 %v6982_v4, %s4009_s18  ;;  %2635 = vrot.lane.b32.xlu0 %v6971_v54, %s4014_s22 }
 0x466   : > { %2133 = vrot.lane.b32.xlu0 %v7041_v18, %s4007_s16  ;;  %1921 = vrot.lane.b32.xlu1 %v7041_v18, %s4008_s17 }
 0x46a   : > { %2149 = vrot.lane.b32.xlu0 %v7050_v36, %s4007_s16  ;;  %1937 = vrot.lane.b32.xlu1 %v7050_v36, %s4008_s17 }
 0x46e   : > { %2517 = vrot.lane.b32.xlu0 %v7041_v18, %s4009_s18  ;;  %2021 = vrot.lane.b32.xlu1 %v7041_v18, %s4010_s19 }
 0x470   : > { %v7064_v60 = vpop.permute.xlu0 %2129  ;;  %v7066_v56 = vpop.permute.xlu1 %1917 }
 0x472   : > { %2533 = vrot.lane.b32.xlu0 %v7050_v36, %s4009_s18  ;;  %2037 = vrot.lane.b32.xlu1 %v7050_v36, %s4010_s19 }
 0x474   : > { %v7074_v63 = vpop.permute.xlu0 %2145  ;;  %v7076_v24 = vpop.permute.xlu1 %1933 }
 0x476   : > { %2245 = vrot.lane.b32.xlu1 %v7041_v18, %s4011_s20  ;;  %2141 = vrot.lane.b32.xlu0 %v7079_v1, %s4007_s16 }
 0x478   : > { %v7087_v47 = vpop.permute.xlu0 %2513  ;;  %v7089_v45 = vpop.permute.xlu1 %2017 }
 0x479   : > { %10978 = vst [vmem:[#allocation129_spill] sm:$0xff] %v7087_v47 }
 0x47a   : > { %2261 = vrot.lane.b32.xlu1 %v7050_v36, %s4011_s20  ;;  %2157 = vrot.lane.b32.xlu0 %v7092_v16, %s4007_s16 }
 0x47c   : > { %v7098_v6 = vpop.permute.xlu0 %2529  ;;  %v7100_v28 = vpop.permute.xlu1 %2033 }
 0x47d   : > { %10979 = vst [vmem:[#allocation128_spill] sm:$0xff] %v7098_v6 }
 0x47e   : > { %2405 = vrot.lane.b32.xlu1 %v7041_v18, %s4012_s21  ;;  %2525 = vrot.lane.b32.xlu0 %v7079_v1, %s4009_s18 }
 0x480   : > { %v7106_v7 = vpop.permute.xlu1 %2241  ;;  %v7108_v40 = vpop.permute.xlu0 %2137 }
 0x482   : > { %2421 = vrot.lane.b32.xlu1 %v7050_v36, %s4012_s21  ;;  %2541 = vrot.lane.b32.xlu0 %v7092_v16, %s4009_s18 }
 0x484   : > { %v7116_v11 = vpop.permute.xlu1 %2257  ;;  %v7118_v59 = vpop.permute.xlu0 %2153 }
 0x486   : > { %2629 = vrot.lane.b32.xlu1 %v7041_v18, %s4014_s22  ;;  %1923 = vrot.lane.b32.xlu0 %v7121_v49, %s4008_s17 }
 0x488   : > { %v7129_v35 = vpop.permute.xlu1 %2401  ;;  %v7131_v62 = vpop.permute.xlu0 %2521 }
 0x489   : > { %10980 = vst [vmem:[#allocation130_spill] sm:$0xff] %v7131_v62  ;;  %v11018_v62 = vmov 8  }
 0x48a   : > { %1929 = vrot.lane.b32.xlu1 %v7079_v1, %s4008_s17  ;;  %1939 = vrot.lane.b32.xlu0 %v7134_v55, %s4008_s17 }
 0x48c   : > { %v7140_v23 = vpop.permute.xlu1 %2417  ;;  %v7142_v50 = vpop.permute.xlu0 %2537 }
 0x48d   : > { %10981 = vst [vmem:[#allocation142_spill] sm:$0xff] %v7142_v50  ;;  %v7216_v50 = vsel %vm1876_vm14, %v6884_v33, %v1892_v25 }
 0x48e   : > { %1945 = vrot.lane.b32.xlu1 %v7092_v16, %s4008_s17  ;;  %2023 = vrot.lane.b32.xlu0 %v7121_v49, %s4010_s19 }
 0x490   : > { %v7148_v39 = vpop.permute.xlu1 %2625  ;;  %v7150_v34 = vpop.permute.xlu0 %1919 }
 0x491   : > { %10982 = vst [vmem:[#allocation143_spill] sm:$0xff] %v7148_v39  ;;  %10983 = vst [vmem:[#allocation74_spill] sm:$0xff] %v7150_v34 }
 0x492   : > { %2029 = vrot.lane.b32.xlu1 %v7079_v1, %s4010_s19  ;;  %2039 = vrot.lane.b32.xlu0 %v7134_v55, %s4010_s19 }
 0x494   : > { %v7156_v57 = vpop.permute.xlu1 %1925  ;;  %v7158_v27 = vpop.permute.xlu0 %1935 }
 0x495   : > { %10984 = vst [vmem:[#allocation144_spill] sm:$0xff] %v7158_v27 }
 0x496   : > { %2045 = vrot.lane.b32.xlu1 %v7092_v16, %s4010_s19  ;;  %2247 = vrot.lane.b32.xlu0 %v7121_v49, %s4011_s20 }
 0x498   : > { %v7164_v8 = vpop.permute.xlu1 %1941  ;;  %v7166_v41 = vpop.permute.xlu0 %2019 }
 0x499   : > { %10985 = vst [vmem:[#allocation145_spill] sm:$0xff] %v7166_v41 }
 0x49a   : > { %2253 = vrot.lane.b32.xlu1 %v7079_v1, %s4011_s20  ;;  %2263 = vrot.lane.b32.xlu0 %v7134_v55, %s4011_s20 }
 0x49c   : > { %v7172_v34 = vpop.permute.xlu1 %2025  ;;  %v7174_v39 = vpop.permute.xlu0 %2035 }
 0x49d   : > { %10986 = vst [vmem:[#allocation56_spill] sm:$0xff] %v7174_v39  ;;  %v7203_v39 = vsel %vm1874_vm11, %v6882_v52, %v1890_v32 }
 0x49e   : > { %2269 = vrot.lane.b32.xlu1 %v7092_v16, %s4011_s20  ;;  %2407 = vrot.lane.b32.xlu0 %v7121_v49, %s4012_s21 }
 0x4a0   : > { %v7180_v27 = vpop.permute.xlu1 %2041  ;;  %v7182_v48 = vpop.permute.xlu0 %2243 }
 0x4a1   : > { %10987 = vst [vmem:[#allocation3_spill] sm:$0xff] %v7182_v48 }
 0x4a2   : > { %2413 = vrot.lane.b32.xlu1 %v7079_v1, %s4012_s21  ;;  %2423 = vrot.lane.b32.xlu0 %v7134_v55, %s4012_s21 }
 0x4a4   : > { %v7188_v20 = vpop.permute.xlu1 %2249  ;;  %v7190_v44 = vpop.permute.xlu0 %2259 }
 0x4a5   : > { %10988 = vst [vmem:[#allocation37_spill] sm:$0xff] %v7190_v44 }
 0x4a6   : > { %2429 = vrot.lane.b32.xlu1 %v7092_v16, %s4012_s21  ;;  %2631 = vrot.lane.b32.xlu0 %v7121_v49, %s4014_s22 }
 0x4a8   : > { %v7198_v48 = vpop.permute.xlu1 %2265  ;;  %v7200_v41 = vpop.permute.xlu0 %2403 }
 0x4a9   : > { %10989 = vst [vmem:[#allocation28_spill] sm:$0xff] %v7200_v41 }
 0x4aa   : > { %2637 = vrot.lane.b32.xlu1 %v7079_v1, %s4014_s22  ;;  %1931 = vrot.lane.b32.xlu0 %v7203_v39, %s4008_s17 }
 0x4ac   : > { %v7211_v44 = vpop.permute.xlu1 %2409  ;;  %v7213_v29 = vpop.permute.xlu0 %2419 }
 0x4ad   : > { %10990 = vst [vmem:[#allocation69_spill] sm:$0xff] %v7213_v29 }
 0x4ae   : > { %2135 = vrot.lane.b32.xlu1 %v7121_v49, %s4007_s16  ;;  %1947 = vrot.lane.b32.xlu0 %v7216_v50, %s4008_s17 }
 0x4b0   : > { %v7222_v32 = vpop.permute.xlu1 %2425  ;;  %v7224_v52 = vpop.permute.xlu0 %2627 }
 0x4b1   : > { %10991 = vst [vmem:[#allocation50_spill] sm:$0xff] %v7224_v52 }
 0x4b2   : > { %2151 = vrot.lane.b32.xlu1 %v7134_v55, %s4007_s16  ;;  %2031 = vrot.lane.b32.xlu0 %v7203_v39, %s4010_s19 }
 0x4b4   : > { %v7230_v41 = vpop.permute.xlu1 %2633  ;;  %v7232_v33 = vpop.permute.xlu0 %1927 }
 0x4b5   : > { %10992 = vst [vmem:[#allocation23_spill] sm:$0xff] %v7230_v41  ;;  %10993 = vst [vmem:[#allocation36_spill] sm:$0xff] %v7232_v33 }
 0x4b6   : > { %2519 = vrot.lane.b32.xlu1 %v7121_v49, %s4009_s18  ;;  %2047 = vrot.lane.b32.xlu0 %v7216_v50, %s4010_s19 }
 0x4b8   : > { %v7238_v25 = vpop.permute.xlu1 %2131  ;;  %v7240_v29 = vpop.permute.xlu0 %1943 }
 0x4b9   : > { %10994 = vst [vmem:[#allocation41_spill] sm:$0xff] %v7238_v25  ;;  %10995 = vst [vmem:[#allocation24_spill] sm:$0xff] %v7240_v29 }
 0x4ba   : > { %2535 = vrot.lane.b32.xlu1 %v7134_v55, %s4009_s18  ;;  %2255 = vrot.lane.b32.xlu0 %v7203_v39, %s4011_s20 }
 0x4bc   : > { %v7246_v52 = vpop.permute.xlu1 %2147  ;;  %v7248_v41 = vpop.permute.xlu0 %2027 }
 0x4bd   : > { %10996 = vst [vmem:[#allocation34_spill] sm:$0xff] %v7246_v52  ;;  %10997 = vst [vmem:[#allocation32_spill] sm:$0xff] %v7248_v41 }
 0x4be   : > { %2143 = vrot.lane.b32.xlu1 %v7203_v39, %s4007_s16  ;;  %2271 = vrot.lane.b32.xlu0 %v7216_v50, %s4011_s20 }
 0x4c0   : > { %v7254_v33 = vpop.permute.xlu1 %2515  ;;  %v7256_v25 = vpop.permute.xlu0 %2043 }
 0x4c1   : > { %10998 = vst [vmem:[#allocation19_spill] sm:$0xff] %v7254_v33  ;;  %10999 = vst [vmem:[#allocation49_spill] sm:$0xff] %v7256_v25 }
 0x4c2   : > { %2159 = vrot.lane.b32.xlu1 %v7216_v50, %s4007_s16  ;;  %2415 = vrot.lane.b32.xlu0 %v7203_v39, %s4012_s21 }
 0x4c4   : > { %v7262_v29 = vpop.permute.xlu1 %2531  ;;  %v7264_v52 = vpop.permute.xlu0 %2251 }
 0x4c5   : > { %11000 = vst [vmem:[#allocation53_spill] sm:$0xff] %v7262_v29  ;;  %11001 = vst [vmem:[#allocation136_spill] sm:$0xff] %v7264_v52 }
 0x4c6   : > { %2527 = vrot.lane.b32.xlu1 %v7203_v39, %s4009_s18  ;;  %2431 = vrot.lane.b32.xlu0 %v7216_v50, %s4012_s21 }
 0x4c8   : > { %v7270_v41 = vpop.permute.xlu1 %2139  ;;  %v7272_v33 = vpop.permute.xlu0 %2267 }
 0x4c9   : > { %11002 = vst [vmem:[#allocation10_spill] sm:$0xff] %v7270_v41  ;;  %11003 = vst [vmem:[#allocation33_spill] sm:$0xff] %v7272_v33 }
 0x4ca   : > { %2543 = vrot.lane.b32.xlu1 %v7216_v50, %s4009_s18  ;;  %2643 = vrot.lane.b32.xlu0 %v6924_v37, %s4014_s22 }
 0x4cc   : > { %v7278_v25 = vpop.permute.xlu1 %2155  ;;  %v7280_v29 = vpop.permute.xlu0 %2411 }
 0x4cd   : > { %11004 = vst [vmem:[#allocation26_spill] sm:$0xff] %v7278_v25  ;;  %11005 = vst [vmem:[#allocation137_spill] sm:$0xff] %v7280_v29 }
 0x4ce   : > { %2641 = vrot.lane.b32.xlu1 %v6860_v19, %s4014_s22  ;;  %2639 = vrot.lane.b32.xlu0 %v7203_v39, %s4014_s22 }
 0x4d0   : > { %v7286_v52 = vpop.permute.xlu1 %2523  ;;  %v7288_v41 = vpop.permute.xlu0 %2427 }
 0x4d1   : > { %11006 = vst [vmem:[#allocation117_spill] sm:$0xff] %v7286_v52  ;;  %11007 = vst [vmem:[#allocation115_spill] sm:$0xff] %v7288_v41 }
 0x4d2   : > { %2645 = vrot.lane.b32.xlu1 %v7050_v36, %s4014_s22  ;;  %2647 = vrot.lane.b32.xlu0 %v7134_v55, %s4014_s22 }
 0x4d4   : > { %v7294_v33 = vpop.permute.xlu1 %2539  ;;  %v7296_v25 = vpop.permute.xlu0 %2635 }
 0x4d5   : > { %11008 = vst [vmem:[#allocation101_spill] sm:$0xff] %v7294_v33  ;;  %11009 = vst [vmem:[#allocation104_spill] sm:$0xff] %v7296_v25  ;;  %v3989_v25 = vld [vmem:[%s9706_s6] sm:$0xff] }
 0x4d6   : > { %2649 = vrot.lane.b32.xlu1 %v6898_v30, %s4014_s22  ;;  %2651 = vrot.lane.b32.xlu0 %v6982_v4, %s4014_s22 }
 0x4d8   : > { %v7302_v29 = vpop.permute.xlu0 %2133  ;;  %v7304_v52 = vpop.permute.xlu1 %1921 }
 0x4d9   : > { %11010 = vst [vmem:[#allocation105_spill] sm:$0xff] %v7302_v29  ;;  %11011 = vst [vmem:[#allocation108_spill] sm:$0xff] %v7304_v52  ;;  %v3990_v29 = vld [vmem:[%s9706_s6 + $0x8] sm:$0xff] }
 0x4da   : > { %2653 = vrot.lane.b32.xlu1 %v7092_v16, %s4014_s22  ;;  %2655 = vrot.lane.b32.xlu0 %v7216_v50, %s4014_s22 }
 0x4dc   : > { %v7310_v41 = vpop.permute.xlu0 %2149  ;;  %v7312_v33 = vpop.permute.xlu1 %1937 }
 0x4dd   : > { %11012 = vst [vmem:[#allocation116_spill] sm:$0xff] %v7310_v41  ;;  %11013 = vst [vmem:[#allocation122_spill] sm:$0xff] %v7312_v33  ;;  %v3991_v41 = vld [vmem:[%s9706_s6 + $0x10] sm:$0xff] }
 0x4de   : > { %2674 = vperm.xlu1 %3904, %v3989_v25   ;;  %2678 = vperm.xlu0 %3905, %v3990_v29  }
 0x4e0   : > { %v7320_v52 = vpop.permute.xlu0 %2517  ;;  %v7322_v47 = vpop.permute.xlu1 %2021 }
 0x4e1   : > { %11014 = vst [vmem:[#allocation138_spill] sm:$0xff] %v7320_v52  ;;  %11015 = vst [vmem:[#allocation31_spill] sm:$0xff] %v7322_v47  ;;  %v3992_v52 = vld [vmem:[%s9706_s6 + $0x18] sm:$0xff] }
 0x4e2   : > { %2682 = vperm.xlu1 %3904, %v3991_v41   ;;  %2737 = vrot.lane.b32.xlu0 %v6850_v3, %s4016_s23 }
 0x4e3   : > { %3907 = vset.pattern.permute.xlu0 %v11018_v62 }
 0x4e4   : > { %v7329_v33 = vpop.permute.xlu0 %2533  ;;  %v7331_v12 = vpop.permute.xlu1 %2037 }
 0x4e5   : > { %11016 = vst [vmem:[#allocation29_spill] sm:$0xff] %v7329_v33  ;;  %11017 = vst [vmem:[#allocation39_spill] sm:$0xff] %v7331_v12 }
 0x4e6   : > { %2686 = vperm.xlu1 %3904, %v3992_v52   ;;  %2790 = vperm.xlu0 %3907, %v3990_v29  }
 0x4e8   : > { %v7337_v47 = vpop.permute.xlu1 %2245  ;;  %v7339_v6 = vpop.permute.xlu0 %2141 }
 0x4e9   : > { %11019 = vst [vmem:[#allocation72_spill] sm:$0xff] %v7337_v47  ;;  %v1913_v47 = vld [vmem:[%s9707_s7] sm:$0xff] }
 0x4ea   : > { %3906 = vset.pattern.permute.xlu1 %v11018_v62  ;;  %3908 = vset.pattern.permute.xlu0 %v10960_v53 }
 0x4eb   : > { %2786 = vperm.xlu1 %3906, %v3989_v25   ;;  %1972 = vperm.xlu0 %3908, %v3990_v29   ;;  %v1914_v29 = vld [vmem:[%s9707_s7 + $0x8] sm:$0xff] }
 0x4ec   : > { %v7343_v33 = vpop.permute.xlu1 %2261  ;;  %v7345_v12 = vpop.permute.xlu0 %2157 }
 0x4ed   : > { %11020 = vst [vmem:[#allocation71_spill] sm:$0xff] %v7343_v33  ;;  %11021 = vst [vmem:[#allocation76_spill] sm:$0xff] %v7345_v12  ;;  %v7457_v12 = vmul.f32 %v7008_v58, %v6898_v30 }
 0x4ef   : > { %2794 = vperm.xlu1 %3906, %v3991_v41   ;;  %1982 = vperm.xlu0 %3908, %v3992_v52  }
 0x4f0   : > { %v7347_v46 = vpop.permute.xlu1 %2405  ;;  %v7349_v13 = vpop.permute.xlu0 %2525 }
 0x4f1   : > { %11022 = vst [vmem:[#allocation66_spill] sm:$0xff] %v7347_v46  ;;  %11023 = vst [vmem:[#allocation80_spill] sm:$0xff] %v7349_v13 }
 0x4f3   : > { %2798 = vperm.xlu1 %3906, %v3992_v52   ;;  %2851 = vperm.xlu0 %3908, %v1913_v47  }
 0x4f4   : > { %v7354_v62 = vpop.permute.xlu1 %2421  ;;  %v7356_v25 = vpop.permute.xlu0 %2541 }
 0x4f5   : > { %11024 = vst [vmem:[#allocation82_spill] sm:$0xff] %v7354_v62  ;;  %11025 = vst [vmem:[#allocation12_spill] sm:$0xff] %v7356_v25 }
 0x4f7   : > { %3909 = vset.pattern.permute.xlu1 %v10960_v53  ;;  %2745 = vrot.lane.b32.xlu0 %v6890_v31, %s4016_s23 }
 0x4f8   : > { %v7364_v41 = vpop.permute.xlu1 %2629  ;;  %v7366_v13 = vpop.permute.xlu0 %1923  ;;  %2856 = vperm.xlu1 %3909, %v1914_v29   ;;  %v1915_v29 = vld [vmem:[%s9707_s7 + $0x10] sm:$0xff] }
 0x4f9   : > { %11026 = vst [vmem:[#allocation58_spill] sm:$0xff] %v7364_v41  ;;  %11027 = vst [vmem:[#allocation27_spill] sm:$0xff] %v7366_v13 }
 0x4fb   : > { %2753 = vrot.lane.b32.xlu0 %v6860_v19, %s4016_s23 }
 0x4fc   : > { %v7370_v47 = vpop.permute.xlu1 %1929  ;;  %v7372_v52 = vpop.permute.xlu0 %1939  ;;  %2739 = vrot.lane.b32.xlu1 %v6916_v21, %s4016_s23 }
 0x4fd   : > { %11028 = vst [vmem:[#allocation21_spill] sm:$0xff] %v7370_v47  ;;  %11029 = vst [vmem:[#allocation20_spill] sm:$0xff] %v7372_v52  ;;  %v7437_v47 = vld [vmem:[%s9708_s8] sm:$0xff] }
 0x4ff   : > { %2761 = vrot.lane.b32.xlu0 %v6898_v30, %s4016_s23 }
 0x500   : > { %v7378_v53 = vpop.permute.xlu1 %1945  ;;  %v7380_v25 = vpop.permute.xlu0 %2023  ;;  %2747 = vrot.lane.b32.xlu1 %v6971_v54, %s4016_s23 }
 0x501   : > { %11030 = vst [vmem:[#allocation16_spill] sm:$0xff] %v7380_v25 }
 0x503   : > { %2861 = vperm.xlu0 %3908, %v1915_v29  }
 0x504   : > { %v7387_v13 = vpop.permute.xlu1 %2029  ;;  %v7389_v52 = vpop.permute.xlu0 %2039  ;;  %2755 = vrot.lane.b32.xlu1 %v6924_v37, %s4016_s23 }
 0x505   : > { %11031 = vst [vmem:[#allocation25_spill] sm:$0xff] %v7389_v52 }
 0x507   : > { %2749 = vrot.lane.b32.xlu0 %v7079_v1, %s4016_s23 }
 0x508   : > { %v7395_v41 = vpop.permute.xlu1 %2045  ;;  %v7397_v25 = vpop.permute.xlu0 %2247  ;;  %2763 = vrot.lane.b32.xlu1 %v6982_v4, %s4016_s23 }
 0x509   : > { %11032 = vst [vmem:[#allocation4_spill] sm:$0xff] %v7397_v25  ;;  %v1916_v25 = vld [vmem:[%s9707_s7 + $0x18] sm:$0xff] }
 0x50b   : > { %2765 = vrot.lane.b32.xlu0 %v7092_v16, %s4016_s23 }
 0x50c   : > { %v7403_v29 = vpop.permute.xlu1 %2253  ;;  %v7405_v62 = vpop.permute.xlu0 %2263  ;;  %2741 = vrot.lane.b32.xlu1 %v7041_v18, %s4016_s23 }
 0x50d   : > { %11033 = vst [vmem:[#allocation134_spill] sm:$0xff] %v7403_v29  ;;  %11034 = vst [vmem:[#allocation8_spill] sm:$0xff] %v7405_v62  ;;  %v7428_v29 = vmul.f32 %v7008_v58, %v6850_v3  ;;  %v7449_v3 = vmul.f32 %v7008_v58, %v6890_v31  ;;  %v7469_v31 = vmul.f32 %v6988_v14, %v6924_v37 }
 0x50f   : > { %2743 = vrot.lane.b32.xlu0 %v7121_v49, %s4016_s23  ;;  %11045 = vst [vmem:[#allocation100_spill] sm:$0xff] %v7469_v31 }
 0x510   : > { %v7411_v52 = vpop.permute.xlu1 %2269  ;;  %v7413_v46 = vpop.permute.xlu0 %2407  ;;  %2757 = vrot.lane.b32.xlu1 %v7050_v36, %s4016_s23 }
 0x511   : > { %11035 = vst [vmem:[#allocation85_spill] sm:$0xff] %v7411_v52  ;;  %11036 = vst [vmem:[#allocation75_spill] sm:$0xff] %v7413_v46  ;;  %v11039_v46 = vld [vmem:[#allocation83_spill] sm:$0xff] }
 0x512   : > { %vm11040_vm7 = vcmp.lt.s32.totalorder %v11039_v46, 16  ;;  %vm11043_vm11 = vcmp.lt.s32.totalorder %v11039_v46, 17  ;;  %vm11053_vm10 = vcmp.lt.s32.totalorder %v11039_v46, 17  ;;  %vm11081_vm12 = vcmp.lt.s32.totalorder %v11039_v46, 127 }
 0x513   : > { %2759 = vrot.lane.b32.xlu0 %v7134_v55, %s4016_s23  ;;  %v2061_v52 = vsel %vm11040_vm7, %v7180_v27, %v7089_v45  ;;  %vm11046_vm14 = vmmov %vm11040_vm7  ;;  %vm11050_vm7 = vcmp.lt.s32.totalorder %v11039_v46, 15  ;;  %v1953_v31 = vsel %vm11053_vm10, %v7156_v57, %v7076_v24 }
 0x514   : > { %v7422_v62 = vpop.permute.xlu1 %2413  ;;  %v7424_v33 = vpop.permute.xlu0 %2423  ;;  %2866 = vperm.xlu1 %3909, %v1916_v25   ;;  %v7445_v25 = vmul.f32 %v6988_v14, %v6971_v54  ;;  %v7465_v54 = vmul.f32 %v6994_v43, %v7041_v18  ;;  %v2081_v30 = vmul.f32 %v6910_v38, %v2061_v52  ;;  %v2169_v37 = vsel %vm11050_vm7, %v7064_v60, %v7108_v40 }
 0x515   : > { %11037 = vst [vmem:[#allocation93_spill] sm:$0xff] %v7422_v62  ;;  %11038 = vst [vmem:[#allocation95_spill] sm:$0xff] %v7424_v33  ;;  %v7441_v62 = vmul.f32 %v6988_v14, %v6916_v21  ;;  %v7453_v33 = vmul.f32 %v7008_v58, %v6860_v19  ;;  %v1961_v21 = vsel %vm11043_vm11, %v7164_v8, %v7066_v56 }
 0x516   : > { %11042 = vst [vmem:[#allocation70_spill] sm:$0xff] %v7445_v25  ;;  %11044 = vst [vmem:[#allocation97_spill] sm:$0xff] %v7465_v54  ;;  %v2057_v19 = vsel %vm11046_vm14, %v7089_v45, %v7172_v34  ;;  %v7478_v58 = vmul.f32 %v6994_v43, %v7079_v1  ;;  %v2053_v45 = vsel %vm11046_vm14, %v7172_v34, %v7100_v28  ;;  %v11078_v54 = vmov 2  }
 0x517   : > { %11041 = vst [vmem:[#allocation73_spill] sm:$0xff] %v7441_v62  ;;  %3323 = vperm.xlu0 %3908, %v7437_v47   ;;  %vm11051_vm11 = vmmov %vm11050_vm7  ;;  %v7501_v52 = vmul.f32 %v6994_v43, %v7050_v36 }
 0x518   : > { %11047 = vst [vmem:[#allocation14_spill] sm:$0xff] %v7478_v58  ;;  %v7481_v25 = vpop.permute.xlu1 %2429  ;;  %v7483_v18 = vpop.permute.xlu0 %2631  ;;  %2751 = vrot.lane.b32.xlu1 %v7203_v39, %s4016_s23  ;;  %v2173_v1 = vsel %vm11051_vm11, %v7118_v59, %v7064_v60  ;;  %vm11054_vm7 = vmmov %vm11053_vm10  ;;  %v1985_v60 = vmul.f32 %v6892_v51, %v1961_v21  ;;  %v11067_v58 = vld [vmem:[#allocation106_spill] sm:$0xff] }
 0x519   : > { %11048 = vst [vmem:[#allocation2_spill] sm:$0xff] %v7481_v25  ;;  %11049 = vst [vmem:[#allocation22_spill] sm:$0xff] %v7483_v18  ;;  %v1957_v62 = vsel %vm11054_vm7, %v7066_v56, %v7156_v57  ;;  %v2194_v57 = vmul.f32 %v6572_v0, %v2169_v37 }
 0x51a   : > { %11052 = vst [vmem:[#allocation135_spill] sm:$0xff] %v7501_v52  ;;  %vm11055_vm11 = vmmov %vm11046_vm14  ;;  %vm11056_vm14 = vcmp.lt.s32.totalorder %v11039_v46, 15  ;;  %v2082_v52 = vmul.f32 %v6910_v38, %v2057_v19  ;;  %v1986_v37 = vmul.f32 %v6892_v51, %v1957_v62  ;;  %v11064_v62 = vld [vmem:[#allocation102_spill] sm:$0xff] }
 0x51b   : > { %v2049_v34 = vsel %vm11055_vm11, %v7100_v28, %v7180_v27  ;;  %v2165_v36 = vsel %vm11056_vm14, %v7108_v40, %v7074_v63  ;;  %vm11057_vm10 = vmmov %vm11054_vm7  ;;  %vm11058_vm7 = vcmp.lt.s32.totalorder %v11039_v46, 1  ;;  %v2193_v27 = vmul.f32 %v6572_v0, %v2173_v1 }
 0x51c   : > { %v1949_v18 = vsel %vm11057_vm10, %v7076_v24, %v7164_v8  ;;  %v2285_v56 = vsel %vm11058_vm7, %v7198_v48, %v7106_v7  ;;  %v2083_v28 = vmul.f32 %v6910_v38, %v2053_v45  ;;  %v2097_v40 = vsel %vm10707_vm1, %v2081_v30, 0.0  ;;  %v7534_v21 = vpop.permute.xlu1 %2637  ;;  %2767 = vrot.lane.b32.xlu1 %v7216_v50, %s4016_s23  ;;  %v7538_v24 = vpop.permute.xlu0 %1931  ;;  %vm11062_vm11 = vmmov %vm11056_vm14  ;;  %v7551_v45 = vld [vmem:[%s9708_s8 + $0x8] sm:$0x3f]  ;;  %s4018_s23 = smov 48  }
 0x51d   : > { %11059 = vst [vmem:[#allocation86_spill] sm:$0xff] %v7534_v21  ;;  %11060 = vst [vmem:[#allocation139_spill] sm:$0xff] %v7538_v24  ;;  %v11061_v8 = vmov 1   ;;  %v2161_v19 = vsel %vm11062_vm11, %v7074_v63, %v7118_v59  ;;  %v1987_v1 = vmul.f32 %v6892_v51, %v1953_v31  ;;  %v2084_v30 = vmul.f32 %v6910_v38, %v2049_v34 }
 0x51e   : > { %3910 = vset.pattern.permute.xlu0 %v11061_v8  ;;  %v1988_v24 = vmul.f32 %v6892_v51, %v1949_v18  ;;  %v2001_v21 = vsel %vm5250_vm0, %v1985_v60, 0.0  ;;  %vm11063_vm14 = vmmov %vm11058_vm7  ;;  %v2305_v59 = vmul.f32 %v6952_v26, %v2285_v56  ;;  %v2195_v38 = vmul.f32 %v6572_v0, %v2165_v36 }
 0x51f   : > { %3381 = vperm.xlu0 %3910, %v7437_v47   ;;  %v2281_v63 = vsel %vm11063_vm14, %v7106_v7, %v7188_v20  ;;  %vm11065_vm10 = vnez %v11064_v62  ;;  %v2113_v34 = vadd.f32 %v2097_v40, %v2001_v21  ;;  %v2277_v51 = vsel %vm11058_vm7, %v7188_v20, %v7116_v11  ;;  %vm11069_vm3 = vmmov %vm11058_vm7  ;;  %v11072_v20 = vld [vmem:[#allocation30_spill] sm:$0xff]  ;;  %v11074_v40 = vld [vmem:[#allocation17_spill] sm:$0xff] }
 0x520   : > { %v2098_v31 = vsel %vm11065_vm10, %v2082_v52, 0.0  ;;  %v2196_v18 = vmul.f32 %v6572_v0, %v2161_v19  ;;  %vm11066_vm11 = vnez %v10324_v17  ;;  %vm11068_vm14 = vnez %v11067_v58  ;;  %v7578_v52 = vpop.permute.xlu1 %2135  ;;  %3328 = vperm.xlu1 %3909, %v7551_v45   ;;  %v7581_v56 = vpop.permute.xlu0 %1947  ;;  %v11076_v21 = vld [vmem:[#allocation113_spill] sm:$0xff] }
 0x521   : > { %v2209_v60 = vsel %vm11066_vm11, %v2193_v27, 0.0  ;;  %v2099_v7 = vsel %vm11068_vm14, %v2083_v28, 0.0  ;;  %v2273_v36 = vsel %vm11069_vm3, %v7116_v11, %v7198_v48  ;;  %11070 = vst [vmem:[#allocation140_spill] sm:$0xff] %v7578_v52  ;;  %11071 = vst [vmem:[#allocation141_spill] sm:$0xff] %v7581_v56  ;;  %vm11073_vm7 = vnez %v11072_v20 }
 0x522   : > { %v2002_v0 = vsel %vm11073_vm7, %v1986_v37, 0.0  ;;  %vm11075_vm2 = vnez %v11074_v40  ;;  %vm11077_vm13 = vnez %v11076_v21  ;;  %v2306_v19 = vmul.f32 %v6952_v26, %v2281_v63 }
 0x523   : > { %v2003_v27 = vsel %vm11075_vm2, %v1987_v1, 0.0  ;;  %v2100_v28 = vsel %vm11077_vm13, %v2084_v30, 0.0  ;;  %3912 = vset.pattern.permute.xlu0 %v11078_v54  ;;  %vm11079_vm3 = vnez %v10377_v9  ;;  %v2114_v11 = vadd.f32 %v2098_v31, %v2002_v0  ;;  %v11092_v0 = vld [vmem:[#allocation109_spill] sm:$0xff] }
 0x524   : > { %v2004_v48 = vsel %vm11079_vm3, %v1988_v24, 0.0  ;;  %v2307_v52 = vmul.f32 %v6952_v26, %v2277_v51  ;;  %v2321_v56 = vsel %vm11080_vm4, %v2305_v59, 0.0  ;;  %3449 = vperm.xlu0 %3912, %v7551_v45   ;;  %v2115_v37 = vadd.f32 %v2099_v7, %v2003_v27  ;;  %vm11084_vm4 = vmmov %vm11081_vm12  ;;  %3911 = vset.pattern.permute.xlu1 %v11061_v8  ;;  %v11090_v7 = vld [vmem:[#allocation98_spill] sm:$0xff] }
 0x525   : > { %v2225_v1 = vadd.f32 %v2209_v60, %v2113_v34  ;;  %v2308_v25 = vmul.f32 %v6952_v26, %v2273_v36  ;;  %v2441_v30 = vsel %vm11081_vm12, %v7129_v35, %v7211_v44  ;;  %v2210_v24 = vsel %vm11082_vm6, %v2194_v57, 0.0  ;;  %v7610_v34 = vpop.permute.xlu1 %2151  ;;  %v7612_v26 = vpop.permute.xlu0 %2031  ;;  %vm11089_vm7 = vmmov %vm11084_vm4  ;;  %3385 = vperm.xlu1 %3911, %v7551_v45  }
 0x526   : > { %vm11083_vm3 = vnez %v10315_v5  ;;  %v2116_v31 = vadd.f32 %v2100_v28, %v2004_v48  ;;  %v2437_v59 = vsel %vm11084_vm4, %v7211_v44, %v7140_v23  ;;  %11085 = vst [vmem:[#allocation114_spill] sm:$0xff] %v7610_v34  ;;  %11086 = vst [vmem:[#allocation119_spill] sm:$0xff] %v7612_v26  ;;  %vm11087_vm12 = vnez %v10327_v10  ;;  %v11096_v28 = vld [vmem:[#allocation130_spill] sm:$0xff]  ;;  %v11098_v48 = vld [vmem:[#allocation103_spill] sm:$0xff] }
 0x527   : > { %v2211_v63 = vsel %vm11083_vm3, %v2195_v38, 0.0  ;;  %v2212_v51 = vsel %vm11087_vm12, %v2196_v18, 0.0  ;;  %vm11088_vm2 = vcmp.ge.s32.totalorder %v10877_v15, 1  ;;  %v2337_v60 = vadd.f32 %v2321_v56, %v2225_v1  ;;  %vm11093_vm0 = vmmov %vm11089_vm7  ;;  %v11095_v56 = vld [vmem:[#allocation128_spill] sm:$0xff]  ;;  %v11100_v1 = vld [vmem:[#allocation129_spill] sm:$0xff] }
 0x528   : > { %v2322_v57 = vsel %vm11088_vm2, %v2306_v19, 0.0  ;;  %v2433_v38 = vsel %vm11089_vm7, %v7140_v23, %v7222_v32  ;;  %v2226_v44 = vadd.f32 %v2210_v24, %v2114_v11  ;;  %vm11091_vm4 = vcmp.ge.s32.totalorder %v11090_v7, 1 }
 0x529   : > { %v2323_v36 = vsel %vm11091_vm4, %v2307_v52, 0.0  ;;  %v2465_v8 = vmul.f32 %v11092_v0, %v2441_v30  ;;  %v2445_v18 = vsel %vm11093_vm0, %v7222_v32, %v7129_v35  ;;  %v11094_v27 = vmov 3   ;;  %v7645_v34 = vpop.permute.xlu1 %2519  ;;  %v7647_v26 = vpop.permute.xlu0 %2047  ;;  %3913 = vset.pattern.permute.xlu1 %v11078_v54 }
 0x52a   : > { %3915 = vset.pattern.permute.xlu0 %v11094_v27  ;;  %vm11097_vm2 = vcmp.lt.s32.totalorder %v11039_v46, 113  ;;  %v2227_v19 = vadd.f32 %v2211_v63, %v2115_v37  ;;  %vm11099_vm7 = vcmp.ge.s32.totalorder %v11098_v48, 1  ;;  %v2466_v52 = vmul.f32 %v11092_v0, %v2437_v59  ;;  %11102 = vst [vmem:[#allocation88_spill] sm:$0xff] %v7645_v34  ;;  %v11103_v37 = vld [vmem:[#allocation142_spill] sm:$0xff]  ;;  %3445 = vperm.xlu1 %3913, %v7437_v47   ;;  %v11191_v34 = vld [vmem:[#allocation65_spill] sm:$0xff] }
 0x52b   : > { %v2549_v23 = vsel %vm11097_vm2, %v11096_v28, %v11095_v56  ;;  %v2324_v11 = vsel %vm11099_vm7, %v2308_v25, 0.0  ;;  %3477 = vperm.xlu0 %3915, %v7437_v47   ;;  %vm11101_vm4 = vmmov %vm11097_vm2  ;;  %v2338_v32 = vadd.f32 %v2322_v57, %v2226_v44  ;;  %v2228_v30 = vadd.f32 %v2212_v51, %v2116_v31 }
 0x52c   : > { %v2553_v35 = vsel %vm11101_vm4, %v11100_v1, %v11096_v28  ;;  %v2467_v24 = vmul.f32 %v11092_v0, %v2433_v38  ;;  %vm11104_vm0 = vmmov %vm11097_vm2  ;;  %v2339_v63 = vadd.f32 %v2323_v36, %v2227_v19  ;;  %v2385_v59 = vadd.f32 %v7428_v29, %v2337_v60  ;;  %v11107_v29 = vld [vmem:[#allocation131_spill] sm:$0xff] }
 0x52d   : > { %v2545_v25 = vsel %vm11104_vm0, %v11095_v56, %v11103_v37  ;;  %v2468_v9 = vmul.f32 %v11092_v0, %v2445_v18  ;;  %vm11105_vm2 = vmmov %vm11104_vm0  ;;  %v2340_v51 = vadd.f32 %v2324_v11, %v2228_v30  ;;  %vm11106_vm7 = vcmp.lt.s32.totalorder %v10875_v42, 15  ;;  %v11110_v36 = vld [vmem:[#allocation111_spill] sm:$0xff]  ;;  %v7684_v28 = vpop.permute.xlu1 %2535  ;;  %v7686_v19 = vpop.permute.xlu0 %2255 }
 0x52e   : > { %v2557_v31 = vsel %vm11105_vm2, %v11103_v37, %v11100_v1  ;;  %v2481_v57 = vsel %vm11106_vm7, %v2465_v8, 0.0  ;;  %v7664_v38 = vmul.f32 %v6994_v43, %v7092_v16  ;;  %v2577_v60 = vmul.f32 %v11107_v29, %v2553_v35  ;;  %11114 = vst [vmem:[#allocation107_spill] sm:$0xff] %v7684_v28  ;;  %v11117_v1 = vld [vmem:[#allocation32_spill] sm:$0xff]  ;;  %3914 = vset.pattern.permute.xlu1 %v11094_v27  ;;  %v11124_v37 = vld [vmem:[#allocation78_spill] sm:$0xff] }
 0x52f   : > { %vm11108_vm4 = vcmp.lt.s32.totalorder %v10877_v15, 15  ;;  %v7672_v44 = vmul.f32 %v6988_v14, %v6982_v4  ;;  %v7676_v0 = vmul.f32 %v11110_v36, %v7121_v49  ;;  %v11112_v8 = vmov 5   ;;  %3481 = vperm.xlu1 %3914, %v7551_v45  }
 0x530   : > { %v2482_v54 = vsel %vm11108_vm4, %v2466_v52, 0.0  ;;  %3918 = vset.pattern.permute.xlu0 %v11112_v8  ;;  %v2578_v16 = vmul.f32 %v11107_v29, %v2549_v23  ;;  %v2579_v43 = vmul.f32 %v11107_v29, %v2545_v25  ;;  %v2386_v18 = vadd.f32 %v7449_v3, %v2338_v32  ;;  %v11116_v52 = vld [vmem:[#allocation56_spill] sm:$0xff]  ;;  %v11119_v32 = vld [vmem:[#allocation145_spill] sm:$0xff] }
 0x531   : > { %11109 = vst [vmem:[#allocation120_spill] sm:$0xff] %v7672_v44  ;;  %11111 = vst [vmem:[#allocation121_spill] sm:$0xff] %v7676_v0  ;;  %vm11113_vm0 = vcmp.lt.s32.totalorder %v11090_v7, 15  ;;  %3582 = vperm.xlu0 %3918, %v7437_v47   ;;  %v2580_v4 = vmul.f32 %v11107_v29, %v2557_v31  ;;  %v2497_v14 = vadd.f32 %v2481_v57, %v2385_v59  ;;  %vm11115_vm2 = vcmp.lt.s32.totalorder %v11098_v48, 15  ;;  %v7724_v57 = vpop.permute.xlu0 %2271  ;;  %v11166_v44 = vld [vmem:[#allocation126_spill] sm:$0xff] }
 0x532   : > { %v2483_v56 = vsel %vm11113_vm0, %v2467_v24, 0.0  ;;  %v2387_v49 = vadd.f32 %v7453_v33, %v2339_v63  ;;  %v2484_v23 = vsel %vm11115_vm2, %v2468_v9, 0.0  ;;  %v2498_v11 = vadd.f32 %v2482_v54, %v2386_v18  ;;  %v11125_v63 = vld [vmem:[#allocation64_spill] sm:$0xff] }
 0x533   : > { %v2388_v3 = vadd.f32 %v7457_v12, %v2340_v51  ;;  %vm11118_vm7 = vcmp.lt.s32.totalorder %v11039_v46, 16  ;;  %v7706_v9 = vmul.f32 %v11110_v36, %v7203_v39  ;;  %v7710_v12 = vmul.f32 %v11110_v36, %v7134_v55  ;;  %v7722_v39 = vpop.permute.xlu1 %2143 }
 0x534   : > { %v2054_v35 = vsel %vm11118_vm7, %v11117_v1, %v11116_v52  ;;  %vm11120_vm4 = vmmov %vm11118_vm7  ;;  %v2499_v24 = vadd.f32 %v2483_v56, %v2387_v49  ;;  %v7714_v33 = vmul.f32 %v11110_v36, %v7216_v50  ;;  %v2593_v25 = vsel %vm5890_vm15, %v2577_v60, 0.0  ;;  %v11130_v36 = vld [vmem:[#allocation48_spill] sm:$0xff]  ;;  %v11135_v56 = vld [vmem:[#allocation143_spill] sm:$0xff] }
 0x535   : > { %v2058_v30 = vsel %vm11120_vm4, %v11119_v32, %v11117_v1  ;;  %11121 = vst [vmem:[#allocation91_spill] sm:$0xff] %v7706_v9  ;;  %11122 = vst [vmem:[#allocation7_spill] sm:$0xff] %v7710_v12  ;;  %v2594_v27 = vsel %vm5908_vm8, %v2578_v16, 0.0  ;;  %v2595_v31 = vsel %vm10853_vm5, %v2579_v43, 0.0  ;;  %v2500_v51 = vadd.f32 %v2484_v23, %v2388_v3  ;;  %v11134_v43 = vld [vmem:[#allocation23_spill] sm:$0xff]  ;;  %v11138_v23 = vld [vmem:[#allocation144_spill] sm:$0xff] }
 0x536   : > { %11123 = vst [vmem:[#allocation87_spill] sm:$0xff] %v7714_v33  ;;  %v11127_v55 = vmov 6   ;;  %v2596_v50 = vsel %vm10856_vm9, %v2580_v4, 0.0  ;;  %v7729_v54 = vadd.f32 %v2593_v25, %v2497_v14  ;;  %v7732_v60 = vmul.f32 %v11130_v36, %v2058_v30  ;;  %v11139_v3 = vld [vmem:[#allocation36_spill] sm:$0xff]  ;;  %v11142_v14 = vld [vmem:[#allocation49_spill] sm:$0xff]  ;;  %vm11143_vm7 = vmmov %vm11120_vm4 }
 0x537   : > { %3920 = vset.pattern.permute.xlu0 %v11127_v55  ;;  %v7735_v16 = vmul.f32 %v11130_v36, %v2054_v35  ;;  %v7737_v18 = vadd.f32 %v2594_v27, %v2498_v11  ;;  %vm11136_vm0 = vcmp.lt.s32.totalorder %v11039_v46, 112  ;;  %vm11140_vm2 = vcmp.lt.s32.totalorder %v11039_v46, 17  ;;  %v11145_v11 = vld [vmem:[#allocation74_spill] sm:$0xff]  ;;  %v11149_v27 = vld [vmem:[#allocation136_spill] sm:$0xff]  ;;  %v11150_v33 = vld [vmem:[#allocation3_spill] sm:$0xff]  ;;  %v7804_v0 = vpop.permute.xlu1 %2159 }
 0x538   : > { %11129 = vst [vmem:[#allocation38_spill] sm:$0xff] %v7729_v54  ;;  %11131 = vst [vmem:[#allocation13_spill] sm:$0xff] %v7732_v60  ;;  %v7743_v49 = vsel %vm11136_vm0, %v11135_v56, %v11134_v43  ;;  %v7749_v4 = vsel %vm11140_vm2, %v11139_v3, %v11138_v23  ;;  %v2062_v1 = vsel %vm11143_vm7, %v11142_v14, %v11119_v32  ;;  %v11152_v9 = vmov 4   ;;  %v11176_v60 = vld [vmem:[#allocation69_spill] sm:$0xff] }
 0x539   : > { %11132 = vst [vmem:[#allocation60_spill] sm:$0xff] %v7735_v16  ;;  %11133 = vst [vmem:[#allocation54_spill] sm:$0xff] %v7737_v18  ;;  %v7755_v35 = vadd.f32 %v2595_v31, %v2499_v24  ;;  %3916 = vset.pattern.permute.xlu1 %v11152_v9  ;;  %v7772_v32 = vadd.f32 %v2596_v50, %v2500_v51  ;;  %v11154_v24 = vld [vmem:[#allocation24_spill] sm:$0xff]  ;;  %v7798_v50 = vmul.f32 %v11130_v36, %v2062_v1  ;;  %v11167_v9 = vld [vmem:[#allocation34_spill] sm:$0xff]  ;;  %v7818_v18 = vpop.permute.xlu0 %2415 }
 0x53a   : > { %11137 = vst [vmem:[#allocation132_spill] sm:$0xff] %v7743_v49  ;;  %11141 = vst [vmem:[#allocation146_spill] sm:$0xff] %v7749_v4  ;;  %3529 = vperm.xlu1 %3916, %v7551_v45   ;;  %v11169_v1 = vld [vmem:[#allocation33_spill] sm:$0xff] }
 0x53b   : > { %11144 = vst [vmem:[#allocation147_spill] sm:$0xff] %v7755_v35  ;;  %vm11146_vm4 = vmmov %vm11140_vm2  ;;  %vm11151_vm2 = vcmp.lt.s32.totalorder %v11039_v46, 1  ;;  %v11181_v56 = vld [vmem:[#allocation117_spill] sm:$0xff] }
 0x53c   : > { %v7761_v30 = vsel %vm11146_vm4, %v11145_v11, %v11139_v3  ;;  %vm11148_vm0 = vmmov %vm11143_vm7  ;;  %v2282_v12 = vsel %vm11151_vm2, %v11150_v33, %v11149_v27  ;;  %11153 = vst [vmem:[#allocation148_spill] sm:$0xff] %v7772_v32  ;;  %v11158_v3 = vld [vmem:[#allocation37_spill] sm:$0xff] }
 0x53d   : > { %11147 = vst [vmem:[#allocation52_spill] sm:$0xff] %v7761_v30  ;;  %v2050_v25 = vsel %vm11148_vm0, %v11116_v52, %v11142_v14  ;;  %vm11155_vm7 = vmmov %vm11146_vm4  ;;  %v7784_v52 = vsel %vm11146_vm4, %v11154_v24, %v11145_v11  ;;  %v11162_v11 = vld [vmem:[#allocation41_spill] sm:$0xff]  ;;  %v2310_v32 = vmul.f32 %v11166_v44, %v2282_v12  ;;  %v11172_v12 = vld [vmem:[#allocation26_spill] sm:$0xff] }
 0x53e   : > { %v7778_v31 = vsel %vm11155_vm7, %v11138_v23, %v11154_v24  ;;  %11157 = vst [vmem:[#allocation47_spill] sm:$0xff] %v7784_v52  ;;  %vm11159_vm0 = vmmov %vm11151_vm2  ;;  %v11161_v23 = vld [vmem:[#allocation10_spill] sm:$0xff]  ;;  %vm11163_vm2 = vcmp.lt.s32.totalorder %v11039_v46, 15  ;;  %3525 = vperm.xlu1 %3916, %v7437_v47   ;;  %v11187_v30 = vld [vmem:[#allocation115_spill] sm:$0xff]  ;;  %v7879_v52 = vpop.permute.xlu1 %2527 }
 0x53f   : > { %11156 = vst [vmem:[#allocation149_spill] sm:$0xff] %v7778_v31  ;;  %v2278_v14 = vsel %vm11159_vm0, %v11149_v27, %v11158_v3  ;;  %11160 = vst [vmem:[#allocation35_spill] sm:$0xff] %v7798_v50  ;;  %v2170_v24 = vsel %vm11163_vm2, %v11162_v11, %v11161_v23  ;;  %v7807_v27 = vmul.f32 %v11130_v36, %v2050_v25  ;;  %v11410_v59 = vld [vmem:[#allocation38_spill] sm:$0xff] }
 0x540   : > { %11164 = vst [vmem:[#allocation118_spill] sm:$0xff] %v7804_v0  ;;  %vm11168_vm7 = vmmov %vm11163_vm2  ;;  %v2311_v54 = vmul.f32 %v11166_v44, %v2278_v14  ;;  %v2274_v36 = vsel %vm11159_vm0, %v11158_v3, %v11169_v1  ;;  %v2162_v25 = vsel %vm11163_vm2, %v11167_v9, %v11172_v12  ;;  %v11177_v14 = vld [vmem:[#allocation137_spill] sm:$0xff]  ;;  %v11179_v3 = vld [vmem:[#allocation28_spill] sm:$0xff] }
 0x541   : > { %11165 = vst [vmem:[#allocation45_spill] sm:$0xff] %v7807_v27  ;;  %v2166_v51 = vsel %vm11168_vm7, %v11161_v23, %v11167_v9  ;;  %vm11170_vm4 = vmmov %vm11159_vm0  ;;  %v11182_v9 = vld [vmem:[#allocation19_spill] sm:$0xff]  ;;  %v2312_v43 = vmul.f32 %v11166_v44, %v2274_v36 }
 0x542   : > { %v2286_v35 = vsel %vm11170_vm4, %v11169_v1, %v11150_v33  ;;  %11171 = vst [vmem:[#allocation11_spill] sm:$0xff] %v7818_v18  ;;  %vm11173_vm7 = vmmov %vm11163_vm2  ;;  %v11174_v33 = vld [vmem:[#allocation57_spill] sm:$0xff]  ;;  %vm11178_vm4 = vcmp.lt.s32.totalorder %v11039_v46, 127  ;;  %vm11183_vm2 = vcmp.lt.s32.totalorder %v11039_v46, 113  ;;  %v11192_v18 = vld [vmem:[#allocation67_spill] sm:$0xff]  ;;  %3917 = vset.pattern.permute.xlu1 %v11112_v8 }
 0x543   : > { %v2174_v23 = vsel %vm11173_vm7, %v11172_v12, %v11162_v11  ;;  %v7834_v16 = vmul.f32 %v11174_v33, %v2170_v24  ;;  %v2438_v49 = vsel %vm11178_vm4, %v11177_v14, %v11176_v60  ;;  %vm11180_vm0 = vmmov %vm11178_vm4  ;;  %v2554_v31 = vsel %vm11183_vm2, %v11182_v9, %v11181_v56  ;;  %v11185_v12 = vld [vmem:[#allocation53_spill] sm:$0xff]  ;;  %3586 = vperm.xlu1 %3917, %v7551_v45  }
 0x544   : > { %v2442_v1 = vsel %vm11180_vm0, %v11179_v3, %v11177_v14  ;;  %v7850_v11 = vmul.f32 %v11174_v33, %v2166_v51  ;;  %v2309_v24 = vmul.f32 %v11166_v44, %v2286_v35  ;;  %vm11186_vm7 = vmmov %vm11183_vm2  ;;  %v7866_v51 = vmul.f32 %v11174_v33, %v2174_v23 }
 0x545   : > { %11175 = vst [vmem:[#allocation63_spill] sm:$0xff] %v7834_v16  ;;  %v2550_v4 = vsel %vm11186_vm7, %v11181_v56, %v11185_v12  ;;  %vm11188_vm4 = vmmov %vm11180_vm0  ;;  %v7869_v35 = vmul.f32 %v11174_v33, %v2162_v25  ;;  %v2469_v28 = vmul.f32 %v11191_v34, %v2442_v1  ;;  %v7877_v0 = vmul.f32 %v11192_v18, %v2554_v31  ;;  %v11218_v33 = vld [vmem:[#allocation105_spill] sm:$0xff]  ;;  %v11220_v56 = vld [vmem:[#allocation43_spill] sm:$0xff] }
 0x546   : > { %11184 = vst [vmem:[#allocation18_spill] sm:$0xff] %v7850_v11  ;;  %v2434_v14 = vsel %vm11188_vm4, %v11176_v60, %v11187_v30  ;;  %11189 = vst [vmem:[#allocation123_spill] sm:$0xff] %v7866_v51  ;;  %v2470_v60 = vmul.f32 %v11191_v34, %v2438_v49  ;;  %vm11194_vm0 = vcmp.ge.s32.totalorder %v10877_v15, 1  ;;  %v7886_v36 = vmul.f32 %v11192_v18, %v2550_v4  ;;  %v7893_v49 = vpop.permute.xlu0 %2431 }
 0x547   : > { %11190 = vst [vmem:[#allocation42_spill] sm:$0xff] %v7869_v35  ;;  %11193 = vst [vmem:[#allocation44_spill] sm:$0xff] %v7877_v0  ;;  %v7883_v44 = vsel %vm11194_vm0, %v2310_v32, 0.0  ;;  %v2471_v23 = vmul.f32 %v11191_v34, %v2434_v14  ;;  %vm11198_vm7 = vcmp.ge.s32.totalorder %v11090_v7, 1  ;;  %vm11202_vm0 = vcmp.ge.s32.totalorder %v11098_v48, 1  ;;  %v7969_v0 = vpop.permute.xlu1 %2543  ;;  %3919 = vset.pattern.permute.xlu1 %v11127_v55 }
 0x548   : > { %11195 = vst [vmem:[#allocation83_spill] sm:$0xff] %v7883_v44  ;;  %11196 = vst [vmem:[#allocation102_spill] sm:$0xff] %v7886_v36  ;;  %v7898_v31 = vsel %vm11198_vm7, %v2311_v54, 0.0  ;;  %v7913_v8 = vsel %vm11202_vm0, %v2312_v43, 0.0  ;;  %vm11206_vm7 = vcmp.lt.s32.totalorder %v10875_v42, 15  ;;  %vm11210_vm0 = vcmp.lt.s32.totalorder %v11090_v7, 15  ;;  %3651 = vperm.xlu1 %3919, %v7551_v45  }
 0x549   : > { %vm11197_vm2 = vmmov %vm11188_vm4  ;;  %11199 = vst [vmem:[#allocation106_spill] sm:$0xff] %v7898_v31  ;;  %vm11200_vm4 = vcmp.ge.s32.totalorder %v10875_v42, 1  ;;  %v7944_v4 = vsel %vm11210_vm0, %v2471_v23, 0.0 }
 0x54a   : > { %v2446_v25 = vsel %vm11197_vm2, %v11187_v30, %v11179_v3  ;;  %v7908_v30 = vsel %vm11200_vm4, %v2309_v24, 0.0  ;;  %11203 = vst [vmem:[#allocation109_spill] sm:$0xff] %v7913_v8  ;;  %v11204_v3 = vld [vmem:[#allocation31_spill] sm:$0xff]  ;;  %vm11205_vm2 = vcmp.lt.s32.totalorder %v11039_v46, 16  ;;  %v7927_v24 = vsel %vm11206_vm7, %v2469_v28, 0.0  ;;  %11211 = vst [vmem:[#allocation129_spill] sm:$0xff] %v7944_v4 }
 0x54b   : > { %11201 = vst [vmem:[#allocation113_spill] sm:$0xff] %v7908_v30  ;;  %v2063_v1 = vsel %vm11205_vm2, %v7395_v41, %v11204_v3  ;;  %11207 = vst [vmem:[#allocation128_spill] sm:$0xff] %v7927_v24  ;;  %vm11208_vm4 = vcmp.lt.s32.totalorder %v10877_v15, 15  ;;  %v7937_v32 = vmul.f32 %v11191_v34, %v2446_v25  ;;  %v11212_v28 = vld [vmem:[#allocation108_spill] sm:$0xff]  ;;  %vm11213_vm2 = vcmp.lt.s32.totalorder %v11039_v46, 17  ;;  %v11215_v34 = vld [vmem:[#allocation101_spill] sm:$0xff]  ;;  %v7988_v24 = vpop.permute.xlu0 %2643 }
 0x54c   : > { %v7931_v43 = vsel %vm11208_vm4, %v2470_v60, 0.0  ;;  %v1963_v60 = vsel %vm11213_vm2, %v7378_v53, %v11212_v28  ;;  %vm11214_vm7 = vcmp.lt.s32.totalorder %v11039_v46, 16  ;;  %vm11216_vm4 = vcmp.lt.s32.totalorder %v11039_v46, 113  ;;  %v11223_v4 = vld [vmem:[#allocation122_spill] sm:$0xff]  ;;  %v11230_v8 = vld [vmem:[#allocation59_spill] sm:$0xff]  ;;  %3647 = vperm.xlu1 %3919, %v7437_v47  }
 0x54d   : > { %11209 = vst [vmem:[#allocation130_spill] sm:$0xff] %v7931_v43  ;;  %v2059_v14 = vsel %vm11214_vm7, %v11204_v3, %v7387_v13  ;;  %v2546_v25 = vsel %vm11216_vm4, %v11185_v12, %v11215_v34  ;;  %vm11217_vm0 = vmmov %vm11216_vm4  ;;  %vm11219_vm2 = vcmp.lt.s32.totalorder %v11039_v46, 15  ;;  %v2089_v36 = vmul.f32 %v11220_v56, %v2063_v1  ;;  %v11221_v3 = vld [vmem:[#allocation76_spill] sm:$0xff]  ;;  %v11224_v43 = vld [vmem:[#allocation21_spill] sm:$0xff] }
 0x54e   : > { %v7962_v23 = vsel %vm11217_vm0, %v11215_v34, %v11182_v9  ;;  %v2171_v54 = vsel %vm11219_vm2, %v11218_v33, %v7339_v6  ;;  %vm11222_vm7 = vmmov %vm11219_vm2  ;;  %vm11225_vm4 = vcmp.lt.s32.totalorder %v11039_v46, 17  ;;  %v11227_v1 = vld [vmem:[#allocation39_spill] sm:$0xff]  ;;  %vm11228_vm2 = vcmp.lt.s32.totalorder %v11039_v46, 16  ;;  %v11458_v10 = vld [vmem:[#allocation44_spill] sm:$0xff] }
 0x54f   : > { %v2175_v12 = vsel %vm11222_vm7, %v11221_v3, %v11218_v33  ;;  %v1955_v9 = vsel %vm11225_vm4, %v11224_v43, %v11223_v4  ;;  %vm11226_vm0 = vmmov %vm11225_vm4  ;;  %v2055_v55 = vsel %vm11228_vm2, %v7387_v13, %v11227_v1  ;;  %v1993_v31 = vmul.f32 %v11230_v8, %v1963_v60  ;;  %v11235_v30 = vld [vmem:[#allocation51_spill] sm:$0xff] }
 0x550   : > { %v1959_v34 = vsel %vm11226_vm0, %v11212_v28, %v11224_v43  ;;  %vm11229_vm7 = vmmov %vm11226_vm0  ;;  %v2090_v44 = vmul.f32 %v11220_v56, %v2059_v14  ;;  %v8002_v13 = vmul.f32 %v11192_v18, %v2546_v25  ;;  %v11233_v28 = vld [vmem:[#allocation116_spill] sm:$0xff]  ;;  %vm11234_vm0 = vcmp.lt.s32.totalorder %v11039_v46, 15 }
 0x551   : > { %v1951_v33 = vsel %vm11229_vm7, %v11223_v4, %v7378_v53  ;;  %vm11231_vm4 = vmmov %vm11228_vm2  ;;  %v2167_v45 = vsel %vm11234_vm0, %v7339_v6, %v11233_v28  ;;  %v2202_v35 = vmul.f32 %v11235_v30, %v2171_v54  ;;  %v11236_v53 = vld [vmem:[#allocation72_spill] sm:$0xff]  ;;  %v11237_v4 = vld [vmem:[#allocation85_spill] sm:$0xff]  ;;  %vm11238_vm2 = vcmp.lt.s32.totalorder %v11039_v46, 1 }
 0x552   : > { %v2051_v43 = vsel %vm11231_vm4, %v11227_v1, %v7395_v41  ;;  %11232 = vst [vmem:[#allocation142_spill] sm:$0xff] %v8002_v13  ;;  %v2287_v14 = vsel %vm11238_vm2, %v11237_v4, %v11236_v53  ;;  %vm11239_vm7 = vmmov %vm11234_vm0  ;;  %v1994_v60 = vmul.f32 %v11230_v8, %v1959_v34  ;;  %v2091_v25 = vmul.f32 %v11220_v56, %v2055_v55  ;;  %v11241_v55 = vld [vmem:[#allocation134_spill] sm:$0xff] }
 0x553   : > { %v2163_v41 = vsel %vm11239_vm7, %v11233_v28, %v11221_v3  ;;  %v2105_v1 = vsel %vm10707_vm1, %v2089_v36, 0.0  ;;  %v2201_v6 = vmul.f32 %v11235_v30, %v2175_v12  ;;  %v1995_v54 = vmul.f32 %v11230_v8, %v1955_v9  ;;  %vm11242_vm0 = vmmov %vm11238_vm2  ;;  %v11243_v12 = vld [vmem:[#allocation125_spill] sm:$0xff]  ;;  %v8035_v9 = vpop.permute.xlu1 %2641 }
 0x554   : > { %v1996_v11 = vmul.f32 %v11230_v8, %v1951_v33  ;;  %v2092_v16 = vmul.f32 %v11220_v56, %v2051_v43  ;;  %vm11240_vm4 = vnez %v10367_v61  ;;  %v2106_v34 = vsel %vm11065_vm10, %v2090_v44, 0.0  ;;  %v11244_v33 = vld [vmem:[#allocation71_spill] sm:$0xff]  ;;  %vm11245_vm2 = vmmov %vm11242_vm0 }
 0x555   : > { %v2009_v3 = vsel %vm11240_vm4, %v1993_v31, 0.0  ;;  %v2283_v36 = vsel %vm11242_vm0, %v11236_v53, %v11241_v55  ;;  %v2313_v28 = vmul.f32 %v11243_v12, %v2287_v14  ;;  %v2203_v8 = vmul.f32 %v11235_v30, %v2167_v45  ;;  %v8044_v31 = vpop.permute.xlu0 %2639 }
 0x556   : > { %v2218_v47 = vsel %vm11082_vm6, %v2202_v35, 0.0  ;;  %v2121_v56 = vadd.f32 %v2105_v1, %v2009_v3  ;;  %v2279_v44 = vsel %vm11245_vm2, %v11241_v55, %v11244_v33  ;;  %v2204_v43 = vmul.f32 %v11235_v30, %v2163_v41 }
 0x557   : > { %vm11246_vm7 = vnez %v11072_v20  ;;  %v2107_v14 = vsel %vm11068_vm14, %v2091_v25, 0.0  ;;  %v2275_v35 = vsel %vm11242_vm0, %v11244_v33, %v11237_v4  ;;  %v2217_v45 = vsel %vm11066_vm11, %v2201_v6, 0.0  ;;  %v11274_v20 = vld [vmem:[#allocation50_spill] sm:$0xff] }
 0x558   : > { %v2010_v53 = vsel %vm11246_vm7, %v1994_v60, 0.0  ;;  %v2108_v3 = vsel %vm11077_vm13, %v2092_v16, 0.0  ;;  %v2314_v30 = vmul.f32 %v11243_v12, %v2283_v36  ;;  %vm11247_vm2 = vnez %v11074_v40  ;;  %v11248_v60 = vld [vmem:[#allocation133_spill] sm:$0xff] }
 0x559   : > { %v2122_v1 = vadd.f32 %v2106_v34, %v2010_v53  ;;  %v2011_v41 = vsel %vm11247_vm2, %v1995_v54, 0.0  ;;  %vm11249_vm7 = vnez %v11248_v60  ;;  %v2315_v55 = vmul.f32 %v11243_v12, %v2279_v44  ;;  %v11251_v34 = vld [vmem:[#allocation93_spill] sm:$0xff]  ;;  %v11252_v53 = vld [vmem:[#allocation66_spill] sm:$0xff]  ;;  %v8088_v27 = vpop.permute.xlu0 %2647 }
 0x55a   : > { %v2012_v25 = vsel %vm11249_vm7, %v1996_v11, 0.0  ;;  %vm11250_vm4 = vcmp.ge.s32.totalorder %v10875_v42, 1  ;;  %v2123_v33 = vadd.f32 %v2107_v14, %v2011_v41  ;;  %v2233_v51 = vadd.f32 %v2217_v45, %v2121_v56  ;;  %v11254_v44 = vld [vmem:[#allocation82_spill] sm:$0xff]  ;;  %v8080_v56 = vpop.permute.xlu1 %2645  ;;  %v11257_v14 = vld [vmem:[#allocation80_spill] sm:$0xff] }
 0x55b   : > { %v2329_v4 = vsel %vm11250_vm4, %v2313_v28, 0.0  ;;  %v2316_v6 = vmul.f32 %v11243_v12, %v2275_v35  ;;  %vm11253_vm0 = vcmp.lt.s32.totalorder %v11039_v46, 127  ;;  %v2219_v54 = vsel %vm11083_vm3, %v2203_v8, 0.0  ;;  %v11256_v12 = vld [vmem:[#allocation29_spill] sm:$0xff] }
 0x55c   : > { %v2443_v16 = vsel %vm11253_vm0, %v11252_v53, %v11251_v34  ;;  %v2220_v11 = vsel %vm11087_vm12, %v2204_v43, 0.0  ;;  %v2124_v36 = vadd.f32 %v2108_v3, %v2012_v25  ;;  %vm11255_vm4 = vmmov %vm11253_vm0  ;;  %vm11258_vm7 = vcmp.lt.s32.totalorder %v11039_v46, 113  ;;  %v11261_v3 = vld [vmem:[#allocation110_spill] sm:$0xff] }
 0x55d   : > { %v2439_v28 = vsel %vm11255_vm4, %v11251_v34, %v11254_v44  ;;  %v2551_v35 = vsel %vm11258_vm7, %v11257_v14, %v11256_v12  ;;  %v2234_v45 = vadd.f32 %v2218_v47, %v2122_v1  ;;  %vm11259_vm0 = vcmp.ge.s32.totalorder %v10877_v15, 1  ;;  %v11262_v34 = vld [vmem:[#allocation2_spill] sm:$0xff]  ;;  %vm11263_vm7 = vmmov %vm11255_vm4 }
 0x55e   : > { %v2330_v8 = vsel %vm11259_vm0, %v2314_v30, 0.0  ;;  %v2345_v41 = vadd.f32 %v2329_v4, %v2233_v51  ;;  %vm11260_vm2 = vcmp.ge.s32.totalorder %v11090_v7, 1  ;;  %v2473_v25 = vmul.f32 %v11261_v3, %v2443_v16  ;;  %v11264_v1 = vld [vmem:[#allocation138_spill] sm:$0xff]  ;;  %v11267_v16 = vld [vmem:[#allocation12_spill] sm:$0xff] }
 0x55f   : > { %v2331_v43 = vsel %vm11260_vm2, %v2315_v55, 0.0  ;;  %v2435_v60 = vsel %vm11255_vm4, %v11254_v44, %v11262_v34  ;;  %v2447_v47 = vsel %vm11263_vm7, %v11262_v34, %v11252_v53  ;;  %vm11265_vm0 = vcmp.lt.s32.totalorder %v11039_v46, 113 }
 0x560   : > { %v2555_v51 = vsel %vm11265_vm0, %v11264_v1, %v11257_v14  ;;  %v2235_v30 = vadd.f32 %v2219_v54, %v2123_v33  ;;  %vm11266_vm2 = vcmp.ge.s32.totalorder %v11098_v48, 1  ;;  %v2474_v4 = vmul.f32 %v11261_v3, %v2439_v28  ;;  %vm11268_vm4 = vmmov %vm11265_vm0  ;;  %v11270_v14 = vld [vmem:[#allocation97_spill] sm:$0xff] }
 0x561   : > { %v2332_v55 = vsel %vm11266_vm2, %v2316_v6, 0.0  ;;  %v2547_v44 = vsel %vm11268_vm4, %v11256_v12, %v11267_v16  ;;  %vm11269_vm7 = vmmov %vm11265_vm0  ;;  %v2346_v34 = vadd.f32 %v2330_v8, %v2234_v45  ;;  %v2236_v50 = vadd.f32 %v2220_v11, %v2124_v36  ;;  %v11273_v12 = vld [vmem:[#allocation104_spill] sm:$0xff]  ;;  %v8132_v36 = vpop.permute.xlu1 %2649  ;;  %v11278_v8 = vld [vmem:[#allocation55_spill] sm:$0xff] }
 0x562   : > { %v2559_v53 = vsel %vm11269_vm7, %v11267_v16, %v11264_v1  ;;  %v2347_v40 = vadd.f32 %v2331_v43, %v2235_v30  ;;  %v2393_v33 = vadd.f32 %v11270_v14, %v2345_v41  ;;  %v2475_v54 = vmul.f32 %v11261_v3, %v2435_v60  ;;  %v11280_v1 = vld [vmem:[#allocation14_spill] sm:$0xff]  ;;  %v11281_v30 = vld [vmem:[#allocation135_spill] sm:$0xff] }
 0x563   : > { %v2476_v6 = vmul.f32 %v11261_v3, %v2447_v47  ;;  %vm11271_vm0 = vcmp.lt.s32.totalorder %v11098_v48, 15  ;;  %vm11275_vm2 = vcmp.lt.s32.totalorder %v11039_v46, 112  ;;  %v2348_v45 = vadd.f32 %v2332_v55, %v2236_v50  ;;  %v8144_v3 = vpop.permute.xlu0 %2651 }
 0x564   : > { %v8122_v28 = vsel %vm11271_vm0, %v7937_v32, 0.0  ;;  %v8128_v61 = vsel %vm11275_vm2, %v11274_v20, %v11273_v12  ;;  %vm11276_vm4 = vcmp.lt.s32.totalorder %v10875_v42, 15  ;;  %v8136_v60 = vmul.f32 %v11192_v18, %v7962_v23  ;;  %v11284_v32 = vld [vmem:[#allocation25_spill] sm:$0xff] }
 0x565   : > { %11272 = vst [vmem:[#allocation131_spill] sm:$0xff] %v8122_v28  ;;  %v2489_v11 = vsel %vm11276_vm4, %v2473_v25, 0.0  ;;  %v2585_v41 = vmul.f32 %v11278_v8, %v2555_v51  ;;  %vm11279_vm7 = vcmp.lt.s32.totalorder %v10877_v15, 15  ;;  %v2586_v50 = vmul.f32 %v11278_v8, %v2551_v35  ;;  %v11285_v35 = vld [vmem:[#allocation119_spill] sm:$0xff]  ;;  %v11317_v28 = vld [vmem:[#allocation141_spill] sm:$0xff] }
 0x566   : > { %11277 = vst [vmem:[#allocation111_spill] sm:$0xff] %v8136_v60  ;;  %v2490_v43 = vsel %vm11279_vm7, %v2474_v4, 0.0  ;;  %v2587_v25 = vmul.f32 %v11278_v8, %v2547_v44  ;;  %v2588_v47 = vmul.f32 %v11278_v8, %v2559_v53  ;;  %v2394_v18 = vadd.f32 %v11280_v1, %v2346_v34  ;;  %v11287_v53 = vld [vmem:[#allocation16_spill] sm:$0xff] }
 0x567   : > { %v2505_v23 = vadd.f32 %v2489_v11, %v2393_v33  ;;  %v2395_v55 = vadd.f32 %v11281_v30, %v2347_v40  ;;  %vm11282_vm0 = vcmp.lt.s32.totalorder %v11090_v7, 15  ;;  %vm11283_vm2 = vcmp.lt.s32.totalorder %v11098_v48, 15  ;;  %v8193_v30 = vpop.permute.xlu0 %2655  ;;  %v11315_v40 = vld [vmem:[#allocation140_spill] sm:$0xff] }
 0x568   : > { %v2491_v16 = vsel %vm11282_vm0, %v2475_v54, 0.0  ;;  %v2492_v51 = vsel %vm11283_vm2, %v2476_v6, 0.0  ;;  %v2506_v4 = vadd.f32 %v2490_v43, %v2394_v18  ;;  %v2396_v14 = vadd.f32 %v7664_v38, %v2348_v45  ;;  %v8181_v43 = vpop.permute.xlu1 %2653 }
 0x569   : > { %vm11286_vm4 = vcmp.lt.s32.totalorder %v11039_v46, 16  ;;  %v2601_v33 = vsel %vm5890_vm15, %v2585_v41, 0.0  ;;  %v2602_v6 = vsel %vm5908_vm8, %v2586_v50, 0.0  ;;  %v2603_v45 = vsel %vm10853_vm5, %v2587_v25, 0.0  ;;  %v11296_v25 = vld [vmem:[#allocation86_spill] sm:$0xff] }
 0x56a   : > { %v2056_v44 = vsel %vm11286_vm4, %v11285_v35, %v11284_v32  ;;  %vm11288_vm7 = vmmov %vm11286_vm4  ;;  %v2507_v11 = vadd.f32 %v2491_v16, %v2395_v55  ;;  %v2508_v8 = vadd.f32 %v2492_v51, %v2396_v14  ;;  %v2604_v41 = vsel %vm10856_vm9, %v2588_v47, 0.0  ;;  %v11297_v55 = vld [vmem:[#allocation58_spill] sm:$0xff]  ;;  %v11302_v51 = vld [vmem:[#allocation20_spill] sm:$0xff] }
 0x56b   : > { %v2060_v34 = vsel %vm11288_vm7, %v11287_v53, %v11285_v35  ;;  %vm11289_vm0 = vmmov %vm11286_vm4  ;;  %v8185_v1 = vadd.f32 %v2601_v33, %v2505_v23  ;;  %v8195_v50 = vadd.f32 %v2602_v6, %v2506_v4  ;;  %vm11298_vm4 = vcmp.lt.s32.totalorder %v11039_v46, 112  ;;  %v11303_v14 = vld [vmem:[#allocation139_spill] sm:$0xff]  ;;  %v11309_v33 = vld [vmem:[#allocation4_spill] sm:$0xff] }
 0x56c   : > { %v2052_v38 = vsel %vm11289_vm0, %v11284_v32, %v7647_v26  ;;  %vm11290_vm2 = vmmov %vm11289_vm0  ;;  %v11292_v32 = vld [vmem:[#allocation127_spill] sm:$0xff]  ;;  %v8201_v16 = vsel %vm11298_vm4, %v11297_v55, %v11296_v25  ;;  %vm11304_vm7 = vcmp.lt.s32.totalorder %v11039_v46, 17  ;;  %v8231_v6 = vadd.f32 %v2604_v41, %v2508_v8  ;;  %v8241_v13 = vpop.permute.xlu1 %2674  ;;  %v8261_v8 = vpop.permute.xlu0 %2678  ;;  %v11325_v41 = vld [vmem:[#allocation118_spill] sm:$0xff] }
 0x56d   : > { %v2064_v54 = vsel %vm11290_vm2, %v7647_v26, %v11287_v53  ;;  %11291 = vst [vmem:[#allocation56_spill] sm:$0xff] %v8185_v1  ;;  %v8188_v18 = vmul.f32 %v11292_v32, %v2060_v34  ;;  %v8191_v26 = vmul.f32 %v11292_v32, %v2056_v44  ;;  %11295 = vst [vmem:[#allocation78_spill] sm:$0xff] %v8195_v50  ;;  %v11305_v4 = vld [vmem:[#allocation27_spill] sm:$0xff]  ;;  %v11307_v53 = vld [vmem:[#allocation8_spill] sm:$0xff]  ;;  %vm11308_vm2 = vcmp.lt.s32.totalorder %v11039_v46, 1 }
 0x56e   : > { %11299 = vst [vmem:[#allocation64_spill] sm:$0xff] %v8201_v16  ;;  %v8204_v47 = vmul.f32 %v11292_v32, %v2064_v54  ;;  %v8207_v23 = vmul.f32 %v11292_v32, %v2052_v38  ;;  %v8213_v35 = vsel %vm11304_vm7, %v11303_v14, %v11302_v51  ;;  %vm11306_vm0 = vmmov %vm11304_vm7  ;;  %v2280_v34 = vsel %vm11308_vm2, %v7686_v19, %v11307_v53  ;;  %v11313_v32 = vld [vmem:[#allocation114_spill] sm:$0xff]  ;;  %v11334_v1 = vld [vmem:[#allocation107_spill] sm:$0xff] }
 0x56f   : > { %11293 = vst [vmem:[#allocation32_spill] sm:$0xff] %v8188_v18  ;;  %11294 = vst [vmem:[#allocation145_spill] sm:$0xff] %v8191_v26  ;;  %v8219_v44 = vsel %vm11306_vm0, %v11305_v4, %v11303_v14  ;;  %v8229_v54 = vadd.f32 %v2603_v45, %v2507_v11  ;;  %vm11314_vm7 = vcmp.lt.s32.totalorder %v11039_v46, 15  ;;  %v11322_v50 = vld [vmem:[#allocation6_spill] sm:$0xff]  ;;  %vm11330_vm13 = vcmp.lt.s32.totalorder %v11039_v46, 127  ;;  %v11336_v26 = vld [vmem:[#allocation88_spill] sm:$0xff] }
 0x570   : > { %11300 = vst [vmem:[#allocation48_spill] sm:$0xff] %v8204_v47  ;;  %11301 = vst [vmem:[#allocation144_spill] sm:$0xff] %v8207_v23  ;;  %v2168_v14 = vsel %vm11314_vm7, %v7722_v39, %v11313_v32  ;;  %v11331_v23 = vld [vmem:[#allocation75_spill] sm:$0xff]  ;;  %v8319_v18 = vpop.permute.xlu0 %2737  ;;  %vm11402_vm8 = vnez %v11076_v21 }
 0x571   : > { %vm11310_vm4 = vmmov %vm11308_vm2  ;;  %11311 = vst [vmem:[#allocation36_spill] sm:$0xff] %v8229_v54  ;;  %vm11318_vm2 = vcmp.lt.s32.totalorder %v11039_v46, 17 }
 0x572   : > { %v2284_v38 = vsel %vm11310_vm4, %v11309_v33, %v7686_v19  ;;  %11312 = vst [vmem:[#allocation49_spill] sm:$0xff] %v8231_v6  ;;  %vm11316_vm0 = vmmov %vm11314_vm7  ;;  %v8247_v19 = vsel %vm11318_vm2, %v11302_v51, %v11317_v28  ;;  %v8275_v6 = vmul.f32 %v11322_v50, %v2168_v14  ;;  %vm11323_vm7 = vcmp.lt.s32.totalorder %v11039_v46, 1  ;;  %v11329_v14 = vld [vmem:[#allocation11_spill] sm:$0xff] }
 0x573   : > { %v2172_v60 = vsel %vm11316_vm0, %v11315_v40, %v7722_v39  ;;  %11319 = vst [vmem:[#allocation74_spill] sm:$0xff] %v8247_v19  ;;  %vm11320_vm4 = vmmov %vm11318_vm2  ;;  %v2276_v39 = vsel %vm11323_vm7, %v11307_v53, %v7724_v57  ;;  %vm11326_vm2 = vcmp.lt.s32.totalorder %v11039_v46, 15 }
 0x574   : > { %v8253_v45 = vsel %vm11320_vm4, %v11317_v28, %v11305_v4  ;;  %v11321_v28 = vld [vmem:[#allocation124_spill] sm:$0xff]  ;;  %v8272_v11 = vmul.f32 %v11322_v50, %v2172_v60  ;;  %vm11324_vm0 = vmmov %vm11323_vm7  ;;  %11340 = vst [vmem:[#allocation3_spill] sm:$0xff] %v8319_v18  ;;  %v11448_v22 = vsel %vm11083_vm3, %v8275_v6, 0.0 }
 0x575   : > { %v2318_v4 = vmul.f32 %v11321_v28, %v2284_v38  ;;  %v2319_v54 = vmul.f32 %v11321_v28, %v2280_v34  ;;  %v2288_v51 = vsel %vm11324_vm0, %v7724_v57, %v11309_v33  ;;  %v2164_v34 = vsel %vm11326_vm2, %v11313_v32, %v11325_v41  ;;  %vm11327_vm4 = vmmov %vm11326_vm2  ;;  %v11328_v38 = vld [vmem:[#allocation95_spill] sm:$0xff]  ;;  %v8301_v33 = vpop.permute.xlu1 %2682 }
 0x576   : > { %v2176_v60 = vsel %vm11327_vm4, %v11325_v41, %v11315_v40  ;;  %v2440_v53 = vsel %vm11330_vm13, %v11329_v14, %v11328_v38  ;;  %vm11332_vm7 = vmmov %vm11330_vm13  ;;  %11333 = vst [vmem:[#allocation136_spill] sm:$0xff] %v8301_v33  ;;  %vm11335_vm0 = vcmp.lt.s32.totalorder %v11039_v46, 113  ;;  %v2317_v47 = vmul.f32 %v11321_v28, %v2288_v51 }
 0x577   : > { %v2444_v57 = vsel %vm11332_vm7, %v11331_v23, %v11329_v14  ;;  %v2552_v32 = vsel %vm11335_vm0, %v7879_v52, %v11334_v1  ;;  %vm11337_vm2 = vmmov %vm11335_vm0  ;;  %v2320_v19 = vmul.f32 %v11321_v28, %v2276_v39  ;;  %v8332_v33 = vmul.f32 %v11322_v50, %v2176_v60  ;;  %v11343_v28 = vld [vmem:[#allocation9_spill] sm:$0xff] }
 0x578   : > { %v2556_v40 = vsel %vm11337_vm2, %v11336_v26, %v7879_v52  ;;  %vm11338_vm13 = vmmov %vm11332_vm7  ;;  %vm11346_vm2 = vcmp.ge.s32.totalorder %v10877_v15, 1 }
 0x579   : > { %v2436_v41 = vsel %vm11338_vm13, %v11328_v38, %v7893_v49  ;;  %vm11339_vm4 = vmmov %vm11332_vm7  ;;  %v2560_v38 = vsel %vm11335_vm0, %v7969_v0, %v11336_v26  ;;  %v8340_v18 = vmul.f32 %v11343_v28, %v2556_v40  ;;  %v8347_v26 = vpop.permute.xlu1 %2686  ;;  %vm11347_vm13 = vcmp.ge.s32.totalorder %v11090_v7, 1 }
 0x57a   : > { %v2448_v14 = vsel %vm11339_vm4, %v7893_v49, %v11331_v23  ;;  %vm11341_vm7 = vmmov %vm11335_vm0  ;;  %v8335_v49 = vmul.f32 %v11322_v50, %v2164_v34  ;;  %v11342_v23 = vld [vmem:[#allocation112_spill] sm:$0xff]  ;;  %v8351_v50 = vsel %vm11346_vm2, %v2318_v4, 0.0  ;;  %v8355_v34 = vsel %vm11347_vm13, %v2319_v54, 0.0 }
 0x57b   : > { %v2548_v52 = vsel %vm11341_vm7, %v11334_v1, %v7969_v0  ;;  %v2477_v51 = vmul.f32 %v11342_v23, %v2444_v57  ;;  %v2478_v39 = vmul.f32 %v11342_v23, %v2440_v53  ;;  %11344 = vst [vmem:[#allocation24_spill] sm:$0xff] %v8340_v18  ;;  %v8343_v1 = vmul.f32 %v11343_v28, %v2552_v32  ;;  %v8363_v57 = vpop.permute.xlu0 %2790  ;;  %v11370_v32 = vld [vmem:[#allocation47_spill] sm:$0xff]  ;;  %v11381_v18 = vld [vmem:[#allocation17_spill] sm:$0xff] }
 0x57c   : > { %v2479_v16 = vmul.f32 %v11342_v23, %v2436_v41  ;;  %v2480_v0 = vmul.f32 %v11342_v23, %v2448_v14  ;;  %v8358_v60 = vmul.f32 %v11343_v28, %v2548_v52  ;;  %v8361_v53 = vmul.f32 %v11343_v28, %v2560_v38  ;;  %11350 = vst [vmem:[#allocation126_spill] sm:$0xff] %v8363_v57  ;;  %v11365_v14 = vld [vmem:[#allocation22_spill] sm:$0xff] }
 0x57d   : > { %11345 = vst [vmem:[#allocation37_spill] sm:$0xff] %v8343_v1  ;;  %vm11351_vm4 = vcmp.ge.s32.totalorder %v10875_v42, 1  ;;  %vm11352_vm7 = vcmp.ge.s32.totalorder %v11098_v48, 1  ;;  %vm11354_vm0 = vcmp.lt.s32.totalorder %v10875_v42, 15  ;;  %vm11356_vm2 = vcmp.lt.s32.totalorder %v10877_v15, 15  ;;  %v11372_v42 = vld [vmem:[#allocation146_spill] sm:$0xff] }
 0x57e   : > { %11348 = vst [vmem:[#allocation10_spill] sm:$0xff] %v8358_v60  ;;  %11349 = vst [vmem:[#allocation41_spill] sm:$0xff] %v8361_v53  ;;  %v8373_v54 = vsel %vm11351_vm4, %v2317_v47, 0.0  ;;  %v8377_v40 = vsel %vm11352_vm7, %v2320_v19, 0.0  ;;  %v8387_v52 = vsel %vm11354_vm0, %v2477_v51, 0.0  ;;  %v8391_v47 = vsel %vm11356_vm2, %v2478_v39, 0.0 }
 0x57f   : > { %11353 = vst [vmem:[#allocation34_spill] sm:$0xff] %v8377_v40  ;;  %11355 = vst [vmem:[#allocation33_spill] sm:$0xff] %v8387_v52  ;;  %vm11358_vm13 = vcmp.lt.s32.totalorder %v11090_v7, 15  ;;  %vm11360_vm4 = vcmp.lt.s32.totalorder %v11098_v48, 15  ;;  %vm11362_vm7 = vcmp.lt.s32.totalorder %v11039_v46, 112  ;;  %v1973_v4 = vpop.permute.xlu0 %1972  ;;  %v11371_v48 = vld [vmem:[#allocation52_spill] sm:$0xff] }
 0x580   : > { %11357 = vst [vmem:[#allocation26_spill] sm:$0xff] %v8391_v47  ;;  %v8401_v23 = vsel %vm11358_vm13, %v2479_v16, 0.0  ;;  %v8405_v51 = vsel %vm11360_vm4, %v2480_v0, 0.0  ;;  %v2662_v38 = vsel %vm11362_vm7, %v11273_v12, %v7988_v24  ;;  %v11363_v16 = vld [vmem:[#allocation23_spill] sm:$0xff]  ;;  %vm11364_vm0 = vmmov %vm11362_vm7  ;;  %v8421_v0 = vpop.permute.xlu1 %2786  ;;  %v1989_v41 = vmul.f32 %v1973_v4, %v11370_v32  ;;  %v11373_v53 = vld [vmem:[#allocation149_spill] sm:$0xff] }
 0x581   : > { %11359 = vst [vmem:[#allocation57_spill] sm:$0xff] %v8401_v23  ;;  %11361 = vst [vmem:[#allocation69_spill] sm:$0xff] %v8405_v51  ;;  %v2661_v19 = vsel %vm11364_vm0, %v11363_v16, %v8035_v9  ;;  %v1990_v7 = vmul.f32 %v1973_v4, %v11371_v48  ;;  %v1991_v15 = vmul.f32 %v1973_v4, %v11372_v42  ;;  %v11374_v60 = vld [vmem:[#allocation143_spill] sm:$0xff]  ;;  %v11397_v52 = vld [vmem:[#allocation84_spill] sm:$0xff]  ;;  %v11454_v6 = vsel %vm11087_vm12, %v8335_v49, 0.0 }
 0x582   : > { %vm11366_vm2 = vmmov %vm11364_vm0  ;;  %v2690_v32 = vmul.f32 %v8241_v13, %v2661_v19  ;;  %v11377_v42 = vld [vmem:[#allocation15_spill] sm:$0xff] }
 0x583   : > { %v8427_v39 = vsel %vm11366_vm2, %v11365_v14, %v8044_v31  ;;  %vm11367_vm13 = vmmov %vm11364_vm0 }
 0x584   : > { %v2663_v28 = vsel %vm11367_vm13, %v11296_v25, %v8080_v56  ;;  %vm11368_vm4 = vmmov %vm11364_vm0  ;;  %v1992_v25 = vmul.f32 %v1973_v4, %v11373_v53  ;;  %vm11378_vm13 = vnez %v11377_v42  ;;  %v11379_v4 = vld [vmem:[#allocation30_spill] sm:$0xff] }
 0x585   : > { %v8437_v12 = vsel %vm11368_vm4, %v8044_v31, %v8088_v27  ;;  %vm11369_vm7 = vmmov %vm11364_vm0  ;;  %v2669_v31 = vsel %vm11364_vm0, %v8132_v36, %v11374_v60  ;;  %v2005_v53 = vsel %vm11378_vm13, %v1989_v41, 0.0  ;;  %vm11380_vm4 = vnez %v11379_v4  ;;  %v8465_v60 = vpop.permute.xlu1 %2794  ;;  %v11428_v42 = vld [vmem:[#allocation106_spill] sm:$0xff]  ;;  %v11443_v4 = vld [vmem:[#allocation49_spill] sm:$0xff] }
 0x586   : > { %v2657_v16 = vsel %vm11369_vm7, %v8035_v9, %v8132_v36  ;;  %vm11375_vm2 = vmmov %vm11364_vm0  ;;  %v11376_v9 = vld [vmem:[#allocation132_spill] sm:$0xff]  ;;  %v2006_v23 = vsel %vm11380_vm4, %v1990_v7, 0.0  ;;  %vm11382_vm7 = vnez %v11381_v18  ;;  %11383 = vst [vmem:[#allocation137_spill] sm:$0xff] %v8465_v60  ;;  %v2692_v41 = vmul.f32 %v8241_v13, %v2669_v31  ;;  %v11385_v7 = vld [vmem:[#allocation35_spill] sm:$0xff] }
 0x587   : > { %v2658_v51 = vsel %vm11375_vm2, %v7988_v24, %v8144_v3  ;;  %v2689_v1 = vmul.f32 %v8241_v13, %v11376_v9  ;;  %v2691_v48 = vmul.f32 %v8241_v13, %v2657_v16  ;;  %v2007_v36 = vsel %vm11382_vm7, %v1991_v15, 0.0  ;;  %vm11384_vm2 = vmmov %vm11364_vm0  ;;  %v1983_v15 = vpop.permute.xlu0 %1982  ;;  %v11391_v31 = vld [vmem:[#allocation13_spill] sm:$0xff] }
 0x588   : > { %v2670_v24 = vsel %vm11364_vm0, %v8144_v3, %v11274_v20  ;;  %v2659_v19 = vsel %vm11384_vm2, %v8080_v56, %v8181_v43  ;;  %v11386_v16 = vsel %vm10707_vm1, %v11385_v7, 0.0  ;;  %vm11387_vm9 = vmmov %vm11364_vm0  ;;  %v2660_v20 = vsel %vm11364_vm0, %v8088_v27, %v8193_v30  ;;  %v11389_v56 = vld [vmem:[#allocation133_spill] sm:$0xff] }
 0x589   : > { %v2117_v9 = vadd.f32 %v11386_v16, %v2005_v53  ;;  %v2671_v47 = vsel %vm11387_vm9, %v8181_v43, %v11297_v55  ;;  %vm11388_vm2 = vmmov %vm11364_vm0  ;;  %vm11390_vm5 = vnez %v11389_v56  ;;  %v11392_v53 = vsel %vm11065_vm10, %v11391_v31, 0.0  ;;  %v11393_v43 = vld [vmem:[#allocation60_spill] sm:$0xff]  ;;  %v11395_v27 = vld [vmem:[#allocation81_spill] sm:$0xff]  ;;  %v8518_v31 = vpop.permute.xlu1 %2798 }
 0x58a   : > { %v8492_v13 = vsel %vm11388_vm2, %v8193_v30, %v11365_v14  ;;  %v2008_v3 = vsel %vm11390_vm5, %v1992_v25, 0.0  ;;  %v2118_v7 = vadd.f32 %v11392_v53, %v2006_v23  ;;  %v11394_v55 = vsel %vm11068_vm14, %v11393_v43, 0.0  ;;  %11399 = vst [vmem:[#allocation28_spill] sm:$0xff] %v8518_v31  ;;  %v11400_v53 = vld [vmem:[#allocation68_spill] sm:$0xff]  ;;  %v11431_v18 = vld [vmem:[#allocation109_spill] sm:$0xff] }
 0x58b   : > { %v2119_v16 = vadd.f32 %v11394_v55, %v2007_v36  ;;  %vm11396_vm9 = vnez %v11395_v27  ;;  %vm11398_vm0 = vnez %v11397_v52  ;;  %v8510_v14 = vmul.f32 %v8261_v8, %v8128_v61  ;;  %v11405_v61 = vld [vmem:[#allocation123_spill] sm:$0xff]  ;;  %v8531_v29 = vpop.permute.xlu0 %2851 }
 0x58c   : > { %v2705_v60 = vsel %vm11396_vm9, %v2689_v1, 0.0  ;;  %v2706_v30 = vsel %vm11398_vm0, %v2690_v32, 0.0  ;;  %v8513_v25 = vmul.f32 %v8261_v8, %v2662_v38  ;;  %v8516_v23 = vmul.f32 %v8261_v8, %v2658_v51  ;;  %v11403_v1 = vld [vmem:[#allocation45_spill] sm:$0xff]  ;;  %11407 = vst [vmem:[#allocation117_spill] sm:$0xff] %v8531_v29  ;;  %v11408_v51 = vld [vmem:[#allocation62_spill] sm:$0xff] }
 0x58d   : > { %vm11401_vm2 = vnez %v11400_v53  ;;  %v11404_v43 = vsel %vm11402_vm8, %v11403_v1, 0.0  ;;  %v11406_v55 = vsel %vm11066_vm11, %v11405_v61, 0.0  ;;  %v1997_v38 = vmul.f32 %v1983_v15, %v8253_v45 }
 0x58e   : > { %v2707_v36 = vsel %vm11401_vm2, %v2691_v48, 0.0  ;;  %v2120_v32 = vadd.f32 %v11404_v43, %v2008_v3  ;;  %v2229_v57 = vadd.f32 %v11406_v55, %v2117_v9  ;;  %vm11409_vm15 = vnez %v11408_v51  ;;  %v11412_v3 = vld [vmem:[#allocation54_spill] sm:$0xff]  ;;  %v11414_v9 = vld [vmem:[#allocation63_spill] sm:$0xff] }
 0x58f   : > { %v2708_v31 = vsel %vm11409_vm15, %v2692_v41, 0.0  ;;  %v8536_v40 = vmul.f32 %v8261_v8, %v2670_v24  ;;  %v1998_v48 = vmul.f32 %v1983_v15, %v8219_v44  ;;  %v8540_v1 = vadd.f32 %v2705_v60, %v11410_v59  ;;  %v11416_v55 = vld [vmem:[#allocation18_spill] sm:$0xff]  ;;  %v11418_v24 = vld [vmem:[#allocation147_spill] sm:$0xff]  ;;  %v11420_v59 = vld [vmem:[#allocation64_spill] sm:$0xff] }
 0x590   : > { %v8543_v43 = vadd.f32 %v2706_v30, %v11412_v3  ;;  %v11415_v45 = vsel %vm11082_vm6, %v11414_v9, 0.0  ;;  %v11417_v41 = vsel %vm11083_vm3, %v11416_v55, 0.0  ;;  %v1999_v8 = vmul.f32 %v1983_v15, %v8213_v35  ;;  %v11421_v60 = vld [vmem:[#allocation136_spill] sm:$0xff]  ;;  %v11425_v55 = vld [vmem:[#allocation113_spill] sm:$0xff] }
 0x591   : > { %11411 = vst [vmem:[#allocation19_spill] sm:$0xff] %v8540_v1  ;;  %v2230_v61 = vadd.f32 %v11415_v45, %v2118_v7  ;;  %v2231_v29 = vadd.f32 %v11417_v41, %v2119_v16  ;;  %v8555_v44 = vadd.f32 %v2707_v36, %v11418_v24  ;;  %v2697_v1 = vmul.f32 %v11421_v60, %v11420_v59  ;;  %v11423_v7 = vld [vmem:[#allocation42_spill] sm:$0xff]  ;;  %v2746_v59 = vpop.permute.xlu0 %2745 }
 0x592   : > { %11413 = vst [vmem:[#allocation53_spill] sm:$0xff] %v8543_v43  ;;  %v2698_v30 = vmul.f32 %v11421_v60, %v2663_v28  ;;  %v2700_v3 = vmul.f32 %v11421_v60, %v2671_v47  ;;  %v11422_v43 = vld [vmem:[#allocation148_spill] sm:$0xff]  ;;  %v11424_v45 = vsel %vm11087_vm12, %v11423_v7, 0.0  ;;  %v2341_v35 = vadd.f32 %v11425_v55, %v2229_v57  ;;  %v11426_v41 = vld [vmem:[#allocation74_spill] sm:$0xff] }
 0x593   : > { %11419 = vst [vmem:[#allocation115_spill] sm:$0xff] %v8555_v44  ;;  %v8562_v9 = vadd.f32 %v2708_v31, %v11422_v43  ;;  %v2232_v16 = vadd.f32 %v11424_v45, %v2120_v32  ;;  %v2000_v36 = vmul.f32 %v1983_v15, %v11426_v41  ;;  %v2013_v24 = vsel %vm11378_vm13, %v1997_v38, 0.0  ;;  %v8572_v44 = vpop.permute.xlu1 %2856  ;;  %v11427_v15 = vld [vmem:[#allocation83_spill] sm:$0xff]  ;;  %v11432_v55 = vld [vmem:[#allocation32_spill] sm:$0xff] }
 0x594   : > { %v2699_v47 = vmul.f32 %v11421_v60, %v2659_v19  ;;  %v2014_v28 = vsel %vm11380_vm4, %v1998_v48, 0.0  ;;  %v2709_v31 = vsel %vm11396_vm9, %v8510_v14, 0.0  ;;  %v2342_v32 = vadd.f32 %v11427_v15, %v2230_v61  ;;  %v11429_v19 = vld [vmem:[#allocation48_spill] sm:$0xff] }
 0x595   : > { %v2343_v38 = vadd.f32 %v11428_v42, %v2231_v29  ;;  %v2015_v43 = vsel %vm11382_vm7, %v1999_v8, 0.0  ;;  %v11430_v48 = vsel %vm10707_vm1, %v11429_v19, 0.0  ;;  %v2713_v61 = vsel %vm11396_vm9, %v2697_v1, 0.0  ;;  %v2754_v15 = vpop.permute.xlu0 %2753  ;;  %v11434_v19 = vld [vmem:[#allocation73_spill] sm:$0xff]  ;;  %v11446_v57 = vld [vmem:[#allocation120_spill] sm:$0xff] }
 0x596   : > { %v2125_v60 = vadd.f32 %v11430_v48, %v2013_v24  ;;  %v2716_v29 = vsel %vm11409_vm15, %v2700_v3, 0.0  ;;  %v2344_v8 = vadd.f32 %v11431_v18, %v2232_v16  ;;  %v2016_v45 = vsel %vm11390_vm5, %v2000_v36, 0.0  ;;  %v11435_v3 = vld [vmem:[#allocation145_spill] sm:$0xff] }
 0x597   : > { %v11433_v41 = vsel %vm11065_vm10, %v11432_v55, 0.0  ;;  %v2740_v42 = vpop.permute.xlu1 %2739  ;;  %v2389_v48 = vadd.f32 %v11434_v19, %v2341_v35  ;;  %v8611_v1 = vmul.f32 %v8347_v26, %v8427_v39  ;;  %v11436_v16 = vsel %vm11068_vm14, %v11435_v3, 0.0  ;;  %v11437_v35 = vld [vmem:[#allocation70_spill] sm:$0xff]  ;;  %v11439_v19 = vld [vmem:[#allocation56_spill] sm:$0xff] }
 0x598   : > { %v2126_v24 = vadd.f32 %v11433_v41, %v2014_v28  ;;  %v2127_v18 = vadd.f32 %v11436_v16, %v2015_v43  ;;  %v2714_v56 = vsel %vm11398_vm0, %v2698_v30, 0.0  ;;  %v2715_v36 = vsel %vm11401_vm2, %v2699_v47, 0.0  ;;  %v11438_v41 = vld [vmem:[#allocation100_spill] sm:$0xff] }
 0x599   : > { %v8623_v28 = vmul.f32 %v8347_v26, %v8437_v12  ;;  %v2390_v55 = vadd.f32 %v11437_v35, %v2342_v32  ;;  %v2391_v39 = vadd.f32 %v11438_v41, %v2343_v38  ;;  %v8628_v7 = vadd.f32 %v2713_v61, %v11439_v19  ;;  %v11440_v30 = vld [vmem:[#allocation144_spill] sm:$0xff] }
 0x59a   : > { %v8631_v3 = vmul.f32 %v8347_v26, %v2660_v20  ;;  %v11441_v43 = vsel %vm11402_vm8, %v11440_v30, 0.0  ;;  %v11442_v12 = vsel %vm11066_vm11, %v8332_v33, 0.0  ;;  %v8642_v32 = vadd.f32 %v2716_v29, %v11443_v4  ;;  %v2762_v20 = vpop.permute.xlu0 %2761  ;;  %v11445_v41 = vld [vmem:[#allocation128_spill] sm:$0xff] }
 0x59b   : > { %v2128_v16 = vadd.f32 %v11441_v43, %v2016_v45  ;;  %v2237_v47 = vadd.f32 %v11442_v12, %v2125_v60  ;;  %v11444_v38 = vsel %vm11082_vm6, %v8272_v11, 0.0  ;;  %v2748_v35 = vpop.permute.xlu1 %2747  ;;  %v2501_v19 = vadd.f32 %v11445_v41, %v2389_v48  ;;  %v11447_v45 = vld [vmem:[#allocation78_spill] sm:$0xff]  ;;  %v11449_v11 = vld [vmem:[#allocation36_spill] sm:$0xff] }
 0x59c   : > { %v2238_v61 = vadd.f32 %v11444_v38, %v2126_v24  ;;  %v2392_v30 = vadd.f32 %v11446_v57, %v2344_v8  ;;  %v8651_v43 = vadd.f32 %v2714_v56, %v11447_v45  ;;  %v8655_v17 = vmul.f32 %v8347_v26, %v8492_v13  ;;  %v11450_v57 = vld [vmem:[#allocation3_spill] sm:$0xff]  ;;  %v11452_v8 = vld [vmem:[#allocation130_spill] sm:$0xff]  ;;  %v11453_v26 = vld [vmem:[#allocation129_spill] sm:$0xff] }
 0x59d   : > { %v2239_v33 = vadd.f32 %v11448_v22, %v2127_v18  ;;  %v8662_v4 = vadd.f32 %v2715_v36, %v11449_v11  ;;  %v2717_v60 = vsel %vm11396_vm9, %v8611_v1, 0.0  ;;  %vm11451_vm5 = vcmp.lt.s32.totalorder %v11039_v46, 111  ;;  %v11466_v22 = vld [vmem:[#allocation77_spill] sm:$0xff] }
 0x59e   : > { %v2777_v29 = vsel %vm11451_vm5, %v11450_v57, %v2746_v59  ;;  %v2502_v24 = vadd.f32 %v11452_v8, %v2390_v55  ;;  %v2503_v13 = vadd.f32 %v11453_v26, %v2391_v39  ;;  %v2240_v48 = vadd.f32 %v11454_v6, %v2128_v16  ;;  %vm11455_vm6 = vmmov %vm11451_vm5  ;;  %v8692_v16 = vpop.permute.xlu0 %2861  ;;  %v11471_v6 = vld [vmem:[#allocation121_spill] sm:$0xff] }
 0x59f   : > { %v2349_v18 = vadd.f32 %v8373_v54, %v2237_v47  ;;  %v2773_v56 = vsel %vm11455_vm6, %v2746_v59, %v2754_v15  ;;  %v2350_v55 = vadd.f32 %v8351_v50, %v2238_v61  ;;  %vm11456_vm11 = vmmov %vm11451_vm5  ;;  %vm11457_vm3 = vnez %v11124_v37  ;;  %v2756_v54 = vpop.permute.xlu1 %2755  ;;  %v11460_v47 = vld [vmem:[#allocation131_spill] sm:$0xff] }
 0x5a0   : > { %v2769_v39 = vsel %vm11456_vm11, %v2754_v15, %v2762_v20  ;;  %v11459_v12 = vsel %vm11457_vm3, %v11458_v10, 0.0  ;;  %v2504_v38 = vadd.f32 %v11460_v47, %v2392_v30  ;;  %v2351_v59 = vadd.f32 %v8355_v34, %v2239_v33  ;;  %vm11461_vm12 = vmmov %vm11451_vm5  ;;  %v11464_v30 = vld [vmem:[#allocation102_spill] sm:$0xff] }
 0x5a1   : > { %v2613_v49 = vadd.f32 %v11459_v12, %v2501_v19  ;;  %v2801_v41 = vmul.f32 %v8421_v0, %v2777_v29  ;;  %v2781_v50 = vsel %vm11461_vm12, %v2762_v20, %v11450_v57  ;;  %v2802_v61 = vmul.f32 %v8421_v0, %v2773_v56  ;;  %vm11462_vm13 = vmmov %vm11451_vm5  ;;  %v11468_v33 = vld [vmem:[#allocation142_spill] sm:$0xff] }
 0x5a2   : > { %v2778_v19 = vsel %vm11462_vm13, %v2740_v42, %v2748_v35  ;;  %vm11463_vm4 = vnez %v11125_v63  ;;  %vm11467_vm7 = vnez %v11466_v22  ;;  %v11470_v20 = vld [vmem:[#allocation34_spill] sm:$0xff]  ;;  %v2803_v8 = vmul.f32 %v8421_v0, %v2769_v39  ;;  %v2750_v12 = vpop.permute.xlu0 %2749  ;;  %v11476_v39 = vld [vmem:[#allocation91_spill] sm:$0xff]  ;;  %vm11480_vm12 = vmmov %vm11451_vm5 }
 0x5a3   : > { %v11465_v45 = vsel %vm11463_vm4, %v11464_v30, 0.0  ;;  %v11469_v11 = vsel %vm11467_vm7, %v11468_v33, 0.0  ;;  %v2352_v57 = vadd.f32 %v11470_v20, %v2240_v48  ;;  %v2774_v26 = vsel %vm11451_vm5, %v2748_v35, %v2756_v54  ;;  %v2764_v47 = vpop.permute.xlu1 %2763  ;;  %v11472_v30 = vld [vmem:[#allocation79_spill] sm:$0xff]  ;;  %vm11481_vm13 = vmmov %vm11451_vm5  ;;  %v11515_v22 = vld [vmem:[#allocation41_spill] sm:$0xff] }
 0x5a4   : > { %v2614_v34 = vadd.f32 %v11465_v45, %v2502_v24  ;;  %v2615_v29 = vadd.f32 %v11469_v11, %v2503_v13  ;;  %v2397_v56 = vadd.f32 %v11471_v6, %v2349_v18  ;;  %v2804_v10 = vmul.f32 %v8421_v0, %v2781_v50  ;;  %v11474_v13 = vld [vmem:[#allocation111_spill] sm:$0xff]  ;;  %v11477_v11 = vld [vmem:[#allocation40_spill] sm:$0xff]  ;;  %v11479_v18 = vld [vmem:[#allocation126_spill] sm:$0xff] }
 0x5a5   : > { %v2725_v24 = vadd.f32 %v2709_v31, %v2613_v49  ;;  %vm11473_vm6 = vnez %v11472_v30  ;;  %v2398_v33 = vadd.f32 %v11476_v39, %v2350_v55  ;;  %vm11478_vm11 = vnez %v11477_v11  ;;  %v11482_v31 = vld [vmem:[#allocation61_spill] sm:$0xff]  ;;  %v11490_v39 = vld [vmem:[#allocation19_spill] sm:$0xff] }
 0x5a6   : > { %v11475_v48 = vsel %vm11473_vm6, %v11474_v13, 0.0  ;;  %v2817_v35 = vsel %vm11478_vm11, %v2801_v41, 0.0  ;;  %v2805_v20 = vmul.f32 %v11479_v18, %v2778_v19  ;;  %v2770_v0 = vsel %vm11480_vm12, %v2756_v54, %v2764_v47  ;;  %v11486_v6 = vld [vmem:[#allocation5_spill] sm:$0xff] }
 0x5a7   : > { %v2616_v45 = vadd.f32 %v11475_v48, %v2504_v38  ;;  %v2782_v14 = vsel %vm11481_vm13, %v2764_v47, %v2740_v42  ;;  %vm11483_vm5 = vnez %v11482_v31  ;;  %v11484_v38 = vsel %vm11398_vm0, %v8513_v25, 0.0  ;;  %v11488_v47 = vld [vmem:[#allocation33_spill] sm:$0xff]  ;;  %v11491_v25 = vld [vmem:[#allocation46_spill] sm:$0xff] }
 0x5a8   : > { %v2818_v49 = vsel %vm11483_vm5, %v2802_v61, 0.0  ;;  %v2726_v50 = vadd.f32 %v11484_v38, %v2614_v34  ;;  %v2806_v55 = vmul.f32 %v11479_v18, %v2774_v26  ;;  %v11485_v41 = vsel %vm11401_vm2, %v8516_v23, 0.0  ;;  %v11489_v61 = vld [vmem:[#allocation7_spill] sm:$0xff]  ;;  %v2766_v38 = vpop.permute.xlu0 %2765 }
 0x5a9   : > { %v2727_v19 = vadd.f32 %v11485_v41, %v2615_v29  ;;  %vm11487_vm12 = vnez %v11486_v6  ;;  %v2807_v42 = vmul.f32 %v11479_v18, %v2770_v0  ;;  %v2509_v13 = vadd.f32 %v11488_v47, %v2397_v56  ;;  %v11494_v41 = vld [vmem:[#allocation53_spill] sm:$0xff] }
 0x5aa   : > { %v2819_v54 = vsel %vm11487_vm12, %v2803_v8, 0.0  ;;  %v2399_v48 = vadd.f32 %v11489_v61, %v2351_v59  ;;  %v2833_v15 = vadd.f32 %v2817_v35, %v11490_v39  ;;  %vm11492_vm13 = vnez %v11491_v25  ;;  %v2742_v8 = vpop.permute.xlu1 %2741  ;;  %v11497_v35 = vld [vmem:[#allocation115_spill] sm:$0xff]  ;;  %v11500_v39 = vld [vmem:[#allocation24_spill] sm:$0xff] }
 0x5ab   : > { %v2820_v34 = vsel %vm11492_vm13, %v2804_v10, 0.0  ;;  %v11493_v26 = vsel %vm11409_vm15, %v8536_v40, 0.0  ;;  %v2808_v29 = vmul.f32 %v11479_v18, %v2782_v14  ;;  %v2834_v0 = vadd.f32 %v2818_v49, %v11494_v41  ;;  %v11499_v14 = vld [vmem:[#allocation26_spill] sm:$0xff] }
 0x5ac   : > { %v2728_v23 = vadd.f32 %v11493_v26, %v2616_v45  ;;  %v2821_v56 = vsel %vm11478_vm11, %v2805_v20, 0.0  ;;  %vm11495_vm8 = vcmp.lt.s32.totalorder %v11039_v46, 111  ;;  %v2835_v47 = vadd.f32 %v2819_v54, %v11497_v35  ;;  %v11498_v45 = vld [vmem:[#allocation137_spill] sm:$0xff] }
 0x5ad   : > { %v2779_v59 = vsel %vm11495_vm8, %v2742_v8, %v2750_v12  ;;  %vm11496_vm1 = vmmov %vm11495_vm8  ;;  %v2822_v40 = vsel %vm11483_vm5, %v2806_v55, 0.0  ;;  %v2510_v61 = vadd.f32 %v11499_v14, %v2398_v33  ;;  %v2836_v49 = vadd.f32 %v2820_v34, %v8562_v9  ;;  %v11503_v54 = vld [vmem:[#allocation117_spill] sm:$0xff] }
 0x5ae   : > { %v2783_v10 = vsel %vm11496_vm1, %v2766_v38, %v2742_v8  ;;  %v2809_v18 = vmul.f32 %v11498_v45, %v2779_v59  ;;  %v2823_v20 = vsel %vm11487_vm12, %v2807_v42, 0.0  ;;  %v11501_v26 = vsel %vm11457_vm3, %v11500_v39, 0.0  ;;  %v11502_v8 = vld [vmem:[#allocation87_spill] sm:$0xff]  ;;  %v2758_v59 = vpop.permute.xlu1 %2757  ;;  %vm11504_vm8 = vmmov %vm11496_vm1 }
 0x5af   : > { %v2621_v41 = vadd.f32 %v11501_v26, %v2509_v13  ;;  %v2400_v36 = vadd.f32 %v11502_v8, %v2352_v57  ;;  %v2869_v35 = vadd.f32 %v11503_v54, %v2833_v15  ;;  %v2837_v5 = vadd.f32 %v2821_v56, %v2725_v24  ;;  %v2744_v15 = vpop.permute.xlu0 %2743  ;;  %v11508_v26 = vld [vmem:[#allocation69_spill] sm:$0xff]  ;;  %vm11509_vm3 = vmmov %vm11496_vm1 }
 0x5b0   : > { %v2824_v55 = vsel %vm11492_vm13, %v2808_v29, 0.0  ;;  %v2812_v33 = vmul.f32 %v11498_v45, %v2783_v10  ;;  %v2870_v9 = vadd.f32 %v11503_v54, %v2834_v0  ;;  %v2838_v34 = vadd.f32 %v2822_v40, %v2726_v50  ;;  %v11505_v0 = vld [vmem:[#allocation57_spill] sm:$0xff] }
 0x5b1   : > { %v2825_v37 = vsel %vm11478_vm11, %v2809_v18, 0.0  ;;  %v2771_v42 = vsel %vm11504_vm8, %v2758_v59, %v2766_v38  ;;  %v2871_v57 = vadd.f32 %v11503_v54, %v2835_v47  ;;  %v2839_v13 = vadd.f32 %v2823_v20, %v2727_v19  ;;  %vm11518_vm8 = vmmov %vm11496_vm1 }
 0x5b2   : > { %v2775_v24 = vsel %vm11496_vm1, %v2750_v12, %v2758_v59  ;;  %v2811_v29 = vmul.f32 %v11498_v45, %v2771_v42  ;;  %v2872_v56 = vadd.f32 %v11503_v54, %v2836_v49  ;;  %v2840_v10 = vadd.f32 %v2824_v55, %v2728_v23  ;;  %v2867_v47 = vpop.permute.xlu1 %2866  ;;  %v11513_v59 = vld [vmem:[#allocation28_spill] sm:$0xff] }
 0x5b3   : > { %v2810_v50 = vmul.f32 %v11498_v45, %v2775_v24  ;;  %v2511_v40 = vadd.f32 %v11505_v0, %v2399_v48  ;;  %3957 = vtanh.f32 %v2869_v35  ;;  %v2873_v18 = vadd.f32 %v8572_v44, %v2837_v5  ;;  %v11506_v45 = vld [vmem:[#allocation37_spill] sm:$0xff]  ;;  %v2760_v55 = vpop.permute.xlu0 %2759 }
 0x5b4   : > { %v2828_v38 = vsel %vm11492_vm13, %v2812_v33, 0.0  ;;  %v2841_v19 = vadd.f32 %v2825_v37, %v8628_v7  ;;  %3959 = vtanh.f32 %v2870_v9  ;;  %v2874_v12 = vadd.f32 %v8572_v44, %v2838_v34 }
 0x5b5   : > { %v2826_v14 = vsel %vm11483_vm5, %v2810_v50, 0.0  ;;  %v2827_v23 = vsel %vm11487_vm12, %v2811_v29, 0.0  ;;  %3961 = vtanh.f32 %v2871_v57  ;;  %v2875_v48 = vadd.f32 %v8572_v44, %v2839_v13 }
 0x5b6   : > { %v2842_v5 = vadd.f32 %v2826_v14, %v8651_v43  ;;  %v11507_v49 = vsel %vm11463_vm4, %v11506_v45, 0.0  ;;  %3963 = vtanh.f32 %v2872_v56  ;;  %v2876_v20 = vadd.f32 %v8572_v44, %v2840_v10  ;;  %v2752_v33 = vpop.permute.xlu1 %2751  ;;  %vm11510_vm4 = vmmov %vm11496_vm1  ;;  %v11511_v43 = vld [vmem:[#allocation10_spill] sm:$0xff] }
 0x5b7   : > { %v2622_v7 = vadd.f32 %v11507_v49, %v2510_v61  ;;  %v2844_v39 = vadd.f32 %v2828_v38, %v8642_v32  ;;  %v2512_v8 = vadd.f32 %v11508_v26, %v2400_v36  ;;  %3965 = vtanh.f32 %v2873_v18 }
 0x5b8   : > { %v2877_v54 = vadd.f32 %v8692_v16, %v2841_v19  ;;  %v2843_v35 = vadd.f32 %v2827_v23, %v8662_v4  ;;  %v2733_v63 = vadd.f32 %v2717_v60, %v2621_v41  ;;  %3967 = vtanh.f32 %v2874_v12 }
 0x5b9   : > { %v2776_v44 = vsel %vm11509_vm3, %v2752_v33, %v2760_v55  ;;  %v2780_v32 = vsel %vm11510_vm4, %v2744_v15, %v2752_v33  ;;  %v11512_v36 = vsel %vm11467_vm7, %v11511_v43, 0.0  ;;  %3969 = vtanh.f32 %v2875_v48  ;;  %vm11517_vm7 = vmmov %vm11496_vm1 }
 0x5ba   : > { %v2623_v61 = vadd.f32 %v11512_v36, %v2511_v40  ;;  %v2878_v4 = vadd.f32 %v8692_v16, %v2842_v5  ;;  %v2813_v9 = vmul.f32 %v11513_v59, %v2780_v32  ;;  %v2814_v1 = vmul.f32 %v11513_v59, %v2776_v44  ;;  %v2768_v29 = vpop.permute.xlu1 %2767 }
 0x5bb   : > { %3971 = vtanh.f32 %v2876_v20  ;;  %v2880_v60 = vadd.f32 %v8692_v16, %v2844_v39  ;;  %v11514_v41 = vsel %vm11398_vm0, %v8623_v28, 0.0  ;;  %v11516_v37 = vsel %vm11473_vm6, %v11515_v22, 0.0 }
 0x5bc   : > { %v2734_v34 = vadd.f32 %v11514_v41, %v2622_v7  ;;  %v2624_v42 = vadd.f32 %v11516_v37, %v2512_v8  ;;  %3973 = vtanh.f32 %v2877_v54  ;;  %v2879_v57 = vadd.f32 %v8692_v16, %v2843_v35 }
 0x5bd   : > { %v2829_v13 = vsel %vm11478_vm11, %v2813_v9, 0.0  ;;  %v2830_v24 = vsel %vm11483_vm5, %v2814_v1, 0.0  ;;  %v2772_v28 = vsel %vm11517_vm7, %v2760_v55, %v2768_v29  ;;  %v2784_v30 = vsel %vm11518_vm8, %v2768_v29, %v2744_v15  ;;  %v8849_v50 = vpop.eup %3957 }
 0x5be   : > { %v2845_v56 = vadd.f32 %v2829_v13, %v2733_v63  ;;  %v2846_v10 = vadd.f32 %v2830_v24, %v2734_v34  ;;  %3975 = vtanh.f32 %v2878_v4  ;;  %v11519_v16 = vsel %vm11401_vm2, %v8631_v3, 0.0  ;;  %v8857_v40 = vpop.eup %3959 }
 0x5bf   : > { %v2735_v11 = vadd.f32 %v11519_v16, %v2623_v61  ;;  %v2815_v31 = vmul.f32 %v11513_v59, %v2772_v28  ;;  %v2816_v0 = vmul.f32 %v11513_v59, %v2784_v30  ;;  %3977 = vtanh.f32 %v2880_v60  ;;  %v8863_v12 = vpop.eup %3961 }
 0x5c0   : > { %v2881_v18 = vadd.f32 %v2867_v47, %v2845_v56  ;;  %v2882_v38 = vadd.f32 %v2867_v47, %v2846_v10  ;;  %v11520_v15 = vsel %vm11409_vm15, %v8655_v17, 0.0  ;;  %11521 = vst [vmem:[#allocation65_spill] sm:$0xff] %v8863_v12  ;;  %3979 = vtanh.f32 %v2879_v57  ;;  %v8869_v23 = vpop.eup %3963 }
 0x5c1   : > { %v2736_v19 = vadd.f32 %v11520_v15, %v2624_v42  ;;  %v2831_v3 = vsel %vm11487_vm12, %v2815_v31, 0.0  ;;  %v2832_v14 = vsel %vm11492_vm13, %v2816_v0, 0.0  ;;  %v8871_v45 = vpop.eup %3965  ;;  %vm2978_vm6 = vcmask 1040384  }
 0x5c2   : > { %3981 = vtanh.f32 %v2881_v18  ;;  %v2847_v48 = vadd.f32 %v2831_v3, %v2735_v11  ;;  %v8873_v49 = vpop.eup %3967  ;;  %v2901_v26 = vadd.f32 %v8871_v45, %v8849_v50  ;;  %v2942_v8 = vmax.f32 %v8849_v50, %v8871_v45 }
 0x5c3   : > { %v2848_v5 = vadd.f32 %v2832_v14, %v2736_v19  ;;  %3983 = vtanh.f32 %v2882_v38  ;;  %11522 = vst [vmem:[#allocation67_spill] sm:$0xff] %v8873_v49  ;;  %v8875_v20 = vpop.eup %3969  ;;  %v2951_v35 = vmax.f32 %v8857_v40, %v8873_v49  ;;  %vm3087_vm11 = vcmp.lt.s32.totalorder %v11039_v46, 48 }
 0x5c4   : > { %v2883_v17 = vadd.f32 %v2867_v47, %v2847_v48  ;;  %11523 = vst [vmem:[#allocation31_spill] sm:$0xff] %v8875_v20  ;;  %v2919_v59 = vadd.f32 %v8875_v20, %v8863_v12  ;;  %v2960_v9 = vmax.f32 %v8863_v12, %v8875_v20 }
 0x5c5   : > { %v2884_v7 = vadd.f32 %v2867_v47, %v2848_v5  ;;  %v8877_v39 = vpop.eup %3971  ;;  %v2910_v47 = vadd.f32 %v8873_v49, %v8857_v40 }
 0x5c6   : > { %3985 = vtanh.f32 %v2883_v17  ;;  %v8879_v6 = vpop.eup %3973  ;;  %v2928_v41 = vadd.f32 %v8877_v39, %v8869_v23  ;;  %v2969_v34 = vmax.f32 %v8869_v23, %v8877_v39 }
 0x5c7   : > { %3987 = vtanh.f32 %v2884_v7  ;;  %v2902_v33 = vadd.f32 %v8879_v6, %v2901_v26  ;;  %v2943_v63 = vmax.f32 %v2942_v8, %v8879_v6 }
 0x5c8   : > { %v8881_v25 = vpop.eup %3975 }
 0x5c9   : > { %11524 = vst [vmem:[#allocation108_spill] sm:$0xff] %v8881_v25  ;;  %v8887_v54 = vpop.eup %3977  ;;  %v2911_v32 = vadd.f32 %v8881_v25, %v2910_v47  ;;  %v2952_v43 = vmax.f32 %v2951_v35, %v8881_v25 }
 0x5ca   : > { %v8893_v55 = vpop.eup %3979  ;;  %v2929_v56 = vadd.f32 %v8887_v54, %v2928_v41  ;;  %v2970_v10 = vmax.f32 %v2969_v34, %v8887_v54 }
 0x5cb   : > { %11525 = vst [vmem:[#allocation101_spill] sm:$0xff] %v8893_v55  ;;  %v2920_v42 = vadd.f32 %v8893_v55, %v2919_v59  ;;  %v2961_v57 = vmax.f32 %v2960_v9, %v8893_v55 }
 0x5cc   : > { %v8897_v44 = vpop.eup %3981 }
 0x5cd   : > { %v8901_v36 = vpop.eup %3983  ;;  %v2903_v61 = vadd.f32 %v8897_v44, %v2902_v33  ;;  %v2944_v4 = vmax.f32 %v2943_v63, %v8897_v44 }
 0x5ce   : > { %11526 = vst [vmem:[#allocation105_spill] sm:$0xff] %v8901_v36  ;;  %v2912_v1 = vadd.f32 %v8901_v36, %v2911_v32  ;;  %v2953_v60 = vmax.f32 %v2952_v43, %v8901_v36 }
 0x5cf   : > { %v2904_v22 = vrot.slane %v2903_v61, 4  ;;  %v2945_v37 = vrot.slane %v2944_v4, 4 }
 0x5d0   : > { %v8917_v13 = vpop.eup %3985  ;;  %v2913_v24 = vrot.slane %v2912_v1, 4  ;;  %v2954_v29 = vrot.slane %v2953_v60, 4 }
 0x5d1   : > { %11527 = vst [vmem:[#allocation43_spill] sm:$0xff] %v8917_v13  ;;  %v8921_v28 = vpop.eup %3987  ;;  %v2905_v30 = vadd.f32 %v2904_v22, %v2903_v61  ;;  %v2946_v16 = vmax.f32 %v2944_v4, %v2945_v37  ;;  %v2921_v11 = vadd.f32 %v8917_v13, %v2920_v42  ;;  %v2962_v31 = vmax.f32 %v2961_v57, %v8917_v13 }
 0x5d2   : > { %v2914_v0 = vadd.f32 %v2913_v24, %v2912_v1  ;;  %v2955_v18 = vmax.f32 %v2953_v60, %v2954_v29  ;;  %v2930_v38 = vadd.f32 %v8921_v28, %v2929_v56  ;;  %v2971_v15 = vmax.f32 %v2970_v10, %v8921_v28 }
 0x5d3   : > { %v2906_v19 = vrot.slane %v2905_v30, 2  ;;  %v2947_v3 = vrot.slane %v2946_v16, 2  ;;  %v2922_v14 = vrot.slane %v2921_v11, 4  ;;  %v2963_v48 = vrot.slane %v2962_v31, 4 }
 0x5d4   : > { %v2915_v5 = vrot.slane %v2914_v0, 2  ;;  %v2956_v17 = vrot.slane %v2955_v18, 2  ;;  %v2931_v7 = vrot.slane %v2930_v38, 4  ;;  %v2972_v26 = vrot.slane %v2971_v15, 4 }
 0x5d5   : > { %v2907_v8 = vadd.f32 %v2906_v19, %v2905_v30  ;;  %v2948_v47 = vmax.f32 %v2946_v16, %v2947_v3  ;;  %v2923_v35 = vadd.f32 %v2922_v14, %v2921_v11  ;;  %v2964_v33 = vmax.f32 %v2962_v31, %v2963_v48 }
 0x5d6   : > { %v2916_v63 = vadd.f32 %v2915_v5, %v2914_v0  ;;  %v2957_v32 = vmax.f32 %v2955_v18, %v2956_v17  ;;  %v2932_v43 = vadd.f32 %v2931_v7, %v2930_v38  ;;  %v2973_v61 = vmax.f32 %v2971_v15, %v2972_v26 }
 0x5d7   : > { %v2908_v4 = vrot.slane %v2907_v8, 1  ;;  %v2949_v59 = vrot.slane %v2948_v47, 1  ;;  %v2924_v9 = vrot.slane %v2923_v35, 2  ;;  %v2965_v1 = vrot.slane %v2964_v33, 2 }
 0x5d8   : > { %v2917_v60 = vrot.slane %v2916_v63, 1  ;;  %v2958_v41 = vrot.slane %v2957_v32, 1  ;;  %v2933_v34 = vrot.slane %v2932_v43, 2  ;;  %v2974_v22 = vrot.slane %v2973_v61, 2 }
 0x5d9   : > { %v2909_v37 = vadd.f32 %v2908_v4, %v2907_v8  ;;  %v2925_v42 = vadd.f32 %v2924_v9, %v2923_v35  ;;  %v2966_v57 = vmax.f32 %v2964_v33, %v2965_v1  ;;  %v2950_v30 = vmax.f32 %v2948_v47, %v2949_v59  ;;  %v8971_v47 = vpop.permute.xlu1 %3328 }
 0x5da   : > { %v2918_v24 = vadd.f32 %v2917_v60, %v2916_v63  ;;  %v2934_v29 = vadd.f32 %v2933_v34, %v2932_v43  ;;  %v2975_v56 = vmax.f32 %v2973_v61, %v2974_v22  ;;  %v2959_v0 = vmax.f32 %v2957_v32, %v2958_v41  ;;  %v8979_v32 = vpop.permute.xlu0 %3323 }
 0x5db   : > { %v2938_v10 = vmul.f32 0.03125, %v2909_v37  ;;  %v2926_v16 = vrot.slane %v2925_v42, 1  ;;  %v2967_v11 = vrot.slane %v2966_v57, 1 }
 0x5dc   : > { %v2939_v31 = vmul.f32 0.03125, %v2918_v24  ;;  %v2935_v18 = vrot.slane %v2934_v29, 1  ;;  %v2976_v38 = vrot.slane %v2975_v56, 1 }
 0x5dd   : > { %v8928_v15 = vsel %vm2978_vm6, %v2938_v10, %v2950_v30  ;;  %v2927_v19 = vadd.f32 %v2926_v16, %v2925_v42  ;;  %v2968_v5 = vmax.f32 %v2966_v57, %v2967_v11  ;;  %v8973_v35 = vpop.permute.xlu1 %3385  ;;  %v11528_v57 = vld [vmem:[#allocation89_spill] sm:$0xff]  ;;  %v11529_v10 = vld [vmem:[#allocation92_spill] sm:$0xff]  ;;  %v11530_v11 = vmov 0 }
 0x5de   : > { %3079 = vrot.lane.b32.xlu0 %v8928_v15, %s4018_s23  ;;  %v8932_v3 = vsel %vm2978_vm6, %v2939_v31, %v2959_v0  ;;  %v2936_v14 = vadd.f32 %v2935_v18, %v2934_v29  ;;  %v2977_v7 = vmax.f32 %v2975_v56, %v2976_v38  ;;  %v8983_v61 = vpop.permute.xlu0 %3381  ;;  %vm2984_vm5 = vcmp.ge.s32.totalorder %v11528_v57, 3  ;;  %v11534_v18 = vld [vmem:[#allocation90_spill] sm:$0xff] }
 0x5df   : > { %3081 = vrot.lane.b32.xlu1 %v8932_v3, %s4018_s23  ;;  %v2940_v48 = vmul.f32 0.03125, %v2927_v19  ;;  %vm2988_vm12 = vcmp.lt.s32.totalorder %v11528_v57, 19  ;;  %vm2996_vm13 = vcmp.ge.s32.totalorder %v11528_v57, 2  ;;  %vm3000_vm1 = vcmp.lt.s32.totalorder %v11528_v57, 18 }
 0x5e0   : > { %v2941_v17 = vmul.f32 0.03125, %v2936_v14  ;;  %vm2985_vm3 = vcmp.ge.s32.totalorder %v11529_v10, 3  ;;  %vm2989_vm4 = vcmp.lt.s32.totalorder %v11529_v10, 19  ;;  %vm9006_vm7 = vmand %vm2984_vm5, %vm2988_vm12  ;;  %vm3001_vm15 = vcmp.lt.s32.totalorder %v11529_v10, 18  ;;  %v11537_v14 = vld [vmem:[#allocation96_spill] sm:$0xff] }
 0x5e1   : > { %v8936_v26 = vsel %vm2978_vm6, %v2940_v48, %v2968_v5  ;;  %v8975_v33 = vpop.permute.xlu1 %3445  ;;  %v11531_v11 = vsel %vm9006_vm7, 4294967295, %v11530_v11  ;;  %vm9013_vm2 = vmand %vm2996_vm13, %vm3000_vm1  ;;  %vm2995_vm0 = vcmp.ge.s32.totalorder %v11534_v18, 2  ;;  %vm2999_vm9 = vcmp.lt.s32.totalorder %v11534_v18, 18 }
 0x5e2   : > { %3083 = vrot.lane.b32.xlu0 %v8936_v26, %s4018_s23  ;;  %v8940_v8 = vsel %vm2978_vm6, %v2941_v17, %v2977_v7  ;;  %v8987_v59 = vpop.permute.xlu0 %3449  ;;  %vm2997_vm6 = vcmp.ge.s32.totalorder %v11529_v10, 2  ;;  %v11535_v38 = vmov 0  ;;  %vm2998_vm5 = vcmp.ge.s32.totalorder %v11537_v14, 2 }
 0x5e3   : > { %3085 = vrot.lane.b32.xlu1 %v8940_v8, %s4018_s23  ;;  %vm3002_vm12 = vcmp.lt.s32.totalorder %v11537_v14, 18  ;;  %vm2983_vm8 = vcmp.ge.s32.totalorder %v11534_v18, 3  ;;  %vm2987_vm13 = vcmp.lt.s32.totalorder %v11534_v18, 19  ;;  %vm11538_vm1 = vcmp.lt.s32.totalorder %v11039_v46, 32  ;;  %vm9029_vm14 = vmand %vm2997_vm6, %vm3001_vm15 }
 0x5e4   : > { %vm3006_vm7 = vmand %vm2998_vm5, %vm3002_vm12  ;;  %vm11543_vm15 = vnez %v11531_v11 }
 0x5e5   : > { %v8977_v63 = vpop.permute.xlu1 %3481  ;;  %vm9043_vm6 = vmand %vm2983_vm8, %vm2987_vm13  ;;  %vm11556_vm13 = vnez %v11064_v62 }
 0x5e6   : > { %3104 = vrot.lane.b32.xlu0 %v8928_v15, %s4019_s25  ;;  %v8991_v1 = vpop.permute.xlu0 %3477 }
 0x5e7   : > { %3106 = vrot.lane.b32.xlu1 %v8932_v3, %s4019_s25 }
 0x5e9   : > { %v8981_v43 = vpop.permute.xlu1 %3529 }
 0x5ea   : > { %3108 = vrot.lane.b32.xlu0 %v8936_v26, %s4019_s25  ;;  %v8995_v41 = vpop.permute.xlu0 %3582 }
 0x5eb   : > { %3110 = vrot.lane.b32.xlu1 %v8940_v8, %s4019_s25 }
 0x5ed   : > { %v8985_v4 = vpop.permute.xlu1 %3525 }
 0x5ee   : > { %3129 = vrot.lane.b32.xlu0 %v8928_v15, %s4010_s19 }
 0x5ef   : > { %3131 = vrot.lane.b32.xlu1 %v8932_v3, %s4010_s19 }
 0x5f1   : > { %v8989_v9 = vpop.permute.xlu1 %3586 }
 0x5f2   : > { %3133 = vrot.lane.b32.xlu0 %v8936_v26, %s4010_s19 }
 0x5f3   : > { %3135 = vrot.lane.b32.xlu1 %v8940_v8, %s4010_s19  ;;  %s4021_s19 = smov 80  }
 0x5f5   : > { %v8993_v60 = vpop.permute.xlu1 %3651 }
 0x5f6   : > { %3145 = vrot.lane.b32.xlu0 %v8928_v15, %s4014_s22 }
 0x5f7   : > { %3147 = vrot.lane.b32.xlu1 %v8932_v3, %s4014_s22 }
 0x5f9   : > { %v8997_v34 = vpop.permute.xlu1 %3647 }
 0x5fa   : > { %3149 = vrot.lane.b32.xlu0 %v8936_v26, %s4014_s22 }
 0x5fb   : > { %3151 = vrot.lane.b32.xlu1 %v8940_v8, %s4014_s22  ;;  %s4022_s22 = smov 3  }
 0x5fe   : > { %3161 = vrot.lane.b32.xlu0 %v8928_v15, %s4020_s26 }
 0x5ff   : > { %3163 = vrot.lane.b32.xlu1 %v8932_v3, %s4020_s26 }
 0x602   : > { %3165 = vrot.lane.b32.xlu0 %v8936_v26, %s4020_s26 }
 0x603   : > { %3167 = vrot.lane.b32.xlu1 %v8940_v8, %s4020_s26 }
 0x606   : > { %3186 = vrot.lane.b32.xlu0 %v8928_v15, %s4021_s19 }
 0x607   : > { %3188 = vrot.lane.b32.xlu1 %v8932_v3, %s4021_s19 }
 0x60a   : > { %3190 = vrot.lane.b32.xlu0 %v8936_v26, %s4021_s19 }
 0x60b   : > { %3192 = vrot.lane.b32.xlu1 %v8940_v8, %s4021_s19 }
 0x650   : > { %v3080_v22 = vpop.permute.xlu0 %3079 }
 0x651   : > { %v3082_v37 = vpop.permute.xlu1 %3081 }
 0x652   : > { %v3090_v42 = vsel %vm3087_vm11, %v3080_v22, %v3082_v37 }
 0x654   : > { %v3084_v24 = vpop.permute.xlu0 %3083 }
 0x655   : > { %v3089_v29 = vsel %vm3087_vm11, %v3082_v37, %v3084_v24  ;;  %v3086_v56 = vpop.permute.xlu1 %3085 }
 0x656   : > { %v3088_v30 = vsel %vm3087_vm11, %v3084_v24, %v3086_v56  ;;  %v3091_v16 = vsel %vm3087_vm11, %v3086_v56, %v3080_v22  ;;  %vm9019_vm11 = vmand %vm2985_vm3, %vm2989_vm4  ;;  %vm2986_vm3 = vcmp.ge.s32.totalorder %v11537_v14, 3  ;;  %vm2990_vm4 = vcmp.lt.s32.totalorder %v11537_v14, 19 }
 0x657   : > { %v11536_v38 = vsel %vm9019_vm11, 4294967295, %v11535_v38  ;;  %vm9037_vm11 = vmand %vm2995_vm0, %vm2999_vm9  ;;  %v3101_v24 = vsel %vm11543_vm15, %v3090_v42, 0.0  ;;  %vm11548_vm9 = vcmask 1041408  }
 0x658   : > { %v3105_v31 = vpop.permute.xlu0 %3104  ;;  %vm9049_vm10 = vmand %vm2986_vm3, %vm2990_vm4  ;;  %vm11551_vm8 = vnez %v11536_v38  ;;  %vm10179_vm3 = vcmask 1045504   ;;  %vm11558_vm4 = vnez %v11067_v58 }
 0x659   : > { %v3107_v19 = vpop.permute.xlu1 %3106  ;;  %vm11549_vm0 = vmmov %vm11538_vm1  ;;  %v3102_v20 = vsel %vm11551_vm8, %v3089_v29, 0.0  ;;  %v3103_v5 = vsel %vm9049_vm10, %v3088_v30, 0.0  ;;  %vm3169_vm8 = vcmp.lt.s32.totalorder %v11039_v46, 96 }
 0x65a   : > { %v3115_v48 = vsel %vm11538_vm1, %v3105_v31, %v3107_v19  ;;  %vm11553_vm5 = vmmov %vm11548_vm9 }
 0x65b   : > { %v3126_v17 = vsel %vm9013_vm2, %v3115_v48, 0.0  ;;  %vm11550_vm2 = vmmov %vm11549_vm0 }
 0x65c   : > { %v3216_v22 = vrot.slane %v3126_v17, 6  ;;  %v3109_v37 = vpop.permute.xlu0 %3108  ;;  %vm11554_vm12 = vmmov %vm11553_vm5 }
 0x65d   : > { %v3114_v13 = vsel %vm11538_vm1, %v3107_v19, %v3109_v37  ;;  %v3111_v36 = vpop.permute.xlu1 %3110  ;;  %vm11561_vm1 = vnez %v10297_v2 }
 0x65e   : > { %v3273_v48 = vsel %vm11548_vm9, %v3101_v24, %v3216_v22  ;;  %v3127_v17 = vsel %vm9029_vm14, %v3114_v13, 0.0  ;;  %v3113_v42 = vsel %vm11549_vm0, %v3109_v37, %v3111_v36  ;;  %v3116_v11 = vsel %vm11550_vm2, %v3111_v36, %v3105_v31  ;;  %vm11552_vm14 = vmmov %vm11548_vm9 }
 0x65f   : > { %v3217_v55 = vrot.slane %v3127_v17, 6  ;;  %v3125_v19 = vsel %vm9037_vm11, %v3116_v11, 0.0  ;;  %v3128_v25 = vsel %vm3006_vm7, %v3113_v42, 0.0  ;;  %v3100_v13 = vsel %vm9043_vm6, %v3091_v16, 0.0 }
 0x660   : > { %v3215_v49 = vrot.slane %v3125_v19, 6  ;;  %v3218_v12 = vrot.slane %v3128_v25, 6  ;;  %v3130_v22 = vpop.permute.xlu0 %3129  ;;  %vm11555_vm7 = vcmp.lt.s32.totalorder %v11039_v46, 16  ;;  %vm10180_vm11 = vcmask 1043456  }
 0x661   : > { %v3274_v37 = vsel %vm11552_vm14, %v3102_v20, %v3217_v55  ;;  %v3132_v36 = vpop.permute.xlu1 %3131  ;;  %v3240_v24 = vrot.slane %v8932_v3, 2  ;;  %vm11557_vm10 = vmmov %vm11555_vm7  ;;  %vm11562_vm9 = vnez %v11076_v21  ;;  %vm3007_vm0 = vcmp.ge.s32.totalorder %v11534_v18, 4294967294 }
 0x662   : > { %v3272_v31 = vsel %vm11553_vm5, %v3100_v13, %v3215_v49  ;;  %v3275_v7 = vsel %vm11554_vm12, %v3103_v5, %v3218_v12  ;;  %v3139_v38 = vsel %vm11555_vm7, %v3130_v22, %v3132_v36  ;;  %vm11559_vm15 = vmmov %vm11555_vm7  ;;  %v3242_v13 = vrot.slane %v8940_v8, 2 }
 0x663   : > { %v3142_v25 = vsel %vm11556_vm13, %v3139_v38, 0.0  ;;  %vm11560_vm6 = vmmov %vm11555_vm7  ;;  %vm3011_vm2 = vcmp.lt.s32.totalorder %v11534_v18, 14  ;;  %vm3008_vm5 = vcmp.ge.s32.totalorder %v11528_v57, 4294967294  ;;  %vm3012_vm12 = vcmp.lt.s32.totalorder %v11528_v57, 14 }
 0x664   : > { %v3228_v29 = vrot.slane %v3142_v25, 4  ;;  %v3134_v16 = vpop.permute.xlu0 %3133  ;;  %vm9116_vm14 = vmand %vm3007_vm0, %vm3011_vm2  ;;  %vm3009_vm7 = vcmp.ge.s32.totalorder %v11529_v10, 4294967294  ;;  %vm3013_vm13 = vcmp.lt.s32.totalorder %v11529_v10, 14  ;;  %vm3194_vm0 = vcmp.lt.s32.totalorder %v11039_v46, 80 }
 0x665   : > { %v3138_v20 = vsel %vm11557_vm10, %v3132_v36, %v3134_v16  ;;  %v3136_v55 = vpop.permute.xlu1 %3135  ;;  %vm3019_vm10 = vcmp.ge.s32.totalorder %v11534_v18, 4294967293  ;;  %vm3020_vm2 = vcmp.ge.s32.totalorder %v11528_v57, 4294967293 }
 0x666   : > { %v3278_v49 = vsel %vm10180_vm11, %v3273_v48, %v3228_v29  ;;  %v3143_v12 = vsel %vm11558_vm4, %v3138_v20, 0.0  ;;  %v3137_v30 = vsel %vm11559_vm15, %v3134_v16, %v3136_v55  ;;  %v3140_v62 = vsel %vm11560_vm6, %v3136_v55, %v3130_v22  ;;  %vm9130_vm15 = vmand %vm3008_vm5, %vm3012_vm12 }
 0x667   : > { %v9086_v56 = vsel %vm10179_vm3, %v3278_v49, %v3240_v24  ;;  %v3229_v0 = vrot.slane %v3143_v12, 4  ;;  %v3141_v3 = vsel %vm11561_vm1, %v3140_v62, 0.0  ;;  %v3144_v17 = vsel %vm11562_vm9, %v3137_v30, 0.0  ;;  %vm9138_vm9 = vmand %vm3009_vm7, %vm3013_vm13 }
 0x668   : > { %v3241_v48 = vrot.slane %v8936_v26, 2  ;;  %v3227_v58 = vrot.slane %v3141_v3, 4  ;;  %v3230_v42 = vrot.slane %v3144_v17, 4  ;;  %v9093_v11 = vpop.permute.xlu0 %3145  ;;  %v3239_v22 = vrot.slane %v8928_v15, 2 }
 0x669   : > { %v3279_v19 = vsel %vm10180_vm11, %v3274_v37, %v3229_v0  ;;  %v3148_v5 = vpop.permute.xlu1 %3147  ;;  %vm3023_vm4 = vcmp.lt.s32.totalorder %v11534_v18, 13  ;;  %vm3010_vm6 = vcmp.ge.s32.totalorder %v11537_v14, 4294967294  ;;  %vm3014_vm1 = vcmp.lt.s32.totalorder %v11537_v14, 14 }
 0x66a   : > { %v9099_v36 = vsel %vm10179_vm3, %v3279_v19, %v3241_v48  ;;  %v3277_v2 = vsel %vm10180_vm11, %v3272_v31, %v3227_v58  ;;  %v3280_v21 = vsel %vm10180_vm11, %v3275_v7, %v3230_v42  ;;  %vm9145_vm5 = vmand %vm3019_vm10, %vm3023_vm4  ;;  %vm3021_vm12 = vcmp.ge.s32.totalorder %v11529_v10, 4294967293 }
 0x66b   : > { %v9104_v26 = vsel %vm10179_vm3, %v3277_v2, %v3239_v22  ;;  %v9107_v38 = vsel %vm10179_vm3, %v3280_v21, %v3242_v13  ;;  %vm3022_vm3 = vcmp.ge.s32.totalorder %v11537_v14, 4294967293  ;;  %vm3025_vm7 = vcmp.lt.s32.totalorder %v11529_v10, 13  ;;  %vm9157_vm11 = vmand %vm3010_vm6, %vm3014_vm1 }
 0x66c   : > { %v9109_v25 = vpop.permute.xlu0 %3149  ;;  %vm11571_vm13 = vcmp.lt.s32.totalorder %v11039_v46, 112  ;;  %vm3026_vm10 = vcmp.lt.s32.totalorder %v11537_v14, 13 }
 0x66d   : > { %v9111_v37 = vpop.permute.xlu1 %3151  ;;  %v3155_v30 = vsel %vm11571_vm13, %v9093_v11, %v3148_v5  ;;  %vm11579_vm6 = vmmov %vm11571_vm13 }
 0x66e   : > { %v3154_v2 = vsel %vm11579_vm6, %v3148_v5, %v9109_v25  ;;  %vm9189_vm1 = vmand %vm3022_vm3, %vm3026_vm10  ;;  %vm11584_vm3 = vnez %v11397_v52 }
 0x670   : > { %v3162_v15 = vpop.permute.xlu0 %3161 }
 0x671   : > { %v3164_v8 = vpop.permute.xlu1 %3163 }
 0x672   : > { %v3172_v7 = vsel %vm3169_vm8, %v3162_v15, %v3164_v8 }
 0x673   : > { %v3182_v24 = vsel %vm9116_vm14, %v3172_v7, 0.0  ;;  %vm3024_vm14 = vcmp.lt.s32.totalorder %v11528_v57, 13 }
 0x674   : > { %v3166_v29 = vpop.permute.xlu0 %3165  ;;  %v3251_v62 = vrot.slane %v3182_v24, 6  ;;  %vm9172_vm4 = vmand %vm3020_vm2, %vm3024_vm14  ;;  %vm11582_vm2 = vcmask 1041408   ;;  %vm11583_vm14 = vcmask 1043456  }
 0x675   : > { %v3168_v16 = vpop.permute.xlu1 %3167  ;;  %v3171_v55 = vsel %vm3169_vm8, %v3164_v8, %v3166_v29  ;;  %vm11591_vm13 = vmmov %vm11582_vm2 }
 0x676   : > { %v3183_v0 = vsel %vm9130_vm15, %v3171_v55, 0.0  ;;  %v3170_v48 = vsel %vm3169_vm8, %v3166_v29, %v3168_v16  ;;  %v3173_v10 = vsel %vm3169_vm8, %v3168_v16, %v3162_v15  ;;  %vm9178_vm15 = vmand %vm3021_vm12, %vm3025_vm7  ;;  %vm11578_vm8 = vnez %v11395_v27 }
 0x677   : > { %v3157_v13 = vsel %vm11578_vm8, %v3155_v30, 0.0  ;;  %v3252_v21 = vrot.slane %v3183_v0, 6  ;;  %v3184_v7 = vsel %vm9138_vm9, %v3170_v48, 0.0  ;;  %v3185_v27 = vsel %vm9157_vm11, %v3173_v10, 0.0  ;;  %vm11585_vm11 = vmmov %vm11579_vm6 }
 0x678   : > { %v3187_v18 = vpop.permute.xlu0 %3186  ;;  %v3286_v31 = vsel %vm11582_vm2, %v3157_v13, %v3251_v62  ;;  %v3158_v55 = vsel %vm11584_vm3, %v3154_v2, 0.0  ;;  %v3153_v52 = vsel %vm11585_vm11, %v9109_v25, %v9111_v37  ;;  %vm11586_vm9 = vmmov %vm11582_vm2  ;;  %v3253_v0 = vrot.slane %v3184_v7, 6 }
 0x679   : > { %v3189_v17 = vpop.permute.xlu1 %3188  ;;  %v3254_v3 = vrot.slane %v3185_v27, 6  ;;  %vm11589_vm12 = vnez %v11400_v53  ;;  %vm11590_vm7 = vnez %v11408_v51  ;;  %vm11592_vm10 = vmmov %vm11582_vm2  ;;  %vm3310_vm8 = vcmp.lt.s32.totalorder %v11039_v46, 3 }
 0x67a   : > { %v3197_v58 = vsel %vm3194_vm0, %v3187_v18, %v3189_v17  ;;  %v3159_v25 = vsel %vm11589_vm12, %v3153_v52, 0.0  ;;  %vm3371_vm2 = vcmp.lt.s32.totalorder %v11039_v46, 2 }
 0x67b   : > { %v3207_v19 = vsel %vm9145_vm5, %v3197_v58, 0.0  ;;  %vm11588_vm5 = vmmov %vm11583_vm14 }
 0x67c   : > { %v3263_v57 = vrot.slane %v3207_v19, 4  ;;  %v3191_v15 = vpop.permute.xlu0 %3190 }
 0x67d   : > { %v3196_v5 = vsel %vm3194_vm0, %v3189_v17, %v3191_v15  ;;  %v3193_v29 = vpop.permute.xlu1 %3192 }
 0x67e   : > { %v9201_v16 = vsel %vm11583_vm14, %v3286_v31, %v3263_v57  ;;  %v3208_v14 = vsel %vm9172_vm4, %v3196_v5, 0.0  ;;  %v3195_v24 = vsel %vm3194_vm0, %v3191_v15, %v3193_v29  ;;  %v3198_v20 = vsel %vm3194_vm0, %v3193_v29, %v3187_v18  ;;  %vm11587_vm0 = vmmov %vm11579_vm6 }
 0x67f   : > { %v3264_v49 = vrot.slane %v3208_v14, 4  ;;  %v3209_v12 = vsel %vm9178_vm15, %v3195_v24, 0.0  ;;  %v3210_v30 = vsel %vm9189_vm1, %v3198_v20, 0.0  ;;  %3422 = vrot.lane.b32.xlu0 %v9201_v16, %s4011_s20  ;;  %3296 = vrot.lane.b32.xlu1 %v9201_v16, %s4022_s22  ;;  %v3287_v18 = vsel %vm11586_vm9, %v3158_v55, %v3252_v21  ;;  %vm11593_vm4 = vmmov %vm11588_vm5 }
 0x680   : > { %v3156_v62 = vsel %vm11587_vm0, %v9111_v37, %v9093_v11  ;;  %v3265_v48 = vrot.slane %v3209_v12, 4  ;;  %v3266_v10 = vrot.slane %v3210_v30, 4  ;;  %v3288_v11 = vsel %vm11591_vm13, %v3159_v25, %v3253_v0  ;;  %vm11594_vm15 = vmmov %vm11593_vm4  ;;  %v11597_v12 = vld [vmem:[#allocation94_spill] sm:$0xff] }
 0x681   : > { %v9229_v17 = vsel %vm11588_vm5, %v3287_v18, %v3264_v49  ;;  %v3160_v58 = vsel %vm11590_vm7, %v3156_v62, 0.0  ;;  %vm11595_vm6 = vcmp.lt.s32.totalorder %v11039_v46, 1  ;;  %vm3032_vm14 = vcmp.ge.s32.totalorder %v11597_v12, 3 }
 0x682   : > { %v3289_v37 = vsel %vm11592_vm10, %v3160_v58, %v3254_v3  ;;  %v9242_v42 = vsel %vm11593_vm4, %v3288_v11, %v3265_v48  ;;  %vm11596_vm1 = vmmov %vm11595_vm6  ;;  %vm3044_vm3 = vcmp.ge.s32.totalorder %v11597_v12, 2  ;;  %vm11598_vm11 = vcmp.ge.s32.totalorder %v11597_v12, 1  ;;  %v11599_v11 = vld [vmem:[#allocation99_spill] sm:$0xff] }
 0x683   : > { %3426 = vrot.lane.b32.xlu0 %v9229_v17, %s4011_s20  ;;  %3300 = vrot.lane.b32.xlu1 %v9229_v17, %s4022_s22  ;;  %v9245_v19 = vsel %vm11594_vm15, %v3289_v37, %v3266_v10  ;;  %vm3031_vm9 = vcmp.ge.s32.totalorder %v11599_v11, 3  ;;  %vm3043_vm5 = vcmp.ge.s32.totalorder %v11599_v11, 2  ;;  %vm11602_vm10 = vcmp.ge.s32.totalorder %v11599_v11, 1  ;;  %vm11603_vm4 = vmmov %vm11596_vm1 }
 0x684   : > { %vm11604_vm15 = vmmov %vm11596_vm1 }
 0x687   : > { %3434 = vrot.lane.b32.xlu0 %v9245_v19, %s4011_s20  ;;  %3304 = vrot.lane.b32.xlu1 %v9242_v42, %s4022_s22 }
 0x68b   : > { %3502 = vrot.lane.b32.xlu0 %v9201_v16, %s4012_s21  ;;  %3308 = vrot.lane.b32.xlu1 %v9245_v19, %s4022_s22 }
 0x68f   : > { %3510 = vrot.lane.b32.xlu0 %v9242_v42, %s4012_s21  ;;  %3357 = vrot.lane.b32.xlu1 %v9201_v16, %s4023_s27 }
 0x693   : > { %3558 = vrot.lane.b32.xlu0 %v9201_v16, %s4024_s28  ;;  %3361 = vrot.lane.b32.xlu1 %v9229_v17, %s4023_s27 }
 0x697   : > { %3566 = vrot.lane.b32.xlu0 %v9242_v42, %s4024_s28  ;;  %3365 = vrot.lane.b32.xlu1 %v9242_v42, %s4023_s27 }
 0x69b   : > { %3623 = vrot.lane.b32.xlu0 %v9201_v16, %s4025_s29  ;;  %3369 = vrot.lane.b32.xlu1 %v9245_v19, %s4023_s27 }
 0x69f   : > { %3631 = vrot.lane.b32.xlu0 %v9242_v42, %s4025_s29  ;;  %3430 = vrot.lane.b32.xlu1 %v9242_v42, %s4011_s20 }
 0x6a3   : > { %3294 = vrot.lane.b32.xlu0 %v9104_v26, %s4022_s22  ;;  %3506 = vrot.lane.b32.xlu1 %v9229_v17, %s4012_s21 }
 0x6a7   : > { %3514 = vrot.lane.b32.xlu1 %v9245_v19, %s4012_s21  ;;  %3298 = vrot.lane.b32.xlu0 %v9086_v56, %s4022_s22 }
 0x6ab   : > { %3562 = vrot.lane.b32.xlu1 %v9229_v17, %s4024_s28  ;;  %3302 = vrot.lane.b32.xlu0 %v9099_v36, %s4022_s22 }
 0x6af   : > { %3570 = vrot.lane.b32.xlu1 %v9245_v19, %s4024_s28  ;;  %3306 = vrot.lane.b32.xlu0 %v9107_v38, %s4022_s22 }
 0x6b3   : > { %3627 = vrot.lane.b32.xlu1 %v9229_v17, %s4025_s29  ;;  %3355 = vrot.lane.b32.xlu0 %v9104_v26, %s4023_s27 }
 0x6b7   : > { %3635 = vrot.lane.b32.xlu1 %v9245_v19, %s4025_s29  ;;  %3359 = vrot.lane.b32.xlu0 %v9086_v56, %s4023_s27 }
 0x6bb   : > { %3420 = vrot.lane.b32.xlu1 %v9104_v26, %s4011_s20  ;;  %3363 = vrot.lane.b32.xlu0 %v9099_v36, %s4023_s27 }
 0x6bf   : > { %3424 = vrot.lane.b32.xlu1 %v9086_v56, %s4011_s20  ;;  %3367 = vrot.lane.b32.xlu0 %v9107_v38, %s4023_s27 }
 0x6c3   : > { %3432 = vrot.lane.b32.xlu1 %v9107_v38, %s4011_s20  ;;  %3428 = vrot.lane.b32.xlu0 %v9099_v36, %s4011_s20  ;;  %s3841_s20 = sshll.u32 %s11646_s10, 7 }
 0x6c4   : > { %s9663_s12 = scalar_lea.vmem %s9709_s9, %s3841_s20 }
 0x6c7   : > { %3504 = vrot.lane.b32.xlu1 %v9086_v56, %s4012_s21  ;;  %3500 = vrot.lane.b32.xlu0 %v9104_v26, %s4012_s21 }
 0x6cb   : > { %3512 = vrot.lane.b32.xlu1 %v9107_v38, %s4012_s21  ;;  %3508 = vrot.lane.b32.xlu0 %v9099_v36, %s4012_s21 }
 0x6cf   : > { %3560 = vrot.lane.b32.xlu1 %v9086_v56, %s4024_s28  ;;  %3556 = vrot.lane.b32.xlu0 %v9104_v26, %s4024_s28 }
 0x6d3   : > { %3568 = vrot.lane.b32.xlu1 %v9107_v38, %s4024_s28  ;;  %3564 = vrot.lane.b32.xlu0 %v9099_v36, %s4024_s28 }
 0x6d7   : > { %3625 = vrot.lane.b32.xlu1 %v9086_v56, %s4025_s29  ;;  %3621 = vrot.lane.b32.xlu0 %v9104_v26, %s4025_s29 }
 0x6db   : > { %3633 = vrot.lane.b32.xlu1 %v9107_v38, %s4025_s29  ;;  %3629 = vrot.lane.b32.xlu0 %v9099_v36, %s4025_s29 }
 0x6f1   : > { %v3423_v53 = vpop.permute.xlu0 %3422  ;;  %v3297_v51 = vpop.permute.xlu1 %3296 }
 0x6f5   : > { %v3427_v22 = vpop.permute.xlu0 %3426  ;;  %v3301_v13 = vpop.permute.xlu1 %3300 }
 0x6f6   : > { %v3441_v2 = vsel %vm11595_vm6, %v3423_v53, %v3427_v22  ;;  %v3316_v21 = vsel %vm3310_vm8, %v3297_v51, %v3301_v13 }
 0x6f7   : > { %v3336_v20 = vmul.f32 %v8971_v47, %v3316_v21  ;;  %v3457_v52 = vmul.f32 %v8987_v59, %v3441_v2 }
 0x6f9   : > { %v3435_v57 = vpop.permute.xlu0 %3434  ;;  %v3305_v15 = vpop.permute.xlu1 %3304  ;;  %v3352_v62 = vsel %vm3032_vm14, %v3336_v20, 0.0  ;;  %v3465_v58 = vsel %vm11598_vm11, %v3457_v52, 0.0  ;;  %vm11607_vm11 = vcmp.lt.s32.totalorder %v11039_v46, 127 }
 0x6fa   : > { %v3443_v8 = vsel %vm11596_vm1, %v3435_v57, %v3423_v53  ;;  %v3314_v31 = vsel %vm3310_vm8, %v3301_v13, %v3305_v15  ;;  %v11600_v53 = vld [vmem:[#allocation98_spill] sm:$0xff] }
 0x6fb   : > { %vm3045_vm0 = vcmp.ge.s32.totalorder %v11600_v53, 2  ;;  %v3456_v20 = vmul.f32 %v8987_v59, %v3443_v8  ;;  %vm3033_vm7 = vcmp.ge.s32.totalorder %v11600_v53, 3  ;;  %vm11605_vm6 = vcmp.ge.s32.totalorder %v11600_v53, 1 }
 0x6fd   : > { %v9336_v7 = vpop.permute.xlu0 %3502  ;;  %v3309_v27 = vpop.permute.xlu1 %3308 }
 0x6fe   : > { %v3312_v5 = vsel %vm3310_vm8, %v3305_v15, %v3309_v27  ;;  %v3318_v29 = vsel %vm3310_vm8, %v3309_v27, %v3297_v51  ;;  %v3489_v51 = vmul.f32 %v8977_v63, %v9229_v17  ;;  %v11601_v15 = vld [vmem:[#allocation103_spill] sm:$0xff] }
 0x6ff   : > { %v3335_v13 = vmul.f32 %v8971_v47, %v3318_v29  ;;  %vm3046_vm12 = vcmp.ge.s32.totalorder %v11601_v15, 2  ;;  %v3337_v29 = vmul.f32 %v8971_v47, %v3314_v31  ;;  %v3338_v52 = vmul.f32 %v8971_v47, %v3312_v5 }
 0x700   : > { %vm3034_vm13 = vcmp.ge.s32.totalorder %v11601_v15, 3  ;;  %vm11606_vm1 = vcmp.ge.s32.totalorder %v11601_v15, 1 }
 0x701   : > { %v9342_v14 = vpop.permute.xlu0 %3510  ;;  %v3358_v24 = vpop.permute.xlu1 %3357  ;;  %v3351_v8 = vsel %vm3031_vm9, %v3335_v13, 0.0 }
 0x705   : > { %v9346_v55 = vpop.permute.xlu0 %3558  ;;  %v3362_v49 = vpop.permute.xlu1 %3361 }
 0x706   : > { %v3377_v30 = vsel %vm3371_vm2, %v3358_v24, %v3362_v49 }
 0x707   : > { %v3393_v18 = vmul.f32 %v8973_v35, %v3377_v30 }
 0x709   : > { %v3409_v0 = vsel %vm3044_vm3, %v3393_v18, 0.0  ;;  %v9358_v3 = vpop.permute.xlu0 %3566  ;;  %v3366_v48 = vpop.permute.xlu1 %3365 }
 0x70a   : > { %v3417_v10 = vadd.f32 %v3409_v0, %v3352_v62  ;;  %v3375_v25 = vsel %vm3371_vm2, %v3362_v49, %v3366_v48 }
 0x70b   : > { %v3394_v2 = vmul.f32 %v8973_v35, %v3375_v25 }
 0x70c   : > { %v3473_v37 = vadd.f32 %v3465_v58, %v3417_v10  ;;  %v3353_v58 = vsel %vm3033_vm7, %v3337_v29, 0.0 }
 0x70d   : > { %v9370_v21 = vpop.permute.xlu0 %3623  ;;  %v3370_v27 = vpop.permute.xlu1 %3369  ;;  %v3410_v0 = vsel %vm3045_vm0, %v3394_v2, 0.0 }
 0x70e   : > { %v3373_v49 = vsel %vm3371_vm2, %v3366_v48, %v3370_v27  ;;  %v3379_v30 = vsel %vm3371_vm2, %v3370_v27, %v3358_v24  ;;  %v3497_v17 = vadd.f32 %v3489_v51, %v3473_v37  ;;  %v3354_v37 = vsel %vm3034_vm13, %v3338_v52, 0.0 }
 0x70f   : > { %v3392_v18 = vmul.f32 %v8973_v35, %v3379_v30  ;;  %v3395_v62 = vmul.f32 %v8973_v35, %v3373_v49  ;;  %v3464_v35 = vsel %vm11602_vm10, %v3456_v20, 0.0  ;;  %v3418_v2 = vadd.f32 %v3410_v0, %v3353_v58  ;;  %vm11608_vm10 = vmmov %vm11607_vm11 }
 0x710   : > { %v3488_v49 = vmul.f32 %v8977_v63, %v9201_v16  ;;  %v3490_v52 = vmul.f32 %v8977_v63, %v9242_v42 }
 0x711   : > { %v3408_v24 = vsel %vm3043_vm5, %v3392_v18, 0.0  ;;  %v3411_v47 = vsel %vm3046_vm12, %v3395_v62, 0.0  ;;  %v9393_v31 = vpop.permute.xlu0 %3631  ;;  %v3431_v5 = vpop.permute.xlu1 %3430 }
 0x712   : > { %v3416_v48 = vadd.f32 %v3408_v24, %v3351_v8  ;;  %v3437_v10 = vsel %vm11603_vm4, %v3431_v5, %v3435_v57  ;;  %v3439_v25 = vsel %vm11604_vm15, %v3427_v22, %v3431_v5  ;;  %v3419_v27 = vadd.f32 %v3411_v47, %v3354_v37 }
 0x713   : > { %v3458_v51 = vmul.f32 %v8987_v59, %v3439_v25  ;;  %v3459_v13 = vmul.f32 %v8987_v59, %v3437_v10  ;;  %v3491_v59 = vmul.f32 %v8977_v63, %v9245_v19  ;;  %vm11609_vm4 = vcmp.lt.s32.totalorder %v11597_v12, 15 }
 0x714   : > { %v3472_v20 = vadd.f32 %v3464_v35, %v3416_v48  ;;  %vm11610_vm15 = vcmp.lt.s32.totalorder %v11599_v11, 15 }
 0x715   : > { %v3466_v57 = vsel %vm11605_vm6, %v3458_v51, 0.0  ;;  %v3467_v22 = vsel %vm11606_vm1, %v3459_v13, 0.0  ;;  %v9413_v30 = vpop.permute.xlu0 %3294  ;;  %v3507_v29 = vpop.permute.xlu1 %3506  ;;  %vm11611_vm6 = vmmov %vm11608_vm10 }
 0x716   : > { %v3474_v18 = vadd.f32 %v3466_v57, %v3418_v2  ;;  %v3475_v62 = vadd.f32 %v3467_v22, %v3419_v27  ;;  %v3496_v8 = vadd.f32 %v3488_v49, %v3472_v20  ;;  %v3519_v16 = vsel %vm11607_vm11, %v3507_v29, %v9342_v14  ;;  %vm11612_vm1 = vmmov %vm11611_vm6 }
 0x717   : > { %v3521_v0 = vsel %vm11608_vm10, %v9336_v7, %v3507_v29  ;;  %v3537_v24 = vmul.f32 %v8981_v43, %v3519_v16  ;;  %vm3572_vm11 = vcmp.lt.s32.totalorder %v11039_v46, 126  ;;  %vm11613_vm10 = vcmp.lt.s32.totalorder %v11600_v53, 15 }
 0x718   : > { %v3536_v47 = vmul.f32 %v8981_v43, %v3521_v0  ;;  %v3498_v5 = vadd.f32 %v3490_v52, %v3474_v18  ;;  %v3499_v42 = vadd.f32 %v3491_v59, %v3475_v62 }
 0x719   : > { %v3545_v63 = vsel %vm11609_vm4, %v3537_v24, 0.0  ;;  %v3515_v19 = vpop.permute.xlu1 %3514  ;;  %v3299_v35 = vpop.permute.xlu0 %3298  ;;  %vm11614_vm4 = vcmp.lt.s32.totalorder %v11601_v15, 15 }
 0x71a   : > { %v3544_v48 = vsel %vm11610_vm15, %v3536_v47, 0.0  ;;  %v3553_v10 = vadd.f32 %v3545_v63, %v3497_v17  ;;  %v3517_v25 = vsel %vm11611_vm6, %v9342_v14, %v3515_v19  ;;  %v3523_v58 = vsel %vm11612_vm1, %v3515_v19, %v9336_v7 }
 0x71b   : > { %v3552_v37 = vadd.f32 %v3544_v48, %v3496_v8  ;;  %v3538_v51 = vmul.f32 %v8981_v43, %v3517_v25  ;;  %v3539_v13 = vmul.f32 %v8981_v43, %v3523_v58  ;;  %vm10182_vm15 = vcmp.lt.s32.totalorder %v11597_v12, 14 }
 0x71c   : > { %vm10184_vm6 = vcmp.lt.s32.totalorder %v11599_v11, 14  ;;  %vm10181_vm1 = vcmp.lt.s32.totalorder %v11600_v53, 14 }
 0x71d   : > { %v3546_v2 = vsel %vm11613_vm10, %v3538_v51, 0.0  ;;  %v3547_v17 = vsel %vm11614_vm4, %v3539_v13, 0.0  ;;  %v3563_v27 = vpop.permute.xlu1 %3562  ;;  %v3303_v20 = vpop.permute.xlu0 %3302  ;;  %vm10183_vm10 = vcmp.lt.s32.totalorder %v11601_v15, 14  ;;  %vm3637_vm4 = vcmp.lt.s32.totalorder %v11039_v46, 125 }
 0x71e   : > { %v3554_v14 = vadd.f32 %v3546_v2, %v3498_v5  ;;  %v3555_v49 = vadd.f32 %v3547_v17, %v3499_v42  ;;  %v3576_v7 = vsel %vm3572_vm11, %v3563_v27, %v9358_v3  ;;  %v3578_v43 = vsel %vm3572_vm11, %v9346_v55, %v3563_v27 }
 0x71f   : > { %v3594_v57 = vmul.f32 %v8989_v9, %v3576_v7  ;;  %v3593_v22 = vmul.f32 %v8989_v9, %v3578_v43  ;;  %v9486_v13 = vmul.f32 %v8991_v1, %v9086_v56  ;;  %v3313_v2 = vsel %vm3310_vm8, %v3299_v35, %v3303_v20 }
 0x720   : > { %v9496_v7 = vmul.f32 %v8991_v1, %v9099_v36 }
 0x721   : > { %v3610_v29 = vsel %vm10182_vm15, %v3594_v57, 0.0  ;;  %v3571_v52 = vpop.permute.xlu1 %3570  ;;  %v3307_v59 = vpop.permute.xlu0 %3306  ;;  %v3609_v18 = vsel %vm10184_vm6, %v3593_v22, 0.0  ;;  %v3333_v22 = vmul.f32 %v8979_v32, %v3313_v2  ;;  %vm3072_vm15 = vcmp.lt.s32.totalorder %v11597_v12, 13 }
 0x722   : > { %v9458_v62 = vadd.f32 %v3610_v29, %v3553_v10  ;;  %v3574_v8 = vsel %vm3572_vm11, %v9358_v3, %v3571_v52  ;;  %v9464_v16 = vadd.f32 %v3609_v18, %v3552_v37  ;;  %v3580_v0 = vsel %vm3572_vm11, %v3571_v52, %v9346_v55 }
 0x723   : > { %v3595_v24 = vmul.f32 %v8989_v9, %v3574_v8  ;;  %v3596_v47 = vmul.f32 %v8989_v9, %v3580_v0  ;;  %v3315_v9 = vsel %vm3310_vm8, %v9413_v30, %v3299_v35  ;;  %v3311_v17 = vsel %vm3310_vm8, %v3303_v20, %v3307_v59 }
 0x724   : > { %v3317_v56 = vsel %vm3310_vm8, %v3307_v59, %v9413_v30  ;;  %v9505_v35 = vmul.f32 %v8991_v1, %v9104_v26  ;;  %v9509_v20 = vmul.f32 %v8991_v1, %v9107_v38  ;;  %v3332_v57 = vmul.f32 %v8979_v32, %v3315_v9 }
 0x725   : > { %v3611_v5 = vsel %vm10181_vm1, %v3595_v24, 0.0  ;;  %v3628_v42 = vpop.permute.xlu1 %3627  ;;  %v3356_v63 = vpop.permute.xlu0 %3355  ;;  %v3612_v3 = vsel %vm10183_vm10, %v3596_v47, 0.0  ;;  %vm3071_vm1 = vcmp.lt.s32.totalorder %v11599_v11, 13  ;;  %v3334_v26 = vmul.f32 %v8979_v32, %v3311_v17 }
 0x726   : > { %v9476_v19 = vadd.f32 %v3611_v5, %v3554_v14  ;;  %v9478_v48 = vadd.f32 %v3612_v3, %v3555_v49  ;;  %v3641_v36 = vsel %vm3637_vm4, %v3628_v42, %v9393_v31  ;;  %v3643_v30 = vsel %vm3637_vm4, %v9370_v21, %v3628_v42 }
 0x727   : > { %vm11615_vm8 = vcmp.lt.s32.totalorder %v11039_v46, 1  ;;  %v3331_v38 = vmul.f32 %v8979_v32, %v3317_v56  ;;  %v3658_v24 = vmul.f32 %v8993_v60, %v3643_v30  ;;  %v3659_v47 = vmul.f32 %v8993_v60, %v3641_v36 }
 0x728   : > { %v3348_v32 = vsel %vm3032_vm14, %v3332_v57, 0.0  ;;  %vm3073_vm6 = vcmp.lt.s32.totalorder %v11600_v53, 13  ;;  %v3350_v2 = vsel %vm3034_vm13, %v3334_v26, 0.0  ;;  %vm11618_vm14 = vcmp.ge.s32.totalorder %v11599_v11, 1 }
 0x729   : > { %v3636_v10 = vpop.permute.xlu1 %3635  ;;  %v3360_v25 = vpop.permute.xlu0 %3359  ;;  %v3347_v9 = vsel %vm3031_vm9, %v3331_v38, 0.0  ;;  %v3675_v56 = vsel %vm3072_vm15, %v3659_v47, 0.0  ;;  %vm11619_vm9 = vcmp.lt.s32.totalorder %v11039_v46, 127 }
 0x72a   : > { %v3376_v27 = vsel %vm3371_vm2, %v3356_v63, %v3360_v25  ;;  %v3639_v57 = vsel %vm3637_vm4, %v9393_v31, %v3636_v10  ;;  %v3645_v36 = vsel %vm3637_vm4, %v3636_v10, %v9370_v21 }
 0x72b   : > { %v3389_v29 = vmul.f32 %v8983_v61, %v3376_v27 }
 0x72d   : > { %v3421_v58 = vpop.permute.xlu1 %3420  ;;  %v3364_v55 = vpop.permute.xlu0 %3363 }
 0x72e   : > { %v3374_v52 = vsel %vm3371_vm2, %v3360_v25, %v3364_v55  ;;  %v3349_v25 = vsel %vm3033_vm7, %v3333_v22, 0.0  ;;  %vm11621_vm7 = vmmov %vm11619_vm9 }
 0x72f   : > { %vm11622_vm13 = vmmov %vm11621_vm7 }
 0x731   : > { %v3425_v37 = vpop.permute.xlu1 %3424  ;;  %v3368_v51 = vpop.permute.xlu0 %3367 }
 0x732   : > { %v3378_v43 = vsel %vm3371_vm2, %v3368_v51, %v3356_v63  ;;  %v3372_v59 = vsel %vm3371_vm2, %v3364_v55, %v3368_v51  ;;  %v3440_v5 = vsel %vm11615_vm8, %v3421_v58, %v3425_v37  ;;  %vm11616_vm2 = vmmov %vm11615_vm8  ;;  %v3405_v55 = vsel %vm3044_vm3, %v3389_v29, 0.0 }
 0x733   : > { %v3388_v18 = vmul.f32 %v8983_v61, %v3378_v43  ;;  %vm11617_vm10 = vmmov %vm11616_vm2  ;;  %v3391_v51 = vmul.f32 %v8983_v61, %v3372_v59  ;;  %v3413_v30 = vadd.f32 %v3405_v55, %v3348_v32  ;;  %vm3074_vm3 = vcmp.lt.s32.totalorder %v11601_v15, 13 }
 0x735   : > { %v3433_v14 = vpop.permute.xlu1 %3432  ;;  %v3429_v49 = vpop.permute.xlu0 %3428  ;;  %v3404_v17 = vsel %vm3043_vm5, %v3388_v18, 0.0  ;;  %vm11620_vm5 = vcmp.ge.s32.totalorder %v11597_v12, 1 }
 0x736   : > { %v3442_v1 = vsel %vm11615_vm8, %v3433_v14, %v3421_v58  ;;  %v3436_v63 = vsel %vm11616_vm2, %v3429_v49, %v3433_v14  ;;  %v3438_v3 = vsel %vm11617_vm10, %v3425_v37, %v3429_v49  ;;  %v3390_v58 = vmul.f32 %v8983_v61, %v3374_v52  ;;  %vm11623_vm10 = vmmov %vm11621_vm7 }
 0x737   : > { %v3452_v42 = vmul.f32 %v8975_v33, %v3442_v1  ;;  %v3453_v37 = vmul.f32 %v8975_v33, %v3440_v5  ;;  %v3674_v49 = vsel %vm3071_vm1, %v3658_v24, 0.0  ;;  %v3454_v61 = vmul.f32 %v8975_v33, %v3438_v3 }
 0x738   : > { %v3455_v43 = vmul.f32 %v8975_v33, %v3436_v63  ;;  %v3406_v26 = vsel %vm3045_vm0, %v3390_v58, 0.0  ;;  %v3407_v33 = vsel %vm3046_vm12, %v3391_v51, 0.0  ;;  %v3412_v29 = vadd.f32 %v3404_v17, %v3347_v9 }
 0x739   : > { %v3505_v8 = vpop.permute.xlu1 %3504  ;;  %v3501_v0 = vpop.permute.xlu0 %3500  ;;  %v3460_v22 = vsel %vm11618_vm14, %v3452_v42, 0.0  ;;  %v3461_v1 = vsel %vm11620_vm5, %v3453_v37, 0.0  ;;  %vm11624_vm0 = vcmp.ge.s32.totalorder %v11600_v53, 1  ;;  %vm11625_vm12 = vcmp.ge.s32.totalorder %v11601_v15, 1 }
 0x73a   : > { %v3520_v31 = vsel %vm11619_vm9, %v3501_v0, %v3505_v8  ;;  %v3468_v18 = vadd.f32 %v3460_v22, %v3412_v29  ;;  %v3462_v24 = vsel %vm11624_vm0, %v3454_v61, 0.0  ;;  %v3463_v47 = vsel %vm11625_vm12, %v3455_v43, 0.0 }
 0x73b   : > { %v3414_v32 = vadd.f32 %v3406_v26, %v3349_v25  ;;  %v3415_v42 = vadd.f32 %v3407_v33, %v3350_v2  ;;  %v3532_v63 = vmul.f32 %v8985_v4, %v3520_v31  ;;  %v3469_v3 = vadd.f32 %v3461_v1, %v3413_v30 }
 0x73c   : > { %v3683_v51 = vadd.f32 %v3675_v56, %v9458_v62  ;;  %v3492_v25 = vadd.f32 %v9505_v35, %v3468_v18  ;;  %v3661_v62 = vmul.f32 %v8993_v60, %v3645_v36  ;;  %vm11626_vm8 = vcmp.lt.s32.totalorder %v11599_v11, 15 }
 0x73d   : > { %v3513_v27 = vpop.permute.xlu1 %3512  ;;  %v3509_v14 = vpop.permute.xlu0 %3508  ;;  %v3470_v9 = vadd.f32 %v3462_v24, %v3414_v32  ;;  %v3471_v37 = vadd.f32 %v3463_v47, %v3415_v42  ;;  %vm11627_vm2 = vcmp.lt.s32.totalorder %v11601_v15, 15  ;;  %v3493_v30 = vadd.f32 %v9486_v13, %v3469_v3 }
 0x73e   : > { %v3522_v21 = vsel %vm11621_vm7, %v3513_v27, %v3501_v0  ;;  %v3516_v10 = vsel %vm11622_vm13, %v3509_v14, %v3513_v27  ;;  %v3518_v38 = vsel %vm11623_vm10, %v3505_v8, %v3509_v14  ;;  %v3660_v0 = vmul.f32 %v8993_v60, %v3639_v57 }
 0x73f   : > { %v3535_v8 = vmul.f32 %v8985_v4, %v3522_v21  ;;  %v3533_v55 = vmul.f32 %v8985_v4, %v3518_v38  ;;  %v3534_v58 = vmul.f32 %v8985_v4, %v3516_v10  ;;  %v3682_v4 = vadd.f32 %v3674_v49, %v9464_v16 }
 0x740   : > { %v3676_v56 = vsel %vm3073_vm6, %v3660_v0, 0.0  ;;  %v3540_v57 = vsel %vm11626_vm8, %v3532_v63, 0.0  ;;  %vm11628_vm14 = vcmp.lt.s32.totalorder %v11597_v12, 15  ;;  %vm11630_vm9 = vcmp.lt.s32.totalorder %v11599_v11, 14 }
 0x741   : > { %v3561_v52 = vpop.permute.xlu1 %3560  ;;  %v3557_v59 = vpop.permute.xlu0 %3556  ;;  %v3543_v35 = vsel %vm11627_vm2, %v3535_v8, 0.0  ;;  %v3541_v22 = vsel %vm11628_vm14, %v3533_v55, 0.0  ;;  %v3548_v31 = vadd.f32 %v3540_v57, %v3492_v25  ;;  %v3495_v13 = vadd.f32 %v9509_v20, %v3471_v37 }
 0x742   : > { %v3577_v5 = vsel %vm3572_vm11, %v3557_v59, %v3561_v52  ;;  %v3494_v1 = vadd.f32 %v9496_v7, %v3470_v9  ;;  %vm11631_vm5 = vcmask 1045504   ;;  %v3677_v38 = vsel %vm3074_vm3, %v3661_v62, 0.0 }
 0x743   : > { %v3589_v17 = vmul.f32 %v8995_v41, %v3577_v5  ;;  %v3686_v10 = vsel %vm11631_vm5, %v3682_v4, 0.0  ;;  %v3549_v18 = vadd.f32 %v3541_v22, %v3493_v30  ;;  %vm11632_vm7 = vcmp.lt.s32.totalorder %v11601_v15, 14 }
 0x744   : > { %vm11633_vm13 = vcmp.lt.s32.totalorder %v11597_v12, 14  ;;  %vm11634_vm10 = vcmp.lt.s32.totalorder %v11600_v53, 14  ;;  %v3685_v55 = vadd.f32 %v3677_v38, %v9478_v48 }
 0x745   : > { %v3569_v27 = vpop.permute.xlu1 %3568  ;;  %v3565_v14 = vpop.permute.xlu0 %3564  ;;  %v3605_v60 = vsel %vm11630_vm9, %v3589_v17, 0.0 }
 0x746   : > { %v3579_v2 = vsel %vm3572_vm11, %v3569_v27, %v3557_v59  ;;  %v3573_v61 = vsel %vm3572_vm11, %v3565_v14, %v3569_v27  ;;  %v3575_v43 = vsel %vm3572_vm11, %v3561_v52, %v3565_v14  ;;  %vm11629_vm11 = vcmp.lt.s32.totalorder %v11600_v53, 15 }
 0x747   : > { %v3542_v26 = vsel %vm11629_vm11, %v3534_v58, 0.0  ;;  %v3592_v16 = vmul.f32 %v8995_v41, %v3579_v2  ;;  %v3590_v49 = vmul.f32 %v8995_v41, %v3575_v43  ;;  %v3591_v36 = vmul.f32 %v8995_v41, %v3573_v61 }
 0x748   : > { %v3684_v52 = vadd.f32 %v3676_v56, %v9476_v19  ;;  %v3551_v41 = vadd.f32 %v3543_v35, %v3495_v13  ;;  %v3550_v24 = vadd.f32 %v3542_v26, %v3494_v1  ;;  %v3613_v47 = vadd.f32 %v3605_v60, %v3548_v31 }
 0x749   : > { %v3626_v33 = vpop.permute.xlu1 %3625  ;;  %v3622_v29 = vpop.permute.xlu0 %3621  ;;  %v3608_v20 = vsel %vm11632_vm7, %v3592_v16, 0.0  ;;  %v3606_v7 = vsel %vm11633_vm13, %v3590_v49, 0.0  ;;  %v3607_v5 = vsel %vm11634_vm10, %v3591_v36, 0.0 }
 0x74a   : > { %v3642_v21 = vsel %vm3637_vm4, %v3622_v29, %v3626_v33  ;;  %v3616_v37 = vadd.f32 %v3608_v20, %v3551_v41  ;;  %v3614_v17 = vadd.f32 %v3606_v7, %v3549_v18  ;;  %v3615_v27 = vadd.f32 %v3607_v5, %v3550_v24 }
 0x74b   : > { %v3654_v59 = vmul.f32 %v8997_v34, %v3642_v21 }
 0x74d   : > { %v3670_v0 = vsel %vm3071_vm1, %v3654_v59, 0.0  ;;  %v3634_v32 = vpop.permute.xlu1 %3633  ;;  %v3630_v19 = vpop.permute.xlu0 %3629  ;;  %vm11635_vm1 = vmmov %vm11631_vm5 }
 0x74e   : > { %v3678_v42 = vadd.f32 %v3670_v0, %v3613_v47  ;;  %v3644_v63 = vsel %vm3637_vm4, %v3634_v32, %v3622_v29  ;;  %v3638_v3 = vsel %vm3637_vm4, %v3630_v19, %v3634_v32  ;;  %v3640_v8 = vsel %vm3637_vm4, %v3626_v33, %v3630_v19  ;;  %vm11636_vm4 = vmmov %vm11635_vm1 }
 0x74f   : > { %v3657_v58 = vmul.f32 %v8997_v34, %v3644_v63  ;;  %v3655_v9 = vmul.f32 %v8997_v34, %v3640_v8  ;;  %v3656_v11 = vmul.f32 %v8997_v34, %v3638_v3  ;;  %v3694_v62 = vsel %vm11635_vm1, %v3683_v51, 0.0  ;;  %vm11637_vm0 = vmmov %vm11635_vm1 }
 0x750   : > { %v3687_v14 = vadd.f32 %v3686_v10, %v3678_v42  ;;  %v3702_v34 = vsel %vm11636_vm4, %v3684_v52, 0.0  ;;  %v3710_v56 = vsel %vm11637_vm0, %v3685_v55, 0.0 }
 0x751   : > { %v3673_v25 = vsel %vm3074_vm3, %v3657_v58, 0.0  ;;  %v3671_v2 = vsel %vm3072_vm15, %v3655_v9, 0.0  ;;  %v3672_v46 = vsel %vm3073_vm6, %v3656_v11, 0.0  ;;  %v11639_v58 = vld [vmem:[#allocation67_spill] sm:$0xff] }
 0x752   : > { %v3688_v48 = vrot.slane %v3687_v14, 4  ;;  %v3681_v61 = vadd.f32 %v3673_v25, %v3616_v37  ;;  %v3679_v43 = vadd.f32 %v3671_v2, %v3614_v17  ;;  %v3680_v4 = vadd.f32 %v3672_v46, %v3615_v27  ;;  %v11641_v37 = vld [vmem:[#allocation108_spill] sm:$0xff]  ;;  %v11642_v27 = vld [vmem:[#allocation101_spill] sm:$0xff]  ;;  %v11644_v46 = vld [vmem:[#allocation43_spill] sm:$0xff] }
 0x753   : > { %v11643_v25 = vld [vmem:[#allocation105_spill] sm:$0xff] }
 0x754   : > { %v3689_v57 = vadd.f32 %v3688_v48, %v3687_v14  ;;  %v3711_v35 = vadd.f32 %v3710_v56, %v3681_v61  ;;  %v3695_v15 = vadd.f32 %v3694_v62, %v3679_v43  ;;  %v3703_v30 = vadd.f32 %v3702_v34, %v3680_v4 }
 0x756   : > { %v3690_v22 = vrot.slane %v3689_v57, 2  ;;  %v3712_v12 = vrot.slane %v3711_v35, 4  ;;  %v3696_v26 = vrot.slane %v3695_v15, 4  ;;  %v3704_v53 = vrot.slane %v3703_v30, 4 }
 0x758   : > { %v3691_v60 = vadd.f32 %v3690_v22, %v3689_v57  ;;  %v3713_v16 = vadd.f32 %v3712_v12, %v3711_v35  ;;  %v3697_v49 = vadd.f32 %v3696_v26, %v3695_v15  ;;  %v3705_v36 = vadd.f32 %v3704_v53, %v3703_v30 }
 0x75a   : > { %v3692_v33 = vrot.slane %v3691_v60, 1  ;;  %v3714_v29 = vrot.slane %v3713_v16, 2  ;;  %v3698_v51 = vrot.slane %v3697_v49, 2  ;;  %v3706_v31 = vrot.slane %v3705_v36, 2 }
 0x75c   : > { %v3693_v13 = vadd.f32 %v3692_v33, %v3691_v60  ;;  %v3715_v1 = vadd.f32 %v3714_v29, %v3713_v16  ;;  %v3699_v21 = vadd.f32 %v3698_v51, %v3697_v49  ;;  %v3707_v10 = vadd.f32 %v3706_v31, %v3705_v36 }
 0x75e   : > { %vm3718_vm15 = vcmp.gt.f32.partialorder %v3693_v13, 0.0  ;;  %v3722_v38 = vmul.f32 0.01, %v3693_v13  ;;  %v3716_v52 = vrot.slane %v3715_v1, 1  ;;  %v3700_v59 = vrot.slane %v3699_v21, 1 }
 0x75f   : > { %v3708_v41 = vrot.slane %v3707_v10, 1 }
 0x760   : > { %v3726_v18 = vsel %vm3718_vm15, %v3693_v13, %v3722_v38  ;;  %v3717_v24 = vadd.f32 %v3716_v52, %v3715_v1  ;;  %v3701_v47 = vadd.f32 %v3700_v59, %v3699_v21 }
 0x761   : > { %v3730_v20 = vmul.f32 %v8849_v50, %v3726_v18  ;;  %v3734_v7 = vmul.f32 %v8871_v45, %v3726_v18  ;;  %v3738_v5 = vmul.f32 %v8879_v6, %v3726_v18  ;;  %v3742_v0 = vmul.f32 %v8897_v44, %v3726_v18 }
 0x762   : > { %vm3721_vm6 = vcmp.gt.f32.partialorder %v3717_v24, 0.0  ;;  %v3725_v32 = vmul.f32 0.01, %v3717_v24  ;;  %v3709_v19 = vadd.f32 %v3708_v41, %v3707_v10  ;;  %vm3719_vm3 = vcmp.gt.f32.partialorder %v3701_v47, 0.0 }
 0x763   : > { %3746 = vst [vmem:[%s9663_s12] sm:$0xff] %v3730_v20  ;;  %3750 = vst [vmem:[%s9663_s12 + $0x20] sm:$0xff] %v3734_v7  ;;  %v3723_v42 = vmul.f32 0.01, %v3701_v47 }
 0x764   : > { %3754 = vst [vmem:[%s9663_s12 + $0x40] sm:$0xff] %v3738_v5  ;;  %3758 = vst [vmem:[%s9663_s12 + $0x60] sm:$0xff] %v3742_v0  ;;  %v3729_v50 = vsel %vm3721_vm6, %v3717_v24, %v3725_v32  ;;  %vm3720_vm12 = vcmp.gt.f32.partialorder %v3709_v19, 0.0  ;;  %v3724_v45 = vmul.f32 0.01, %v3709_v19 }
 0x765   : > { %v3733_v6 = vmul.f32 %v8869_v23, %v3729_v50  ;;  %v3737_v44 = vmul.f32 %v8877_v39, %v3729_v50  ;;  %v3741_v63 = vmul.f32 %v8887_v54, %v3729_v50  ;;  %v3745_v3 = vmul.f32 %v8921_v28, %v3729_v50  ;;  %v11638_v39 = vld [vmem:[#allocation65_spill] sm:$0xff]  ;;  %v11640_v28 = vld [vmem:[#allocation31_spill] sm:$0xff] }
 0x766   : > { %v3727_v8 = vsel %vm3719_vm3, %v3701_v47, %v3723_v42  ;;  %v3728_v55 = vsel %vm3720_vm12, %v3709_v19, %v3724_v45 }
 0x767   : > { %3749 = vst [vmem:[%s9663_s12 + $0x18] sm:$0xff] %v3733_v6  ;;  %3753 = vst [vmem:[%s9663_s12 + $0x38] sm:$0xff] %v3737_v44  ;;  %v3731_v23 = vmul.f32 %v8857_v40, %v3727_v8  ;;  %v3732_v54 = vmul.f32 %v11638_v39, %v3728_v55  ;;  %v3735_v9 = vmul.f32 %v11639_v58, %v3727_v8 }
 0x768   : > { %3757 = vst [vmem:[%s9663_s12 + $0x58] sm:$0xff] %v3741_v63  ;;  %3761 = vst [vmem:[%s9663_s12 + $0x78] sm:$0xff] %v3745_v3  ;;  %v3736_v11 = vmul.f32 %v11640_v28, %v3728_v55  ;;  %v3739_v17 = vmul.f32 %v11641_v37, %v3727_v8  ;;  %v3740_v14 = vmul.f32 %v11642_v27, %v3728_v55 }
 0x769   : > { %v3743_v2 = vmul.f32 %v11643_v25, %v3727_v8  ;;  %v3744_v48 = vmul.f32 %v11644_v46, %v3728_v55  ;;  %3747 = vst [vmem:[%s9663_s12 + $0x8] sm:$0xff] %v3731_v23  ;;  %3748 = vst [vmem:[%s9663_s12 + $0x10] sm:$0xff] %v3732_v54 }
 0x76a   : > { %3751 = vst [vmem:[%s9663_s12 + $0x28] sm:$0xff] %v3735_v9  ;;  %3752 = vst [vmem:[%s9663_s12 + $0x30] sm:$0xff] %v3736_v11 }
 0x76b   : > { %3755 = vst [vmem:[%s9663_s12 + $0x48] sm:$0xff] %v3739_v17  ;;  %3756 = vst [vmem:[%s9663_s12 + $0x50] sm:$0xff] %v3740_v14 }
 0x76c   : > { %3759 = vst [vmem:[%s9663_s12 + $0x68] sm:$0xff] %v3743_v2  ;;  %3760 = vst [vmem:[%s9663_s12 + $0x70] sm:$0xff] %v3744_v48 }
 0x76d PF: > { %s19_s30 = sadd.s32 1, %s3999_s30  }
 0x76e   : > { %p16_p4 = scmp.ge.s32.totalorder %s19_s30, 4  }
 0x770   :  { %18 = sbr.rel (!%p16_p4) target bundleno = 1 (0x1), region = 86 }

</bundles_post_ra>
